<compile_context>
chip_gen: v7x
topology: tpu7x:2x2x1
jax: 0.10.0
libtpu: 0.0.40
codegen_flags: <defaults>
</compile_context>

<pallas_src>
import jax
import jax.numpy as jnp
from jax.experimental import pallas as pl
from jax.experimental.pallas import tpu as pltpu


def _round_up(x, m):
    return (x + m - 1) // m * m


# Raise v5e's 16 MiB default scoped-VMEM limit; matches v6e/v7x defaults.
_VMEM_LIMIT_BYTES = 32 * 1024 * 1024


# ----------------------------- Pallas kernels ------------------------------

def _conv_relu_pool_kernel(q_ref, w_ref, b_ref, o_ref):
    """Fused conv-as-matmul + bias + ReLU + 2x2 max-pool.

    q_ref holds the im2col matrices of the four conv positions inside each
    2x2 pool window, stacked on the leading axis: (4, tm, Kp).  The pool
    commutes with the shared bias add and the monotone ReLU, so
        out = relu(max_q(x_q @ W) + b).
    One block -> one input DMA stream per grid step; four MXU dots share the
    VMEM-resident weight tile.  Elementwise math stays f32; cast at store.
    """
    w = w_ref[...]

    def mm(i):
        return jnp.dot(q_ref[i], w, preferred_element_type=jnp.float32)

    y = jnp.maximum(jnp.maximum(mm(0), mm(1)), jnp.maximum(mm(2), mm(3)))
    y = jnp.maximum(y + b_ref[...], 0.0)
    o_ref[...] = y.astype(o_ref.dtype)


def _fc_chain_kernel(x_ref, w1, b1, w2, b2, w3, b3, w4, b4, o_ref):
    """All four FC layers fused; weights VMEM-resident bf16, math in f32."""
    h = jnp.dot(x_ref[...], w1[...], preferred_element_type=jnp.float32)
    h = jnp.maximum(h + b1[...], 0.0)
    h = jnp.dot(h.astype(jnp.bfloat16), w2[...], preferred_element_type=jnp.float32)
    h = jnp.maximum(h + b2[...], 0.0)
    h = jnp.dot(h.astype(jnp.bfloat16), w3[...], preferred_element_type=jnp.float32)
    h = jnp.maximum(h + b3[...], 0.0)
    h = jnp.dot(h.astype(jnp.bfloat16), w4[...], preferred_element_type=jnp.float32)
    o_ref[...] = (h + b4[...]).astype(o_ref.dtype)


# ------------------------------ layer wrappers ------------------------------

def conv_relu_pool(x_nhwc, w_mat, b_row, ksize, cout, *, tm_max=1024):
    """valid conv (stride 1) + ReLU + 2x2/2 max-pool; NHWC in, NHWC bf16 out."""
    B, H, W, C = x_nhwc.shape
    OH, OW = H - ksize + 1, W - ksize + 1
    PH, PW = OH // 2, OW // 2
    K = ksize * ksize * C
    Kp, Np = w_mat.shape                       # padded K, padded N (=128)

    xb = x_nhwc.astype(jnp.bfloat16)
    # im2col (XLA glue): feature order (kh, kw, ci) matches w_mat row order.
    # TODO(synk): im2col/quadrant extraction still materializes in HBM; a fully
    # fused per-batch-tile conv1->conv2->fc kernel with on-chip patch
    # extraction would remove this remaining off-chip traffic.
    patches = [xb[:, i:i + OH, j:j + OW, :]
               for i in range(ksize) for j in range(ksize)]
    cols = jnp.concatenate(patches, axis=-1)                      # (B, OH, OW, K)
    cols = jnp.pad(cols, ((0, 0), (0, 0), (0, 0), (0, Kp - K)))   # pad K once

    M = B * PH * PW                            # number of pooled positions
    tm = min(tm_max, _round_up(M, 16))
    Mp = _round_up(M, tm)

    # Stack the four pool-window quadrants on a leading axis: (4, Mp, Kp).
    q = cols.reshape(B, PH, 2, PW, 2, Kp)
    q = jnp.transpose(q, (2, 4, 0, 1, 3, 5)).reshape(4, M, Kp)
    q = jnp.pad(q, ((0, 0), (0, Mp - M), (0, 0)))

    out = pl.pallas_call(
        _conv_relu_pool_kernel,
        out_shape=jax.ShapeDtypeStruct((Mp, Np), jnp.bfloat16),
        grid=(Mp // tm,),
        in_specs=[pl.BlockSpec((4, tm, Kp), lambda i: (0, i, 0)),  # all quadrants, 1 DMA
                  pl.BlockSpec((Kp, Np), lambda i: (0, 0)),        # weights resident
                  pl.BlockSpec((1, Np), lambda i: (0, 0))],        # bias resident
        out_specs=pl.BlockSpec((tm, Np), lambda i: (i, 0)),
        compiler_params=pltpu.CompilerParams(
            dimension_semantics=("parallel",),
            vmem_limit_bytes=_VMEM_LIMIT_BYTES),
    )(q, w_mat, b_row)
    return out[:M, :cout].reshape(B, PH, PW, cout)


def fc_chain(x2d, pp, *, tb_max=512):
    """Fused fc1->relu->fc2->relu->fc3->relu->fc4 in a single pallas_call."""
    B, F = x2d.shape                           # F = 400
    Kp = pp["f1_w"].shape[0]                   # 512
    Np = pp["f4_w"].shape[1]                   # 128
    tb = min(tb_max, _round_up(B, 16))
    Bp = _round_up(B, tb)
    xb = jnp.pad(x2d.astype(jnp.bfloat16), ((0, Bp - B), (0, Kp - F)))

    def resident(a):
        return pl.BlockSpec(a.shape, lambda i: (0, 0))

    out = pl.pallas_call(
        _fc_chain_kernel,
        out_shape=jax.ShapeDtypeStruct((Bp, Np), jnp.float32),
        grid=(Bp // tb,),
        in_specs=[pl.BlockSpec((tb, Kp), lambda i: (i, 0)),
                  resident(pp["f1_w"]), resident(pp["f1_b"]),
                  resident(pp["f2_w"]), resident(pp["f2_b"]),
                  resident(pp["f3_w"]), resident(pp["f3_b"]),
                  resident(pp["f4_w"]), resident(pp["f4_b"])],
        out_specs=pl.BlockSpec((tb, Np), lambda i: (i, 0)),
        compiler_params=pltpu.CompilerParams(
            dimension_semantics=("parallel",),
            vmem_limit_bytes=_VMEM_LIMIT_BYTES),
    )(xb, pp["f1_w"], pp["f1_b"], pp["f2_w"], pp["f2_b"],
      pp["f3_w"], pp["f3_b"], pp["f4_w"], pp["f4_b"])
    return out[:B, :10]


# ------------------------------- parameters ---------------------------------

def init_params(key):
    ks = jax.random.split(key, 12)

    def u(k, shape, fan_in):   # PyTorch-style U(-1/sqrt(fan_in), 1/sqrt(fan_in))
        bound = 1.0 / jnp.sqrt(jnp.float32(fan_in))
        return jax.random.uniform(k, shape, jnp.float32, -bound, bound)

    return {
        "conv1_w": u(ks[0], (6, 3, 5, 5), 3 * 25),
        "conv1_b": u(ks[1], (6,), 3 * 25),
        "conv2_w": u(ks[2], (16, 6, 5, 5), 6 * 25),
        "conv2_b": u(ks[3], (16,), 6 * 25),
        "fc1_w": u(ks[4], (1024, 400), 400),
        "fc1_b": u(ks[5], (1024,), 400),
        "fc2_w": u(ks[6], (1024, 1024), 1024),
        "fc2_b": u(ks[7], (1024,), 1024),
        "fc3_w": u(ks[8], (84, 1024), 1024),
        "fc3_b": u(ks[9], (84,), 1024),
        "fc4_w": u(ks[10], (10, 84), 84),
        "fc4_b": u(ks[11], (10,), 84),
    }


def prepare_params(p):
    """One-time preprocessing: transpose to (K, N), zero-pad K/N to multiples
    of 128 (lane-dense, full MXU tiles), cast matmul operands to bf16."""

    def pad2(a, rows, cols):
        return jnp.pad(a, ((0, rows - a.shape[0]), (0, cols - a.shape[1])))

    def conv_wmat(w, kp):
        cout, cin, kh, kw = w.shape
        # row index = (kh*KW + kw)*Cin + ci, matching the im2col feature order
        m = jnp.transpose(w, (2, 3, 1, 0)).reshape(kh * kw * cin, cout)
        return pad2(m, kp, 128).astype(jnp.bfloat16)

    def fc_wmat(w, kp, np_):
        return pad2(w.T, kp, np_).astype(jnp.bfloat16)

    def bias_row(b, n):
        return jnp.pad(b, (0, n - b.shape[0])).reshape(1, n).astype(jnp.float32)

    return {
        "c1_w": conv_wmat(p["conv1_w"], 128),      # K: 75  -> 128, N: 6  -> 128
        "c1_b": bias_row(p["conv1_b"], 128),
        "c2_w": conv_wmat(p["conv2_w"], 256),      # K: 150 -> 256, N: 16 -> 128
        "c2_b": bias_row(p["conv2_b"], 128),
        "f1_w": fc_wmat(p["fc1_w"], 512, 1024),    # K: 400 -> 512
        "f1_b": bias_row(p["fc1_b"], 1024),
        "f2_w": fc_wmat(p["fc2_w"], 1024, 1024),
        "f2_b": bias_row(p["fc2_b"], 1024),
        "f3_w": fc_wmat(p["fc3_w"], 1024, 128),    # N: 84 -> 128
        "f3_b": bias_row(p["fc3_b"], 128),
        "f4_w": fc_wmat(p["fc4_w"], 128, 128),     # K: 84 -> 128, N: 10 -> 128
        "f4_b": bias_row(p["fc4_b"], 128),
    }


# -------------------------------- forward -----------------------------------

@jax.jit
def net_forward(pp, x_nchw):
    # x_nchw: (B, 3, 32, 32) float32, PyTorch NCHW interface
    x = jnp.transpose(x_nchw, (0, 2, 3, 1))                    # -> NHWC
    x = conv_relu_pool(x, pp["c1_w"], pp["c1_b"], 5, 6)        # (B, 14, 14, 6)
    x = conv_relu_pool(x, pp["c2_w"], pp["c2_b"], 5, 16)       # (B, 5, 5, 16)
    B = x.shape[0]
    # match torch.flatten on NCHW: feature order is (C, H, W)
    x = jnp.transpose(x, (0, 3, 1, 2)).reshape(B, 16 * 5 * 5)  # (B, 400)
    return fc_chain(x, pp)                                     # (B, 10) f32


if __name__ == "__main__":
    key = jax.random.PRNGKey(0)
    pkey, xkey = jax.random.split(key)
    params = prepare_params(init_params(pkey))
    x = jax.random.normal(xkey, (2, 3, 32, 32), jnp.float32)
    out = jax.block_until_ready(net_forward(params, x))
    assert out.shape == (2, 10), out.shape
    assert bool(jnp.all(jnp.isfinite(out)))
    print("KERNEL_OK")
</pallas_src>

<mosaic_0001>
module attributes {stable_mosaic.version = 11 : i64} {
  func.func @_conv_relu_pool_kernel(%arg0: i32, %arg1: memref<4x400x128xbf16, #tpu.memory_space<vmem>>, %arg2: memref<128x128xbf16, #tpu.memory_space<vmem>>, %arg3: memref<1x128xf32, #tpu.memory_space<vmem>>, %arg4: memref<400x128xbf16, #tpu.memory_space<vmem>>) attributes {dimension_semantics = [#tpu.dimension_semantics<parallel>], iteration_bounds = array<i64: 1>, scalar_prefetch = 0 : i64, scratch_operands = 0 : i64, tpu.core_type = #tpu.core_type<tc>, window_params = [{transform_indices = @transform_0, window_bounds = array<i64: 4, 400, 128>}, {pipeline_mode = #tpu.pipeline_mode<synchronous>, transform_indices = @transform_1, window_bounds = array<i64: 128, 128>}, {pipeline_mode = #tpu.pipeline_mode<synchronous>, transform_indices = @transform_2, window_bounds = array<i64: 1, 128>}, {transform_indices = @transform_3, window_bounds = array<i64: 400, 128>}]} {
    %c0 = arith.constant 0 : index
    %c0_0 = arith.constant 0 : index
    %0 = vector.load %arg2[%c0, %c0_0] : memref<128x128xbf16, #tpu.memory_space<vmem>>, vector<128x128xbf16>
    %c0_1 = arith.constant 0 : index
    %c0_2 = arith.constant 0 : index
    %c0_3 = arith.constant 0 : index
    %1 = vector.load %arg1[%c0_1, %c0_2, %c0_3] : memref<4x400x128xbf16, #tpu.memory_space<vmem>>, vector<1x400x128xbf16>
    %2 = vector.shape_cast %1 : vector<1x400x128xbf16> to vector<400x128xbf16>
    %cst = arith.constant dense<0.000000e+00> : vector<400x128xf32>
    %3 = tpu.matmul %2, %0, %cst {dimension_numbers = #tpu.dot_dimension_numbers<[1], [0], [0], [1], [0, 0, 1, 1], [], []>} : vector<400x128xbf16>, vector<128x128xbf16>, vector<400x128xf32> -> vector<400x128xf32>
    %c1 = arith.constant 1 : index
    %c0_4 = arith.constant 0 : index
    %c0_5 = arith.constant 0 : index
    %4 = vector.load %arg1[%c1, %c0_4, %c0_5] : memref<4x400x128xbf16, #tpu.memory_space<vmem>>, vector<1x400x128xbf16>
    %5 = vector.shape_cast %4 : vector<1x400x128xbf16> to vector<400x128xbf16>
    %cst_6 = arith.constant dense<0.000000e+00> : vector<400x128xf32>
    %6 = tpu.matmul %5, %0, %cst_6 {dimension_numbers = #tpu.dot_dimension_numbers<[1], [0], [0], [1], [0, 0, 1, 1], [], []>} : vector<400x128xbf16>, vector<128x128xbf16>, vector<400x128xf32> -> vector<400x128xf32>
    %7 = arith.maximumf %3, %6 : vector<400x128xf32>
    %c2 = arith.constant 2 : index
    %c0_7 = arith.constant 0 : index
    %c0_8 = arith.constant 0 : index
    %8 = vector.load %arg1[%c2, %c0_7, %c0_8] : memref<4x400x128xbf16, #tpu.memory_space<vmem>>, vector<1x400x128xbf16>
    %9 = vector.shape_cast %8 : vector<1x400x128xbf16> to vector<400x128xbf16>
    %cst_9 = arith.constant dense<0.000000e+00> : vector<400x128xf32>
    %10 = tpu.matmul %9, %0, %cst_9 {dimension_numbers = #tpu.dot_dimension_numbers<[1], [0], [0], [1], [0, 0, 1, 1], [], []>} : vector<400x128xbf16>, vector<128x128xbf16>, vector<400x128xf32> -> vector<400x128xf32>
    %c3 = arith.constant 3 : index
    %c0_10 = arith.constant 0 : index
    %c0_11 = arith.constant 0 : index
    %11 = vector.load %arg1[%c3, %c0_10, %c0_11] : memref<4x400x128xbf16, #tpu.memory_space<vmem>>, vector<1x400x128xbf16>
    %12 = vector.shape_cast %11 : vector<1x400x128xbf16> to vector<400x128xbf16>
    %cst_12 = arith.constant dense<0.000000e+00> : vector<400x128xf32>
    %13 = tpu.matmul %12, %0, %cst_12 {dimension_numbers = #tpu.dot_dimension_numbers<[1], [0], [0], [1], [0, 0, 1, 1], [], []>} : vector<400x128xbf16>, vector<128x128xbf16>, vector<400x128xf32> -> vector<400x128xf32>
    %14 = arith.maximumf %10, %13 : vector<400x128xf32>
    %15 = arith.maximumf %7, %14 : vector<400x128xf32>
    %c0_13 = arith.constant 0 : index
    %c0_14 = arith.constant 0 : index
    %16 = vector.load %arg3[%c0_13, %c0_14] : memref<1x128xf32, #tpu.memory_space<vmem>>, vector<1x128xf32>
    %17 = vector.broadcast %16 : vector<1x128xf32> to vector<400x128xf32>
    %18 = arith.addf %15, %17 : vector<400x128xf32>
    %cst_15 = arith.constant 0.000000e+00 : f32
    %19 = vector.broadcast %cst_15 : f32 to vector<400x128xf32>
    %20 = arith.maximumf %18, %19 : vector<400x128xf32>
    %21 = arith.truncf %20 : vector<400x128xf32> to vector<400x128xbf16>
    %c0_16 = arith.constant 0 : index
    %c0_17 = arith.constant 0 : index
    %22 = vector.load %arg4[%c0_16, %c0_17] : memref<400x128xbf16, #tpu.memory_space<vmem>>, vector<400x128xbf16>
    tpu.vector_store %arg4[%c0_16, %c0_17], %21 {strides = array<i32>} : memref<400x128xbf16, #tpu.memory_space<vmem>>, vector<400x128xbf16>,
    return
  }
  func.func @transform_0(%arg0: i32) -> (i32, i32, i32) {
    %c0_i32 = arith.constant 0 : i32
    %c0_i32_0 = arith.constant 0 : i32
    %c0_i32_1 = arith.constant 0 : i32
    return %c0_i32, %arg0, %c0_i32_0 : i32, i32, i32
  }
  func.func @transform_1(%arg0: i32) -> (i32, i32) {
    %c0_i32 = arith.constant 0 : i32
    %c0_i32_0 = arith.constant 0 : i32
    %c0_i32_1 = arith.constant 0 : i32
    return %c0_i32, %c0_i32_0 : i32, i32
  }
  func.func @transform_2(%arg0: i32) -> (i32, i32) {
    %c0_i32 = arith.constant 0 : i32
    %c0_i32_0 = arith.constant 0 : i32
    %c0_i32_1 = arith.constant 0 : i32
    return %c0_i32, %c0_i32_0 : i32, i32
  }
  func.func @transform_3(%arg0: i32) -> (i32, i32) {
    %c0_i32 = arith.constant 0 : i32
    %c0_i32_0 = arith.constant 0 : i32
    return %arg0, %c0_i32 : i32, i32
  }
}

module attributes {stable_mosaic.version = 11 : i64} {
  func.func @_conv_relu_pool_kernel(%arg0: i32, %arg1: memref<4x64x256xbf16, #tpu.memory_space<vmem>>, %arg2: memref<256x128xbf16, #tpu.memory_space<vmem>>, %arg3: memref<1x128xf32, #tpu.memory_space<vmem>>, %arg4: memref<64x128xbf16, #tpu.memory_space<vmem>>) attributes {dimension_semantics = [#tpu.dimension_semantics<parallel>], iteration_bounds = array<i64: 1>, scalar_prefetch = 0 : i64, scratch_operands = 0 : i64, tpu.core_type = #tpu.core_type<tc>, window_params = [{transform_indices = @transform_0, window_bounds = array<i64: 4, 64, 256>}, {pipeline_mode = #tpu.pipeline_mode<synchronous>, transform_indices = @transform_1, window_bounds = array<i64: 256, 128>}, {pipeline_mode = #tpu.pipeline_mode<synchronous>, transform_indices = @transform_2, window_bounds = array<i64: 1, 128>}, {transform_indices = @transform_3, window_bounds = array<i64: 64, 128>}]} {
    %c0 = arith.constant 0 : index
    %c0_0 = arith.constant 0 : index
    %0 = vector.load %arg2[%c0, %c0_0] : memref<256x128xbf16, #tpu.memory_space<vmem>>, vector<256x128xbf16>
    %c0_1 = arith.constant 0 : index
    %c0_2 = arith.constant 0 : index
    %c0_3 = arith.constant 0 : index
    %1 = vector.load %arg1[%c0_1, %c0_2, %c0_3] : memref<4x64x256xbf16, #tpu.memory_space<vmem>>, vector<1x64x256xbf16>
    %2 = vector.shape_cast %1 : vector<1x64x256xbf16> to vector<64x256xbf16>
    %cst = arith.constant dense<0.000000e+00> : vector<64x128xf32>
    %3 = tpu.matmul %2, %0, %cst {dimension_numbers = #tpu.dot_dimension_numbers<[1], [0], [0], [1], [0, 0, 1, 1], [], []>} : vector<64x256xbf16>, vector<256x128xbf16>, vector<64x128xf32> -> vector<64x128xf32>
    %c1 = arith.constant 1 : index
    %c0_4 = arith.constant 0 : index
    %c0_5 = arith.constant 0 : index
    %4 = vector.load %arg1[%c1, %c0_4, %c0_5] : memref<4x64x256xbf16, #tpu.memory_space<vmem>>, vector<1x64x256xbf16>
    %5 = vector.shape_cast %4 : vector<1x64x256xbf16> to vector<64x256xbf16>
    %cst_6 = arith.constant dense<0.000000e+00> : vector<64x128xf32>
    %6 = tpu.matmul %5, %0, %cst_6 {dimension_numbers = #tpu.dot_dimension_numbers<[1], [0], [0], [1], [0, 0, 1, 1], [], []>} : vector<64x256xbf16>, vector<256x128xbf16>, vector<64x128xf32> -> vector<64x128xf32>
    %7 = arith.maximumf %3, %6 : vector<64x128xf32>
    %c2 = arith.constant 2 : index
    %c0_7 = arith.constant 0 : index
    %c0_8 = arith.constant 0 : index
    %8 = vector.load %arg1[%c2, %c0_7, %c0_8] : memref<4x64x256xbf16, #tpu.memory_space<vmem>>, vector<1x64x256xbf16>
    %9 = vector.shape_cast %8 : vector<1x64x256xbf16> to vector<64x256xbf16>
    %cst_9 = arith.constant dense<0.000000e+00> : vector<64x128xf32>
    %10 = tpu.matmul %9, %0, %cst_9 {dimension_numbers = #tpu.dot_dimension_numbers<[1], [0], [0], [1], [0, 0, 1, 1], [], []>} : vector<64x256xbf16>, vector<256x128xbf16>, vector<64x128xf32> -> vector<64x128xf32>
    %c3 = arith.constant 3 : index
    %c0_10 = arith.constant 0 : index
    %c0_11 = arith.constant 0 : index
    %11 = vector.load %arg1[%c3, %c0_10, %c0_11] : memref<4x64x256xbf16, #tpu.memory_space<vmem>>, vector<1x64x256xbf16>
    %12 = vector.shape_cast %11 : vector<1x64x256xbf16> to vector<64x256xbf16>
    %cst_12 = arith.constant dense<0.000000e+00> : vector<64x128xf32>
    %13 = tpu.matmul %12, %0, %cst_12 {dimension_numbers = #tpu.dot_dimension_numbers<[1], [0], [0], [1], [0, 0, 1, 1], [], []>} : vector<64x256xbf16>, vector<256x128xbf16>, vector<64x128xf32> -> vector<64x128xf32>
    %14 = arith.maximumf %10, %13 : vector<64x128xf32>
    %15 = arith.maximumf %7, %14 : vector<64x128xf32>
    %c0_13 = arith.constant 0 : index
    %c0_14 = arith.constant 0 : index
    %16 = vector.load %arg3[%c0_13, %c0_14] : memref<1x128xf32, #tpu.memory_space<vmem>>, vector<1x128xf32>
    %17 = vector.broadcast %16 : vector<1x128xf32> to vector<64x128xf32>
    %18 = arith.addf %15, %17 : vector<64x128xf32>
    %cst_15 = arith.constant 0.000000e+00 : f32
    %19 = vector.broadcast %cst_15 : f32 to vector<64x128xf32>
    %20 = arith.maximumf %18, %19 : vector<64x128xf32>
    %21 = arith.truncf %20 : vector<64x128xf32> to vector<64x128xbf16>
    %c0_16 = arith.constant 0 : index
    %c0_17 = arith.constant 0 : index
    %22 = vector.load %arg4[%c0_16, %c0_17] : memref<64x128xbf16, #tpu.memory_space<vmem>>, vector<64x128xbf16>
    tpu.vector_store %arg4[%c0_16, %c0_17], %21 {strides = array<i32>} : memref<64x128xbf16, #tpu.memory_space<vmem>>, vector<64x128xbf16>,
    return
  }
  func.func @transform_0(%arg0: i32) -> (i32, i32, i32) {
    %c0_i32 = arith.constant 0 : i32
    %c0_i32_0 = arith.constant 0 : i32
    %c0_i32_1 = arith.constant 0 : i32
    return %c0_i32, %arg0, %c0_i32_0 : i32, i32, i32
  }
  func.func @transform_1(%arg0: i32) -> (i32, i32) {
    %c0_i32 = arith.constant 0 : i32
    %c0_i32_0 = arith.constant 0 : i32
    %c0_i32_1 = arith.constant 0 : i32
    return %c0_i32, %c0_i32_0 : i32, i32
  }
  func.func @transform_2(%arg0: i32) -> (i32, i32) {
    %c0_i32 = arith.constant 0 : i32
    %c0_i32_0 = arith.constant 0 : i32
    %c0_i32_1 = arith.constant 0 : i32
    return %c0_i32, %c0_i32_0 : i32, i32
  }
  func.func @transform_3(%arg0: i32) -> (i32, i32) {
    %c0_i32 = arith.constant 0 : i32
    %c0_i32_0 = arith.constant 0 : i32
    return %arg0, %c0_i32 : i32, i32
  }
}

module attributes {stable_mosaic.version = 11 : i64} {
  func.func @_fc_chain_kernel(%arg0: i32, %arg1: memref<16x512xbf16, #tpu.memory_space<vmem>>, %arg2: memref<512x1024xbf16, #tpu.memory_space<vmem>>, %arg3: memref<1x1024xf32, #tpu.memory_space<vmem>>, %arg4: memref<1024x1024xbf16, #tpu.memory_space<vmem>>, %arg5: memref<1x1024xf32, #tpu.memory_space<vmem>>, %arg6: memref<1024x128xbf16, #tpu.memory_space<vmem>>, %arg7: memref<1x128xf32, #tpu.memory_space<vmem>>, %arg8: memref<128x128xbf16, #tpu.memory_space<vmem>>, %arg9: memref<1x128xf32, #tpu.memory_space<vmem>>, %arg10: memref<16x128xf32, #tpu.memory_space<vmem>>) attributes {dimension_semantics = [#tpu.dimension_semantics<parallel>], iteration_bounds = array<i64: 1>, scalar_prefetch = 0 : i64, scratch_operands = 0 : i64, tpu.core_type = #tpu.core_type<tc>, window_params = [{transform_indices = @transform_0, window_bounds = array<i64: 16, 512>}, {pipeline_mode = #tpu.pipeline_mode<synchronous>, transform_indices = @transform_1, window_bounds = array<i64: 512, 1024>}, {pipeline_mode = #tpu.pipeline_mode<synchronous>, transform_indices = @transform_2, window_bounds = array<i64: 1, 1024>}, {pipeline_mode = #tpu.pipeline_mode<synchronous>, transform_indices = @transform_3, window_bounds = array<i64: 1024, 1024>}, {pipeline_mode = #tpu.pipeline_mode<synchronous>, transform_indices = @transform_4, window_bounds = array<i64: 1, 1024>}, {pipeline_mode = #tpu.pipeline_mode<synchronous>, transform_indices = @transform_5, window_bounds = array<i64: 1024, 128>}, {pipeline_mode = #tpu.pipeline_mode<synchronous>, transform_indices = @transform_6, window_bounds = array<i64: 1, 128>}, {pipeline_mode = #tpu.pipeline_mode<synchronous>, transform_indices = @transform_7, window_bounds = array<i64: 128, 128>}, {pipeline_mode = #tpu.pipeline_mode<synchronous>, transform_indices = @transform_8, window_bounds = array<i64: 1, 128>}, {transform_indices = @transform_9, window_bounds = array<i64: 16, 128>}]} {
    %c0 = arith.constant 0 : index
    %c0_0 = arith.constant 0 : index
    %0 = vector.load %arg1[%c0, %c0_0] : memref<16x512xbf16, #tpu.memory_space<vmem>>, vector<16x512xbf16>
    %c0_1 = arith.constant 0 : index
    %c0_2 = arith.constant 0 : index
    %1 = vector.load %arg2[%c0_1, %c0_2] : memref<512x1024xbf16, #tpu.memory_space<vmem>>, vector<512x1024xbf16>
    %cst = arith.constant dense<0.000000e+00> : vector<16x1024xf32>
    %2 = tpu.matmul %0, %1, %cst {dimension_numbers = #tpu.dot_dimension_numbers<[1], [0], [0], [1], [0, 0, 1, 1], [], []>} : vector<16x512xbf16>, vector<512x1024xbf16>, vector<16x1024xf32> -> vector<16x1024xf32>
    %c0_3 = arith.constant 0 : index
    %c0_4 = arith.constant 0 : index
    %3 = vector.load %arg3[%c0_3, %c0_4] : memref<1x1024xf32, #tpu.memory_space<vmem>>, vector<1x1024xf32>
    %4 = vector.broadcast %3 : vector<1x1024xf32> to vector<16x1024xf32>
    %5 = arith.addf %2, %4 : vector<16x1024xf32>
    %cst_5 = arith.constant 0.000000e+00 : f32
    %6 = vector.broadcast %cst_5 : f32 to vector<16x1024xf32>
    %7 = arith.maximumf %5, %6 : vector<16x1024xf32>
    %8 = arith.truncf %7 : vector<16x1024xf32> to vector<16x1024xbf16>
    %c0_6 = arith.constant 0 : index
    %c0_7 = arith.constant 0 : index
    %9 = vector.load %arg4[%c0_6, %c0_7] : memref<1024x1024xbf16, #tpu.memory_space<vmem>>, vector<1024x1024xbf16>
    %cst_8 = arith.constant dense<0.000000e+00> : vector<16x1024xf32>
    %10 = tpu.matmul %8, %9, %cst_8 {dimension_numbers = #tpu.dot_dimension_numbers<[1], [0], [0], [1], [0, 0, 1, 1], [], []>} : vector<16x1024xbf16>, vector<1024x1024xbf16>, vector<16x1024xf32> -> vector<16x1024xf32>
    %c0_9 = arith.constant 0 : index
    %c0_10 = arith.constant 0 : index
    %11 = vector.load %arg5[%c0_9, %c0_10] : memref<1x1024xf32, #tpu.memory_space<vmem>>, vector<1x1024xf32>
    %12 = vector.broadcast %11 : vector<1x1024xf32> to vector<16x1024xf32>
    %13 = arith.addf %10, %12 : vector<16x1024xf32>
    %cst_11 = arith.constant 0.000000e+00 : f32
    %14 = vector.broadcast %cst_11 : f32 to vector<16x1024xf32>
    %15 = arith.maximumf %13, %14 : vector<16x1024xf32>
    %16 = arith.truncf %15 : vector<16x1024xf32> to vector<16x1024xbf16>
    %c0_12 = arith.constant 0 : index
    %c0_13 = arith.constant 0 : index
    %17 = vector.load %arg6[%c0_12, %c0_13] : memref<1024x128xbf16, #tpu.memory_space<vmem>>, vector<1024x128xbf16>
    %cst_14 = arith.constant dense<0.000000e+00> : vector<16x128xf32>
    %18 = tpu.matmul %16, %17, %cst_14 {dimension_numbers = #tpu.dot_dimension_numbers<[1], [0], [0], [1], [0, 0, 1, 1], [], []>} : vector<16x1024xbf16>, vector<1024x128xbf16>, vector<16x128xf32> -> vector<16x128xf32>
    %c0_15 = arith.constant 0 : index
    %c0_16 = arith.constant 0 : index
    %19 = vector.load %arg7[%c0_15, %c0_16] : memref<1x128xf32, #tpu.memory_space<vmem>>, vector<1x128xf32>
    %20 = vector.broadcast %19 : vector<1x128xf32> to vector<16x128xf32>
    %21 = arith.addf %18, %20 : vector<16x128xf32>
    %cst_17 = arith.constant 0.000000e+00 : f32
    %22 = vector.broadcast %cst_17 : f32 to vector<16x128xf32>
    %23 = arith.maximumf %21, %22 : vector<16x128xf32>
    %24 = arith.truncf %23 : vector<16x128xf32> to vector<16x128xbf16>
    %c0_18 = arith.constant 0 : index
    %c0_19 = arith.constant 0 : index
    %25 = vector.load %arg8[%c0_18, %c0_19] : memref<128x128xbf16, #tpu.memory_space<vmem>>, vector<128x128xbf16>
    %cst_20 = arith.constant dense<0.000000e+00> : vector<16x128xf32>
    %26 = tpu.matmul %24, %25, %cst_20 {dimension_numbers = #tpu.dot_dimension_numbers<[1], [0], [0], [1], [0, 0, 1, 1], [], []>} : vector<16x128xbf16>, vector<128x128xbf16>, vector<16x128xf32> -> vector<16x128xf32>
    %c0_21 = arith.constant 0 : index
    %c0_22 = arith.constant 0 : index
    %27 = vector.load %arg9[%c0_21, %c0_22] : memref<1x128xf32, #tpu.memory_space<vmem>>, vector<1x128xf32>
    %28 = vector.broadcast %27 : vector<1x128xf32> to vector<16x128xf32>
    %29 = arith.addf %26, %28 : vector<16x128xf32>
    %c0_23 = arith.constant 0 : index
    %c0_24 = arith.constant 0 : index
    %30 = vector.load %arg10[%c0_23, %c0_24] : memref<16x128xf32, #tpu.memory_space<vmem>>, vector<16x128xf32>
    tpu.vector_store %arg10[%c0_23, %c0_24], %29 {strides = array<i32>} : memref<16x128xf32, #tpu.memory_space<vmem>>, vector<16x128xf32>,
    return
  }
  func.func @transform_0(%arg0: i32) -> (i32, i32) {
    %c0_i32 = arith.constant 0 : i32
    %c0_i32_0 = arith.constant 0 : i32
    return %arg0, %c0_i32 : i32, i32
  }
  func.func @transform_1(%arg0: i32) -> (i32, i32) {
    %c0_i32 = arith.constant 0 : i32
    %c0_i32_0 = arith.constant 0 : i32
    %c0_i32_1 = arith.constant 0 : i32
    return %c0_i32, %c0_i32_0 : i32, i32
  }
  func.func @transform_2(%arg0: i32) -> (i32, i32) {
    %c0_i32 = arith.constant 0 : i32
    %c0_i32_0 = arith.constant 0 : i32
    %c0_i32_1 = arith.constant 0 : i32
    return %c0_i32, %c0_i32_0 : i32, i32
  }
  func.func @transform_3(%arg0: i32) -> (i32, i32) {
    %c0_i32 = arith.constant 0 : i32
    %c0_i32_0 = arith.constant 0 : i32
    %c0_i32_1 = arith.constant 0 : i32
    return %c0_i32, %c0_i32_0 : i32, i32
  }
  func.func @transform_4(%arg0: i32) -> (i32, i32) {
    %c0_i32 = arith.constant 0 : i32
    %c0_i32_0 = arith.constant 0 : i32
    %c0_i32_1 = arith.constant 0 : i32
    return %c0_i32, %c0_i32_0 : i32, i32
  }
  func.func @transform_5(%arg0: i32) -> (i32, i32) {
    %c0_i32 = arith.constant 0 : i32
    %c0_i32_0 = arith.constant 0 : i32
    %c0_i32_1 = arith.constant 0 : i32
    return %c0_i32, %c0_i32_0 : i32, i32
  }
  func.func @transform_6(%arg0: i32) -> (i32, i32) {
    %c0_i32 = arith.constant 0 : i32
    %c0_i32_0 = arith.constant 0 : i32
    %c0_i32_1 = arith.constant 0 : i32
    return %c0_i32, %c0_i32_0 : i32, i32
  }
  func.func @transform_7(%arg0: i32) -> (i32, i32) {
    %c0_i32 = arith.constant 0 : i32
    %c0_i32_0 = arith.constant 0 : i32
    %c0_i32_1 = arith.constant 0 : i32
    return %c0_i32, %c0_i32_0 : i32, i32
  }
  func.func @transform_8(%arg0: i32) -> (i32, i32) {
    %c0_i32 = arith.constant 0 : i32
    %c0_i32_0 = arith.constant 0 : i32
    %c0_i32_1 = arith.constant 0 : i32
    return %c0_i32, %c0_i32_0 : i32, i32
  }
  func.func @transform_9(%arg0: i32) -> (i32, i32) {
    %c0_i32 = arith.constant 0 : i32
    %c0_i32_0 = arith.constant 0 : i32
    return %arg0, %c0_i32 : i32, i32
  }
}

</mosaic_0001>

<bundles_post_ra>
// kernel: net_forward.3
= control target key start
LH: loop header
LB: loop body
LE: loop exit
PB: predicated region body
PF: predicated region fallthrough
CT: control target
= control target key end

     0   :  { %v4701_v0 = vmov 0.0   ;;  %vm3540_vm0 = vmmov 0   ;;  %s4697_s1 = inlined_call_operand.vmem [shape: bf16[128,128], index: 1, kind: input, shape index: {}]   ;;  %s4698_s0 = inlined_call_operand.vmem [shape: bf16[4,400,128], index: 0, kind: input, shape index: {}]   ;;  %s4699_s2 = inlined_call_operand.vmem [shape: f32[1,128], index: 2, kind: input, shape index: {}]   ;;  %s4700_s3 = inlined_call_operand.vmem [shape: bf16[400,128], index: 3, kind: output, shape index: {}]  }
   0x1   :  { %2965 = vmatprep.subr.bf16.mxu0 %v4701_v0  ;;  %3081 = vmatprep.subr.bf16.mxu1 %v4701_v0  ;;  %v3431_v1 = vld [vmem:[%s4697_s1] sm:$0xff]   ;;  %v3432_v2 = vld [vmem:[%s4697_s1 + $0x8] sm:$0xff]   ;;  %v3433_v3 = vld [vmem:[%s4697_s1 + $0x10] sm:$0xff]  }
   0x2   :  { %2981 = vmatprep.mubr.msk.bf16.mxu0 %vm3540_vm0, %v4701_v0  ;;  %3097 = vmatprep.mubr.msk.bf16.mxu1 %vm3540_vm0, %v4701_v0  ;;  %v3434_v4 = vld [vmem:[%s4697_s1 + $0x18] sm:$0xff]   ;;  %v3435_v5 = vld [vmem:[%s4697_s1 + $0x20] sm:$0xff]   ;;  %v3436_v6 = vld [vmem:[%s4697_s1 + $0x28] sm:$0xff]  }
   0x3   :  { %2966 = vmatpush3.bf16.msra.mxu0 %v3431_v1  ;;  %3082 = vmatpush3.bf16.msra.mxu1 %v3431_v1  ;;  %v3437_v7 = vld [vmem:[%s4697_s1 + $0x30] sm:$0xff]   ;;  %v3438_v8 = vld [vmem:[%s4697_s1 + $0x38] sm:$0xff]   ;;  %v3439_v9 = vld [vmem:[%s4698_s0] sm:$0xff]  }
   0x4   :  { %2967 = vmatprep.subr.bf16.mxu0 %v4701_v0  ;;  %3083 = vmatprep.subr.bf16.mxu1 %v4701_v0  ;;  %v3440_v10 = vld [vmem:[%s4698_s0 + $0xc8] sm:$0xff]   ;;  %v3442_v12 = vld [vmem:[%s4698_s0 + $0xd0] sm:$0xff]   ;;  %v3444_v14 = vld [vmem:[%s4698_s0 + $0xd8] sm:$0xff]  }
   0x5   :  { %v3441_v11 = vld [vmem:[%s4698_s0 + $0x8] sm:$0xff]   ;;  %v3443_v13 = vld [vmem:[%s4698_s0 + $0x10] sm:$0xff]   ;;  %v3445_v15 = vld [vmem:[%s4698_s0 + $0x18] sm:$0xff]  }
   0x6   :  { %v3446_v16 = vld [vmem:[%s4698_s0 + $0xe0] sm:$0xff]   ;;  %v3448_v18 = vld [vmem:[%s4698_s0 + $0xe8] sm:$0xff]   ;;  %v3450_v20 = vld [vmem:[%s4698_s0 + $0xf0] sm:$0xff]  }
   0x7   :  { %2968 = vmatpush3.bf16.msra.mxu0 %v3432_v2  ;;  %3084 = vmatpush3.bf16.msra.mxu1 %v3432_v2  ;;  %v3447_v17 = vld [vmem:[%s4698_s0 + $0x20] sm:$0xff]   ;;  %v3449_v19 = vld [vmem:[%s4698_s0 + $0x28] sm:$0xff]   ;;  %v3451_v21 = vld [vmem:[%s4698_s0 + $0x30] sm:$0xff]  }
   0x8   :  { %2969 = vmatprep.subr.bf16.mxu0 %v4701_v0  ;;  %3085 = vmatprep.subr.bf16.mxu1 %v4701_v0  ;;  %v3452_v22 = vld [vmem:[%s4698_s0 + $0xf8] sm:$0xff]   ;;  %v3454_v24 = vld [vmem:[%s4698_s0 + $0x100] sm:$0xff]   ;;  %v3456_v26 = vld [vmem:[%s4698_s0 + $0x108] sm:$0xff]  }
   0x9   :  { %v3453_v23 = vld [vmem:[%s4698_s0 + $0x38] sm:$0xff]   ;;  %v3455_v25 = vld [vmem:[%s4698_s0 + $0x40] sm:$0xff]   ;;  %v3457_v27 = vld [vmem:[%s4698_s0 + $0x48] sm:$0xff]  }
   0xa   :  { %v3458_v28 = vld [vmem:[%s4698_s0 + $0x110] sm:$0xff]   ;;  %v3460_v30 = vld [vmem:[%s4698_s0 + $0x118] sm:$0xff]   ;;  %v3462_v32 = vld [vmem:[%s4698_s0 + $0x120] sm:$0xff]  }
   0xb   :  { %2970 = vmatpush3.bf16.msra.mxu0 %v3433_v3  ;;  %3086 = vmatpush3.bf16.msra.mxu1 %v3433_v3  ;;  %v3459_v29 = vld [vmem:[%s4698_s0 + $0x50] sm:$0xff]   ;;  %v3461_v31 = vld [vmem:[%s4698_s0 + $0x58] sm:$0xff]   ;;  %v3463_v33 = vld [vmem:[%s4698_s0 + $0x60] sm:$0xff]  }
   0xc   :  { %2971 = vmatprep.subr.bf16.mxu0 %v4701_v0  ;;  %3087 = vmatprep.subr.bf16.mxu1 %v4701_v0  ;;  %v3464_v34 = vld [vmem:[%s4698_s0 + $0x128] sm:$0xff]   ;;  %v3466_v36 = vld [vmem:[%s4698_s0 + $0x130] sm:$0xff]   ;;  %v3468_v38 = vld [vmem:[%s4698_s0 + $0x138] sm:$0xff]  }
   0xd   :  { %v3465_v35 = vld [vmem:[%s4698_s0 + $0x68] sm:$0xff]   ;;  %v3467_v37 = vld [vmem:[%s4698_s0 + $0x70] sm:$0xff]   ;;  %v3469_v39 = vld [vmem:[%s4698_s0 + $0x78] sm:$0xff]  }
   0xe   :  { %v3470_v40 = vld [vmem:[%s4698_s0 + $0x140] sm:$0xff]   ;;  %v3472_v42 = vld [vmem:[%s4698_s0 + $0x148] sm:$0xff]   ;;  %v3474_v44 = vld [vmem:[%s4698_s0 + $0x150] sm:$0xff]  }
   0xf   :  { %2972 = vmatpush3.bf16.msra.mxu0 %v3434_v4  ;;  %3088 = vmatpush3.bf16.msra.mxu1 %v3434_v4  ;;  %v3471_v41 = vld [vmem:[%s4698_s0 + $0x80] sm:$0xff]   ;;  %v3473_v43 = vld [vmem:[%s4698_s0 + $0x88] sm:$0xff]   ;;  %v3475_v45 = vld [vmem:[%s4698_s0 + $0x90] sm:$0xff]  }
  0x10   :  { %2973 = vmatprep.subr.bf16.mxu0 %v4701_v0  ;;  %3089 = vmatprep.subr.bf16.mxu1 %v4701_v0  ;;  %v3476_v46 = vld [vmem:[%s4698_s0 + $0x158] sm:$0xff]   ;;  %v3478_v48 = vld [vmem:[%s4698_s0 + $0x160] sm:$0xff]   ;;  %v3480_v50 = vld [vmem:[%s4698_s0 + $0x168] sm:$0xff]  }
  0x11   :  { %v3477_v47 = vld [vmem:[%s4698_s0 + $0x98] sm:$0xff]   ;;  %v3479_v49 = vld [vmem:[%s4698_s0 + $0xa0] sm:$0xff]   ;;  %v3481_v51 = vld [vmem:[%s4698_s0 + $0xa8] sm:$0xff]  }
  0x12   :  { %v3482_v52 = vld [vmem:[%s4698_s0 + $0x170] sm:$0xff]   ;;  %v3484_v54 = vld [vmem:[%s4698_s0 + $0x178] sm:$0xff]   ;;  %v3486_v56 = vld [vmem:[%s4698_s0 + $0x180] sm:$0xff]  }
  0x13   :  { %2974 = vmatpush3.bf16.msra.mxu0 %v3435_v5  ;;  %3090 = vmatpush3.bf16.msra.mxu1 %v3435_v5  ;;  %v3483_v53 = vld [vmem:[%s4698_s0 + $0xb0] sm:$0xff]   ;;  %v3485_v55 = vld [vmem:[%s4698_s0 + $0xb8] sm:$0xff]   ;;  %v3487_v57 = vld [vmem:[%s4698_s0 + $0xc0] sm:$0xff]  }
  0x14   :  { %2975 = vmatprep.subr.bf16.mxu0 %v4701_v0  ;;  %3091 = vmatprep.subr.bf16.mxu1 %v4701_v0  ;;  %v3488_v58 = vld [vmem:[%s4698_s0 + $0x188] sm:$0xff]   ;;  %v3489_v59 = vld [vmem:[%s4698_s0 + $0x190] sm:$0xff]   ;;  %v3490_v60 = vld [vmem:[%s4698_s0 + $0x258] sm:$0xff]  }
  0x15   :  { %v3491_v61 = vld [vmem:[%s4698_s0 + $0x198] sm:$0xff]   ;;  %v3492_v62 = vld [vmem:[%s4698_s0 + $0x260] sm:$0xff]  }
  0x17   :  { %2976 = vmatpush3.bf16.msra.mxu0 %v3436_v6  ;;  %3092 = vmatpush3.bf16.msra.mxu1 %v3436_v6 }
  0x18   :  { %2977 = vmatprep.subr.bf16.mxu0 %v4701_v0  ;;  %3093 = vmatprep.subr.bf16.mxu1 %v4701_v0 }
  0x1b   :  { %2978 = vmatpush3.bf16.msra.mxu0 %v3437_v7  ;;  %3094 = vmatpush3.bf16.msra.mxu1 %v3437_v7 }
  0x1c   :  { %2979 = vmatprep.subr.bf16.mxu0 %v4701_v0  ;;  %3095 = vmatprep.subr.bf16.mxu1 %v4701_v0 }
  0x1f   :  { %2980 = vmatpush3.bf16.msra.mxu0 %v3438_v8  ;;  %3096 = vmatpush3.bf16.msra.mxu1 %v3438_v8 }
  0x20   :  { %3197 = vmatprep.subr.bf16.mxu0 %v4701_v0  ;;  %3313 = vmatprep.subr.bf16.mxu1 %v4701_v0 }
  0x22   :  { %2982 = vmatmul.mubr.bf16.vlgmr.msra.gmra.mrb[0].mxu0 %v3439_v9  ;;  %3098 = vmatmul.mubr.bf16.vlgmr.msra.gmra.mrb[0].mxu1 %v3440_v10 }
  0x23   :  { %3198 = vmatpush3.bf16.msra.mxu0 %v3431_v1  ;;  %3314 = vmatpush3.bf16.msra.mxu1 %v3431_v1 }
  0x24   :  { %2985 = vmatprep.mubr.msk.bf16.mxu0 %vm3540_vm0, %v4701_v0  ;;  %3101 = vmatprep.mubr.msk.bf16.mxu1 %vm3540_vm0, %v4701_v0 }
  0x25   :  { %3199 = vmatprep.subr.bf16.mxu0 %v4701_v0  ;;  %3315 = vmatprep.subr.bf16.mxu1 %v4701_v0 }
  0x27   :  { %3200 = vmatpush3.bf16.msra.mxu0 %v3432_v2  ;;  %3316 = vmatpush3.bf16.msra.mxu1 %v3432_v2 }
  0x28   :  { %3201 = vmatprep.subr.bf16.mxu0 %v4701_v0  ;;  %3317 = vmatprep.subr.bf16.mxu1 %v4701_v0 }
  0x2a   :  { %2986 = vmatmul.mubr.bf16.gmra.mrb[4].mxu0 %v3441_v11  ;;  %3102 = vmatmul.mubr.bf16.gmra.mrb[4].mxu1 %v3442_v12 }
  0x2b   :  { %2989 = vmatprep.mubr.msk.bf16.mxu0 %vm3540_vm0, %v4701_v0  ;;  %3105 = vmatprep.mubr.msk.bf16.mxu1 %vm3540_vm0, %v4701_v0 }
  0x2c   :  { %3202 = vmatpush3.bf16.msra.mxu0 %v3433_v3  ;;  %3318 = vmatpush3.bf16.msra.mxu1 %v3433_v3 }
  0x2d   :  { %3203 = vmatprep.subr.bf16.mxu0 %v4701_v0  ;;  %3319 = vmatprep.subr.bf16.mxu1 %v4701_v0 }
  0x30   :  { %3204 = vmatpush3.bf16.msra.mxu0 %v3434_v4  ;;  %3320 = vmatpush3.bf16.msra.mxu1 %v3434_v4 }
  0x31   :  { %3205 = vmatprep.subr.bf16.mxu0 %v4701_v0  ;;  %3321 = vmatprep.subr.bf16.mxu1 %v4701_v0 }
  0x32   :  { %2990 = vmatmul.mubr.bf16.gmra.mrb[8].mxu0 %v3443_v13  ;;  %3106 = vmatmul.mubr.bf16.gmra.mrb[8].mxu1 %v3444_v14 }
  0x33   :  { %2993 = vmatprep.mubr.msk.bf16.mxu0 %vm3540_vm0, %v4701_v0  ;;  %3109 = vmatprep.mubr.msk.bf16.mxu1 %vm3540_vm0, %v4701_v0 }
  0x34   :  { %3206 = vmatpush3.bf16.msra.mxu0 %v3435_v5  ;;  %3322 = vmatpush3.bf16.msra.mxu1 %v3435_v5  ;;  %v3493_v5 = vld [vmem:[%s4698_s0 + $0x1a0] sm:$0xff]  }
  0x35   :  { %3207 = vmatprep.subr.bf16.mxu0 %v4701_v0  ;;  %3323 = vmatprep.subr.bf16.mxu1 %v4701_v0 }
  0x38   :  { %3208 = vmatpush3.bf16.msra.mxu0 %v3436_v6  ;;  %3324 = vmatpush3.bf16.msra.mxu1 %v3436_v6  ;;  %v3494_v6 = vld [vmem:[%s4698_s0 + $0x268] sm:$0xff]  }
  0x39   :  { %3209 = vmatprep.subr.bf16.mxu0 %v4701_v0  ;;  %3325 = vmatprep.subr.bf16.mxu1 %v4701_v0 }
  0x3a   :  { %2994 = vmatmul.mubr.bf16.gmra.mrb[12].mxu0 %v3445_v15  ;;  %3110 = vmatmul.mubr.bf16.gmra.mrb[12].mxu1 %v3446_v16 }
  0x3b   :  { %2997 = vmatprep.mubr.msk.bf16.mxu0 %vm3540_vm0, %v4701_v0  ;;  %3113 = vmatprep.mubr.msk.bf16.mxu1 %vm3540_vm0, %v4701_v0 }
  0x3c   :  { %3210 = vmatpush3.bf16.msra.mxu0 %v3437_v7  ;;  %3326 = vmatpush3.bf16.msra.mxu1 %v3437_v7 }
  0x3d   :  { %3211 = vmatprep.subr.bf16.mxu0 %v4701_v0  ;;  %3327 = vmatprep.subr.bf16.mxu1 %v4701_v0 }
  0x40   :  { %3212 = vmatpush3.bf16.msra.mxu0 %v3438_v8  ;;  %3328 = vmatpush3.bf16.msra.mxu1 %v3438_v8 }
  0x42   :  { %2998 = vmatmul.mubr.bf16.gmra.mrb[16].mxu0 %v3447_v17  ;;  %3114 = vmatmul.mubr.bf16.gmra.mrb[16].mxu1 %v3448_v18  ;;  %v3495_v17 = vld [vmem:[%s4698_s0 + $0x1a8] sm:$0xff]   ;;  %v3496_v18 = vld [vmem:[%s4698_s0 + $0x270] sm:$0xff]  }
  0x43   :  { %3001 = vmatprep.mubr.msk.bf16.mxu0 %vm3540_vm0, %v4701_v0  ;;  %3117 = vmatprep.mubr.msk.bf16.mxu1 %vm3540_vm0, %v4701_v0 }
  0x4a   :  { %3002 = vmatmul.mubr.bf16.gmra.mrb[20].mxu0 %v3449_v19  ;;  %3118 = vmatmul.mubr.bf16.gmra.mrb[20].mxu1 %v3450_v20 }
  0x4b   :  { %3005 = vmatprep.mubr.msk.bf16.mxu0 %vm3540_vm0, %v4701_v0  ;;  %3121 = vmatprep.mubr.msk.bf16.mxu1 %vm3540_vm0, %v4701_v0 }
  0x52   :  { %3006 = vmatmul.mubr.bf16.gmra.mrb[24].mxu0 %v3451_v21  ;;  %3122 = vmatmul.mubr.bf16.gmra.mrb[24].mxu1 %v3452_v22 }
  0x53   :  { %3009 = vmatprep.mubr.msk.bf16.mxu0 %vm3540_vm0, %v4701_v0  ;;  %3125 = vmatprep.mubr.msk.bf16.mxu1 %vm3540_vm0, %v4701_v0 }
  0x5a   :  { %3010 = vmatmul.mubr.bf16.gmra.mrb[28].mxu0 %v3453_v23  ;;  %3126 = vmatmul.mubr.bf16.gmra.mrb[28].mxu1 %v3454_v24 }
  0x5b   :  { %3013 = vmatprep.mubr.msk.bf16.mxu0 %vm3540_vm0, %v4701_v0  ;;  %3129 = vmatprep.mubr.msk.bf16.mxu1 %vm3540_vm0, %v4701_v0 }
  0x62   :  { %3014 = vmatmul.mubr.bf16.gmra.mrb[32].mxu0 %v3455_v25  ;;  %3130 = vmatmul.mubr.bf16.gmra.mrb[32].mxu1 %v3456_v26 }
  0x63   :  { %3017 = vmatprep.mubr.msk.bf16.mxu0 %vm3540_vm0, %v4701_v0  ;;  %3133 = vmatprep.mubr.msk.bf16.mxu1 %vm3540_vm0, %v4701_v0 }
  0x6a   :  { %3018 = vmatmul.mubr.bf16.gmra.mrb[36].mxu0 %v3457_v27  ;;  %3134 = vmatmul.mubr.bf16.gmra.mrb[36].mxu1 %v3458_v28 }
  0x6b   :  { %3021 = vmatprep.mubr.msk.bf16.mxu0 %vm3540_vm0, %v4701_v0  ;;  %3137 = vmatprep.mubr.msk.bf16.mxu1 %vm3540_vm0, %v4701_v0 }
  0x72   :  { %3022 = vmatmul.mubr.bf16.gmra.mrb[40].mxu0 %v3459_v29  ;;  %3138 = vmatmul.mubr.bf16.gmra.mrb[40].mxu1 %v3460_v30  ;;  %v3497_v29 = vld [vmem:[%s4698_s0 + $0x1b0] sm:$0xff]   ;;  %v3498_v30 = vld [vmem:[%s4698_s0 + $0x278] sm:$0xff]  }
  0x73   :  { %3025 = vmatprep.mubr.msk.bf16.mxu0 %vm3540_vm0, %v4701_v0  ;;  %3141 = vmatprep.mubr.msk.bf16.mxu1 %vm3540_vm0, %v4701_v0 }
  0x7a   :  { %3026 = vmatmul.mubr.bf16.gmra.mrb[44].mxu0 %v3461_v31  ;;  %3142 = vmatmul.mubr.bf16.gmra.mrb[44].mxu1 %v3462_v32 }
  0x7b   :  { %3029 = vmatprep.mubr.msk.bf16.mxu0 %vm3540_vm0, %v4701_v0  ;;  %3145 = vmatprep.mubr.msk.bf16.mxu1 %vm3540_vm0, %v4701_v0 }
  0x82   :  { %3030 = vmatmul.mubr.bf16.gmra.mrb[48].mxu0 %v3463_v33  ;;  %3146 = vmatmul.mubr.bf16.gmra.mrb[48].mxu1 %v3464_v34 }
  0x83   :  { %3033 = vmatprep.mubr.msk.bf16.mxu0 %vm3540_vm0, %v4701_v0  ;;  %3149 = vmatprep.mubr.msk.bf16.mxu1 %vm3540_vm0, %v4701_v0 }
  0x8a   :  { %3034 = vmatmul.mubr.bf16.gmra.mrb[52].mxu0 %v3465_v35  ;;  %3150 = vmatmul.mubr.bf16.gmra.mrb[52].mxu1 %v3466_v36 }
  0x8b   :  { %3037 = vmatprep.mubr.msk.bf16.mxu0 %vm3540_vm0, %v4701_v0  ;;  %3153 = vmatprep.mubr.msk.bf16.mxu1 %vm3540_vm0, %v4701_v0 }
  0x92   :  { %3038 = vmatmul.mubr.bf16.gmra.mrb[56].mxu0 %v3467_v37  ;;  %3154 = vmatmul.mubr.bf16.gmra.mrb[56].mxu1 %v3468_v38 }
  0x93   :  { %3041 = vmatprep.mubr.msk.bf16.mxu0 %vm3540_vm0, %v4701_v0  ;;  %3157 = vmatprep.mubr.msk.bf16.mxu1 %vm3540_vm0, %v4701_v0 }
  0x9a   :  { %3042 = vmatmul.mubr.bf16.gmra.mrb[60].mxu0 %v3469_v39  ;;  %3158 = vmatmul.mubr.bf16.gmra.mrb[60].mxu1 %v3470_v40 }
  0x9b   :  { %3045 = vmatprep.mubr.msk.bf16.mxu0 %vm3540_vm0, %v4701_v0  ;;  %3161 = vmatprep.mubr.msk.bf16.mxu1 %vm3540_vm0, %v4701_v0 }
  0xa2   :  { %3046 = vmatmul.mubr.bf16.gmra.mrb[64].mxu0 %v3471_v41  ;;  %3162 = vmatmul.mubr.bf16.gmra.mrb[64].mxu1 %v3472_v42  ;;  %v3499_v41 = vld [vmem:[%s4698_s0 + $0x1b8] sm:$0xff]   ;;  %v3500_v42 = vld [vmem:[%s4698_s0 + $0x280] sm:$0xff]  }
  0xa3   :  { %3049 = vmatprep.mubr.msk.bf16.mxu0 %vm3540_vm0, %v4701_v0  ;;  %3165 = vmatprep.mubr.msk.bf16.mxu1 %vm3540_vm0, %v4701_v0 }
  0xaa   :  { %3050 = vmatmul.mubr.bf16.gmra.mrb[68].mxu0 %v3473_v43  ;;  %3166 = vmatmul.mubr.bf16.gmra.mrb[68].mxu1 %v3474_v44 }
  0xab   :  { %3053 = vmatprep.mubr.msk.bf16.mxu0 %vm3540_vm0, %v4701_v0  ;;  %3169 = vmatprep.mubr.msk.bf16.mxu1 %vm3540_vm0, %v4701_v0 }
  0xb2   :  { %3054 = vmatmul.mubr.bf16.gmra.mrb[72].mxu0 %v3475_v45  ;;  %3170 = vmatmul.mubr.bf16.gmra.mrb[72].mxu1 %v3476_v46 }
  0xb3   :  { %3057 = vmatprep.mubr.msk.bf16.mxu0 %vm3540_vm0, %v4701_v0  ;;  %3173 = vmatprep.mubr.msk.bf16.mxu1 %vm3540_vm0, %v4701_v0 }
  0xba   :  { %3058 = vmatmul.mubr.bf16.gmra.mrb[76].mxu0 %v3477_v47  ;;  %3174 = vmatmul.mubr.bf16.gmra.mrb[76].mxu1 %v3478_v48 }
  0xbb   :  { %3061 = vmatprep.mubr.msk.bf16.mxu0 %vm3540_vm0, %v4701_v0  ;;  %3177 = vmatprep.mubr.msk.bf16.mxu1 %vm3540_vm0, %v4701_v0 }
  0xc2   :  { %3062 = vmatmul.mubr.bf16.gmra.mrb[80].mxu0 %v3479_v49  ;;  %3178 = vmatmul.mubr.bf16.gmra.mrb[80].mxu1 %v3480_v50 }
  0xc3   :  { %3065 = vmatprep.mubr.msk.bf16.mxu0 %vm3540_vm0, %v4701_v0  ;;  %3181 = vmatprep.mubr.msk.bf16.mxu1 %vm3540_vm0, %v4701_v0 }
  0xca   :  { %3066 = vmatmul.mubr.bf16.gmra.mrb[84].mxu0 %v3481_v51  ;;  %3182 = vmatmul.mubr.bf16.gmra.mrb[84].mxu1 %v3482_v52 }
  0xcb   :  { %3069 = vmatprep.mubr.msk.bf16.mxu0 %vm3540_vm0, %v4701_v0  ;;  %3185 = vmatprep.mubr.msk.bf16.mxu1 %vm3540_vm0, %v4701_v0 }
  0xd2   :  { %3070 = vmatmul.mubr.bf16.gmra.mrb[88].mxu0 %v3483_v53  ;;  %3186 = vmatmul.mubr.bf16.gmra.mrb[88].mxu1 %v3484_v54  ;;  %v3501_v53 = vld [vmem:[%s4698_s0 + $0x1c0] sm:$0xff]   ;;  %v3502_v54 = vld [vmem:[%s4698_s0 + $0x288] sm:$0xff]  }
  0xd3   :  { %3073 = vmatprep.mubr.msk.bf16.mxu0 %vm3540_vm0, %v4701_v0  ;;  %3189 = vmatprep.mubr.msk.bf16.mxu1 %vm3540_vm0, %v4701_v0 }
  0xda   :  { %3074 = vmatmul.mubr.bf16.gmra.mrb[92].mxu0 %v3485_v55  ;;  %3190 = vmatmul.mubr.bf16.gmra.mrb[92].mxu1 %v3486_v56 }
  0xdb   :  { %3077 = vmatprep.mubr.msk.bf16.mxu0 %vm3540_vm0, %v4701_v0  ;;  %3193 = vmatprep.mubr.msk.bf16.mxu1 %vm3540_vm0, %v4701_v0 }
  0xe2   :  { %3078 = vmatmul.mubr.bf16.gmra.mrb[96].mxu0 %v3487_v57  ;;  %3194 = vmatmul.mubr.bf16.gmra.mrb[96].mxu1 %v3488_v58 }
  0xe3   :  { %3213 = vmatprep.mubr.msk.bf16.mxu0 %vm3540_vm0, %v4701_v0  ;;  %3329 = vmatprep.mubr.msk.bf16.mxu1 %vm3540_vm0, %v4701_v0 }
  0xea   :  { %3214 = vmatmul.mubr.bf16.vlgmr.msra.gmra.mrb[100].mxu0 %v3489_v59  ;;  %3330 = vmatmul.mubr.bf16.vlgmr.msra.gmra.mrb[100].mxu1 %v3490_v60 }
  0xeb   :  { %3217 = vmatprep.mubr.msk.bf16.mxu0 %vm3540_vm0, %v4701_v0  ;;  %3333 = vmatprep.mubr.msk.bf16.mxu1 %vm3540_vm0, %v4701_v0 }
  0xf2   :  { %3218 = vmatmul.mubr.bf16.gmra.mrb[104].mxu0 %v3491_v61  ;;  %3334 = vmatmul.mubr.bf16.gmra.mrb[104].mxu1 %v3492_v62 }
  0xf3   :  { %3221 = vmatprep.mubr.msk.bf16.mxu0 %vm3540_vm0, %v4701_v0  ;;  %3337 = vmatprep.mubr.msk.bf16.mxu1 %vm3540_vm0, %v4701_v0 }
  0xf5   :  { %v3891_v63 = vpop.f32.mrb[0].mxu0  ;;  %v3893_v1 = vpop.f32.mrb[0].mxu1 }
  0xf6   :  { %v2983_v3 = vpop.f32.mrb[1].mxu0  ;;  %v3099_v4 = vpop.f32.mrb[1].mxu1 }
  0xf7   :  { %v3903_v7 = vpop.f32.mrb[2].mxu0  ;;  %v3905_v8 = vpop.f32.mrb[2].mxu1 }
  0xf8   :  { %v2984_v10 = vpop.f32.mrb[3].mxu0  ;;  %v3100_v11 = vpop.f32.mrb[3].mxu1 }
  0xfa   :  { %3222 = vmatmul.mubr.bf16.gmra.mrb[108].mxu0 %v3493_v5  ;;  %3338 = vmatmul.mubr.bf16.gmra.mrb[108].mxu1 %v3494_v6  ;;  %v3503_v5 = vld [vmem:[%s4698_s0 + $0x1c8] sm:$0xff]   ;;  %v3504_v6 = vld [vmem:[%s4698_s0 + $0x290] sm:$0xff]  }
  0xfb   :  { %3225 = vmatprep.mubr.msk.bf16.mxu0 %vm3540_vm0, %v4701_v0  ;;  %3341 = vmatprep.mubr.msk.bf16.mxu1 %vm3540_vm0, %v4701_v0 }
  0xfd   :  { %v3913_v12 = vpop.f32.mrb[4].mxu0  ;;  %v3915_v13 = vpop.f32.mrb[4].mxu1 }
  0xfe   :  { %v2987_v15 = vpop.f32.mrb[5].mxu0  ;;  %v3103_v16 = vpop.f32.mrb[5].mxu1 }
  0xff   :  { %v3925_v19 = vpop.f32.mrb[6].mxu0  ;;  %v3927_v20 = vpop.f32.mrb[6].mxu1 }
 0x100   :  { %v2988_v22 = vpop.f32.mrb[7].mxu0  ;;  %v3104_v23 = vpop.f32.mrb[7].mxu1 }
 0x102   :  { %3226 = vmatmul.mubr.bf16.gmra.mrb[112].mxu0 %v3495_v17  ;;  %3342 = vmatmul.mubr.bf16.gmra.mrb[112].mxu1 %v3496_v18 }
 0x103   :  { %3229 = vmatprep.mubr.msk.bf16.mxu0 %vm3540_vm0, %v4701_v0  ;;  %3345 = vmatprep.mubr.msk.bf16.mxu1 %vm3540_vm0, %v4701_v0 }
 0x105   :  { %v3935_v24 = vpop.f32.mrb[8].mxu0  ;;  %v3937_v25 = vpop.f32.mrb[8].mxu1 }
 0x106   :  { %v2991_v27 = vpop.f32.mrb[9].mxu0  ;;  %v3107_v28 = vpop.f32.mrb[9].mxu1 }
 0x107   :  { %v3947_v31 = vpop.f32.mrb[10].mxu0  ;;  %v3949_v32 = vpop.f32.mrb[10].mxu1 }
 0x108   :  { %v2992_v34 = vpop.f32.mrb[11].mxu0  ;;  %v3108_v35 = vpop.f32.mrb[11].mxu1 }
 0x10a   :  { %3230 = vmatmul.mubr.bf16.gmra.mrb[116].mxu0 %v3497_v29  ;;  %3346 = vmatmul.mubr.bf16.gmra.mrb[116].mxu1 %v3498_v30  ;;  %v3505_v29 = vld [vmem:[%s4698_s0 + $0x1d0] sm:$0xff]   ;;  %v3506_v30 = vld [vmem:[%s4698_s0 + $0x298] sm:$0xff]  }
 0x10b   :  { %3233 = vmatprep.mubr.msk.bf16.mxu0 %vm3540_vm0, %v4701_v0  ;;  %3349 = vmatprep.mubr.msk.bf16.mxu1 %vm3540_vm0, %v4701_v0 }
 0x10d   :  { %v3957_v36 = vpop.f32.mrb[12].mxu0  ;;  %v3959_v37 = vpop.f32.mrb[12].mxu1 }
 0x10e   :  { %v2995_v39 = vpop.f32.mrb[13].mxu0  ;;  %v3111_v40 = vpop.f32.mrb[13].mxu1 }
 0x10f   :  { %v3969_v43 = vpop.f32.mrb[14].mxu0  ;;  %v3971_v44 = vpop.f32.mrb[14].mxu1 }
 0x110   :  { %v2996_v46 = vpop.f32.mrb[15].mxu0  ;;  %v3112_v47 = vpop.f32.mrb[15].mxu1 }
 0x112   :  { %3234 = vmatmul.mubr.bf16.gmra.mrb[120].mxu0 %v3499_v41  ;;  %3350 = vmatmul.mubr.bf16.gmra.mrb[120].mxu1 %v3500_v42 }
 0x113   :  { %3237 = vmatprep.mubr.msk.bf16.mxu0 %vm3540_vm0, %v4701_v0  ;;  %3353 = vmatprep.mubr.msk.bf16.mxu1 %vm3540_vm0, %v4701_v0 }
 0x115   :  { %v3979_v48 = vpop.f32.mrb[16].mxu0  ;;  %v3981_v49 = vpop.f32.mrb[16].mxu1 }
 0x116   :  { %v2999_v51 = vpop.f32.mrb[17].mxu0  ;;  %v3115_v52 = vpop.f32.mrb[17].mxu1 }
 0x117   :  { %v3991_v55 = vpop.f32.mrb[18].mxu0  ;;  %v3993_v56 = vpop.f32.mrb[18].mxu1 }
 0x118   :  { %v3000_v58 = vpop.f32.mrb[19].mxu0  ;;  %v3116_v59 = vpop.f32.mrb[19].mxu1 }
 0x11a   :  { %3238 = vmatmul.mubr.bf16.gmra.mrb[124].mxu0 %v3501_v53  ;;  %3354 = vmatmul.mubr.bf16.gmra.mrb[124].mxu1 %v3502_v54  ;;  %v3507_v53 = vld [vmem:[%s4698_s0 + $0x1d8] sm:$0xff]   ;;  %v3508_v54 = vld [vmem:[%s4698_s0 + $0x2a0] sm:$0xff]  }
 0x11b   :  { %3241 = vmatprep.mubr.msk.bf16.mxu0 %vm3540_vm0, %v4701_v0  ;;  %3357 = vmatprep.mubr.msk.bf16.mxu1 %vm3540_vm0, %v4701_v0 }
 0x11d   :  { %v4001_v60 = vpop.f32.mrb[20].mxu0  ;;  %v4003_v61 = vpop.f32.mrb[20].mxu1 }
 0x11e   :  { %v3003_v3 = vpop.f32.mrb[21].mxu0  ;;  %v3119_v4 = vpop.f32.mrb[21].mxu1 }
 0x11f   :  { %v4013_v10 = vpop.f32.mrb[22].mxu0  ;;  %v4015_v11 = vpop.f32.mrb[22].mxu1 }
 0x120   :  { %v3004_v16 = vpop.f32.mrb[23].mxu0  ;;  %v3120_v17 = vpop.f32.mrb[23].mxu1 }
 0x122   :  { %3242 = vmatmul.mubr.bf16.gmra.mrb[128].mxu0 %v3503_v5  ;;  %3358 = vmatmul.mubr.bf16.gmra.mrb[128].mxu1 %v3504_v6 }
 0x123   :  { %3245 = vmatprep.mubr.msk.bf16.mxu0 %vm3540_vm0, %v4701_v0  ;;  %3361 = vmatprep.mubr.msk.bf16.mxu1 %vm3540_vm0, %v4701_v0 }
 0x125   :  { %v4023_v18 = vpop.f32.mrb[24].mxu0  ;;  %v4025_v22 = vpop.f32.mrb[24].mxu1 }
 0x126   :  { %v3007_v27 = vpop.f32.mrb[25].mxu0  ;;  %v3123_v28 = vpop.f32.mrb[25].mxu1 }
 0x127   :  { %v4035_v34 = vpop.f32.mrb[26].mxu0  ;;  %v4037_v35 = vpop.f32.mrb[26].mxu1 }
 0x128   :  { %v3008_v40 = vpop.f32.mrb[27].mxu0  ;;  %v3124_v41 = vpop.f32.mrb[27].mxu1 }
 0x12a   :  { %3246 = vmatmul.mubr.bf16.gmra.mrb[132].mxu0 %v3505_v29  ;;  %3362 = vmatmul.mubr.bf16.gmra.mrb[132].mxu1 %v3506_v30  ;;  %v3509_v29 = vld [vmem:[%s4698_s0 + $0x1e0] sm:$0xff]   ;;  %v3510_v30 = vld [vmem:[%s4698_s0 + $0x2a8] sm:$0xff]  }
 0x12b   :  { %3249 = vmatprep.mubr.msk.bf16.mxu0 %vm3540_vm0, %v4701_v0  ;;  %3365 = vmatprep.mubr.msk.bf16.mxu1 %vm3540_vm0, %v4701_v0 }
 0x12d   :  { %v4045_v42 = vpop.f32.mrb[28].mxu0  ;;  %v4047_v46 = vpop.f32.mrb[28].mxu1 }
 0x12e   :  { %v3011_v51 = vpop.f32.mrb[29].mxu0  ;;  %v3127_v52 = vpop.f32.mrb[29].mxu1 }
 0x12f   :  { %v4057_v58 = vpop.f32.mrb[30].mxu0  ;;  %v4059_v59 = vpop.f32.mrb[30].mxu1 }
 0x130   :  { %v3012_v4 = vpop.f32.mrb[31].mxu0  ;;  %v3128_v5 = vpop.f32.mrb[31].mxu1 }
 0x132   :  { %3250 = vmatmul.mubr.bf16.gmra.mrb[136].mxu0 %v3507_v53  ;;  %3366 = vmatmul.mubr.bf16.gmra.mrb[136].mxu1 %v3508_v54 }
 0x133   :  { %3253 = vmatprep.mubr.msk.bf16.mxu0 %vm3540_vm0, %v4701_v0  ;;  %3369 = vmatprep.mubr.msk.bf16.mxu1 %vm3540_vm0, %v4701_v0 }
 0x135   :  { %v4067_v6 = vpop.f32.mrb[32].mxu0  ;;  %v4069_v16 = vpop.f32.mrb[32].mxu1 }
 0x136   :  { %v3015_v27 = vpop.f32.mrb[33].mxu0  ;;  %v3131_v28 = vpop.f32.mrb[33].mxu1 }
 0x137   :  { %v4079_v40 = vpop.f32.mrb[34].mxu0  ;;  %v4081_v41 = vpop.f32.mrb[34].mxu1 }
 0x138   :  { %v3016_v52 = vpop.f32.mrb[35].mxu0  ;;  %v3132_v53 = vpop.f32.mrb[35].mxu1 }
 0x13a   :  { %3254 = vmatmul.mubr.bf16.gmra.mrb[140].mxu0 %v3509_v29  ;;  %3370 = vmatmul.mubr.bf16.gmra.mrb[140].mxu1 %v3510_v30  ;;  %v3511_v29 = vld [vmem:[%s4698_s0 + $0x1e8] sm:$0xff]   ;;  %v3512_v30 = vld [vmem:[%s4698_s0 + $0x2b0] sm:$0xff]  }
 0x13b   :  { %3257 = vmatprep.mubr.msk.bf16.mxu0 %vm3540_vm0, %v4701_v0  ;;  %3373 = vmatprep.mubr.msk.bf16.mxu1 %vm3540_vm0, %v4701_v0 }
 0x13d   :  { %v4089_v54 = vpop.f32.mrb[36].mxu0  ;;  %v4091_v4 = vpop.f32.mrb[36].mxu1 }
 0x13e   :  { %v3019_v27 = vpop.f32.mrb[37].mxu0  ;;  %v3135_v28 = vpop.f32.mrb[37].mxu1 }
 0x13f   :  { %v4101_v52 = vpop.f32.mrb[38].mxu0  ;;  %v4103_v53 = vpop.f32.mrb[38].mxu1 }
 0x140   :  { %v3020_v17 = vpop.f32.mrb[39].mxu0  ;;  %v3136_v3 = vpop.f32.mrb[39].mxu1 }
 0x141   :  { %v3513_v3 = vld [vmem:[%s4698_s0 + $0x1f0] sm:$0xff]   ;;  %v3514_v17 = vld [vmem:[%s4698_s0 + $0x2b8] sm:$0xff]  }
 0x142   :  { %3258 = vmatmul.mubr.bf16.gmra.mrb[144].mxu0 %v3511_v29  ;;  %3374 = vmatmul.mubr.bf16.gmra.mrb[144].mxu1 %v3512_v30 }
 0x143   :  { %3261 = vmatprep.mubr.msk.bf16.mxu0 %vm3540_vm0, %v4701_v0  ;;  %3377 = vmatprep.mubr.msk.bf16.mxu1 %vm3540_vm0, %v4701_v0 }
 0x145   :  { %v4111_v27 = vpop.f32.mrb[40].mxu0  ;;  %v4113_v28 = vpop.f32.mrb[40].mxu1 }
 0x146   :  { %v3023_v47 = vpop.f32.mrb[41].mxu0  ;;  %v3139_v39 = vpop.f32.mrb[41].mxu1 }
 0x147   :  { %v4123_v29 = vpop.f32.mrb[42].mxu0  ;;  %v4125_v30 = vpop.f32.mrb[42].mxu1 }
 0x148   :  { %v3024_v23 = vpop.f32.mrb[43].mxu0  ;;  %v3140_v15 = vpop.f32.mrb[43].mxu1 }
 0x149   :  { %v3515_v15 = vld [vmem:[%s4698_s0 + $0x1f8] sm:$0xff]   ;;  %v3516_v23 = vld [vmem:[%s4698_s0 + $0x2c0] sm:$0xff]  }
 0x14a   :  { %3262 = vmatmul.mubr.bf16.gmra.mrb[148].mxu0 %v3513_v3  ;;  %3378 = vmatmul.mubr.bf16.gmra.mrb[148].mxu1 %v3514_v17 }
 0x14b   :  { %3265 = vmatprep.mubr.msk.bf16.mxu0 %vm3540_vm0, %v4701_v0  ;;  %3381 = vmatprep.mubr.msk.bf16.mxu1 %vm3540_vm0, %v4701_v0 }
 0x14d   :  { %v4133_v39 = vpop.f32.mrb[44].mxu0  ;;  %v4135_v47 = vpop.f32.mrb[44].mxu1 }
 0x14e   :  { %4759 = vst [vmem:[#allocation2_spill] sm:$0xff] %v4133_v39  ;;  %4760 = vst [vmem:[#allocation3_spill] sm:$0xff] %v4135_v47  ;;  %v3027_v62 = vpop.f32.mrb[45].mxu0  ;;  %v3143_v57 = vpop.f32.mrb[45].mxu1 }
 0x14f   :  { %v4145_v3 = vpop.f32.mrb[46].mxu0  ;;  %v4147_v17 = vpop.f32.mrb[46].mxu1 }
 0x150   :  { %4761 = vst [vmem:[#allocation4_spill] sm:$0xff] %v4145_v3  ;;  %4762 = vst [vmem:[#allocation5_spill] sm:$0xff] %v4147_v17  ;;  %v3028_v50 = vpop.f32.mrb[47].mxu0  ;;  %v3144_v45 = vpop.f32.mrb[47].mxu1 }
 0x151   :  { %v3517_v45 = vld [vmem:[%s4698_s0 + $0x200] sm:$0xff]   ;;  %v3518_v50 = vld [vmem:[%s4698_s0 + $0x2c8] sm:$0xff]  }
 0x152   :  { %3266 = vmatmul.mubr.bf16.gmra.mrb[152].mxu0 %v3515_v15  ;;  %3382 = vmatmul.mubr.bf16.gmra.mrb[152].mxu1 %v3516_v23 }
 0x153   :  { %3269 = vmatprep.mubr.msk.bf16.mxu0 %vm3540_vm0, %v4701_v0  ;;  %3385 = vmatprep.mubr.msk.bf16.mxu1 %vm3540_vm0, %v4701_v0 }
 0x155   :  { %v4155_v57 = vpop.f32.mrb[48].mxu0  ;;  %v4157_v62 = vpop.f32.mrb[48].mxu1 }
 0x156   :  { %4763 = vst [vmem:[#allocation6_spill] sm:$0xff] %v4155_v57  ;;  %4764 = vst [vmem:[#allocation7_spill] sm:$0xff] %v4157_v62  ;;  %v3031_v38 = vpop.f32.mrb[49].mxu0  ;;  %v3147_v33 = vpop.f32.mrb[49].mxu1 }
 0x157   :  { %v4167_v15 = vpop.f32.mrb[50].mxu0  ;;  %v4169_v23 = vpop.f32.mrb[50].mxu1 }
 0x158   :  { %4765 = vst [vmem:[#allocation8_spill] sm:$0xff] %v4167_v15  ;;  %4766 = vst [vmem:[#allocation9_spill] sm:$0xff] %v4169_v23  ;;  %v3032_v26 = vpop.f32.mrb[51].mxu0  ;;  %v3148_v21 = vpop.f32.mrb[51].mxu1 }
 0x159   :  { %v3519_v21 = vld [vmem:[%s4698_s0 + $0x208] sm:$0xff]   ;;  %v3520_v26 = vld [vmem:[%s4698_s0 + $0x2d0] sm:$0xff]  }
 0x15a   :  { %3270 = vmatmul.mubr.bf16.gmra.mrb[156].mxu0 %v3517_v45  ;;  %3386 = vmatmul.mubr.bf16.gmra.mrb[156].mxu1 %v3518_v50 }
 0x15b   :  { %3273 = vmatprep.mubr.msk.bf16.mxu0 %vm3540_vm0, %v4701_v0  ;;  %3389 = vmatprep.mubr.msk.bf16.mxu1 %vm3540_vm0, %v4701_v0 }
 0x15d   :  { %v4177_v33 = vpop.f32.mrb[52].mxu0  ;;  %v4179_v38 = vpop.f32.mrb[52].mxu1 }
 0x15e   :  { %4767 = vst [vmem:[#allocation10_spill] sm:$0xff] %v4177_v33  ;;  %4768 = vst [vmem:[#allocation11_spill] sm:$0xff] %v4179_v38  ;;  %v3035_v14 = vpop.f32.mrb[53].mxu0  ;;  %v3151_v9 = vpop.f32.mrb[53].mxu1 }
 0x15f   :  { %v4189_v45 = vpop.f32.mrb[54].mxu0  ;;  %v4191_v50 = vpop.f32.mrb[54].mxu1  ;;  %v4771_v9 = vmov 0.0  }
 0x160   :  { %4769 = vst [vmem:[#allocation12_spill] sm:$0xff] %v4189_v45  ;;  %4770 = vst [vmem:[#allocation13_spill] sm:$0xff] %v4191_v50  ;;  %v3036_v2 = vpop.f32.mrb[55].mxu0  ;;  %v3152_v0 = vpop.f32.mrb[55].mxu1 }
 0x161   :  { %v3521_v0 = vld [vmem:[%s4698_s0 + $0x210] sm:$0xff]   ;;  %v3522_v2 = vld [vmem:[%s4698_s0 + $0x2d8] sm:$0xff]  }
 0x162   :  { %3274 = vmatmul.mubr.bf16.gmra.mrb[160].mxu0 %v3519_v21  ;;  %3390 = vmatmul.mubr.bf16.gmra.mrb[160].mxu1 %v3520_v26 }
 0x163   :  { %3277 = vmatprep.mubr.msk.bf16.mxu0 %vm3540_vm0, %v4771_v9  ;;  %3393 = vmatprep.mubr.msk.bf16.mxu1 %vm3540_vm0, %v4771_v9 }
 0x165   :  { %v4199_v14 = vpop.f32.mrb[56].mxu0  ;;  %v4201_v5 = vpop.f32.mrb[56].mxu1 }
 0x166   :  { %4772 = vst [vmem:[#allocation14_spill] sm:$0xff] %v4199_v14  ;;  %4773 = vst [vmem:[#allocation15_spill] sm:$0xff] %v4201_v5  ;;  %v3039_v33 = vpop.f32.mrb[57].mxu0  ;;  %v3155_v23 = vpop.f32.mrb[57].mxu1 }
 0x167   :  { %v4211_v21 = vpop.f32.mrb[58].mxu0  ;;  %v4213_v26 = vpop.f32.mrb[58].mxu1 }
 0x168   :  { %4774 = vst [vmem:[#allocation16_spill] sm:$0xff] %v4211_v21  ;;  %4775 = vst [vmem:[#allocation17_spill] sm:$0xff] %v4213_v26  ;;  %v3040_v50 = vpop.f32.mrb[59].mxu0  ;;  %v3156_v45 = vpop.f32.mrb[59].mxu1 }
 0x169   :  { %v3523_v45 = vld [vmem:[%s4698_s0 + $0x218] sm:$0xff]   ;;  %v3524_v50 = vld [vmem:[%s4698_s0 + $0x2e0] sm:$0xff]  }
 0x16a   :  { %3278 = vmatmul.mubr.bf16.gmra.mrb[164].mxu0 %v3521_v0  ;;  %3394 = vmatmul.mubr.bf16.gmra.mrb[164].mxu1 %v3522_v2 }
 0x16b   :  { %3281 = vmatprep.mubr.msk.bf16.mxu0 %vm3540_vm0, %v4771_v9  ;;  %3397 = vmatprep.mubr.msk.bf16.mxu1 %vm3540_vm0, %v4771_v9 }
 0x16d   :  { %v4221_v23 = vpop.f32.mrb[60].mxu0  ;;  %v4223_v33 = vpop.f32.mrb[60].mxu1 }
 0x16e   :  { %4776 = vst [vmem:[#allocation18_spill] sm:$0xff] %v4221_v23  ;;  %4777 = vst [vmem:[#allocation19_spill] sm:$0xff] %v4223_v33  ;;  %v3043_v5 = vpop.f32.mrb[61].mxu0  ;;  %v3159_v14 = vpop.f32.mrb[61].mxu1 }
 0x16f   :  { %v4233_v0 = vpop.f32.mrb[62].mxu0  ;;  %v4235_v2 = vpop.f32.mrb[62].mxu1 }
 0x170   :  { %4778 = vst [vmem:[#allocation20_spill] sm:$0xff] %v4233_v0  ;;  %4779 = vst [vmem:[#allocation21_spill] sm:$0xff] %v4235_v2  ;;  %v3044_v26 = vpop.f32.mrb[63].mxu0  ;;  %v3160_v21 = vpop.f32.mrb[63].mxu1 }
 0x171   :  { %v3525_v21 = vld [vmem:[%s4698_s0 + $0x220] sm:$0xff]   ;;  %v3526_v26 = vld [vmem:[%s4698_s0 + $0x2e8] sm:$0xff]  }
 0x172   :  { %3282 = vmatmul.mubr.bf16.gmra.mrb[168].mxu0 %v3523_v45  ;;  %3398 = vmatmul.mubr.bf16.gmra.mrb[168].mxu1 %v3524_v50 }
 0x173   :  { %3285 = vmatprep.mubr.msk.bf16.mxu0 %vm3540_vm0, %v4771_v9  ;;  %3401 = vmatprep.mubr.msk.bf16.mxu1 %vm3540_vm0, %v4771_v9 }
 0x175   :  { %v4243_v5 = vpop.f32.mrb[64].mxu0  ;;  %v4245_v14 = vpop.f32.mrb[64].mxu1 }
 0x176   :  { %4780 = vst [vmem:[#allocation22_spill] sm:$0xff] %v4243_v5  ;;  %4781 = vst [vmem:[#allocation23_spill] sm:$0xff] %v4245_v14  ;;  %v3047_v33 = vpop.f32.mrb[65].mxu0  ;;  %v3163_v23 = vpop.f32.mrb[65].mxu1 }
 0x177   :  { %v4255_v45 = vpop.f32.mrb[66].mxu0  ;;  %v4257_v50 = vpop.f32.mrb[66].mxu1 }
 0x178   :  { %4782 = vst [vmem:[#allocation24_spill] sm:$0xff] %v4255_v45  ;;  %4783 = vst [vmem:[#allocation25_spill] sm:$0xff] %v4257_v50  ;;  %v3048_v2 = vpop.f32.mrb[67].mxu0  ;;  %v3164_v0 = vpop.f32.mrb[67].mxu1 }
 0x179   :  { %v3527_v0 = vld [vmem:[%s4698_s0 + $0x228] sm:$0xff]   ;;  %v3528_v2 = vld [vmem:[%s4698_s0 + $0x2f0] sm:$0xff]  }
 0x17a   :  { %3286 = vmatmul.mubr.bf16.gmra.mrb[172].mxu0 %v3525_v21  ;;  %3402 = vmatmul.mubr.bf16.gmra.mrb[172].mxu1 %v3526_v26 }
 0x17b   :  { %3289 = vmatprep.mubr.msk.bf16.mxu0 %vm3540_vm0, %v4771_v9  ;;  %3405 = vmatprep.mubr.msk.bf16.mxu1 %vm3540_vm0, %v4771_v9 }
 0x17d   :  { %v4265_v23 = vpop.f32.mrb[68].mxu0  ;;  %v4267_v33 = vpop.f32.mrb[68].mxu1 }
 0x17e   :  { %4784 = vst [vmem:[#allocation26_spill] sm:$0xff] %v4265_v23  ;;  %4785 = vst [vmem:[#allocation27_spill] sm:$0xff] %v4267_v33  ;;  %v3051_v14 = vpop.f32.mrb[69].mxu0  ;;  %v3167_v5 = vpop.f32.mrb[69].mxu1 }
 0x17f   :  { %v4277_v21 = vpop.f32.mrb[70].mxu0  ;;  %v4279_v26 = vpop.f32.mrb[70].mxu1 }
 0x180   :  { %4786 = vst [vmem:[#allocation28_spill] sm:$0xff] %v4277_v21  ;;  %4787 = vst [vmem:[#allocation29_spill] sm:$0xff] %v4279_v26  ;;  %v3052_v50 = vpop.f32.mrb[71].mxu0  ;;  %v3168_v45 = vpop.f32.mrb[71].mxu1 }
 0x181   :  { %v3529_v45 = vld [vmem:[%s4698_s0 + $0x230] sm:$0xff]   ;;  %v3530_v50 = vld [vmem:[%s4698_s0 + $0x2f8] sm:$0xff]  }
 0x182   :  { %3290 = vmatmul.mubr.bf16.gmra.mrb[176].mxu0 %v3527_v0  ;;  %3406 = vmatmul.mubr.bf16.gmra.mrb[176].mxu1 %v3528_v2 }
 0x183   :  { %3293 = vmatprep.mubr.msk.bf16.mxu0 %vm3540_vm0, %v4771_v9  ;;  %3409 = vmatprep.mubr.msk.bf16.mxu1 %vm3540_vm0, %v4771_v9 }
 0x185   :  { %v4287_v5 = vpop.f32.mrb[72].mxu0  ;;  %v4289_v14 = vpop.f32.mrb[72].mxu1 }
 0x186   :  { %4788 = vst [vmem:[#allocation30_spill] sm:$0xff] %v4287_v5  ;;  %4789 = vst [vmem:[#allocation31_spill] sm:$0xff] %v4289_v14  ;;  %v3055_v33 = vpop.f32.mrb[73].mxu0  ;;  %v3171_v23 = vpop.f32.mrb[73].mxu1 }
 0x187   :  { %v4299_v0 = vpop.f32.mrb[74].mxu0  ;;  %v4301_v2 = vpop.f32.mrb[74].mxu1 }
 0x188   :  { %4790 = vst [vmem:[#allocation32_spill] sm:$0xff] %v4299_v0  ;;  %4791 = vst [vmem:[#allocation33_spill] sm:$0xff] %v4301_v2  ;;  %v3056_v26 = vpop.f32.mrb[75].mxu0  ;;  %v3172_v21 = vpop.f32.mrb[75].mxu1 }
 0x189   :  { %v3531_v21 = vld [vmem:[%s4698_s0 + $0x238] sm:$0xff]   ;;  %v3532_v26 = vld [vmem:[%s4698_s0 + $0x300] sm:$0xff]  }
 0x18a   :  { %3294 = vmatmul.mubr.bf16.gmra.mrb[180].mxu0 %v3529_v45  ;;  %3410 = vmatmul.mubr.bf16.gmra.mrb[180].mxu1 %v3530_v50 }
 0x18b   :  { %3297 = vmatprep.mubr.msk.bf16.mxu0 %vm3540_vm0, %v4771_v9  ;;  %3413 = vmatprep.mubr.msk.bf16.mxu1 %vm3540_vm0, %v4771_v9 }
 0x18d   :  { %v4309_v23 = vpop.f32.mrb[76].mxu0  ;;  %v4311_v33 = vpop.f32.mrb[76].mxu1 }
 0x18e   :  { %4792 = vst [vmem:[#allocation34_spill] sm:$0xff] %v4309_v23  ;;  %4793 = vst [vmem:[#allocation35_spill] sm:$0xff] %v4311_v33  ;;  %v3059_v14 = vpop.f32.mrb[77].mxu0  ;;  %v3175_v5 = vpop.f32.mrb[77].mxu1 }
 0x18f   :  { %v4321_v45 = vpop.f32.mrb[78].mxu0  ;;  %v4323_v50 = vpop.f32.mrb[78].mxu1 }
 0x190   :  { %4794 = vst [vmem:[#allocation36_spill] sm:$0xff] %v4321_v45  ;;  %4795 = vst [vmem:[#allocation37_spill] sm:$0xff] %v4323_v50  ;;  %v3060_v2 = vpop.f32.mrb[79].mxu0  ;;  %v3176_v0 = vpop.f32.mrb[79].mxu1 }
 0x191   :  { %v3533_v0 = vld [vmem:[%s4698_s0 + $0x240] sm:$0xff]   ;;  %v3534_v2 = vld [vmem:[%s4698_s0 + $0x308] sm:$0xff]  }
 0x192   :  { %3298 = vmatmul.mubr.bf16.gmra.mrb[184].mxu0 %v3531_v21  ;;  %3414 = vmatmul.mubr.bf16.gmra.mrb[184].mxu1 %v3532_v26 }
 0x193   :  { %3301 = vmatprep.mubr.msk.bf16.mxu0 %vm3540_vm0, %v4771_v9  ;;  %3417 = vmatprep.mubr.msk.bf16.mxu1 %vm3540_vm0, %v4771_v9 }
 0x195   :  { %v4331_v5 = vpop.f32.mrb[80].mxu0  ;;  %v4333_v14 = vpop.f32.mrb[80].mxu1 }
 0x196   :  { %4796 = vst [vmem:[#allocation38_spill] sm:$0xff] %v4331_v5  ;;  %4797 = vst [vmem:[#allocation39_spill] sm:$0xff] %v4333_v14  ;;  %v3063_v33 = vpop.f32.mrb[81].mxu0  ;;  %v3179_v23 = vpop.f32.mrb[81].mxu1 }
 0x197   :  { %v4343_v21 = vpop.f32.mrb[82].mxu0  ;;  %v4345_v26 = vpop.f32.mrb[82].mxu1 }
 0x198   :  { %4798 = vst [vmem:[#allocation40_spill] sm:$0xff] %v4343_v21  ;;  %4799 = vst [vmem:[#allocation41_spill] sm:$0xff] %v4345_v26  ;;  %v3064_v50 = vpop.f32.mrb[83].mxu0  ;;  %v3180_v45 = vpop.f32.mrb[83].mxu1 }
 0x199   :  { %v3535_v45 = vld [vmem:[%s4698_s0 + $0x248] sm:$0xff]   ;;  %v3536_v50 = vld [vmem:[%s4698_s0 + $0x310] sm:$0xff]  }
 0x19a   :  { %3302 = vmatmul.mubr.bf16.gmra.mrb[188].mxu0 %v3533_v0  ;;  %3418 = vmatmul.mubr.bf16.gmra.mrb[188].mxu1 %v3534_v2 }
 0x19b   :  { %3305 = vmatprep.mubr.msk.bf16.mxu0 %vm3540_vm0, %v4771_v9  ;;  %3421 = vmatprep.mubr.msk.bf16.mxu1 %vm3540_vm0, %v4771_v9 }
 0x19d   :  { %v4353_v23 = vpop.f32.mrb[84].mxu0  ;;  %v4355_v33 = vpop.f32.mrb[84].mxu1 }
 0x19e   :  { %4800 = vst [vmem:[#allocation42_spill] sm:$0xff] %v4353_v23  ;;  %4801 = vst [vmem:[#allocation43_spill] sm:$0xff] %v4355_v33  ;;  %v3067_v14 = vpop.f32.mrb[85].mxu0  ;;  %v3183_v5 = vpop.f32.mrb[85].mxu1 }
 0x19f   :  { %v4365_v0 = vpop.f32.mrb[86].mxu0  ;;  %v4367_v2 = vpop.f32.mrb[86].mxu1 }
 0x1a0   :  { %4802 = vst [vmem:[#allocation44_spill] sm:$0xff] %v4365_v0  ;;  %4803 = vst [vmem:[#allocation45_spill] sm:$0xff] %v4367_v2  ;;  %v3068_v26 = vpop.f32.mrb[87].mxu0  ;;  %v3184_v21 = vpop.f32.mrb[87].mxu1 }
 0x1a1   :  { %v3537_v21 = vld [vmem:[%s4698_s0 + $0x250] sm:$0xff]   ;;  %v3538_v26 = vld [vmem:[%s4698_s0 + $0x318] sm:$0xff]  }
 0x1a2   :  { %3306 = vmatmul.mubr.bf16.gmra.mrb[192].mxu0 %v3535_v45  ;;  %3422 = vmatmul.mubr.bf16.gmra.mrb[192].mxu1 %v3536_v50 }
 0x1a3   :  { %3309 = vmatprep.mubr.msk.bf16.mxu0 %vm3540_vm0, %v4771_v9  ;;  %3425 = vmatprep.mubr.msk.bf16.mxu1 %vm3540_vm0, %v4771_v9 }
 0x1a5   :  { %v4375_v5 = vpop.f32.mrb[88].mxu0  ;;  %v4377_v14 = vpop.f32.mrb[88].mxu1 }
 0x1a6   :  { %4804 = vst [vmem:[#allocation46_spill] sm:$0xff] %v4375_v5  ;;  %4805 = vst [vmem:[#allocation47_spill] sm:$0xff] %v4377_v14  ;;  %v3071_v33 = vpop.f32.mrb[89].mxu0  ;;  %v3187_v23 = vpop.f32.mrb[89].mxu1 }
 0x1a7   :  { %v4387_v45 = vpop.f32.mrb[90].mxu0  ;;  %v4389_v9 = vpop.f32.mrb[90].mxu1 }
 0x1a8   :  { %4806 = vst [vmem:[#allocation48_spill] sm:$0xff] %v4387_v45  ;;  %4807 = vst [vmem:[#allocation49_spill] sm:$0xff] %v4389_v9  ;;  %v3072_v51 = vpop.f32.mrb[91].mxu0  ;;  %v3188_v2 = vpop.f32.mrb[91].mxu1  ;;  %v4420_v9 = vld [vmem:[%s4699_s2] ss:$0 sm:$0xff] }
 0x1aa   :  { %3310 = vmatmul.mubr.bf16.gmra.mrb[196].mxu0 %v3537_v21  ;;  %3426 = vmatmul.mubr.bf16.gmra.mrb[196].mxu1 %v3538_v26 }
 0x1ad   :  { %v4393_v23 = vpop.f32.mrb[92].mxu0  ;;  %v4395_v33 = vpop.f32.mrb[92].mxu1 }
 0x1ae   :  { %4808 = vst [vmem:[#allocation50_spill] sm:$0xff] %v4393_v23  ;;  %4809 = vst [vmem:[#allocation51_spill] sm:$0xff] %v4395_v33  ;;  %v3075_v14 = vpop.f32.mrb[93].mxu0  ;;  %v3191_v5 = vpop.f32.mrb[93].mxu1 }
 0x1af   :  { %v4399_v0 = vpop.f32.mrb[94].mxu0  ;;  %v4401_v15 = vpop.f32.mrb[94].mxu1 }
 0x1b0   :  { %4810 = vst [vmem:[#allocation52_spill] sm:$0xff] %v4399_v0  ;;  %4811 = vst [vmem:[#allocation53_spill] sm:$0xff] %v4401_v15  ;;  %v3076_v51 = vpop.f32.mrb[95].mxu0  ;;  %v3192_v2 = vpop.f32.mrb[95].mxu1 }
 0x1b5   :  { %v4405_v21 = vpop.f32.mrb[96].mxu0  ;;  %v4407_v26 = vpop.f32.mrb[96].mxu1 }
 0x1b6   :  { %4812 = vst [vmem:[#allocation54_spill] sm:$0xff] %v4405_v21  ;;  %4813 = vst [vmem:[#allocation55_spill] sm:$0xff] %v4407_v26  ;;  %v3079_v45 = vpop.f32.mrb[97].mxu0  ;;  %v3195_v38 = vpop.f32.mrb[97].mxu1  ;;  %v4816_v26 = vmax.f32 %v3891_v63, %v3893_v1 }
 0x1b7   :  { %v4411_v14 = vpop.f32.mrb[98].mxu0  ;;  %v4413_v5 = vpop.f32.mrb[98].mxu1 }
 0x1b8   :  { %4814 = vst [vmem:[#allocation56_spill] sm:$0xff] %v4411_v14  ;;  %4815 = vst [vmem:[#allocation57_spill] sm:$0xff] %v4413_v5  ;;  %v3080_v23 = vpop.f32.mrb[99].mxu0  ;;  %v3196_v50 = vpop.f32.mrb[99].mxu1 }
 0x1bd   :  { %v1231_v51 = vpop.f32.mrb[100].mxu0  ;;  %v1665_v2 = vpop.f32.mrb[100].mxu1 }
 0x1be   :  { %v1864_v15 = vmax.f32 %v1231_v51, %v1665_v2  ;;  %v3215_v0 = vpop.f32.mrb[101].mxu0  ;;  %v3331_v62 = vpop.f32.mrb[101].mxu1 }
 0x1bf   :  { %v1234_v38 = vpop.f32.mrb[102].mxu0  ;;  %v1668_v45 = vpop.f32.mrb[102].mxu1  ;;  %v4817_v0 = vmax.f32 %v3903_v7, %v3905_v8 }
 0x1c0   :  { %v1914_v21 = vmax.f32 %v4816_v26, %v1864_v15  ;;  %v1865_v57 = vmax.f32 %v1234_v38, %v1668_v45  ;;  %v3216_v33 = vpop.f32.mrb[103].mxu0  ;;  %v3332_v23 = vpop.f32.mrb[103].mxu1 }
 0x1c1   :  { %v4818_v33 = vmax.f32 %v3913_v12, %v3915_v13 }
 0x1c2   :  { %v1971_v50 = vadd.f32 %v4420_v9, %v1914_v21  ;;  %v1915_v62 = vmax.f32 %v4817_v0, %v1865_v57 }
 0x1c4   :  { %v1972_v51 = vadd.f32 %v4420_v9, %v1915_v62  ;;  %v2021_v14 = vmax.f32 %v1971_v50, 0.0  ;;  %v4820_v62 = vmax.f32 %v3935_v24, %v3937_v25 }
 0x1c5   :  { %v1239_v2 = vpop.f32.mrb[104].mxu0  ;;  %v1673_v5 = vpop.f32.mrb[104].mxu1 }
 0x1c6   :  { %v2022_v17 = vmax.f32 %v1972_v51, 0.0  ;;  %v1866_v3 = vmax.f32 %v1239_v2, %v1673_v5  ;;  %v3219_v47 = vpop.f32.mrb[105].mxu0  ;;  %v3335_v39 = vpop.f32.mrb[105].mxu1 }
 0x1c7   :  { %v1242_v63 = vpop.f32.mrb[106].mxu0  ;;  %v1676_v1 = vpop.f32.mrb[106].mxu1  ;;  %v4819_v47 = vmax.f32 %v3925_v19, %v3927_v20 }
 0x1c8   :  { %v2687_v15 = vpack.c.bf16 %v2022_v17, %v2021_v14  ;;  %v1916_v21 = vmax.f32 %v4818_v33, %v1866_v3  ;;  %v1867_v26 = vmax.f32 %v1242_v63, %v1676_v1  ;;  %v3220_v38 = vpop.f32.mrb[107].mxu0  ;;  %v3336_v7 = vpop.f32.mrb[107].mxu1  ;;  %v4821_v1 = vmax.f32 %v3947_v31, %v3949_v32 }
 0x1ca   :  { %2688 = vst [vmem:[%s4700_s3] sm:$0xff] %v2687_v15   ;;  %v1973_v8 = vadd.f32 %v4420_v9, %v1916_v21  ;;  %v1917_v39 = vmax.f32 %v4819_v47, %v1867_v26 }
 0x1cc   :  { %v1974_v57 = vadd.f32 %v4420_v9, %v1917_v39  ;;  %v2023_v5 = vmax.f32 %v1973_v8, 0.0 }
 0x1cd   :  { %v1247_v17 = vpop.f32.mrb[108].mxu0  ;;  %v1681_v14 = vpop.f32.mrb[108].mxu1 }
 0x1ce   :  { %v2024_v12 = vmax.f32 %v1974_v57, 0.0  ;;  %v1868_v13 = vmax.f32 %v1247_v17, %v1681_v14  ;;  %v3223_v3 = vpop.f32.mrb[109].mxu0  ;;  %v3339_v45 = vpop.f32.mrb[109].mxu1  ;;  %v4822_v17 = vmax.f32 %v3957_v36, %v3959_v37 }
 0x1cf   :  { %v1250_v23 = vpop.f32.mrb[110].mxu0  ;;  %v1684_v50 = vpop.f32.mrb[110].mxu1 }
 0x1d0   :  { %v2692_v0 = vpack.c.bf16 %v2024_v12, %v2023_v5  ;;  %v1918_v51 = vmax.f32 %v4820_v62, %v1868_v13  ;;  %v1869_v2 = vmax.f32 %v1250_v23, %v1684_v50  ;;  %v3224_v63 = vpop.f32.mrb[111].mxu0  ;;  %v3340_v19 = vpop.f32.mrb[111].mxu1  ;;  %v4823_v13 = vmax.f32 %v3969_v43, %v3971_v44 }
 0x1d2   :  { %2809 = vst [vmem:[%s4700_s3 + $0x8] sm:$0xff] %v2692_v0   ;;  %v1975_v20 = vadd.f32 %v4420_v9, %v1918_v51  ;;  %v1919_v15 = vmax.f32 %v4821_v1, %v1869_v2 }
 0x1d4   :  { %v1976_v33 = vadd.f32 %v4420_v9, %v1919_v15  ;;  %v2025_v38 = vmax.f32 %v1975_v20, 0.0  ;;  %v4824_v20 = vmax.f32 %v3979_v48, %v3981_v49 }
 0x1d5   :  { %v1255_v21 = vpop.f32.mrb[112].mxu0  ;;  %v1689_v26 = vpop.f32.mrb[112].mxu1 }
 0x1d6   :  { %v2026_v24 = vmax.f32 %v1976_v33, 0.0  ;;  %v1870_v25 = vmax.f32 %v1255_v21, %v1689_v26  ;;  %v3227_v7 = vpop.f32.mrb[113].mxu0  ;;  %v3343_v8 = vpop.f32.mrb[113].mxu1  ;;  %v4825_v21 = vmax.f32 %v3991_v55, %v3993_v56 }
 0x1d7   :  { %v1258_v47 = vpop.f32.mrb[114].mxu0  ;;  %v1692_v39 = vpop.f32.mrb[114].mxu1 }
 0x1d8   :  { %v2697_v57 = vpack.c.bf16 %v2026_v24, %v2025_v38  ;;  %v1920_v14 = vmax.f32 %v4822_v17, %v1870_v25  ;;  %v1871_v5 = vmax.f32 %v1258_v47, %v1692_v39  ;;  %v3228_v12 = vpop.f32.mrb[115].mxu0  ;;  %v3344_v31 = vpop.f32.mrb[115].mxu1 }
 0x1da   :  { %2810 = vst [vmem:[%s4700_s3 + $0x10] sm:$0xff] %v2697_v57   ;;  %v1977_v32 = vadd.f32 %v4420_v9, %v1920_v14  ;;  %v1921_v3 = vmax.f32 %v4823_v13, %v1871_v5  ;;  %v4826_v14 = vmax.f32 %v4001_v60, %v4003_v61 }
 0x1dc   :  { %v1978_v45 = vadd.f32 %v4420_v9, %v1921_v3  ;;  %v2027_v0 = vmax.f32 %v1977_v32, 0.0  ;;  %v4827_v32 = vmax.f32 %v4013_v10, %v4015_v11 }
 0x1dd   :  { %v1263_v23 = vpop.f32.mrb[116].mxu0  ;;  %v1697_v50 = vpop.f32.mrb[116].mxu1 }
 0x1de   :  { %v2028_v36 = vmax.f32 %v1978_v45, 0.0  ;;  %v1872_v37 = vmax.f32 %v1263_v23, %v1697_v50  ;;  %v3231_v62 = vpop.f32.mrb[117].mxu0  ;;  %v3347_v51 = vpop.f32.mrb[117].mxu1 }
 0x1df   :  { %v1266_v2 = vpop.f32.mrb[118].mxu0  ;;  %v1700_v63 = vpop.f32.mrb[118].mxu1 }
 0x1e0   :  { %v2702_v19 = vpack.c.bf16 %v2028_v36, %v2027_v0  ;;  %v1922_v1 = vmax.f32 %v4824_v20, %v1872_v37  ;;  %v1873_v15 = vmax.f32 %v1266_v2, %v1700_v63  ;;  %v3232_v33 = vpop.f32.mrb[119].mxu0  ;;  %v3348_v43 = vpop.f32.mrb[119].mxu1  ;;  %v4828_v2 = vmax.f32 %v4023_v18, %v4025_v22 }
 0x1e2   :  { %2811 = vst [vmem:[%s4700_s3 + $0x18] sm:$0xff] %v2702_v19   ;;  %v1979_v44 = vadd.f32 %v4420_v9, %v1922_v1  ;;  %v1923_v26 = vmax.f32 %v4825_v21, %v1873_v15  ;;  %v4829_v1 = vmax.f32 %v4035_v34, %v4037_v35 }
 0x1e4   :  { %v1980_v38 = vadd.f32 %v4420_v9, %v1923_v26  ;;  %v2029_v7 = vmax.f32 %v1979_v44, 0.0 }
 0x1e5   :  { %v1271_v24 = vpop.f32.mrb[120].mxu0  ;;  %v1705_v25 = vpop.f32.mrb[120].mxu1 }
 0x1e6   :  { %v2030_v48 = vmax.f32 %v1980_v38, 0.0  ;;  %v1874_v49 = vmax.f32 %v1271_v24, %v1705_v25  ;;  %v3235_v8 = vpop.f32.mrb[121].mxu0  ;;  %v3351_v47 = vpop.f32.mrb[121].mxu1 }
 0x1e7   :  { %v1274_v39 = vpop.f32.mrb[122].mxu0  ;;  %v1708_v57 = vpop.f32.mrb[122].mxu1 }
 0x1e8   :  { %v2707_v17 = vpack.c.bf16 %v2030_v48, %v2029_v7  ;;  %v1924_v5 = vmax.f32 %v4826_v14, %v1874_v49  ;;  %v1875_v12 = vmax.f32 %v1274_v39, %v1708_v57  ;;  %v3236_v31 = vpop.f32.mrb[123].mxu0  ;;  %v3352_v55 = vpop.f32.mrb[123].mxu1  ;;  %v4830_v48 = vmax.f32 %v4045_v42, %v4047_v46 }
 0x1e9   :  { %v4831_v39 = vmax.f32 %v4057_v58, %v4059_v59 }
 0x1ea   :  { %2812 = vst [vmem:[%s4700_s3 + $0x20] sm:$0xff] %v2707_v17   ;;  %v1981_v56 = vadd.f32 %v4420_v9, %v1924_v5  ;;  %v1925_v13 = vmax.f32 %v4827_v32, %v1875_v12 }
 0x1ec   :  { %v1982_v3 = vadd.f32 %v4420_v9, %v1925_v13  ;;  %v2031_v50 = vmax.f32 %v1981_v56, 0.0 }
 0x1ed   :  { %v1279_v45 = vpop.f32.mrb[124].mxu0  ;;  %v1713_v23 = vpop.f32.mrb[124].mxu1 }
 0x1ee   :  { %v2032_v60 = vmax.f32 %v1982_v3, 0.0  ;;  %v1876_v61 = vmax.f32 %v1279_v45, %v1713_v23  ;;  %v3239_v0 = vpop.f32.mrb[125].mxu0  ;;  %v3355_v36 = vpop.f32.mrb[125].mxu1  ;;  %v4832_v3 = vmax.f32 %v4067_v6, %v4069_v16 }
 0x1ef   :  { %v1282_v37 = vpop.f32.mrb[126].mxu0  ;;  %v1716_v62 = vpop.f32.mrb[126].mxu1 }
 0x1f0   :  { %v2712_v51 = vpack.c.bf16 %v2032_v60, %v2031_v50  ;;  %v1926_v63 = vmax.f32 %v4828_v2, %v1876_v61  ;;  %v1877_v19 = vmax.f32 %v1282_v37, %v1716_v62  ;;  %v3240_v20 = vpop.f32.mrb[127].mxu0  ;;  %v3356_v10 = vpop.f32.mrb[127].mxu1  ;;  %v4833_v60 = vmax.f32 %v4079_v40, %v4081_v41 }
 0x1f1   :  { %v4834_v10 = vmax.f32 %v4089_v54, %v4091_v4 }
 0x1f2   :  { %2813 = vst [vmem:[%s4700_s3 + $0x28] sm:$0xff] %v2712_v51   ;;  %v1983_v11 = vadd.f32 %v4420_v9, %v1926_v63  ;;  %v1927_v15 = vmax.f32 %v4829_v1, %v1877_v19 }
 0x1f4   :  { %v1984_v33 = vadd.f32 %v4420_v9, %v1927_v15  ;;  %v2033_v21 = vmax.f32 %v1983_v11, 0.0 }
 0x1f5   :  { %v1287_v43 = vpop.f32.mrb[128].mxu0  ;;  %v1721_v44 = vpop.f32.mrb[128].mxu1 }
 0x1f6   :  { %v2034_v18 = vmax.f32 %v1984_v33, 0.0  ;;  %v1878_v22 = vmax.f32 %v1287_v43, %v1721_v44  ;;  %v3243_v26 = vpop.f32.mrb[129].mxu0  ;;  %v3359_v38 = vpop.f32.mrb[129].mxu1  ;;  %v4835_v33 = vmax.f32 %v4101_v52, %v4103_v53 }
 0x1f7   :  { %v1290_v24 = vpop.f32.mrb[130].mxu0  ;;  %v1724_v25 = vpop.f32.mrb[130].mxu1 }
 0x1f8   :  { %v2717_v7 = vpack.c.bf16 %v2034_v18, %v2033_v21  ;;  %v1928_v49 = vmax.f32 %v4830_v48, %v1878_v22  ;;  %v1879_v8 = vmax.f32 %v1290_v24, %v1724_v25  ;;  %v3244_v47 = vpop.f32.mrb[131].mxu0  ;;  %v3360_v34 = vpop.f32.mrb[131].mxu1  ;;  %v4836_v48 = vmax.f32 %v4111_v27, %v4113_v28 }
 0x1f9   :  { %v4837_v34 = vmax.f32 %v4123_v29, %v4125_v30 }
 0x1fa   :  { %2814 = vst [vmem:[%s4700_s3 + $0x30] sm:$0xff] %v2717_v7   ;;  %v1985_v35 = vadd.f32 %v4420_v9, %v1928_v49  ;;  %v1929_v57 = vmax.f32 %v4831_v39, %v1879_v8 }
 0x1fc   :  { %v1986_v17 = vadd.f32 %v4420_v9, %v1929_v57  ;;  %v2035_v12 = vmax.f32 %v1985_v35, 0.0 }
 0x1fd   :  { %v1295_v14 = vpop.f32.mrb[132].mxu0  ;;  %v1729_v5 = vpop.f32.mrb[132].mxu1 }
 0x1fe   :  { %v2036_v42 = vmax.f32 %v1986_v17, 0.0  ;;  %v1880_v46 = vmax.f32 %v1295_v14, %v1729_v5  ;;  %v3247_v31 = vpop.f32.mrb[133].mxu0  ;;  %v3363_v55 = vpop.f32.mrb[133].mxu1 }
 0x1ff   :  { %v1298_v56 = vpop.f32.mrb[134].mxu0  ;;  %v1732_v32 = vpop.f32.mrb[134].mxu1  ;;  %v4838_v55 = vld [vmem:[#allocation2_spill] sm:$0xff] }
 0x200   :  { %v2722_v13 = vpack.c.bf16 %v2036_v42, %v2035_v12  ;;  %v1930_v45 = vmax.f32 %v4832_v3, %v1880_v46  ;;  %v1881_v23 = vmax.f32 %v1298_v56, %v1732_v32  ;;  %v3248_v50 = vpop.f32.mrb[135].mxu0  ;;  %v3364_v58 = vpop.f32.mrb[135].mxu1  ;;  %v4839_v56 = vld [vmem:[#allocation3_spill] sm:$0xff] }
 0x201   :  { %v4840_v32 = vmax.f32 %v4838_v55, %v4839_v56  ;;  %v4842_v50 = vld [vmem:[#allocation5_spill] sm:$0xff] }
 0x202   :  { %2815 = vst [vmem:[%s4700_s3 + $0x38] sm:$0xff] %v2722_v13   ;;  %v1987_v59 = vadd.f32 %v4420_v9, %v1930_v45  ;;  %v1931_v61 = vmax.f32 %v4833_v60, %v1881_v23  ;;  %v4841_v23 = vld [vmem:[#allocation4_spill] sm:$0xff] }
 0x203   :  { %v4843_v58 = vmax.f32 %v4841_v23, %v4842_v50 }
 0x204   :  { %v1988_v0 = vadd.f32 %v4420_v9, %v1931_v61  ;;  %v2037_v62 = vmax.f32 %v1987_v59, 0.0 }
 0x205   :  { %v1303_v36 = vpop.f32.mrb[136].mxu0  ;;  %v1737_v37 = vpop.f32.mrb[136].mxu1 }
 0x206   :  { %v2038_v6 = vmax.f32 %v1988_v0, 0.0  ;;  %v1882_v16 = vmax.f32 %v1303_v36, %v1737_v37  ;;  %v3251_v51 = vpop.f32.mrb[137].mxu0  ;;  %v3367_v2 = vpop.f32.mrb[137].mxu1 }
 0x207   :  { %v1306_v63 = vpop.f32.mrb[138].mxu0  ;;  %v1740_v19 = vpop.f32.mrb[138].mxu1 }
 0x208   :  { %v2727_v20 = vpack.c.bf16 %v2038_v6, %v2037_v62  ;;  %v1932_v11 = vmax.f32 %v4834_v10, %v1882_v16  ;;  %v1883_v1 = vmax.f32 %v1306_v63, %v1740_v19  ;;  %v3252_v15 = vpop.f32.mrb[139].mxu0  ;;  %v3368_v40 = vpop.f32.mrb[139].mxu1  ;;  %v4844_v19 = vld [vmem:[#allocation6_spill] sm:$0xff] }
 0x20a   :  { %2816 = vst [vmem:[%s4700_s3 + $0x40] sm:$0xff] %v2727_v20   ;;  %v1989_v41 = vadd.f32 %v4420_v9, %v1932_v11  ;;  %v1933_v43 = vmax.f32 %v4835_v33, %v1883_v1  ;;  %v4845_v20 = vld [vmem:[#allocation7_spill] sm:$0xff]  ;;  %v4847_v33 = vld [vmem:[#allocation8_spill] sm:$0xff] }
 0x20b   :  { %v4846_v10 = vmax.f32 %v4844_v19, %v4845_v20 }
 0x20c   :  { %v1990_v44 = vadd.f32 %v4420_v9, %v1933_v43  ;;  %v2039_v22 = vmax.f32 %v1989_v41, 0.0  ;;  %v4848_v43 = vld [vmem:[#allocation9_spill] sm:$0xff] }
 0x20d   :  { %v1311_v21 = vpop.f32.mrb[140].mxu0  ;;  %v1745_v18 = vpop.f32.mrb[140].mxu1 }
 0x20e   :  { %v2040_v54 = vmax.f32 %v1990_v44, 0.0  ;;  %v1884_v4 = vmax.f32 %v1311_v21, %v1745_v18  ;;  %v3255_v26 = vpop.f32.mrb[141].mxu0  ;;  %v3371_v38 = vpop.f32.mrb[141].mxu1  ;;  %v4849_v44 = vmax.f32 %v4847_v33, %v4848_v43 }
 0x20f   :  { %v1314_v24 = vpop.f32.mrb[142].mxu0  ;;  %v1748_v25 = vpop.f32.mrb[142].mxu1 }
 0x210   :  { %v2732_v7 = vpack.c.bf16 %v2040_v54, %v2039_v22  ;;  %v1934_v49 = vmax.f32 %v4836_v48, %v1884_v4  ;;  %v1885_v8 = vmax.f32 %v1314_v24, %v1748_v25  ;;  %v3256_v47 = vpop.f32.mrb[143].mxu0  ;;  %v3372_v52 = vpop.f32.mrb[143].mxu1 }
 0x211   :  { %v4851_v47 = vld [vmem:[#allocation11_spill] sm:$0xff] }
 0x212   :  { %2817 = vst [vmem:[%s4700_s3 + $0x48] sm:$0xff] %v2732_v7   ;;  %v1991_v53 = vadd.f32 %v4420_v9, %v1934_v49  ;;  %v1935_v35 = vmax.f32 %v4837_v34, %v1885_v8  ;;  %v4850_v8 = vld [vmem:[#allocation10_spill] sm:$0xff] }
 0x213   :  { %v4852_v52 = vmax.f32 %v4850_v8, %v4851_v47 }
 0x214   :  { %v1992_v39 = vadd.f32 %v4420_v9, %v1935_v35  ;;  %v2041_v14 = vmax.f32 %v1991_v53, 0.0 }
 0x215   :  { %v1319_v57 = vpop.f32.mrb[144].mxu0  ;;  %v1753_v17 = vpop.f32.mrb[144].mxu1 }
 0x216   :  { %v2042_v27 = vmax.f32 %v1992_v39, 0.0  ;;  %v1886_v28 = vmax.f32 %v1319_v57, %v1753_v17  ;;  %v3259_v5 = vpop.f32.mrb[145].mxu0  ;;  %v3375_v12 = vpop.f32.mrb[145].mxu1  ;;  %v4853_v17 = vld [vmem:[#allocation12_spill] sm:$0xff] }
 0x217   :  { %v1322_v42 = vpop.f32.mrb[146].mxu0  ;;  %v1756_v46 = vpop.f32.mrb[146].mxu1 }
 0x218   :  { %v2737_v31 = vpack.c.bf16 %v2042_v27, %v2041_v14  ;;  %v1936_v13 = vmax.f32 %v4840_v32, %v1886_v28  ;;  %v1887_v3 = vmax.f32 %v1322_v42, %v1756_v46  ;;  %v3260_v45 = vpop.f32.mrb[147].mxu0  ;;  %v3376_v29 = vpop.f32.mrb[147].mxu1  ;;  %v4854_v14 = vld [vmem:[#allocation13_spill] sm:$0xff] }
 0x219   :  { %v4855_v27 = vmax.f32 %v4853_v17, %v4854_v14  ;;  %v4856_v29 = vld [vmem:[#allocation14_spill] sm:$0xff] }
 0x21a   :  { %2818 = vst [vmem:[%s4700_s3 + $0x50] sm:$0xff] %v2737_v31   ;;  %v1993_v30 = vadd.f32 %v4420_v9, %v1936_v13  ;;  %v1937_v59 = vmax.f32 %v4843_v58, %v1887_v3 }
 0x21c   :  { %v1994_v60 = vadd.f32 %v4420_v9, %v1937_v59  ;;  %v2043_v36 = vmax.f32 %v1993_v30, 0.0  ;;  %v4857_v30 = vld [vmem:[#allocation15_spill] sm:$0xff] }
 0x21d   :  { %v1327_v61 = vpop.f32.mrb[148].mxu0  ;;  %v1761_v0 = vpop.f32.mrb[148].mxu1  ;;  %v4858_v23 = vmax.f32 %v4856_v29, %v4857_v30 }
 0x21e   :  { %v2044_v37 = vmax.f32 %v1994_v60, 0.0  ;;  %v1888_v62 = vmax.f32 %v1327_v61, %v1761_v0  ;;  %v3263_v6 = vpop.f32.mrb[149].mxu0  ;;  %v3379_v16 = vpop.f32.mrb[149].mxu1  ;;  %v4859_v0 = vld [vmem:[#allocation16_spill] sm:$0xff] }
 0x21f   :  { %v1330_v51 = vpop.f32.mrb[150].mxu0  ;;  %v1764_v2 = vpop.f32.mrb[150].mxu1 }
 0x220   :  { %v2742_v63 = vpack.c.bf16 %v2044_v37, %v2043_v36  ;;  %v1938_v11 = vmax.f32 %v4846_v10, %v1888_v62  ;;  %v1889_v1 = vmax.f32 %v1330_v51, %v1764_v2  ;;  %v3264_v15 = vpop.f32.mrb[151].mxu0  ;;  %v3380_v40 = vpop.f32.mrb[151].mxu1  ;;  %v4860_v36 = vld [vmem:[#allocation17_spill] sm:$0xff] }
 0x221   :  { %v4861_v37 = vmax.f32 %v4859_v0, %v4860_v36  ;;  %v4862_v40 = vld [vmem:[#allocation18_spill] sm:$0xff] }
 0x222   :  { %2819 = vst [vmem:[%s4700_s3 + $0x58] sm:$0xff] %v2742_v63   ;;  %v1995_v41 = vadd.f32 %v4420_v9, %v1938_v11  ;;  %v1939_v21 = vmax.f32 %v4849_v44, %v1889_v1 }
 0x224   :  { %v1996_v18 = vadd.f32 %v4420_v9, %v1939_v21  ;;  %v2045_v4 = vmax.f32 %v1995_v41, 0.0  ;;  %v4863_v41 = vld [vmem:[#allocation19_spill] sm:$0xff] }
 0x225   :  { %v1335_v22 = vpop.f32.mrb[152].mxu0  ;;  %v1769_v54 = vpop.f32.mrb[152].mxu1  ;;  %v4864_v33 = vmax.f32 %v4862_v40, %v4863_v41 }
 0x226   :  { %v2046_v26 = vmax.f32 %v1996_v18, 0.0  ;;  %v1890_v38 = vmax.f32 %v1335_v22, %v1769_v54  ;;  %v3267_v24 = vpop.f32.mrb[153].mxu0  ;;  %v3383_v25 = vpop.f32.mrb[153].mxu1  ;;  %v4865_v54 = vld [vmem:[#allocation20_spill] sm:$0xff] }
 0x227   :  { %v1338_v7 = vpop.f32.mrb[154].mxu0  ;;  %v1772_v48 = vpop.f32.mrb[154].mxu1 }
 0x228   :  { %v2747_v49 = vpack.c.bf16 %v2046_v26, %v2045_v4  ;;  %v1940_v53 = vmax.f32 %v4852_v52, %v1890_v38  ;;  %v1891_v34 = vmax.f32 %v1338_v7, %v1772_v48  ;;  %v3268_v35 = vpop.f32.mrb[155].mxu0  ;;  %v3384_v39 = vpop.f32.mrb[155].mxu1  ;;  %v4866_v4 = vld [vmem:[#allocation21_spill] sm:$0xff] }
 0x229   :  { %v4867_v26 = vmax.f32 %v4865_v54, %v4866_v4  ;;  %v4868_v39 = vld [vmem:[#allocation22_spill] sm:$0xff] }
 0x22a   :  { %2820 = vst [vmem:[%s4700_s3 + $0x60] sm:$0xff] %v2747_v49   ;;  %v1997_v57 = vadd.f32 %v4420_v9, %v1940_v53  ;;  %v1941_v28 = vmax.f32 %v4855_v27, %v1891_v34 }
 0x22c   :  { %v1998_v5 = vadd.f32 %v4420_v9, %v1941_v28  ;;  %v2047_v46 = vmax.f32 %v1997_v57, 0.0  ;;  %v4869_v57 = vld [vmem:[#allocation23_spill] sm:$0xff] }
 0x22d   :  { %v1343_v12 = vpop.f32.mrb[156].mxu0  ;;  %v1777_v42 = vpop.f32.mrb[156].mxu1  ;;  %v4870_v17 = vmax.f32 %v4868_v39, %v4869_v57 }
 0x22e   :  { %v2048_v31 = vmax.f32 %v1998_v5, 0.0  ;;  %v1892_v55 = vmax.f32 %v1343_v12, %v1777_v42  ;;  %v3271_v56 = vpop.f32.mrb[157].mxu0  ;;  %v3387_v32 = vpop.f32.mrb[157].mxu1  ;;  %v4871_v42 = vld [vmem:[#allocation24_spill] sm:$0xff] }
 0x22f   :  { %v1346_v13 = vpop.f32.mrb[158].mxu0  ;;  %v1780_v3 = vpop.f32.mrb[158].mxu1 }
 0x230   :  { %v2752_v45 = vpack.c.bf16 %v2048_v31, %v2047_v46  ;;  %v1942_v50 = vmax.f32 %v4858_v23, %v1892_v55  ;;  %v1893_v58 = vmax.f32 %v1346_v13, %v1780_v3  ;;  %v3272_v59 = vpop.f32.mrb[159].mxu0  ;;  %v3388_v60 = vpop.f32.mrb[159].mxu1  ;;  %v4872_v46 = vld [vmem:[#allocation25_spill] sm:$0xff] }
 0x231   :  { %v4873_v31 = vmax.f32 %v4871_v42, %v4872_v46  ;;  %v4874_v60 = vld [vmem:[#allocation26_spill] sm:$0xff] }
 0x232   :  { %2821 = vst [vmem:[%s4700_s3 + $0x68] sm:$0xff] %v2752_v45   ;;  %v1999_v61 = vadd.f32 %v4420_v9, %v1942_v50  ;;  %v1943_v62 = vmax.f32 %v4861_v37, %v1893_v58 }
 0x234   :  { %v2000_v6 = vadd.f32 %v4420_v9, %v1943_v62  ;;  %v2049_v2 = vmax.f32 %v1999_v61, 0.0  ;;  %v4875_v61 = vld [vmem:[#allocation27_spill] sm:$0xff] }
 0x235   :  { %v1351_v16 = vpop.f32.mrb[160].mxu0  ;;  %v1785_v51 = vpop.f32.mrb[160].mxu1  ;;  %v4876_v0 = vmax.f32 %v4874_v60, %v4875_v61 }
 0x236   :  { %v2050_v63 = vmax.f32 %v2000_v6, 0.0  ;;  %v1894_v19 = vmax.f32 %v1351_v16, %v1785_v51  ;;  %v3275_v20 = vpop.f32.mrb[161].mxu0  ;;  %v3391_v10 = vpop.f32.mrb[161].mxu1  ;;  %v4877_v51 = vld [vmem:[#allocation28_spill] sm:$0xff] }
 0x237   :  { %v1354_v11 = vpop.f32.mrb[162].mxu0  ;;  %v1788_v1 = vpop.f32.mrb[162].mxu1 }
 0x238   :  { %v2757_v15 = vpack.c.bf16 %v2050_v63, %v2049_v2  ;;  %v1944_v43 = vmax.f32 %v4864_v33, %v1894_v19  ;;  %v1895_v44 = vmax.f32 %v1354_v11, %v1788_v1  ;;  %v3276_v21 = vpop.f32.mrb[163].mxu0  ;;  %v3392_v18 = vpop.f32.mrb[163].mxu1  ;;  %v4878_v2 = vld [vmem:[#allocation29_spill] sm:$0xff] }
 0x239   :  { %v4879_v63 = vmax.f32 %v4877_v51, %v4878_v2  ;;  %v4880_v18 = vld [vmem:[#allocation30_spill] sm:$0xff] }
 0x23a   :  { %2822 = vst [vmem:[%s4700_s3 + $0x70] sm:$0xff] %v2757_v15   ;;  %v2001_v22 = vadd.f32 %v4420_v9, %v1944_v43  ;;  %v1945_v38 = vmax.f32 %v4867_v26, %v1895_v44 }
 0x23c   :  { %v2002_v24 = vadd.f32 %v4420_v9, %v1945_v38  ;;  %v2051_v48 = vmax.f32 %v2001_v22, 0.0  ;;  %v4881_v22 = vld [vmem:[#allocation31_spill] sm:$0xff] }
 0x23d   :  { %v1359_v25 = vpop.f32.mrb[164].mxu0  ;;  %v1793_v7 = vpop.f32.mrb[164].mxu1  ;;  %v4882_v54 = vmax.f32 %v4880_v18, %v4881_v22 }
 0x23e   :  { %v2052_v49 = vmax.f32 %v2002_v24, 0.0  ;;  %v1896_v8 = vmax.f32 %v1359_v25, %v1793_v7  ;;  %v3279_v47 = vpop.f32.mrb[165].mxu0  ;;  %v3395_v52 = vpop.f32.mrb[165].mxu1  ;;  %v4883_v7 = vld [vmem:[#allocation32_spill] sm:$0xff] }
 0x23f   :  { %v1362_v53 = vpop.f32.mrb[166].mxu0  ;;  %v1796_v34 = vpop.f32.mrb[166].mxu1 }
 0x240   :  { %v2762_v35 = vpack.c.bf16 %v2052_v49, %v2051_v48  ;;  %v1946_v14 = vmax.f32 %v4870_v17, %v1896_v8  ;;  %v1897_v27 = vmax.f32 %v1362_v53, %v1796_v34  ;;  %v3280_v28 = vpop.f32.mrb[167].mxu0  ;;  %v3396_v5 = vpop.f32.mrb[167].mxu1  ;;  %v4884_v48 = vld [vmem:[#allocation33_spill] sm:$0xff] }
 0x241   :  { %v4885_v49 = vmax.f32 %v4883_v7, %v4884_v48  ;;  %v4886_v5 = vld [vmem:[#allocation34_spill] sm:$0xff] }
 0x242   :  { %2823 = vst [vmem:[%s4700_s3 + $0x78] sm:$0xff] %v2762_v35   ;;  %v2003_v12 = vadd.f32 %v4420_v9, %v1946_v14  ;;  %v1947_v55 = vmax.f32 %v4873_v31, %v1897_v27 }
 0x244   :  { %v2004_v56 = vadd.f32 %v4420_v9, %v1947_v55  ;;  %v2053_v3 = vmax.f32 %v2003_v12, 0.0  ;;  %v4887_v12 = vld [vmem:[#allocation35_spill] sm:$0xff] }
 0x245   :  { %v1367_v32 = vpop.f32.mrb[168].mxu0  ;;  %v1801_v13 = vpop.f32.mrb[168].mxu1  ;;  %v4888_v42 = vmax.f32 %v4886_v5, %v4887_v12 }
 0x246   :  { %v2054_v45 = vmax.f32 %v2004_v56, 0.0  ;;  %v1898_v29 = vmax.f32 %v1367_v32, %v1801_v13  ;;  %v3283_v30 = vpop.f32.mrb[169].mxu0  ;;  %v3399_v23 = vpop.f32.mrb[169].mxu1  ;;  %v4889_v13 = vld [vmem:[#allocation36_spill] sm:$0xff] }
 0x247   :  { %v1370_v50 = vpop.f32.mrb[170].mxu0  ;;  %v1804_v58 = vpop.f32.mrb[170].mxu1 }
 0x248   :  { %v2767_v59 = vpack.c.bf16 %v2054_v45, %v2053_v3  ;;  %v1948_v36 = vmax.f32 %v4876_v0, %v1898_v29  ;;  %v1899_v37 = vmax.f32 %v1370_v50, %v1804_v58  ;;  %v3284_v62 = vpop.f32.mrb[171].mxu0  ;;  %v3400_v6 = vpop.f32.mrb[171].mxu1  ;;  %v4890_v3 = vld [vmem:[#allocation37_spill] sm:$0xff] }
 0x249   :  { %v4891_v45 = vmax.f32 %v4889_v13, %v4890_v3  ;;  %v4892_v6 = vld [vmem:[#allocation38_spill] sm:$0xff] }
 0x24a   :  { %2824 = vst [vmem:[%s4700_s3 + $0x80] sm:$0xff] %v2767_v59   ;;  %v2005_v16 = vadd.f32 %v4420_v9, %v1948_v36  ;;  %v1949_v19 = vmax.f32 %v4879_v63, %v1899_v37 }
 0x24c   :  { %v2006_v20 = vadd.f32 %v4420_v9, %v1949_v19  ;;  %v2055_v1 = vmax.f32 %v2005_v16, 0.0  ;;  %v4893_v16 = vld [vmem:[#allocation39_spill] sm:$0xff] }
 0x24d   :  { %v1375_v10 = vpop.f32.mrb[172].mxu0  ;;  %v1809_v11 = vpop.f32.mrb[172].mxu1  ;;  %v4894_v51 = vmax.f32 %v4892_v6, %v4893_v16 }
 0x24e   :  { %v2056_v15 = vmax.f32 %v2006_v20, 0.0  ;;  %v1900_v40 = vmax.f32 %v1375_v10, %v1809_v11  ;;  %v3287_v41 = vpop.f32.mrb[173].mxu0  ;;  %v3403_v33 = vpop.f32.mrb[173].mxu1  ;;  %v4895_v11 = vld [vmem:[#allocation40_spill] sm:$0xff] }
 0x24f   :  { %v1378_v43 = vpop.f32.mrb[174].mxu0  ;;  %v1812_v44 = vpop.f32.mrb[174].mxu1 }
 0x250   :  { %v2772_v21 = vpack.c.bf16 %v2056_v15, %v2055_v1  ;;  %v1950_v4 = vmax.f32 %v4882_v54, %v1900_v40  ;;  %v1901_v26 = vmax.f32 %v1378_v43, %v1812_v44  ;;  %v3288_v38 = vpop.f32.mrb[175].mxu0  ;;  %v3404_v24 = vpop.f32.mrb[175].mxu1  ;;  %v4896_v1 = vld [vmem:[#allocation41_spill] sm:$0xff] }
 0x251   :  { %v4897_v15 = vmax.f32 %v4895_v11, %v4896_v1  ;;  %v4898_v24 = vld [vmem:[#allocation42_spill] sm:$0xff] }
 0x252   :  { %2825 = vst [vmem:[%s4700_s3 + $0x88] sm:$0xff] %v2772_v21   ;;  %v2007_v25 = vadd.f32 %v4420_v9, %v1950_v4  ;;  %v1951_v8 = vmax.f32 %v4885_v49, %v1901_v26 }
 0x254   :  { %v2008_v47 = vadd.f32 %v4420_v9, %v1951_v8  ;;  %v2057_v34 = vmax.f32 %v2007_v25, 0.0  ;;  %v4899_v25 = vld [vmem:[#allocation43_spill] sm:$0xff] }
 0x255   :  { %v1383_v52 = vpop.f32.mrb[176].mxu0  ;;  %v1817_v53 = vpop.f32.mrb[176].mxu1  ;;  %v4900_v7 = vmax.f32 %v4898_v24, %v4899_v25 }
 0x256   :  { %v2058_v35 = vmax.f32 %v2008_v47, 0.0  ;;  %v1902_v39 = vmax.f32 %v1383_v52, %v1817_v53  ;;  %v3291_v57 = vpop.f32.mrb[177].mxu0  ;;  %v3407_v17 = vpop.f32.mrb[177].mxu1  ;;  %v4901_v53 = vld [vmem:[#allocation44_spill] sm:$0xff] }
 0x257   :  { %v1386_v14 = vpop.f32.mrb[178].mxu0  ;;  %v1820_v27 = vpop.f32.mrb[178].mxu1 }
 0x258   :  { %v2777_v28 = vpack.c.bf16 %v2058_v35, %v2057_v34  ;;  %v1952_v46 = vmax.f32 %v4888_v42, %v1902_v39  ;;  %v1903_v31 = vmax.f32 %v1386_v14, %v1820_v27  ;;  %v3292_v55 = vpop.f32.mrb[179].mxu0  ;;  %v3408_v56 = vpop.f32.mrb[179].mxu1  ;;  %v4902_v34 = vld [vmem:[#allocation45_spill] sm:$0xff] }
 0x259   :  { %v4903_v35 = vmax.f32 %v4901_v53, %v4902_v34  ;;  %v4904_v56 = vld [vmem:[#allocation46_spill] sm:$0xff] }
 0x25a   :  { %2826 = vst [vmem:[%s4700_s3 + $0x90] sm:$0xff] %v2777_v28   ;;  %v2009_v32 = vadd.f32 %v4420_v9, %v1952_v46  ;;  %v1953_v29 = vmax.f32 %v4891_v45, %v1903_v31 }
 0x25c   :  { %v2010_v30 = vadd.f32 %v4420_v9, %v1953_v29  ;;  %v2059_v58 = vmax.f32 %v2009_v32, 0.0  ;;  %v4905_v32 = vld [vmem:[#allocation47_spill] sm:$0xff] }
 0x25d   :  { %v1391_v23 = vpop.f32.mrb[180].mxu0  ;;  %v1825_v50 = vpop.f32.mrb[180].mxu1  ;;  %v4906_v13 = vmax.f32 %v4904_v56, %v4905_v32 }
 0x25e   :  { %v2060_v59 = vmax.f32 %v2010_v30, 0.0  ;;  %v1904_v60 = vmax.f32 %v1391_v23, %v1825_v50  ;;  %v3295_v61 = vpop.f32.mrb[181].mxu0  ;;  %v3411_v0 = vpop.f32.mrb[181].mxu1  ;;  %v4907_v50 = vld [vmem:[#allocation48_spill] sm:$0xff] }
 0x25f   :  { %v1394_v36 = vpop.f32.mrb[182].mxu0  ;;  %v1828_v37 = vpop.f32.mrb[182].mxu1 }
 0x260   :  { %v2782_v62 = vpack.c.bf16 %v2060_v59, %v2059_v58  ;;  %v1954_v2 = vmax.f32 %v4894_v51, %v1904_v60  ;;  %v1905_v63 = vmax.f32 %v1394_v36, %v1828_v37  ;;  %v3296_v19 = vpop.f32.mrb[183].mxu0  ;;  %v3412_v20 = vpop.f32.mrb[183].mxu1  ;;  %v4908_v58 = vld [vmem:[#allocation49_spill] sm:$0xff] }
 0x261   :  { %v4909_v59 = vmax.f32 %v4907_v50, %v4908_v58  ;;  %v4910_v20 = vld [vmem:[#allocation50_spill] sm:$0xff] }
 0x262   :  { %2827 = vst [vmem:[%s4700_s3 + $0x98] sm:$0xff] %v2782_v62   ;;  %v2011_v10 = vadd.f32 %v4420_v9, %v1954_v2  ;;  %v1955_v40 = vmax.f32 %v4897_v15, %v1905_v63 }
 0x264   :  { %v2012_v41 = vadd.f32 %v4420_v9, %v1955_v40  ;;  %v2061_v44 = vmax.f32 %v2011_v10, 0.0  ;;  %v4911_v10 = vld [vmem:[#allocation51_spill] sm:$0xff] }
 0x265   :  { %v1399_v33 = vpop.f32.mrb[184].mxu0  ;;  %v1833_v43 = vpop.f32.mrb[184].mxu1  ;;  %v4912_v11 = vmax.f32 %v4910_v20, %v4911_v10 }
 0x266   :  { %v2062_v21 = vmax.f32 %v2012_v41, 0.0  ;;  %v1906_v18 = vmax.f32 %v1399_v33, %v1833_v43  ;;  %v3299_v22 = vpop.f32.mrb[185].mxu0  ;;  %v3415_v54 = vpop.f32.mrb[185].mxu1  ;;  %v4913_v43 = vld [vmem:[#allocation52_spill] sm:$0xff] }
 0x267   :  { %v1402_v4 = vpop.f32.mrb[186].mxu0  ;;  %v1836_v26 = vpop.f32.mrb[186].mxu1 }
 0x268   :  { %v2787_v38 = vpack.c.bf16 %v2062_v21, %v2061_v44  ;;  %v1956_v48 = vmax.f32 %v4900_v7, %v1906_v18  ;;  %v1907_v49 = vmax.f32 %v1402_v4, %v1836_v26  ;;  %v3300_v8 = vpop.f32.mrb[187].mxu0  ;;  %v3416_v47 = vpop.f32.mrb[187].mxu1  ;;  %v4914_v44 = vld [vmem:[#allocation53_spill] sm:$0xff] }
 0x269   :  { %v4915_v21 = vmax.f32 %v4913_v43, %v4914_v44  ;;  %v4916_v47 = vld [vmem:[#allocation54_spill] sm:$0xff] }
 0x26a   :  { %2828 = vst [vmem:[%s4700_s3 + $0xa0] sm:$0xff] %v2787_v38   ;;  %v2013_v52 = vadd.f32 %v4420_v9, %v1956_v48  ;;  %v1957_v39 = vmax.f32 %v4903_v35, %v1907_v49 }
 0x26c   :  { %v2014_v57 = vadd.f32 %v4420_v9, %v1957_v39  ;;  %v2063_v27 = vmax.f32 %v2013_v52, 0.0  ;;  %v4917_v52 = vld [vmem:[#allocation55_spill] sm:$0xff] }
 0x26d   :  { %v1407_v17 = vpop.f32.mrb[188].mxu0  ;;  %v1841_v14 = vpop.f32.mrb[188].mxu1  ;;  %v4918_v53 = vmax.f32 %v4916_v47, %v4917_v52 }
 0x26e   :  { %v2064_v28 = vmax.f32 %v2014_v57, 0.0  ;;  %v1908_v5 = vmax.f32 %v1407_v17, %v1841_v14  ;;  %v3303_v12 = vpop.f32.mrb[189].mxu0  ;;  %v3419_v42 = vpop.f32.mrb[189].mxu1  ;;  %v4919_v14 = vld [vmem:[#allocation56_spill] sm:$0xff] }
 0x26f   :  { %v1410_v46 = vpop.f32.mrb[190].mxu0  ;;  %v1844_v31 = vpop.f32.mrb[190].mxu1 }
 0x270   :  { %v2792_v55 = vpack.c.bf16 %v2064_v28, %v2063_v27  ;;  %v1958_v3 = vmax.f32 %v4906_v13, %v1908_v5  ;;  %v1909_v45 = vmax.f32 %v1410_v46, %v1844_v31  ;;  %v3304_v29 = vpop.f32.mrb[191].mxu0  ;;  %v3420_v30 = vpop.f32.mrb[191].mxu1  ;;  %v4920_v27 = vld [vmem:[#allocation57_spill] sm:$0xff] }
 0x271   :  { %v4921_v28 = vmax.f32 %v4919_v14, %v4920_v27 }
 0x272   :  { %2829 = vst [vmem:[%s4700_s3 + $0xa8] sm:$0xff] %v2792_v55   ;;  %v2015_v23 = vadd.f32 %v4420_v9, %v1958_v3  ;;  %v1959_v60 = vmax.f32 %v4909_v59, %v1909_v45 }
 0x274   :  { %v2016_v61 = vadd.f32 %v4420_v9, %v1959_v60  ;;  %v2065_v37 = vmax.f32 %v2015_v23, 0.0 }
 0x275   :  { %v1415_v0 = vpop.f32.mrb[192].mxu0  ;;  %v1849_v36 = vpop.f32.mrb[192].mxu1 }
 0x276   :  { %v2066_v62 = vmax.f32 %v2016_v61, 0.0  ;;  %v1910_v6 = vmax.f32 %v1415_v0, %v1849_v36  ;;  %v3307_v16 = vpop.f32.mrb[193].mxu0  ;;  %v3423_v51 = vpop.f32.mrb[193].mxu1 }
 0x277   :  { %v1418_v2 = vpop.f32.mrb[194].mxu0  ;;  %v1852_v63 = vpop.f32.mrb[194].mxu1 }
 0x278   :  { %v2797_v19 = vpack.c.bf16 %v2066_v62, %v2065_v37  ;;  %v1960_v1 = vmax.f32 %v4912_v11, %v1910_v6  ;;  %v1911_v15 = vmax.f32 %v1418_v2, %v1852_v63  ;;  %v3308_v40 = vpop.f32.mrb[195].mxu0  ;;  %v3424_v41 = vpop.f32.mrb[195].mxu1 }
 0x27a   :  { %2830 = vst [vmem:[%s4700_s3 + $0xb0] sm:$0xff] %v2797_v19   ;;  %v2017_v33 = vadd.f32 %v4420_v9, %v1960_v1  ;;  %v1961_v18 = vmax.f32 %v4915_v21, %v1911_v15 }
 0x27c   :  { %v2018_v22 = vadd.f32 %v4420_v9, %v1961_v18  ;;  %v2067_v26 = vmax.f32 %v2017_v33, 0.0 }
 0x27d   :  { %v1423_v54 = vpop.f32.mrb[196].mxu0  ;;  %v1857_v4 = vpop.f32.mrb[196].mxu1 }
 0x27e   :  { %v2068_v38 = vmax.f32 %v2018_v22, 0.0  ;;  %v1912_v24 = vmax.f32 %v1423_v54, %v1857_v4  ;;  %v3311_v25 = vpop.f32.mrb[197].mxu0  ;;  %v3427_v7 = vpop.f32.mrb[197].mxu1 }
 0x27f   :  { %v1426_v48 = vpop.f32.mrb[198].mxu0  ;;  %v1860_v49 = vpop.f32.mrb[198].mxu1 }
 0x280   :  { %v2802_v8 = vpack.c.bf16 %v2068_v38, %v2067_v26  ;;  %v1962_v34 = vmax.f32 %v4918_v53, %v1912_v24  ;;  %v1913_v35 = vmax.f32 %v1426_v48, %v1860_v49  ;;  %v3312_v39 = vpop.f32.mrb[199].mxu0  ;;  %v3428_v57 = vpop.f32.mrb[199].mxu1 }
 0x282   :  { %2831 = vst [vmem:[%s4700_s3 + $0xb8] sm:$0xff] %v2802_v8   ;;  %v2019_v17 = vadd.f32 %v4420_v9, %v1962_v34  ;;  %v1963_v5 = vmax.f32 %v4921_v28, %v1913_v35 }
 0x284   :  { %v2020_v12 = vadd.f32 %v4420_v9, %v1963_v5  ;;  %v2069_v42 = vmax.f32 %v2019_v17, 0.0 }
 0x286   :  { %v2070_v46 = vmax.f32 %v2020_v12, 0.0 }
 0x288   :  { %v2807_v31 = vpack.c.bf16 %v2070_v46, %v2069_v42 }
 0x28a   :  { %2832 = vst [vmem:[%s4700_s3 + $0xc0] sm:$0xff] %v2807_v31  }

// kernel: net_forward.4
= control target key start
LH: loop header
LB: loop body
LE: loop exit
PB: predicated region body
PF: predicated region fallthrough
CT: control target
= control target key end

     0   :  { %s1346_s1 = inlined_call_operand.vmem [shape: bf16[256,128], index: 1, kind: input, shape index: {}]   ;;  %s1347_s0 = inlined_call_operand.vmem [shape: bf16[4,64,256], index: 0, kind: input, shape index: {}]   ;;  %s1348_s2 = inlined_call_operand.vmem [shape: f32[1,128], index: 2, kind: input, shape index: {}]   ;;  %s1349_s3 = inlined_call_operand.vmem [shape: bf16[64,128], index: 3, kind: output, shape index: {}]  }
   0x1   :  { %v961_v0 = vld [vmem:[%s1346_s1 + $0x40] sm:$0xff]   ;;  %v963_v2 = vld [vmem:[%s1346_s1 + $0x48] sm:$0xff]   ;;  %v965_v4 = vld [vmem:[%s1346_s1 + $0x50] sm:$0xff]  }
   0x2   :  { %v962_v1 = vld [vmem:[%s1346_s1] sm:$0xff]   ;;  %801 = vmatprep.subr.bf16.mxu0 %v961_v0  ;;  %841 = vmatprep.subr.bf16.mxu1 %v961_v0  ;;  %v964_v3 = vld [vmem:[%s1346_s1 + $0x8] sm:$0xff]   ;;  %v1063_v5 = vld [vmem:[%s1346_s1 + $0x10] sm:$0xff]  }
   0x3   :  { %802 = vmatpush3.bf16.msra.mxu0 %v962_v1  ;;  %842 = vmatpush3.bf16.msra.mxu1 %v962_v1  ;;  %v1068_v6 = vld [vmem:[%s1346_s1 + $0x58] sm:$0xff]   ;;  %v1082_v8 = vld [vmem:[%s1346_s1 + $0x60] sm:$0xff]   ;;  %v1096_v10 = vld [vmem:[%s1346_s1 + $0x68] sm:$0xff]  }
   0x4   :  { %803 = vmatprep.subr.bf16.mxu0 %v963_v2  ;;  %843 = vmatprep.subr.bf16.mxu1 %v963_v2  ;;  %v1075_v7 = vld [vmem:[%s1346_s1 + $0x18] sm:$0xff]   ;;  %v1089_v9 = vld [vmem:[%s1346_s1 + $0x20] sm:$0xff]   ;;  %v1109_v13 = vld [vmem:[%s1346_s1 + $0x28] sm:$0xff]  }
   0x5   :  { %v979_v11 = vld [vmem:[%s1347_s0 + $0x4] ss:$8 sps:$4 sm:$0xff]   ;;  %v1116_v14 = vld [vmem:[%s1346_s1 + $0x70] sm:$0xff]   ;;  %v1130_v16 = vld [vmem:[%s1346_s1 + $0x78] sm:$0xff]  }
   0x6   :  { %v982_v12 = vld [vmem:[%s1347_s0 + $0x44] ss:$8 sps:$4 sm:$0xff]   ;;  %223 = vmatprep.mubr.bf16.mxu0 %v979_v11  ;;  %v1123_v15 = vld [vmem:[%s1346_s1 + $0x30] sm:$0xff]   ;;  %v1137_v17 = vld [vmem:[%s1346_s1 + $0x38] sm:$0xff]  }
   0x7   :  { %804 = vmatpush3.bf16.msra.mxu0 %v964_v3  ;;  %844 = vmatpush3.bf16.msra.mxu1 %v964_v3  ;;  %v977_v18 = vld [vmem:[%s1347_s0] ss:$8 sps:$4 sm:$0xff]   ;;  %v983_v20 = vld [vmem:[%s1347_s0 + $0x14] ss:$8 sps:$4 sm:$0xff]   ;;  %v987_v22 = vld [vmem:[%s1347_s0 + $0x10] ss:$8 sps:$4 sm:$0xff]  }
   0x8   :  { %805 = vmatprep.subr.bf16.mxu0 %v965_v4  ;;  %845 = vmatprep.subr.bf16.mxu1 %v965_v4  ;;  %v980_v19 = vld [vmem:[%s1347_s0 + $0x40] ss:$8 sps:$4 sm:$0xff]   ;;  %v985_v21 = vld [vmem:[%s1347_s0 + $0x54] ss:$8 sps:$4 sm:$0xff]   ;;  %v988_v23 = vld [vmem:[%s1347_s0 + $0x50] ss:$8 sps:$4 sm:$0xff]  }
   0x9   :  { %337 = vmatprep.mubr.bf16.mxu1 %v982_v12  ;;  %v989_v24 = vld [vmem:[%s1347_s0 + $0x24] ss:$8 sps:$4 sm:$0xff]   ;;  %v993_v26 = vld [vmem:[%s1347_s0 + $0x20] ss:$8 sps:$4 sm:$0xff]   ;;  %v995_v28 = vld [vmem:[%s1347_s0 + $0x34] ss:$8 sps:$4 sm:$0xff]  }
   0xa   :  { %v991_v25 = vld [vmem:[%s1347_s0 + $0x64] ss:$8 sps:$4 sm:$0xff]   ;;  %v994_v27 = vld [vmem:[%s1347_s0 + $0x60] ss:$8 sps:$4 sm:$0xff]   ;;  %v997_v29 = vld [vmem:[%s1347_s0 + $0x74] ss:$8 sps:$4 sm:$0xff]  }
   0xb   :  { %806 = vmatpush3.bf16.msra.mxu0 %v1063_v5  ;;  %846 = vmatpush3.bf16.msra.mxu1 %v1063_v5  ;;  %v999_v30 = vld [vmem:[%s1347_s0 + $0x30] ss:$8 sps:$4 sm:$0xff]   ;;  %v1003_v32 = vld [vmem:[%s1347_s0 + $0x84] ss:$8 sps:$4 sm:$0xff]   ;;  %v1001_v34 = vld [vmem:[%s1347_s0 + $0x80] ss:$8 sps:$4 sm:$0xff]  }
   0xc   :  { %807 = vmatprep.subr.bf16.mxu0 %v1068_v6  ;;  %847 = vmatprep.subr.bf16.mxu1 %v1068_v6  ;;  %v1000_v31 = vld [vmem:[%s1347_s0 + $0x70] ss:$8 sps:$4 sm:$0xff]   ;;  %v1006_v33 = vld [vmem:[%s1347_s0 + $0xc4] ss:$8 sps:$4 sm:$0xff]   ;;  %v1004_v35 = vld [vmem:[%s1347_s0 + $0xc0] ss:$8 sps:$4 sm:$0xff]  }
   0xd   :  { %v1007_v36 = vld [vmem:[%s1347_s0 + $0x94] ss:$8 sps:$4 sm:$0xff]   ;;  %v1011_v38 = vld [vmem:[%s1347_s0 + $0x90] ss:$8 sps:$4 sm:$0xff]   ;;  %v1013_v40 = vld [vmem:[%s1347_s0 + $0xa4] ss:$8 sps:$4 sm:$0xff]  }
   0xe   :  { %v1009_v37 = vld [vmem:[%s1347_s0 + $0xd4] ss:$8 sps:$4 sm:$0xff]   ;;  %v1012_v39 = vld [vmem:[%s1347_s0 + $0xd0] ss:$8 sps:$4 sm:$0xff]   ;;  %v1015_v41 = vld [vmem:[%s1347_s0 + $0xe4] ss:$8 sps:$4 sm:$0xff]  }
   0xf   :  { %808 = vmatpush3.bf16.msra.mxu0 %v1075_v7  ;;  %848 = vmatpush3.bf16.msra.mxu1 %v1075_v7  ;;  %v1017_v42 = vld [vmem:[%s1347_s0 + $0xa0] ss:$8 sps:$4 sm:$0xff]   ;;  %v1019_v44 = vld [vmem:[%s1347_s0 + $0xb4] ss:$8 sps:$4 sm:$0xff]   ;;  %v1023_v46 = vld [vmem:[%s1347_s0 + $0xb0] ss:$8 sps:$4 sm:$0xff]  }
  0x10   :  { %809 = vmatprep.subr.bf16.mxu0 %v1082_v8  ;;  %849 = vmatprep.subr.bf16.mxu1 %v1082_v8  ;;  %v1018_v43 = vld [vmem:[%s1347_s0 + $0xe0] ss:$8 sps:$4 sm:$0xff]   ;;  %v1021_v45 = vld [vmem:[%s1347_s0 + $0xf4] ss:$8 sps:$4 sm:$0xff]   ;;  %v1024_v47 = vld [vmem:[%s1347_s0 + $0xf0] ss:$8 sps:$4 sm:$0xff]  }
  0x13   :  { %810 = vmatpush3.bf16.msra.mxu0 %v1089_v9  ;;  %850 = vmatpush3.bf16.msra.mxu1 %v1089_v9 }
  0x14   :  { %811 = vmatprep.subr.bf16.mxu0 %v1096_v10  ;;  %851 = vmatprep.subr.bf16.mxu1 %v1096_v10 }
  0x17   :  { %812 = vmatpush3.bf16.msra.mxu0 %v1109_v13  ;;  %852 = vmatpush3.bf16.msra.mxu1 %v1109_v13 }
  0x18   :  { %813 = vmatprep.subr.bf16.mxu0 %v1116_v14  ;;  %853 = vmatprep.subr.bf16.mxu1 %v1116_v14 }
  0x1b   :  { %814 = vmatpush3.bf16.msra.mxu0 %v1123_v15  ;;  %854 = vmatpush3.bf16.msra.mxu1 %v1123_v15 }
  0x1c   :  { %815 = vmatprep.subr.bf16.mxu0 %v1130_v16  ;;  %855 = vmatprep.subr.bf16.mxu1 %v1130_v16 }
  0x1f   :  { %816 = vmatpush3.bf16.msra.mxu0 %v1137_v17  ;;  %856 = vmatpush3.bf16.msra.mxu1 %v1137_v17 }
  0x20   :  { %881 = vmatprep.subr.bf16.mxu0 %v961_v0  ;;  %921 = vmatprep.subr.bf16.mxu1 %v961_v0 }
  0x22   :  { %224 = vmatmul.mubr.bf16.vlgmr.msra.gmra.mrb[0].mxu0 %v977_v18  ;;  %338 = vmatmul.mubr.bf16.vlgmr.msra.gmra.mrb[0].mxu1 %v980_v19 }
  0x23   :  { %882 = vmatpush3.bf16.msra.mxu0 %v962_v1  ;;  %922 = vmatpush3.bf16.msra.mxu1 %v962_v1 }
  0x24   :  { %883 = vmatprep.subr.bf16.mxu0 %v963_v2  ;;  %923 = vmatprep.subr.bf16.mxu1 %v963_v2 }
  0x25   :  { %231 = vmatprep.mubr.bf16.mxu0 %v983_v20  ;;  %345 = vmatprep.mubr.bf16.mxu1 %v985_v21 }
  0x27   :  { %884 = vmatpush3.bf16.msra.mxu0 %v964_v3  ;;  %924 = vmatpush3.bf16.msra.mxu1 %v964_v3 }
  0x28   :  { %885 = vmatprep.subr.bf16.mxu0 %v965_v4  ;;  %925 = vmatprep.subr.bf16.mxu1 %v965_v4 }
  0x2a   :  { %232 = vmatmul.mubr.bf16.gmra.mrb[4].mxu0 %v987_v22  ;;  %346 = vmatmul.mubr.bf16.gmra.mrb[4].mxu1 %v988_v23 }
  0x2b   :  { %886 = vmatpush3.bf16.msra.mxu0 %v1063_v5  ;;  %926 = vmatpush3.bf16.msra.mxu1 %v1063_v5 }
  0x2c   :  { %887 = vmatprep.subr.bf16.mxu0 %v1068_v6  ;;  %927 = vmatprep.subr.bf16.mxu1 %v1068_v6 }
  0x2d   :  { %239 = vmatprep.mubr.bf16.mxu0 %v989_v24  ;;  %353 = vmatprep.mubr.bf16.mxu1 %v991_v25 }
  0x2f   :  { %888 = vmatpush3.bf16.msra.mxu0 %v1075_v7  ;;  %928 = vmatpush3.bf16.msra.mxu1 %v1075_v7 }
  0x30   :  { %889 = vmatprep.subr.bf16.mxu0 %v1082_v8  ;;  %929 = vmatprep.subr.bf16.mxu1 %v1082_v8 }
  0x32   :  { %240 = vmatmul.mubr.bf16.gmra.mrb[8].mxu0 %v993_v26  ;;  %354 = vmatmul.mubr.bf16.gmra.mrb[8].mxu1 %v994_v27 }
  0x33   :  { %890 = vmatpush3.bf16.msra.mxu0 %v1089_v9  ;;  %930 = vmatpush3.bf16.msra.mxu1 %v1089_v9 }
  0x34   :  { %891 = vmatprep.subr.bf16.mxu0 %v1096_v10  ;;  %931 = vmatprep.subr.bf16.mxu1 %v1096_v10 }
  0x35   :  { %247 = vmatprep.mubr.bf16.mxu0 %v995_v28  ;;  %361 = vmatprep.mubr.bf16.mxu1 %v997_v29 }
  0x37   :  { %892 = vmatpush3.bf16.msra.mxu0 %v1109_v13  ;;  %932 = vmatpush3.bf16.msra.mxu1 %v1109_v13 }
  0x38   :  { %893 = vmatprep.subr.bf16.mxu0 %v1116_v14  ;;  %933 = vmatprep.subr.bf16.mxu1 %v1116_v14 }
  0x3a   :  { %248 = vmatmul.mubr.bf16.gmra.mrb[12].mxu0 %v999_v30  ;;  %362 = vmatmul.mubr.bf16.gmra.mrb[12].mxu1 %v1000_v31 }
  0x3b   :  { %894 = vmatpush3.bf16.msra.mxu0 %v1123_v15  ;;  %934 = vmatpush3.bf16.msra.mxu1 %v1123_v15 }
  0x3c   :  { %895 = vmatprep.subr.bf16.mxu0 %v1130_v16  ;;  %935 = vmatprep.subr.bf16.mxu1 %v1130_v16 }
  0x3d   :  { %459 = vmatprep.mubr.bf16.mxu0 %v1003_v32  ;;  %573 = vmatprep.mubr.bf16.mxu1 %v1006_v33 }
  0x3f   :  { %896 = vmatpush3.bf16.msra.mxu0 %v1137_v17  ;;  %936 = vmatpush3.bf16.msra.mxu1 %v1137_v17 }
  0x42   :  { %460 = vmatmul.mubr.bf16.vlgmr.msra.gmra.mrb[16].mxu0 %v1001_v34  ;;  %574 = vmatmul.mubr.bf16.vlgmr.msra.gmra.mrb[16].mxu1 %v1004_v35 }
  0x43   :  { %467 = vmatprep.mubr.bf16.mxu0 %v1007_v36  ;;  %581 = vmatprep.mubr.bf16.mxu1 %v1009_v37 }
  0x4a   :  { %468 = vmatmul.mubr.bf16.gmra.mrb[20].mxu0 %v1011_v38  ;;  %582 = vmatmul.mubr.bf16.gmra.mrb[20].mxu1 %v1012_v39 }
  0x4b   :  { %475 = vmatprep.mubr.bf16.mxu0 %v1013_v40  ;;  %589 = vmatprep.mubr.bf16.mxu1 %v1015_v41 }
  0x52   :  { %476 = vmatmul.mubr.bf16.gmra.mrb[24].mxu0 %v1017_v42  ;;  %590 = vmatmul.mubr.bf16.gmra.mrb[24].mxu1 %v1018_v43 }
  0x53   :  { %483 = vmatprep.mubr.bf16.mxu0 %v1019_v44  ;;  %597 = vmatprep.mubr.bf16.mxu1 %v1021_v45 }
  0x5a   :  { %484 = vmatmul.mubr.bf16.gmra.mrb[28].mxu0 %v1023_v46  ;;  %598 = vmatmul.mubr.bf16.gmra.mrb[28].mxu1 %v1024_v47 }
  0xf5   :  { %v817_v48 = vpop.f32.mrb[0].mxu0  ;;  %v857_v49 = vpop.f32.mrb[0].mxu1 }
  0xf6   :  { %v818_v50 = vpop.f32.mrb[1].mxu0  ;;  %v858_v51 = vpop.f32.mrb[1].mxu1 }
  0xf7   :  { %v1255_v52 = vadd.f32 %v818_v50, %v817_v48  ;;  %v1257_v53 = vadd.f32 %v858_v51, %v857_v49  ;;  %v820_v54 = vpop.f32.mrb[2].mxu0  ;;  %v860_v55 = vpop.f32.mrb[2].mxu1 }
  0xf8   :  { %v821_v56 = vpop.f32.mrb[3].mxu0  ;;  %v861_v57 = vpop.f32.mrb[3].mxu1 }
  0xf9   :  { %v370_v58 = vmax.f32 %v1255_v52, %v1257_v53  ;;  %v1261_v59 = vadd.f32 %v821_v56, %v820_v54  ;;  %v1263_v60 = vadd.f32 %v861_v57, %v860_v55  ;;  %v1306_v53 = vld [vmem:[%s1348_s2] ss:$0 sm:$0xff] }
  0xfb   :  { %v371_v61 = vmax.f32 %v1261_v59, %v1263_v60 }
  0xfd   :  { %v823_v62 = vpop.f32.mrb[4].mxu0  ;;  %v863_v63 = vpop.f32.mrb[4].mxu1 }
  0xfe   :  { %v824_v0 = vpop.f32.mrb[5].mxu0  ;;  %v864_v1 = vpop.f32.mrb[5].mxu1 }
  0xff   :  { %v1267_v2 = vadd.f32 %v824_v0, %v823_v62  ;;  %v1269_v3 = vadd.f32 %v864_v1, %v863_v63  ;;  %v826_v4 = vpop.f32.mrb[6].mxu0  ;;  %v866_v5 = vpop.f32.mrb[6].mxu1 }
 0x100   :  { %v827_v6 = vpop.f32.mrb[7].mxu0  ;;  %v867_v7 = vpop.f32.mrb[7].mxu1 }
 0x101   :  { %v372_v8 = vmax.f32 %v1267_v2, %v1269_v3  ;;  %v1273_v9 = vadd.f32 %v827_v6, %v826_v4  ;;  %v1275_v10 = vadd.f32 %v867_v7, %v866_v5 }
 0x103   :  { %v373_v11 = vmax.f32 %v1273_v9, %v1275_v10 }
 0x105   :  { %v829_v12 = vpop.f32.mrb[8].mxu0  ;;  %v869_v13 = vpop.f32.mrb[8].mxu1 }
 0x106   :  { %v830_v14 = vpop.f32.mrb[9].mxu0  ;;  %v870_v15 = vpop.f32.mrb[9].mxu1 }
 0x107   :  { %v1279_v16 = vadd.f32 %v830_v14, %v829_v12  ;;  %v1281_v17 = vadd.f32 %v870_v15, %v869_v13  ;;  %v832_v18 = vpop.f32.mrb[10].mxu0  ;;  %v872_v19 = vpop.f32.mrb[10].mxu1 }
 0x108   :  { %v833_v20 = vpop.f32.mrb[11].mxu0  ;;  %v873_v21 = vpop.f32.mrb[11].mxu1 }
 0x109   :  { %v374_v22 = vmax.f32 %v1279_v16, %v1281_v17  ;;  %v1285_v23 = vadd.f32 %v833_v20, %v832_v18  ;;  %v1287_v24 = vadd.f32 %v873_v21, %v872_v19 }
 0x10b   :  { %v375_v25 = vmax.f32 %v1285_v23, %v1287_v24 }
 0x10d   :  { %v835_v26 = vpop.f32.mrb[12].mxu0  ;;  %v875_v27 = vpop.f32.mrb[12].mxu1 }
 0x10e   :  { %v836_v28 = vpop.f32.mrb[13].mxu0  ;;  %v876_v29 = vpop.f32.mrb[13].mxu1 }
 0x10f   :  { %v1291_v30 = vadd.f32 %v836_v28, %v835_v26  ;;  %v1293_v31 = vadd.f32 %v876_v29, %v875_v27  ;;  %v838_v32 = vpop.f32.mrb[14].mxu0  ;;  %v878_v33 = vpop.f32.mrb[14].mxu1 }
 0x110   :  { %v839_v34 = vpop.f32.mrb[15].mxu0  ;;  %v879_v35 = vpop.f32.mrb[15].mxu1 }
 0x111   :  { %v376_v36 = vmax.f32 %v1291_v30, %v1293_v31  ;;  %v1297_v37 = vadd.f32 %v839_v34, %v838_v32  ;;  %v1299_v38 = vadd.f32 %v879_v35, %v878_v33 }
 0x113   :  { %v377_v39 = vmax.f32 %v1297_v37, %v1299_v38 }
 0x115   :  { %v897_v40 = vpop.f32.mrb[16].mxu0  ;;  %v937_v41 = vpop.f32.mrb[16].mxu1 }
 0x116   :  { %v898_v42 = vpop.f32.mrb[17].mxu0  ;;  %v938_v43 = vpop.f32.mrb[17].mxu1 }
 0x117   :  { %v899_v44 = vadd.f32 %v898_v42, %v897_v40  ;;  %v939_v45 = vadd.f32 %v938_v43, %v937_v41  ;;  %v900_v46 = vpop.f32.mrb[18].mxu0  ;;  %v940_v47 = vpop.f32.mrb[18].mxu1 }
 0x118   :  { %v901_v48 = vpop.f32.mrb[19].mxu0  ;;  %v941_v49 = vpop.f32.mrb[19].mxu1 }
 0x119   :  { %v606_v50 = vmax.f32 %v899_v44, %v939_v45  ;;  %v902_v51 = vadd.f32 %v901_v48, %v900_v46  ;;  %v942_v52 = vadd.f32 %v941_v49, %v940_v47 }
 0x11b   :  { %v614_v54 = vmax.f32 %v370_v58, %v606_v50  ;;  %v607_v55 = vmax.f32 %v902_v51, %v942_v52 }
 0x11d   :  { %v629_v56 = vadd.f32 %v1306_v53, %v614_v54  ;;  %v615_v57 = vmax.f32 %v371_v61, %v607_v55  ;;  %v903_v59 = vpop.f32.mrb[20].mxu0  ;;  %v943_v60 = vpop.f32.mrb[20].mxu1 }
 0x11e   :  { %v904_v62 = vpop.f32.mrb[21].mxu0  ;;  %v944_v63 = vpop.f32.mrb[21].mxu1 }
 0x11f   :  { %v630_v0 = vadd.f32 %v1306_v53, %v615_v57  ;;  %v905_v1 = vadd.f32 %v904_v62, %v903_v59  ;;  %v945_v4 = vadd.f32 %v944_v63, %v943_v60  ;;  %v906_v5 = vpop.f32.mrb[22].mxu0  ;;  %v946_v6 = vpop.f32.mrb[22].mxu1  ;;  %v637_v7 = vmax.f32 %v629_v56, 0.0 }
 0x120   :  { %v907_v12 = vpop.f32.mrb[23].mxu0  ;;  %v947_v13 = vpop.f32.mrb[23].mxu1 }
 0x121   :  { %v638_v14 = vmax.f32 %v630_v0, 0.0  ;;  %v608_v15 = vmax.f32 %v905_v1, %v945_v4  ;;  %v908_v58 = vadd.f32 %v907_v12, %v906_v5  ;;  %v948_v18 = vadd.f32 %v947_v13, %v946_v6 }
 0x123   :  { %v781_v19 = vpack.c.bf16 %v638_v14, %v637_v7  ;;  %v616_v61 = vmax.f32 %v372_v8, %v608_v15  ;;  %v609_v20 = vmax.f32 %v908_v58, %v948_v18 }
 0x125   :  { %782 = vst [vmem:[%s1349_s3] sm:$0xff] %v781_v19   ;;  %v631_v21 = vadd.f32 %v1306_v53, %v616_v61  ;;  %v617_v26 = vmax.f32 %v373_v11, %v609_v20  ;;  %v909_v27 = vpop.f32.mrb[24].mxu0  ;;  %v949_v28 = vpop.f32.mrb[24].mxu1 }
 0x126   :  { %v910_v29 = vpop.f32.mrb[25].mxu0  ;;  %v950_v32 = vpop.f32.mrb[25].mxu1 }
 0x127   :  { %v632_v33 = vadd.f32 %v1306_v53, %v617_v26  ;;  %v911_v34 = vadd.f32 %v910_v29, %v909_v27  ;;  %v951_v2 = vadd.f32 %v950_v32, %v949_v28  ;;  %v912_v3 = vpop.f32.mrb[26].mxu0  ;;  %v952_v8 = vpop.f32.mrb[26].mxu1  ;;  %v639_v35 = vmax.f32 %v631_v21, 0.0 }
 0x128   :  { %v913_v40 = vpop.f32.mrb[27].mxu0  ;;  %v953_v41 = vpop.f32.mrb[27].mxu1 }
 0x129   :  { %v640_v42 = vmax.f32 %v632_v33, 0.0  ;;  %v610_v43 = vmax.f32 %v911_v34, %v951_v2  ;;  %v914_v44 = vadd.f32 %v913_v40, %v912_v3  ;;  %v954_v45 = vadd.f32 %v953_v41, %v952_v8 }
 0x12b   :  { %v786_v46 = vpack.c.bf16 %v640_v42, %v639_v35  ;;  %v618_v9 = vmax.f32 %v374_v22, %v610_v43  ;;  %v611_v10 = vmax.f32 %v914_v44, %v954_v45 }
 0x12d   :  { %798 = vst [vmem:[%s1349_s3 + $0x8] sm:$0xff] %v786_v46   ;;  %v633_v11 = vadd.f32 %v1306_v53, %v618_v9  ;;  %v619_v47 = vmax.f32 %v375_v25, %v611_v10  ;;  %v915_v48 = vpop.f32.mrb[28].mxu0  ;;  %v955_v49 = vpop.f32.mrb[28].mxu1 }
 0x12e   :  { %v916_v50 = vpop.f32.mrb[29].mxu0  ;;  %v956_v51 = vpop.f32.mrb[29].mxu1 }
 0x12f   :  { %v634_v52 = vadd.f32 %v1306_v53, %v619_v47  ;;  %v917_v54 = vadd.f32 %v916_v50, %v915_v48  ;;  %v957_v16 = vadd.f32 %v956_v51, %v955_v49  ;;  %v918_v17 = vpop.f32.mrb[30].mxu0  ;;  %v958_v22 = vpop.f32.mrb[30].mxu1  ;;  %v641_v55 = vmax.f32 %v633_v11, 0.0 }
 0x130   :  { %v919_v56 = vpop.f32.mrb[31].mxu0  ;;  %v959_v57 = vpop.f32.mrb[31].mxu1 }
 0x131   :  { %v642_v59 = vmax.f32 %v634_v52, 0.0  ;;  %v612_v60 = vmax.f32 %v917_v54, %v957_v16  ;;  %v920_v62 = vadd.f32 %v919_v56, %v918_v17  ;;  %v960_v63 = vadd.f32 %v959_v57, %v958_v22 }
 0x133   :  { %v791_v0 = vpack.c.bf16 %v642_v59, %v641_v55  ;;  %v620_v23 = vmax.f32 %v376_v36, %v612_v60  ;;  %v613_v24 = vmax.f32 %v920_v62, %v960_v63 }
 0x135   :  { %799 = vst [vmem:[%s1349_s3 + $0x10] sm:$0xff] %v791_v0   ;;  %v635_v25 = vadd.f32 %v1306_v53, %v620_v23  ;;  %v621_v1 = vmax.f32 %v377_v39, %v613_v24 }
 0x137   :  { %v636_v4 = vadd.f32 %v1306_v53, %v621_v1  ;;  %v643_v5 = vmax.f32 %v635_v25, 0.0 }
 0x139   :  { %v644_v6 = vmax.f32 %v636_v4, 0.0 }
 0x13b   :  { %v796_v7 = vpack.c.bf16 %v644_v6, %v643_v5 }
 0x13d   :  { %800 = vst [vmem:[%s1349_s3 + $0x18] sm:$0xff] %v796_v7  }

// kernel: net_forward.5
= control target key start
LH: loop header
LB: loop body
LE: loop exit
PB: predicated region body
PF: predicated region fallthrough
CT: control target
= control target key end

     0   :  { %vm7773_vm0 = vmmov 0   ;;  %s10545_s1 = inlined_call_operand.vmem [shape: bf16[512,1024], index: 1, kind: input, shape index: {}]   ;;  %s10546_s0 = inlined_call_operand.vmem [shape: bf16[16,512], index: 0, kind: input, shape index: {}]   ;;  %s10547_s3 = inlined_call_operand.vmem [shape: bf16[1024,1024], index: 3, kind: input, shape index: {}]   ;;  %s10548_s2 = inlined_call_operand.vmem [shape: f32[1,1024], index: 2, kind: input, shape index: {}]   ;;  %s10549_s5 = inlined_call_operand.vmem [shape: bf16[1024,128], index: 5, kind: input, shape index: {}]   ;;  %s10550_s4 = inlined_call_operand.vmem [shape: f32[1,1024], index: 4, kind: input, shape index: {}]   ;;  %s10551_s7 = inlined_call_operand.vmem [shape: bf16[128,128], index: 7, kind: input, shape index: {}]   ;;  %s10552_s6 = inlined_call_operand.vmem [shape: f32[1,128], index: 6, kind: input, shape index: {}]   ;;  %s10553_s8 = inlined_call_operand.vmem [shape: f32[1,128], index: 8, kind: input, shape index: {}]   ;;  %s10554_s9 = inlined_call_operand.vmem [shape: f32[16,128], index: 9, kind: output, shape index: {}]  }
   0x1   :  { %v37_v0 = vld [vmem:[%s10545_s1] sm:$0xff]  ;;  %v38_v2 = vld [vmem:[%s10545_s1 + $0x8] sm:$0xff] }
   0x2   :  { %v41_v1 = vld [vmem:[%s10545_s1 + $0x20] sm:$0xff]  ;;  %v42_v4 = vld [vmem:[%s10545_s1 + $0x28] sm:$0xff] }
   0x3   :  { %v6638_v3 = vcombine.high %v37_v0, %v41_v1  ;;  %v6637_v5 = vcombine.low %v37_v0, %v41_v1  ;;  %v45_v6 = vld [vmem:[%s10545_s1 + $0x40] sm:$0xff]  ;;  %v6640_v8 = vcombine.high %v38_v2, %v42_v4  ;;  %v6639_v9 = vcombine.low %v38_v2, %v42_v4  ;;  %v46_v11 = vld [vmem:[%s10545_s1 + $0x48] sm:$0xff] }
   0x4   :  { %v49_v7 = vld [vmem:[%s10545_s1 + $0x60] sm:$0xff]  ;;  %v50_v12 = vld [vmem:[%s10545_s1 + $0x68] sm:$0xff] }
   0x5   :  { %v6646_v10 = vcombine.high %v45_v6, %v49_v7  ;;  %v53_v13 = vld [vmem:[%s10545_s1 + $0x80] sm:$0xff]  ;;  %1635 = vmatprep.subr.bf16.mxu0 %v6638_v3  ;;  %v6648_v14 = vcombine.high %v46_v11, %v50_v12  ;;  %v54_v16 = vld [vmem:[%s10545_s1 + $0x88] sm:$0xff]  ;;  %1721 = vmatprep.subr.bf16.mxu1 %v6640_v8  ;;  %v6645_v18 = vcombine.low %v45_v6, %v49_v7 }
   0x6   :  { %v57_v15 = vld [vmem:[%s10545_s1 + $0xa0] sm:$0xff]  ;;  %v58_v17 = vld [vmem:[%s10545_s1 + $0xa8] sm:$0xff]  ;;  %1636 = vmatpush1.bf16.msra.mxu0 %v6637_v5  ;;  %1722 = vmatpush1.bf16.msra.mxu1 %v6639_v9  ;;  %v6647_v19 = vcombine.low %v46_v11, %v50_v12 }
   0x7   :  { %1637 = vmatprep.subr.bf16.mxu0 %v6646_v10  ;;  %v6654_v20 = vcombine.high %v53_v13, %v57_v15  ;;  %1723 = vmatprep.subr.bf16.mxu1 %v6648_v14  ;;  %v6656_v21 = vcombine.high %v54_v16, %v58_v17  ;;  %v61_v22 = vld [vmem:[%s10545_s1 + $0xc0] sm:$0xff]  ;;  %v62_v24 = vld [vmem:[%s10545_s1 + $0xc8] sm:$0xff]  ;;  %v6653_v26 = vcombine.low %v53_v13, %v57_v15 }
   0x8   :  { %v65_v23 = vld [vmem:[%s10545_s1 + $0xe0] sm:$0xff]  ;;  %v66_v25 = vld [vmem:[%s10545_s1 + $0xe8] sm:$0xff]  ;;  %v6655_v27 = vcombine.low %v54_v16, %v58_v17 }
   0x9   :  { %v6662_v28 = vcombine.high %v61_v22, %v65_v23  ;;  %v6664_v29 = vcombine.high %v62_v24, %v66_v25  ;;  %v69_v30 = vld [vmem:[%s10545_s1 + $0x100] sm:$0xff]  ;;  %v70_v32 = vld [vmem:[%s10545_s1 + $0x108] sm:$0xff]  ;;  %v6661_v34 = vcombine.low %v61_v22, %v65_v23  ;;  %v6663_v35 = vcombine.low %v62_v24, %v66_v25 }
   0xa   :  { %1638 = vmatpush1.bf16.msra.mxu0 %v6645_v18  ;;  %1724 = vmatpush1.bf16.msra.mxu1 %v6647_v19  ;;  %v73_v31 = vld [vmem:[%s10545_s1 + $0x120] sm:$0xff]  ;;  %v74_v33 = vld [vmem:[%s10545_s1 + $0x128] sm:$0xff] }
   0xb   :  { %1639 = vmatprep.subr.bf16.mxu0 %v6654_v20  ;;  %1725 = vmatprep.subr.bf16.mxu1 %v6656_v21  ;;  %v6670_v36 = vcombine.high %v69_v30, %v73_v31  ;;  %v6672_v37 = vcombine.high %v70_v32, %v74_v33  ;;  %v77_v38 = vld [vmem:[%s10545_s1 + $0x140] sm:$0xff]  ;;  %v78_v40 = vld [vmem:[%s10545_s1 + $0x148] sm:$0xff]  ;;  %v6669_v42 = vcombine.low %v69_v30, %v73_v31 }
   0xc   :  { %v81_v39 = vld [vmem:[%s10545_s1 + $0x160] sm:$0xff]  ;;  %v82_v41 = vld [vmem:[%s10545_s1 + $0x168] sm:$0xff]  ;;  %v6671_v43 = vcombine.low %v70_v32, %v74_v33 }
   0xd   :  { %v6678_v44 = vcombine.high %v77_v38, %v81_v39  ;;  %v6680_v45 = vcombine.high %v78_v40, %v82_v41  ;;  %v85_v46 = vld [vmem:[%s10545_s1 + $0x180] sm:$0xff]  ;;  %v86_v48 = vld [vmem:[%s10545_s1 + $0x188] sm:$0xff]  ;;  %v6677_v50 = vcombine.low %v77_v38, %v81_v39  ;;  %v6679_v51 = vcombine.low %v78_v40, %v82_v41 }
   0xe   :  { %1640 = vmatpush1.bf16.msra.mxu0 %v6653_v26  ;;  %1726 = vmatpush1.bf16.msra.mxu1 %v6655_v27  ;;  %v89_v47 = vld [vmem:[%s10545_s1 + $0x1a0] sm:$0xff]  ;;  %v90_v49 = vld [vmem:[%s10545_s1 + $0x1a8] sm:$0xff] }
   0xf   :  { %1641 = vmatprep.subr.bf16.mxu0 %v6662_v28  ;;  %1727 = vmatprep.subr.bf16.mxu1 %v6664_v29  ;;  %v6686_v52 = vcombine.high %v85_v46, %v89_v47  ;;  %v6688_v53 = vcombine.high %v86_v48, %v90_v49  ;;  %v93_v54 = vld [vmem:[%s10545_s1 + $0x1c0] sm:$0xff]  ;;  %v94_v57 = vld [vmem:[%s10545_s1 + $0x1c8] sm:$0xff]  ;;  %v6685_v59 = vcombine.low %v85_v46, %v89_v47 }
  0x10   :  { %v97_v55 = vld [vmem:[%s10545_s1 + $0x1e0] sm:$0xff]  ;;  %v98_v58 = vld [vmem:[%s10545_s1 + $0x1e8] sm:$0xff]  ;;  %v6687_v60 = vcombine.low %v86_v48, %v90_v49 }
  0x11   :  { %v7917_v56 = vld [vmem:[%s10546_s0 + $0x4] ss:$16 sps:$4 sm:$0xff]   ;;  %v6694_v61 = vcombine.high %v93_v54, %v97_v55  ;;  %v6696_v62 = vcombine.high %v94_v57, %v98_v58  ;;  %v102_v1 = vld [vmem:[%s10545_s1 + $0x208] sm:$0xff]  ;;  %v6693_v3 = vcombine.low %v93_v54, %v97_v55  ;;  %v6695_v4 = vcombine.low %v94_v57, %v98_v58 }
  0x12   :  { %1642 = vmatpush1.bf16.msra.mxu0 %v6661_v34  ;;  %1728 = vmatpush1.bf16.msra.mxu1 %v6663_v35  ;;  %v101_v63 = vld [vmem:[%s10545_s1 + $0x200] sm:$0xff]  ;;  %v106_v2 = vld [vmem:[%s10545_s1 + $0x228] sm:$0xff] }
  0x13   :  { %1643 = vmatprep.subr.bf16.mxu0 %v6670_v36  ;;  %1729 = vmatprep.subr.bf16.mxu1 %v6672_v37  ;;  %v105_v0 = vld [vmem:[%s10545_s1 + $0x220] sm:$0xff]  ;;  %v6704_v6 = vcombine.high %v102_v1, %v106_v2  ;;  %v110_v9 = vld [vmem:[%s10545_s1 + $0x248] sm:$0xff]  ;;  %v6703_v12 = vcombine.low %v102_v1, %v106_v2 }
  0x14   :  { %1667 = vmatprep.mubr.bf16.mxu0 %v7917_v56  ;;  %1753 = vmatprep.mubr.bf16.mxu1 %v7917_v56  ;;  %v6702_v5 = vcombine.high %v101_v63, %v105_v0  ;;  %v109_v7 = vld [vmem:[%s10545_s1 + $0x240] sm:$0xff]  ;;  %v114_v10 = vld [vmem:[%s10545_s1 + $0x268] sm:$0xff]  ;;  %v6701_v11 = vcombine.low %v101_v63, %v105_v0 }
  0x15   :  { %v113_v8 = vld [vmem:[%s10545_s1 + $0x260] sm:$0xff]  ;;  %v6712_v14 = vcombine.high %v110_v9, %v114_v10  ;;  %v118_v17 = vld [vmem:[%s10545_s1 + $0x288] sm:$0xff]  ;;  %v6711_v20 = vcombine.low %v110_v9, %v114_v10 }
  0x16   :  { %1644 = vmatpush1.bf16.msra.mxu0 %v6669_v42  ;;  %1730 = vmatpush1.bf16.msra.mxu1 %v6671_v43  ;;  %v6710_v13 = vcombine.high %v109_v7, %v113_v8  ;;  %v117_v15 = vld [vmem:[%s10545_s1 + $0x280] sm:$0xff]  ;;  %v122_v18 = vld [vmem:[%s10545_s1 + $0x2a8] sm:$0xff]  ;;  %v6709_v19 = vcombine.low %v109_v7, %v113_v8 }
  0x17   :  { %1645 = vmatprep.subr.bf16.mxu0 %v6678_v44  ;;  %1731 = vmatprep.subr.bf16.mxu1 %v6680_v45  ;;  %v121_v16 = vld [vmem:[%s10545_s1 + $0x2a0] sm:$0xff]  ;;  %v6720_v22 = vcombine.high %v118_v17, %v122_v18  ;;  %v126_v25 = vld [vmem:[%s10545_s1 + $0x2c8] sm:$0xff]  ;;  %v6719_v28 = vcombine.low %v118_v17, %v122_v18 }
  0x18   :  { %v6718_v21 = vcombine.high %v117_v15, %v121_v16  ;;  %v125_v23 = vld [vmem:[%s10545_s1 + $0x2c0] sm:$0xff]  ;;  %v130_v26 = vld [vmem:[%s10545_s1 + $0x2e8] sm:$0xff]  ;;  %v6717_v27 = vcombine.low %v117_v15, %v121_v16 }
  0x19   :  { %v129_v24 = vld [vmem:[%s10545_s1 + $0x2e0] sm:$0xff]  ;;  %v6728_v30 = vcombine.high %v126_v25, %v130_v26  ;;  %v134_v33 = vld [vmem:[%s10545_s1 + $0x308] sm:$0xff]  ;;  %v6727_v36 = vcombine.low %v126_v25, %v130_v26 }
  0x1a   :  { %1646 = vmatpush1.bf16.msra.mxu0 %v6677_v50  ;;  %1732 = vmatpush1.bf16.msra.mxu1 %v6679_v51  ;;  %v6726_v29 = vcombine.high %v125_v23, %v129_v24  ;;  %v133_v31 = vld [vmem:[%s10545_s1 + $0x300] sm:$0xff]  ;;  %v138_v34 = vld [vmem:[%s10545_s1 + $0x328] sm:$0xff]  ;;  %v6725_v35 = vcombine.low %v125_v23, %v129_v24 }
  0x1b   :  { %1647 = vmatprep.subr.bf16.mxu0 %v6686_v52  ;;  %1733 = vmatprep.subr.bf16.mxu1 %v6688_v53  ;;  %v137_v32 = vld [vmem:[%s10545_s1 + $0x320] sm:$0xff]  ;;  %v6736_v38 = vcombine.high %v134_v33, %v138_v34  ;;  %v142_v41 = vld [vmem:[%s10545_s1 + $0x348] sm:$0xff]  ;;  %v6735_v44 = vcombine.low %v134_v33, %v138_v34 }
  0x1c   :  { %v6734_v37 = vcombine.high %v133_v31, %v137_v32  ;;  %v141_v39 = vld [vmem:[%s10545_s1 + $0x340] sm:$0xff]  ;;  %v146_v42 = vld [vmem:[%s10545_s1 + $0x368] sm:$0xff]  ;;  %v6733_v43 = vcombine.low %v133_v31, %v137_v32 }
  0x1d   :  { %v145_v40 = vld [vmem:[%s10545_s1 + $0x360] sm:$0xff]  ;;  %v6744_v46 = vcombine.high %v142_v41, %v146_v42  ;;  %v150_v49 = vld [vmem:[%s10545_s1 + $0x388] sm:$0xff]  ;;  %v6743_v52 = vcombine.low %v142_v41, %v146_v42 }
  0x1e   :  { %1648 = vmatpush1.bf16.msra.mxu0 %v6685_v59  ;;  %1734 = vmatpush1.bf16.msra.mxu1 %v6687_v60  ;;  %v6742_v45 = vcombine.high %v141_v39, %v145_v40  ;;  %v149_v47 = vld [vmem:[%s10545_s1 + $0x380] sm:$0xff]  ;;  %v154_v50 = vld [vmem:[%s10545_s1 + $0x3a8] sm:$0xff]  ;;  %v6741_v51 = vcombine.low %v141_v39, %v145_v40 }
  0x1f   :  { %1649 = vmatprep.subr.bf16.mxu0 %v6694_v61  ;;  %1735 = vmatprep.subr.bf16.mxu1 %v6696_v62  ;;  %v153_v48 = vld [vmem:[%s10545_s1 + $0x3a0] sm:$0xff]  ;;  %v6752_v54 = vcombine.high %v150_v49, %v154_v50  ;;  %v158_v58 = vld [vmem:[%s10545_s1 + $0x3c8] sm:$0xff]  ;;  %v6751_v61 = vcombine.low %v150_v49, %v154_v50 }
  0x20   :  { %v6750_v53 = vcombine.high %v149_v47, %v153_v48  ;;  %v157_v55 = vld [vmem:[%s10545_s1 + $0x3c0] sm:$0xff]  ;;  %v162_v59 = vld [vmem:[%s10545_s1 + $0x3e8] sm:$0xff]  ;;  %v6749_v60 = vcombine.low %v149_v47, %v153_v48 }
  0x21   :  { %v161_v57 = vld [vmem:[%s10545_s1 + $0x3e0] sm:$0xff]  ;;  %v6760_v63 = vcombine.high %v158_v58, %v162_v59  ;;  %v166_v2 = vld [vmem:[%s10545_s1 + $0x408] sm:$0xff] }
  0x22   :  { %1650 = vmatpush1.bf16.msra.mxu0 %v6693_v3  ;;  %1736 = vmatpush1.bf16.msra.mxu1 %v6695_v4  ;;  %v6758_v62 = vcombine.high %v157_v55, %v161_v57  ;;  %v165_v0 = vld [vmem:[%s10545_s1 + $0x400] sm:$0xff]  ;;  %v170_v3 = vld [vmem:[%s10545_s1 + $0x428] sm:$0xff]  ;;  %v6757_v4 = vcombine.low %v157_v55, %v161_v57 }
  0x23   :  { %1651 = vmatprep.subr.bf16.mxu0 %v6702_v5  ;;  %1737 = vmatprep.subr.bf16.mxu1 %v6704_v6  ;;  %v169_v1 = vld [vmem:[%s10545_s1 + $0x420] sm:$0xff]  ;;  %v6759_v5 = vcombine.low %v158_v58, %v162_v59  ;;  %v6768_v7 = vcombine.high %v166_v2, %v170_v3 }
  0x24   :  { %v6766_v6 = vcombine.high %v165_v0, %v169_v1  ;;  %v173_v8 = vld [vmem:[%s10545_s1 + $0x440] sm:$0xff] }
  0x25   :  { %v177_v9 = vld [vmem:[%s10545_s1 + $0x460] sm:$0xff] }
  0x26   :  { %1652 = vmatpush1.bf16.msra.mxu0 %v6701_v11  ;;  %1738 = vmatpush1.bf16.msra.mxu1 %v6703_v12  ;;  %v8044_v10 = vld [vmem:[%s10546_s0] ss:$16 sps:$4 sm:$0xff]   ;;  %v174_v11 = vld [vmem:[%s10545_s1 + $0x448] sm:$0xff]  ;;  %v6774_v15 = vcombine.high %v173_v8, %v177_v9 }
  0x27   :  { %1653 = vmatprep.subr.bf16.mxu0 %v6710_v13  ;;  %1739 = vmatprep.subr.bf16.mxu1 %v6712_v14  ;;  %v178_v12 = vld [vmem:[%s10545_s1 + $0x468] sm:$0xff]  ;;  %v6765_v13 = vcombine.low %v165_v0, %v169_v1  ;;  %v6767_v14 = vcombine.low %v166_v2, %v170_v3  ;;  %v181_v17 = vld [vmem:[%s10545_s1 + $0x480] sm:$0xff] }
  0x28   :  { %v6776_v16 = vcombine.high %v174_v11, %v178_v12  ;;  %v185_v18 = vld [vmem:[%s10545_s1 + $0x4a0] sm:$0xff]  ;;  %v6775_v23 = vcombine.low %v174_v11, %v178_v12 }
  0x29   :  { %v6782_v24 = vcombine.high %v181_v17, %v185_v18  ;;  %v189_v26 = vld [vmem:[%s10545_s1 + $0x4c0] sm:$0xff] }
  0x2a   :  { %1654 = vmatpush1.bf16.msra.mxu0 %v6709_v19  ;;  %1740 = vmatpush1.bf16.msra.mxu1 %v6711_v20  ;;  %v8061_v19 = vld [vmem:[%s10546_s0 + $0xc] ss:$16 sps:$4 sm:$0xff]   ;;  %v197_v34 = vld [vmem:[%s10545_s1 + $0x500] sm:$0xff] }
  0x2b   :  { %1655 = vmatprep.subr.bf16.mxu0 %v6718_v21  ;;  %1741 = vmatprep.subr.bf16.mxu1 %v6720_v22  ;;  %v182_v20 = vld [vmem:[%s10545_s1 + $0x488] sm:$0xff]  ;;  %v6773_v22 = vcombine.low %v173_v8, %v177_v9  ;;  %v205_v42 = vld [vmem:[%s10545_s1 + $0x540] sm:$0xff] }
  0x2c   :  { %v186_v21 = vld [vmem:[%s10545_s1 + $0x4a8] sm:$0xff]  ;;  %v213_v50 = vld [vmem:[%s10545_s1 + $0x580] sm:$0xff] }
  0x2d   :  { %v6784_v25 = vcombine.high %v182_v20, %v186_v21  ;;  %v6783_v31 = vcombine.low %v182_v20, %v186_v21  ;;  %v221_v59 = vld [vmem:[%s10545_s1 + $0x5c0] sm:$0xff] }
  0x2e   :  { %1656 = vmatpush1.bf16.msra.mxu0 %v6717_v27  ;;  %1742 = vmatpush1.bf16.msra.mxu1 %v6719_v28  ;;  %v193_v27 = vld [vmem:[%s10545_s1 + $0x4e0] sm:$0xff]  ;;  %v190_v28 = vld [vmem:[%s10545_s1 + $0x4c8] sm:$0xff] }
  0x2f   :  { %1657 = vmatprep.subr.bf16.mxu0 %v6726_v29  ;;  %1743 = vmatprep.subr.bf16.mxu1 %v6728_v30  ;;  %v194_v29 = vld [vmem:[%s10545_s1 + $0x4e8] sm:$0xff]  ;;  %v6781_v30 = vcombine.low %v181_v17, %v185_v18  ;;  %v6790_v32 = vcombine.high %v189_v26, %v193_v27  ;;  %v229_v3 = vld [vmem:[%s10545_s1 + $0x600] sm:$0xff] }
  0x30   :  { %v6792_v33 = vcombine.high %v190_v28, %v194_v29  ;;  %v6791_v39 = vcombine.low %v190_v28, %v194_v29  ;;  %v237_v12 = vld [vmem:[%s10545_s1 + $0x640] sm:$0xff] }
  0x31   :  { %v245_v21 = vld [vmem:[%s10545_s1 + $0x680] sm:$0xff] }
  0x32   :  { %1658 = vmatpush1.bf16.msra.mxu0 %v6725_v35  ;;  %1744 = vmatpush1.bf16.msra.mxu1 %v6727_v36  ;;  %v201_v35 = vld [vmem:[%s10545_s1 + $0x520] sm:$0xff]  ;;  %v198_v36 = vld [vmem:[%s10545_s1 + $0x508] sm:$0xff] }
  0x33   :  { %1659 = vmatprep.subr.bf16.mxu0 %v6734_v37  ;;  %1745 = vmatprep.subr.bf16.mxu1 %v6736_v38  ;;  %v202_v37 = vld [vmem:[%s10545_s1 + $0x528] sm:$0xff]  ;;  %v6789_v38 = vcombine.low %v189_v26, %v193_v27  ;;  %v6798_v40 = vcombine.high %v197_v34, %v201_v35  ;;  %v253_v29 = vld [vmem:[%s10545_s1 + $0x6c0] sm:$0xff] }
  0x34   :  { %v6800_v41 = vcombine.high %v198_v36, %v202_v37  ;;  %v6799_v47 = vcombine.low %v198_v36, %v202_v37  ;;  %v261_v37 = vld [vmem:[%s10545_s1 + $0x700] sm:$0xff] }
  0x36   :  { %1660 = vmatpush1.bf16.msra.mxu0 %v6733_v43  ;;  %1746 = vmatpush1.bf16.msra.mxu1 %v6735_v44  ;;  %v209_v43 = vld [vmem:[%s10545_s1 + $0x560] sm:$0xff]  ;;  %v206_v44 = vld [vmem:[%s10545_s1 + $0x548] sm:$0xff] }
  0x37   :  { %1661 = vmatprep.subr.bf16.mxu0 %v6742_v45  ;;  %1747 = vmatprep.subr.bf16.mxu1 %v6744_v46  ;;  %v210_v45 = vld [vmem:[%s10545_s1 + $0x568] sm:$0xff]  ;;  %v6797_v46 = vcombine.low %v197_v34, %v201_v35  ;;  %v6806_v48 = vcombine.high %v205_v42, %v209_v43 }
  0x38   :  { %v6808_v49 = vcombine.high %v206_v44, %v210_v45  ;;  %v6807_v55 = vcombine.low %v206_v44, %v210_v45  ;;  %v269_v45 = vld [vmem:[%s10545_s1 + $0x740] sm:$0xff] }
  0x3a   :  { %1662 = vmatpush1.bf16.msra.mxu0 %v6741_v51  ;;  %1748 = vmatpush1.bf16.msra.mxu1 %v6743_v52  ;;  %v217_v51 = vld [vmem:[%s10545_s1 + $0x5a0] sm:$0xff]  ;;  %v214_v52 = vld [vmem:[%s10545_s1 + $0x588] sm:$0xff] }
  0x3b   :  { %1663 = vmatprep.subr.bf16.mxu0 %v6750_v53  ;;  %1749 = vmatprep.subr.bf16.mxu1 %v6752_v54  ;;  %v218_v53 = vld [vmem:[%s10545_s1 + $0x5a8] sm:$0xff]  ;;  %v6805_v54 = vcombine.low %v205_v42, %v209_v43  ;;  %v6814_v57 = vcombine.high %v213_v50, %v217_v51 }
  0x3c   :  { %v6816_v58 = vcombine.high %v214_v52, %v218_v53  ;;  %v6815_v0 = vcombine.low %v214_v52, %v218_v53  ;;  %v277_v53 = vld [vmem:[%s10545_s1 + $0x780] sm:$0xff] }
  0x3e   :  { %1664 = vmatpush1.bf16.msra.mxu0 %v6749_v60  ;;  %1750 = vmatpush1.bf16.msra.mxu1 %v6751_v61  ;;  %v225_v60 = vld [vmem:[%s10545_s1 + $0x5e0] sm:$0xff]  ;;  %v222_v61 = vld [vmem:[%s10545_s1 + $0x5c8] sm:$0xff] }
  0x3f   :  { %1665 = vmatprep.subr.bf16.mxu0 %v6758_v62  ;;  %1751 = vmatprep.subr.bf16.mxu1 %v6760_v63  ;;  %v226_v62 = vld [vmem:[%s10545_s1 + $0x5e8] sm:$0xff]  ;;  %v6813_v63 = vcombine.low %v213_v50, %v217_v51  ;;  %v6822_v1 = vcombine.high %v221_v59, %v225_v60 }
  0x40   :  { %v6824_v2 = vcombine.high %v222_v61, %v226_v62  ;;  %v6823_v8 = vcombine.low %v222_v61, %v226_v62  ;;  %v285_v62 = vld [vmem:[%s10545_s1 + $0x7c0] sm:$0xff] }
  0x42   :  { %1666 = vmatpush1.bf16.msra.mxu0 %v6757_v4  ;;  %1752 = vmatpush1.bf16.msra.mxu1 %v6759_v5  ;;  %v233_v4 = vld [vmem:[%s10545_s1 + $0x620] sm:$0xff]  ;;  %v230_v5 = vld [vmem:[%s10545_s1 + $0x608] sm:$0xff] }
  0x43   :  { %1678 = vmatprep.subr.bf16.mxu0 %v6766_v6  ;;  %1764 = vmatprep.subr.bf16.mxu1 %v6768_v7  ;;  %v234_v6 = vld [vmem:[%s10545_s1 + $0x628] sm:$0xff]  ;;  %v6821_v7 = vcombine.low %v221_v59, %v225_v60  ;;  %v6830_v9 = vcombine.high %v229_v3, %v233_v4 }
  0x44   :  { %v6832_v11 = vcombine.high %v230_v5, %v234_v6  ;;  %v6831_v17 = vcombine.low %v230_v5, %v234_v6  ;;  %v39_v6 = vld [vmem:[%s10545_s1 + $0x10] sm:$0xff] }
  0x45   :  { %1668 = vmatmul.mubr.bf16.vlgmr.msra.gmra.mrb[0].mxu0 %v8044_v10  ;;  %1754 = vmatmul.mubr.bf16.vlgmr.msra.gmra.mrb[0].mxu1 %v8044_v10 }
  0x46   :  { %1679 = vmatpush1.bf16.msra.mxu0 %v6765_v13  ;;  %1765 = vmatpush1.bf16.msra.mxu1 %v6767_v14  ;;  %v241_v13 = vld [vmem:[%s10545_s1 + $0x660] sm:$0xff]  ;;  %v238_v14 = vld [vmem:[%s10545_s1 + $0x648] sm:$0xff] }
  0x47   :  { %1680 = vmatprep.subr.bf16.mxu0 %v6774_v15  ;;  %1766 = vmatprep.subr.bf16.mxu1 %v6776_v16  ;;  %v242_v15 = vld [vmem:[%s10545_s1 + $0x668] sm:$0xff]  ;;  %v6829_v16 = vcombine.low %v229_v3, %v233_v4  ;;  %v6838_v18 = vcombine.high %v237_v12, %v241_v13 }
  0x48   :  { %1710 = vmatprep.mubr.bf16.mxu0 %v8061_v19  ;;  %1796 = vmatprep.mubr.bf16.mxu1 %v8061_v19  ;;  %v6840_v20 = vcombine.high %v238_v14, %v242_v15  ;;  %v6839_v26 = vcombine.low %v238_v14, %v242_v15  ;;  %v47_v15 = vld [vmem:[%s10545_s1 + $0x50] sm:$0xff] }
  0x4a   :  { %1681 = vmatpush1.bf16.msra.mxu0 %v6773_v22  ;;  %1767 = vmatpush1.bf16.msra.mxu1 %v6775_v23  ;;  %v249_v22 = vld [vmem:[%s10545_s1 + $0x6a0] sm:$0xff]  ;;  %v246_v23 = vld [vmem:[%s10545_s1 + $0x688] sm:$0xff] }
  0x4b   :  { %1682 = vmatprep.subr.bf16.mxu0 %v6782_v24  ;;  %1768 = vmatprep.subr.bf16.mxu1 %v6784_v25  ;;  %v250_v24 = vld [vmem:[%s10545_s1 + $0x6a8] sm:$0xff]  ;;  %v6837_v25 = vcombine.low %v237_v12, %v241_v13  ;;  %v6846_v27 = vcombine.high %v245_v21, %v249_v22 }
  0x4c   :  { %v6848_v28 = vcombine.high %v246_v23, %v250_v24  ;;  %v6847_v34 = vcombine.low %v246_v23, %v250_v24 }
  0x4e   :  { %1683 = vmatpush1.bf16.msra.mxu0 %v6781_v30  ;;  %1769 = vmatpush1.bf16.msra.mxu1 %v6783_v31  ;;  %v257_v30 = vld [vmem:[%s10545_s1 + $0x6e0] sm:$0xff]  ;;  %v254_v31 = vld [vmem:[%s10545_s1 + $0x6c8] sm:$0xff] }
  0x4f   :  { %1684 = vmatprep.subr.bf16.mxu0 %v6790_v32  ;;  %1770 = vmatprep.subr.bf16.mxu1 %v6792_v33  ;;  %v258_v32 = vld [vmem:[%s10545_s1 + $0x6e8] sm:$0xff]  ;;  %v6845_v33 = vcombine.low %v245_v21, %v249_v22  ;;  %v6854_v35 = vcombine.high %v253_v29, %v257_v30 }
  0x50   :  { %v6856_v36 = vcombine.high %v254_v31, %v258_v32  ;;  %v6855_v42 = vcombine.low %v254_v31, %v258_v32 }
  0x52   :  { %1685 = vmatpush1.bf16.msra.mxu0 %v6789_v38  ;;  %1771 = vmatpush1.bf16.msra.mxu1 %v6791_v39  ;;  %v265_v38 = vld [vmem:[%s10545_s1 + $0x720] sm:$0xff]  ;;  %v262_v39 = vld [vmem:[%s10545_s1 + $0x708] sm:$0xff] }
  0x53   :  { %1686 = vmatprep.subr.bf16.mxu0 %v6798_v40  ;;  %1772 = vmatprep.subr.bf16.mxu1 %v6800_v41  ;;  %v266_v40 = vld [vmem:[%s10545_s1 + $0x728] sm:$0xff]  ;;  %v6853_v41 = vcombine.low %v253_v29, %v257_v30  ;;  %v6862_v43 = vcombine.high %v261_v37, %v265_v38 }
  0x54   :  { %v6864_v44 = vcombine.high %v262_v39, %v266_v40  ;;  %v6863_v50 = vcombine.low %v262_v39, %v266_v40 }
  0x56   :  { %1687 = vmatpush1.bf16.msra.mxu0 %v6797_v46  ;;  %1773 = vmatpush1.bf16.msra.mxu1 %v6799_v47  ;;  %v273_v46 = vld [vmem:[%s10545_s1 + $0x760] sm:$0xff]  ;;  %v270_v47 = vld [vmem:[%s10545_s1 + $0x748] sm:$0xff] }
  0x57   :  { %1688 = vmatprep.subr.bf16.mxu0 %v6806_v48  ;;  %1774 = vmatprep.subr.bf16.mxu1 %v6808_v49  ;;  %v274_v48 = vld [vmem:[%s10545_s1 + $0x768] sm:$0xff]  ;;  %v6861_v49 = vcombine.low %v261_v37, %v265_v38  ;;  %v6870_v51 = vcombine.high %v269_v45, %v273_v46 }
  0x58   :  { %v6872_v52 = vcombine.high %v270_v47, %v274_v48  ;;  %v6871_v59 = vcombine.low %v270_v47, %v274_v48  ;;  %v79_v48 = vld [vmem:[%s10545_s1 + $0x150] sm:$0xff] }
  0x5a   :  { %1689 = vmatpush1.bf16.msra.mxu0 %v6805_v54  ;;  %1775 = vmatpush1.bf16.msra.mxu1 %v6807_v55  ;;  %v281_v54 = vld [vmem:[%s10545_s1 + $0x7a0] sm:$0xff]  ;;  %v278_v55 = vld [vmem:[%s10545_s1 + $0x788] sm:$0xff] }
  0x5b   :  { %1690 = vmatprep.subr.bf16.mxu0 %v6814_v57  ;;  %1776 = vmatprep.subr.bf16.mxu1 %v6816_v58  ;;  %v282_v57 = vld [vmem:[%s10545_s1 + $0x7a8] sm:$0xff]  ;;  %v6869_v58 = vcombine.low %v269_v45, %v273_v46  ;;  %v6878_v60 = vcombine.high %v277_v53, %v281_v54 }
  0x5c   :  { %v6880_v61 = vcombine.high %v278_v55, %v282_v57  ;;  %v6879_v3 = vcombine.low %v278_v55, %v282_v57  ;;  %v87_v57 = vld [vmem:[%s10545_s1 + $0x190] sm:$0xff] }
  0x5e   :  { %1691 = vmatpush1.bf16.msra.mxu0 %v6813_v63  ;;  %1777 = vmatpush1.bf16.msra.mxu1 %v6815_v0  ;;  %v289_v63 = vld [vmem:[%s10545_s1 + $0x7e0] sm:$0xff]  ;;  %v286_v0 = vld [vmem:[%s10545_s1 + $0x7c8] sm:$0xff] }
  0x5f   :  { %1692 = vmatprep.subr.bf16.mxu0 %v6822_v1  ;;  %1778 = vmatprep.subr.bf16.mxu1 %v6824_v2  ;;  %v290_v1 = vld [vmem:[%s10545_s1 + $0x7e8] sm:$0xff]  ;;  %v6877_v2 = vcombine.low %v277_v53, %v281_v54  ;;  %v6886_v4 = vcombine.high %v285_v62, %v289_v63 }
  0x60   :  { %v6888_v5 = vcombine.high %v286_v0, %v290_v1  ;;  %v6887_v12 = vcombine.low %v286_v0, %v290_v1  ;;  %v95_v1 = vld [vmem:[%s10545_s1 + $0x1d0] sm:$0xff] }
  0x62   :  { %1693 = vmatpush1.bf16.msra.mxu0 %v6821_v7  ;;  %1779 = vmatpush1.bf16.msra.mxu1 %v6823_v8  ;;  %v43_v7 = vld [vmem:[%s10545_s1 + $0x30] sm:$0xff]  ;;  %v40_v8 = vld [vmem:[%s10545_s1 + $0x18] sm:$0xff] }
  0x63   :  { %1694 = vmatprep.subr.bf16.mxu0 %v6830_v9  ;;  %1780 = vmatprep.subr.bf16.mxu1 %v6832_v11  ;;  %v44_v9 = vld [vmem:[%s10545_s1 + $0x38] sm:$0xff]  ;;  %v6885_v11 = vcombine.low %v285_v62, %v289_v63  ;;  %v6642_v13 = vcombine.high %v39_v6, %v43_v7  ;;  %v6641_v21 = vcombine.low %v39_v6, %v43_v7 }
  0x64   :  { %v6644_v14 = vcombine.high %v40_v8, %v44_v9  ;;  %v6643_v22 = vcombine.low %v40_v8, %v44_v9  ;;  %v103_v9 = vld [vmem:[%s10545_s1 + $0x210] sm:$0xff] }
  0x66   :  { %1695 = vmatpush1.bf16.msra.mxu0 %v6829_v16  ;;  %1781 = vmatpush1.bf16.msra.mxu1 %v6831_v17  ;;  %v51_v16 = vld [vmem:[%s10545_s1 + $0x70] sm:$0xff]  ;;  %v8250_v17 = vld [vmem:[%s10546_s0 + $0x8] ss:$16 sps:$4 sm:$0xff]  }
  0x67   :  { %1696 = vmatprep.subr.bf16.mxu0 %v6838_v18  ;;  %1782 = vmatprep.subr.bf16.mxu1 %v6840_v20  ;;  %v48_v18 = vld [vmem:[%s10545_s1 + $0x58] sm:$0xff]  ;;  %v6650_v23 = vcombine.high %v47_v15, %v51_v16  ;;  %v6649_v29 = vcombine.low %v47_v15, %v51_v16 }
  0x68   :  { %v52_v20 = vld [vmem:[%s10545_s1 + $0x78] sm:$0xff] }
  0x69   :  { %v6652_v24 = vcombine.high %v48_v18, %v52_v20  ;;  %v6651_v30 = vcombine.low %v48_v18, %v52_v20  ;;  %v111_v20 = vld [vmem:[%s10545_s1 + $0x250] sm:$0xff] }
  0x6a   :  { %1697 = vmatpush1.bf16.msra.mxu0 %v6837_v25  ;;  %1783 = vmatpush1.bf16.msra.mxu1 %v6839_v26  ;;  %v55_v25 = vld [vmem:[%s10545_s1 + $0x90] sm:$0xff] }
  0x6b   :  { %1698 = vmatprep.subr.bf16.mxu0 %v6846_v27  ;;  %1784 = vmatprep.subr.bf16.mxu1 %v6848_v28  ;;  %v59_v26 = vld [vmem:[%s10545_s1 + $0xb0] sm:$0xff]  ;;  %v56_v27 = vld [vmem:[%s10545_s1 + $0x98] sm:$0xff] }
  0x6c   :  { %v60_v28 = vld [vmem:[%s10545_s1 + $0xb8] sm:$0xff]  ;;  %v6658_v31 = vcombine.high %v55_v25, %v59_v26  ;;  %v6657_v37 = vcombine.low %v55_v25, %v59_v26 }
  0x6d   :  { %v6660_v32 = vcombine.high %v56_v27, %v60_v28  ;;  %v6659_v38 = vcombine.low %v56_v27, %v60_v28  ;;  %v119_v28 = vld [vmem:[%s10545_s1 + $0x290] sm:$0xff] }
  0x6e   :  { %1699 = vmatpush1.bf16.msra.mxu0 %v6845_v33  ;;  %1785 = vmatpush1.bf16.msra.mxu1 %v6847_v34  ;;  %v63_v33 = vld [vmem:[%s10545_s1 + $0xd0] sm:$0xff] }
  0x6f   :  { %1700 = vmatprep.subr.bf16.mxu0 %v6854_v35  ;;  %1786 = vmatprep.subr.bf16.mxu1 %v6856_v36  ;;  %v67_v34 = vld [vmem:[%s10545_s1 + $0xf0] sm:$0xff]  ;;  %v64_v35 = vld [vmem:[%s10545_s1 + $0xd8] sm:$0xff] }
  0x70   :  { %v68_v36 = vld [vmem:[%s10545_s1 + $0xf8] sm:$0xff]  ;;  %v6666_v39 = vcombine.high %v63_v33, %v67_v34 }
  0x71   :  { %v6668_v40 = vcombine.high %v64_v35, %v68_v36  ;;  %v6667_v45 = vcombine.low %v64_v35, %v68_v36  ;;  %v127_v36 = vld [vmem:[%s10545_s1 + $0x2d0] sm:$0xff] }
  0x72   :  { %1701 = vmatpush1.bf16.msra.mxu0 %v6853_v41  ;;  %1787 = vmatpush1.bf16.msra.mxu1 %v6855_v42  ;;  %v71_v41 = vld [vmem:[%s10545_s1 + $0x110] sm:$0xff] }
  0x73   :  { %1702 = vmatprep.subr.bf16.mxu0 %v6862_v43  ;;  %1788 = vmatprep.subr.bf16.mxu1 %v6864_v44  ;;  %v75_v42 = vld [vmem:[%s10545_s1 + $0x130] sm:$0xff]  ;;  %v76_v43 = vld [vmem:[%s10545_s1 + $0x138] sm:$0xff]  ;;  %v6665_v44 = vcombine.low %v63_v33, %v67_v34 }
  0x74   :  { %v6674_v46 = vcombine.high %v71_v41, %v75_v42 }
  0x76   :  { %1703 = vmatpush1.bf16.msra.mxu0 %v6861_v49  ;;  %1789 = vmatpush1.bf16.msra.mxu1 %v6863_v50  ;;  %v83_v49 = vld [vmem:[%s10545_s1 + $0x170] sm:$0xff]  ;;  %v80_v50 = vld [vmem:[%s10545_s1 + $0x158] sm:$0xff] }
  0x77   :  { %1704 = vmatprep.subr.bf16.mxu0 %v6870_v51  ;;  %1790 = vmatprep.subr.bf16.mxu1 %v6872_v52  ;;  %v84_v51 = vld [vmem:[%s10545_s1 + $0x178] sm:$0xff]  ;;  %v6673_v52 = vcombine.low %v71_v41, %v75_v42  ;;  %v6682_v54 = vcombine.high %v79_v48, %v83_v49 }
  0x78   :  { %v6684_v55 = vcombine.high %v80_v50, %v84_v51  ;;  %v6683_v62 = vcombine.low %v80_v50, %v84_v51  ;;  %v143_v51 = vld [vmem:[%s10545_s1 + $0x350] sm:$0xff] }
  0x7a   :  { %1705 = vmatpush1.bf16.msra.mxu0 %v6869_v58  ;;  %1791 = vmatpush1.bf16.msra.mxu1 %v6871_v59  ;;  %v91_v58 = vld [vmem:[%s10545_s1 + $0x1b0] sm:$0xff]  ;;  %v88_v59 = vld [vmem:[%s10545_s1 + $0x198] sm:$0xff] }
  0x7b   :  { %1706 = vmatprep.subr.bf16.mxu0 %v6878_v60  ;;  %1792 = vmatprep.subr.bf16.mxu1 %v6880_v61  ;;  %v92_v60 = vld [vmem:[%s10545_s1 + $0x1b8] sm:$0xff]  ;;  %v6681_v61 = vcombine.low %v79_v48, %v83_v49  ;;  %v6690_v63 = vcombine.high %v87_v57, %v91_v58 }
  0x7c   :  { %v6692_v0 = vcombine.high %v88_v59, %v92_v60  ;;  %v6691_v6 = vcombine.low %v88_v59, %v92_v60  ;;  %v151_v60 = vld [vmem:[%s10545_s1 + $0x390] sm:$0xff] }
  0x7e   :  { %1707 = vmatpush1.bf16.msra.mxu0 %v6877_v2  ;;  %1793 = vmatpush1.bf16.msra.mxu1 %v6879_v3  ;;  %v99_v2 = vld [vmem:[%s10545_s1 + $0x1f0] sm:$0xff]  ;;  %v96_v3 = vld [vmem:[%s10545_s1 + $0x1d8] sm:$0xff] }
  0x7f   :  { %1708 = vmatprep.subr.bf16.mxu0 %v6886_v4  ;;  %1794 = vmatprep.subr.bf16.mxu1 %v6888_v5  ;;  %v100_v4 = vld [vmem:[%s10545_s1 + $0x1f8] sm:$0xff]  ;;  %v6689_v5 = vcombine.low %v87_v57, %v91_v58  ;;  %v6698_v7 = vcombine.high %v95_v1, %v99_v2 }
  0x80   :  { %v6700_v8 = vcombine.high %v96_v3, %v100_v4  ;;  %v6699_v15 = vcombine.low %v96_v3, %v100_v4  ;;  %v159_v4 = vld [vmem:[%s10545_s1 + $0x3d0] sm:$0xff] }
  0x82   :  { %1709 = vmatpush1.bf16.msra.mxu0 %v6885_v11  ;;  %1795 = vmatpush1.bf16.msra.mxu1 %v6887_v12  ;;  %v107_v11 = vld [vmem:[%s10545_s1 + $0x230] sm:$0xff]  ;;  %v104_v12 = vld [vmem:[%s10545_s1 + $0x218] sm:$0xff] }
  0x83   :  { %1807 = vmatprep.subr.bf16.mxu0 %v6642_v13  ;;  %1893 = vmatprep.subr.bf16.mxu1 %v6644_v14  ;;  %v108_v13 = vld [vmem:[%s10545_s1 + $0x238] sm:$0xff]  ;;  %v6697_v14 = vcombine.low %v95_v1, %v99_v2  ;;  %v6706_v16 = vcombine.high %v103_v9, %v107_v11 }
  0x84   :  { %v6708_v18 = vcombine.high %v104_v12, %v108_v13  ;;  %v6707_v25 = vcombine.low %v104_v12, %v108_v13  ;;  %v167_v13 = vld [vmem:[%s10545_s1 + $0x410] sm:$0xff] }
  0x85   :  { %1711 = vmatmul.mubr.bf16.vlgmr.msra.gmra.mrb[0].mxu0 %v8250_v17  ;;  %1797 = vmatmul.mubr.bf16.vlgmr.msra.gmra.mrb[0].mxu1 %v8250_v17 }
  0x86   :  { %1808 = vmatpush1.bf16.msra.mxu0 %v6641_v21  ;;  %1894 = vmatpush1.bf16.msra.mxu1 %v6643_v22  ;;  %v115_v21 = vld [vmem:[%s10545_s1 + $0x270] sm:$0xff]  ;;  %v112_v22 = vld [vmem:[%s10545_s1 + $0x258] sm:$0xff] }
  0x87   :  { %1809 = vmatprep.subr.bf16.mxu0 %v6650_v23  ;;  %1895 = vmatprep.subr.bf16.mxu1 %v6652_v24  ;;  %v116_v23 = vld [vmem:[%s10545_s1 + $0x278] sm:$0xff]  ;;  %v6705_v24 = vcombine.low %v103_v9, %v107_v11  ;;  %v6714_v26 = vcombine.high %v111_v20, %v115_v21 }
  0x88   :  { %1839 = vmatprep.mubr.bf16.mxu0 %v7917_v56  ;;  %1925 = vmatprep.mubr.bf16.mxu1 %v7917_v56  ;;  %v72_v56 = vld [vmem:[%s10545_s1 + $0x118] sm:$0xff]  ;;  %v6716_v27 = vcombine.high %v112_v22, %v116_v23  ;;  %v6715_v33 = vcombine.low %v112_v22, %v116_v23  ;;  %v175_v23 = vld [vmem:[%s10545_s1 + $0x450] sm:$0xff] }
  0x89   :  { %v6676_v47 = vcombine.high %v72_v56, %v76_v43  ;;  %v6675_v53 = vcombine.low %v72_v56, %v76_v43  ;;  %v135_v43 = vld [vmem:[%s10545_s1 + $0x310] sm:$0xff] }
  0x8a   :  { %1810 = vmatpush1.bf16.msra.mxu0 %v6649_v29  ;;  %1896 = vmatpush1.bf16.msra.mxu1 %v6651_v30  ;;  %v123_v29 = vld [vmem:[%s10545_s1 + $0x2b0] sm:$0xff]  ;;  %v120_v30 = vld [vmem:[%s10545_s1 + $0x298] sm:$0xff] }
  0x8b   :  { %1811 = vmatprep.subr.bf16.mxu0 %v6658_v31  ;;  %1897 = vmatprep.subr.bf16.mxu1 %v6660_v32  ;;  %v124_v31 = vld [vmem:[%s10545_s1 + $0x2b8] sm:$0xff]  ;;  %v6713_v32 = vcombine.low %v111_v20, %v115_v21  ;;  %v6722_v34 = vcombine.high %v119_v28, %v123_v29 }
  0x8c   :  { %v6724_v35 = vcombine.high %v120_v30, %v124_v31  ;;  %v6723_v41 = vcombine.low %v120_v30, %v124_v31  ;;  %v183_v31 = vld [vmem:[%s10545_s1 + $0x490] sm:$0xff] }
  0x8e   :  { %1812 = vmatpush1.bf16.msra.mxu0 %v6657_v37  ;;  %1898 = vmatpush1.bf16.msra.mxu1 %v6659_v38  ;;  %v131_v37 = vld [vmem:[%s10545_s1 + $0x2f0] sm:$0xff]  ;;  %v128_v38 = vld [vmem:[%s10545_s1 + $0x2d8] sm:$0xff] }
  0x8f   :  { %1813 = vmatprep.subr.bf16.mxu0 %v6666_v39  ;;  %1899 = vmatprep.subr.bf16.mxu1 %v6668_v40  ;;  %v132_v39 = vld [vmem:[%s10545_s1 + $0x2f8] sm:$0xff]  ;;  %v6721_v40 = vcombine.low %v119_v28, %v123_v29  ;;  %v6730_v42 = vcombine.high %v127_v36, %v131_v37 }
  0x90   :  { %v6732_v56 = vcombine.high %v128_v38, %v132_v39  ;;  %v6731_v48 = vcombine.low %v128_v38, %v132_v39  ;;  %v191_v39 = vld [vmem:[%s10545_s1 + $0x4d0] sm:$0xff] }
  0x92   :  { %1814 = vmatpush1.bf16.msra.mxu0 %v6665_v44  ;;  %1900 = vmatpush1.bf16.msra.mxu1 %v6667_v45  ;;  %v139_v44 = vld [vmem:[%s10545_s1 + $0x330] sm:$0xff]  ;;  %v136_v45 = vld [vmem:[%s10545_s1 + $0x318] sm:$0xff] }
  0x93   :  { %1815 = vmatprep.subr.bf16.mxu0 %v6674_v46  ;;  %1901 = vmatprep.subr.bf16.mxu1 %v6676_v47  ;;  %v140_v46 = vld [vmem:[%s10545_s1 + $0x338] sm:$0xff]  ;;  %v6729_v47 = vcombine.low %v127_v36, %v131_v37  ;;  %v6738_v49 = vcombine.high %v135_v43, %v139_v44 }
  0x94   :  { %v6740_v50 = vcombine.high %v136_v45, %v140_v46  ;;  %v6739_v57 = vcombine.low %v136_v45, %v140_v46  ;;  %v199_v45 = vld [vmem:[%s10545_s1 + $0x510] sm:$0xff] }
  0x95   :  { %v203_v46 = vld [vmem:[%s10545_s1 + $0x530] sm:$0xff] }
  0x96   :  { %1816 = vmatpush1.bf16.msra.mxu0 %v6673_v52  ;;  %1902 = vmatpush1.bf16.msra.mxu1 %v6675_v53  ;;  %v147_v52 = vld [vmem:[%s10545_s1 + $0x370] sm:$0xff]  ;;  %v144_v53 = vld [vmem:[%s10545_s1 + $0x358] sm:$0xff] }
  0x97   :  { %1817 = vmatprep.subr.bf16.mxu0 %v6682_v54  ;;  %1903 = vmatprep.subr.bf16.mxu1 %v6684_v55  ;;  %v148_v54 = vld [vmem:[%s10545_s1 + $0x378] sm:$0xff]  ;;  %v6737_v55 = vcombine.low %v135_v43, %v139_v44  ;;  %v6746_v58 = vcombine.high %v143_v51, %v147_v52 }
  0x98   :  { %v6748_v59 = vcombine.high %v144_v53, %v148_v54  ;;  %v6747_v1 = vcombine.low %v144_v53, %v148_v54  ;;  %v211_v53 = vld [vmem:[%s10545_s1 + $0x570] sm:$0xff]  ;;  %v208_v54 = vld [vmem:[%s10545_s1 + $0x558] sm:$0xff] }
  0x9a   :  { %1818 = vmatpush1.bf16.msra.mxu0 %v6681_v61  ;;  %1904 = vmatpush1.bf16.msra.mxu1 %v6683_v62  ;;  %v155_v61 = vld [vmem:[%s10545_s1 + $0x3b0] sm:$0xff]  ;;  %v152_v62 = vld [vmem:[%s10545_s1 + $0x398] sm:$0xff] }
  0x9b   :  { %1819 = vmatprep.subr.bf16.mxu0 %v6690_v63  ;;  %1905 = vmatprep.subr.bf16.mxu1 %v6692_v0  ;;  %v156_v63 = vld [vmem:[%s10545_s1 + $0x3b8] sm:$0xff]  ;;  %v6745_v0 = vcombine.low %v143_v51, %v147_v52  ;;  %v6754_v2 = vcombine.high %v151_v60, %v155_v61  ;;  %v207_v52 = vld [vmem:[%s10545_s1 + $0x550] sm:$0xff] }
  0x9c   :  { %v6756_v3 = vcombine.high %v152_v62, %v156_v63  ;;  %v6755_v9 = vcombine.low %v152_v62, %v156_v63  ;;  %v219_v62 = vld [vmem:[%s10545_s1 + $0x5b0] sm:$0xff]  ;;  %v216_v63 = vld [vmem:[%s10545_s1 + $0x598] sm:$0xff] }
  0x9e   :  { %1820 = vmatpush1.bf16.msra.mxu0 %v6689_v5  ;;  %1906 = vmatpush1.bf16.msra.mxu1 %v6691_v6  ;;  %v163_v5 = vld [vmem:[%s10545_s1 + $0x3f0] sm:$0xff]  ;;  %v160_v6 = vld [vmem:[%s10545_s1 + $0x3d8] sm:$0xff] }
  0x9f   :  { %1821 = vmatprep.subr.bf16.mxu0 %v6698_v7  ;;  %1907 = vmatprep.subr.bf16.mxu1 %v6700_v8  ;;  %v164_v7 = vld [vmem:[%s10545_s1 + $0x3f8] sm:$0xff]  ;;  %v6753_v8 = vcombine.low %v151_v60, %v155_v61  ;;  %v6762_v11 = vcombine.high %v159_v4, %v163_v5  ;;  %v215_v61 = vld [vmem:[%s10545_s1 + $0x590] sm:$0xff] }
  0xa0   :  { %v6764_v12 = vcombine.high %v160_v6, %v164_v7  ;;  %v6763_v20 = vcombine.low %v160_v6, %v164_v7  ;;  %v227_v6 = vld [vmem:[%s10545_s1 + $0x5f0] sm:$0xff]  ;;  %v224_v7 = vld [vmem:[%s10545_s1 + $0x5d8] sm:$0xff] }
  0xa2   :  { %1822 = vmatpush1.bf16.msra.mxu0 %v6697_v14  ;;  %1908 = vmatpush1.bf16.msra.mxu1 %v6699_v15  ;;  %v171_v14 = vld [vmem:[%s10545_s1 + $0x430] sm:$0xff]  ;;  %v168_v15 = vld [vmem:[%s10545_s1 + $0x418] sm:$0xff] }
  0xa3   :  { %1823 = vmatprep.subr.bf16.mxu0 %v6706_v16  ;;  %1909 = vmatprep.subr.bf16.mxu1 %v6708_v18  ;;  %v172_v16 = vld [vmem:[%s10545_s1 + $0x438] sm:$0xff]  ;;  %v6761_v18 = vcombine.low %v159_v4, %v163_v5  ;;  %v6770_v21 = vcombine.high %v167_v13, %v171_v14  ;;  %v223_v5 = vld [vmem:[%s10545_s1 + $0x5d0] sm:$0xff] }
  0xa4   :  { %v6772_v22 = vcombine.high %v168_v15, %v172_v16  ;;  %v6771_v28 = vcombine.low %v168_v15, %v172_v16  ;;  %v235_v15 = vld [vmem:[%s10545_s1 + $0x630] sm:$0xff]  ;;  %v232_v16 = vld [vmem:[%s10545_s1 + $0x618] sm:$0xff] }
  0xa6   :  { %1824 = vmatpush1.bf16.msra.mxu0 %v6705_v24  ;;  %1910 = vmatpush1.bf16.msra.mxu1 %v6707_v25  ;;  %v179_v24 = vld [vmem:[%s10545_s1 + $0x470] sm:$0xff]  ;;  %v176_v25 = vld [vmem:[%s10545_s1 + $0x458] sm:$0xff] }
  0xa7   :  { %1825 = vmatprep.subr.bf16.mxu0 %v6714_v26  ;;  %1911 = vmatprep.subr.bf16.mxu1 %v6716_v27  ;;  %v180_v26 = vld [vmem:[%s10545_s1 + $0x478] sm:$0xff]  ;;  %v6769_v27 = vcombine.low %v167_v13, %v171_v14  ;;  %v6778_v29 = vcombine.high %v175_v23, %v179_v24  ;;  %v231_v14 = vld [vmem:[%s10545_s1 + $0x610] sm:$0xff] }
  0xa8   :  { %v6780_v30 = vcombine.high %v176_v25, %v180_v26  ;;  %v6779_v36 = vcombine.low %v176_v25, %v180_v26  ;;  %v243_v25 = vld [vmem:[%s10545_s1 + $0x670] sm:$0xff]  ;;  %v240_v26 = vld [vmem:[%s10545_s1 + $0x658] sm:$0xff] }
  0xaa   :  { %1826 = vmatpush1.bf16.msra.mxu0 %v6713_v32  ;;  %1912 = vmatpush1.bf16.msra.mxu1 %v6715_v33  ;;  %v187_v32 = vld [vmem:[%s10545_s1 + $0x4b0] sm:$0xff]  ;;  %v184_v33 = vld [vmem:[%s10545_s1 + $0x498] sm:$0xff] }
  0xab   :  { %1827 = vmatprep.subr.bf16.mxu0 %v6722_v34  ;;  %1913 = vmatprep.subr.bf16.mxu1 %v6724_v35  ;;  %v188_v34 = vld [vmem:[%s10545_s1 + $0x4b8] sm:$0xff]  ;;  %v6777_v35 = vcombine.low %v175_v23, %v179_v24  ;;  %v6786_v37 = vcombine.high %v183_v31, %v187_v32  ;;  %v239_v24 = vld [vmem:[%s10545_s1 + $0x650] sm:$0xff] }
  0xac   :  { %v6788_v38 = vcombine.high %v184_v33, %v188_v34 }
  0xae   :  { %1828 = vmatpush1.bf16.msra.mxu0 %v6721_v40  ;;  %1914 = vmatpush1.bf16.msra.mxu1 %v6723_v41  ;;  %v195_v40 = vld [vmem:[%s10545_s1 + $0x4f0] sm:$0xff]  ;;  %v196_v41 = vld [vmem:[%s10545_s1 + $0x4f8] sm:$0xff] }
  0xaf   :  { %1829 = vmatprep.subr.bf16.mxu0 %v6730_v42  ;;  %1915 = vmatprep.subr.bf16.mxu1 %v6732_v56  ;;  %v6785_v42 = vcombine.low %v183_v31, %v187_v32  ;;  %v6787_v56 = vcombine.low %v184_v33, %v188_v34  ;;  %v6794_v43 = vcombine.high %v191_v39, %v195_v40  ;;  %v247_v32 = vld [vmem:[%s10545_s1 + $0x690] sm:$0xff]  ;;  %v248_v34 = vld [vmem:[%s10545_s1 + $0x698] sm:$0xff] }
  0xb0   :  { %v251_v33 = vld [vmem:[%s10545_s1 + $0x6b0] sm:$0xff] }
  0xb2   :  { %1830 = vmatpush1.bf16.msra.mxu0 %v6729_v47  ;;  %1916 = vmatpush1.bf16.msra.mxu1 %v6731_v48  ;;  %v204_v47 = vld [vmem:[%s10545_s1 + $0x538] sm:$0xff]  ;;  %v6793_v48 = vcombine.low %v191_v39, %v195_v40  ;;  %v255_v40 = vld [vmem:[%s10545_s1 + $0x6d0] sm:$0xff] }
  0xb3   :  { %1831 = vmatprep.subr.bf16.mxu0 %v6738_v49  ;;  %1917 = vmatprep.subr.bf16.mxu1 %v6740_v50  ;;  %v6802_v50 = vcombine.high %v199_v45, %v203_v46 }
  0xb6   :  { %1832 = vmatpush1.bf16.msra.mxu0 %v6737_v55  ;;  %1918 = vmatpush1.bf16.msra.mxu1 %v6739_v57  ;;  %v212_v55 = vld [vmem:[%s10545_s1 + $0x578] sm:$0xff]  ;;  %v6801_v57 = vcombine.low %v199_v45, %v203_v46  ;;  %v263_v46 = vld [vmem:[%s10545_s1 + $0x710] sm:$0xff] }
  0xb7   :  { %1833 = vmatprep.subr.bf16.mxu0 %v6746_v58  ;;  %1919 = vmatprep.subr.bf16.mxu1 %v6748_v59  ;;  %v6810_v59 = vcombine.high %v207_v52, %v211_v53  ;;  %v6812_v60 = vcombine.high %v208_v54, %v212_v55 }
  0xba   :  { %1834 = vmatpush1.bf16.msra.mxu0 %v6745_v0  ;;  %1920 = vmatpush1.bf16.msra.mxu1 %v6747_v1  ;;  %v220_v0 = vld [vmem:[%s10545_s1 + $0x5b8] sm:$0xff]  ;;  %v6809_v1 = vcombine.low %v207_v52, %v211_v53  ;;  %v271_v53 = vld [vmem:[%s10545_s1 + $0x750] sm:$0xff] }
  0xbb   :  { %1835 = vmatprep.subr.bf16.mxu0 %v6754_v2  ;;  %1921 = vmatprep.subr.bf16.mxu1 %v6756_v3  ;;  %v6811_v2 = vcombine.low %v208_v54, %v212_v55  ;;  %v6818_v3 = vcombine.high %v215_v61, %v219_v62  ;;  %v6820_v4 = vcombine.high %v216_v63, %v220_v0  ;;  %v275_v54 = vld [vmem:[%s10545_s1 + $0x770] sm:$0xff]  ;;  %v272_v55 = vld [vmem:[%s10545_s1 + $0x758] sm:$0xff] }
  0xbe   :  { %1836 = vmatpush1.bf16.msra.mxu0 %v6753_v8  ;;  %1922 = vmatpush1.bf16.msra.mxu1 %v6755_v9  ;;  %v228_v8 = vld [vmem:[%s10545_s1 + $0x5f8] sm:$0xff]  ;;  %v6817_v9 = vcombine.low %v215_v61, %v219_v62  ;;  %v279_v62 = vld [vmem:[%s10545_s1 + $0x790] sm:$0xff] }
  0xbf   :  { %1837 = vmatprep.subr.bf16.mxu0 %v6762_v11  ;;  %1923 = vmatprep.subr.bf16.mxu1 %v6764_v12  ;;  %v6819_v11 = vcombine.low %v216_v63, %v220_v0  ;;  %v6826_v12 = vcombine.high %v223_v5, %v227_v6  ;;  %v6828_v13 = vcombine.high %v224_v7, %v228_v8  ;;  %v283_v63 = vld [vmem:[%s10545_s1 + $0x7b0] sm:$0xff]  ;;  %v280_v0 = vld [vmem:[%s10545_s1 + $0x798] sm:$0xff] }
  0xc2   :  { %1838 = vmatpush1.bf16.msra.mxu0 %v6761_v18  ;;  %1924 = vmatpush1.bf16.msra.mxu1 %v6763_v20  ;;  %v236_v18 = vld [vmem:[%s10545_s1 + $0x638] sm:$0xff]  ;;  %v6825_v20 = vcombine.low %v223_v5, %v227_v6  ;;  %v287_v6 = vld [vmem:[%s10545_s1 + $0x7d0] sm:$0xff] }
  0xc3   :  { %1850 = vmatprep.subr.bf16.mxu0 %v6770_v21  ;;  %1936 = vmatprep.subr.bf16.mxu1 %v6772_v22  ;;  %v6827_v21 = vcombine.low %v224_v7, %v228_v8  ;;  %v6834_v22 = vcombine.high %v231_v14, %v235_v15  ;;  %v6836_v23 = vcombine.high %v232_v16, %v236_v18  ;;  %v291_v7 = vld [vmem:[%s10545_s1 + $0x7f0] sm:$0xff]  ;;  %v288_v8 = vld [vmem:[%s10545_s1 + $0x7d8] sm:$0xff] }
  0xc5   :  { %1840 = vmatmul.mubr.bf16.vlgmr.msra.gmra.mrb[4].mxu0 %v8044_v10  ;;  %1926 = vmatmul.mubr.bf16.vlgmr.msra.gmra.mrb[4].mxu1 %v8044_v10  ;;  %v192_v10 = vld [vmem:[%s10545_s1 + $0x4d8] sm:$0xff] }
  0xc6   :  { %1851 = vmatpush1.bf16.msra.mxu0 %v6769_v27  ;;  %1937 = vmatpush1.bf16.msra.mxu1 %v6771_v28  ;;  %v6796_v44 = vcombine.high %v192_v10, %v196_v41  ;;  %v6795_v49 = vcombine.low %v192_v10, %v196_v41  ;;  %v244_v27 = vld [vmem:[%s10545_s1 + $0x678] sm:$0xff]  ;;  %v6833_v28 = vcombine.low %v231_v14, %v235_v15  ;;  %v259_v10 = vld [vmem:[%s10545_s1 + $0x6f0] sm:$0xff]  ;;  %v2003_v15 = vld [vmem:[%s10547_s3] sm:$0xff] }
  0xc7   :  { %1852 = vmatprep.subr.bf16.mxu0 %v6778_v29  ;;  %1938 = vmatprep.subr.bf16.mxu1 %v6780_v30  ;;  %v6835_v29 = vcombine.low %v232_v16, %v236_v18  ;;  %v6842_v30 = vcombine.high %v239_v24, %v243_v25  ;;  %v6844_v31 = vcombine.high %v240_v26, %v244_v27  ;;  %v256_v41 = vld [vmem:[%s10545_s1 + $0x6d8] sm:$0xff]  ;;  %v2007_v16 = vld [vmem:[%s10547_s3 + $0x20] sm:$0xff]  ;;  %v2004_v18 = vld [vmem:[%s10547_s3 + $0x8] sm:$0xff] }
  0xc8   :  { %1882 = vmatprep.mubr.bf16.mxu0 %v8061_v19  ;;  %1968 = vmatprep.mubr.bf16.mxu1 %v8061_v19  ;;  %v200_v19 = vld [vmem:[%s10545_s1 + $0x518] sm:$0xff] }
  0xc9   :  { %v6804_v51 = vcombine.high %v200_v19, %v204_v47  ;;  %v6803_v58 = vcombine.low %v200_v19, %v204_v47  ;;  %v267_v19 = vld [vmem:[%s10545_s1 + $0x730] sm:$0xff]  ;;  %v264_v47 = vld [vmem:[%s10545_s1 + $0x718] sm:$0xff] }
  0xca   :  { %1853 = vmatpush1.bf16.msra.mxu0 %v6777_v35  ;;  %1939 = vmatpush1.bf16.msra.mxu1 %v6779_v36  ;;  %v252_v35 = vld [vmem:[%s10545_s1 + $0x6b8] sm:$0xff]  ;;  %v6841_v36 = vcombine.low %v239_v24, %v243_v25  ;;  %v2011_v25 = vld [vmem:[%s10547_s3 + $0x40] sm:$0xff] }
  0xcb   :  { %1854 = vmatprep.subr.bf16.mxu0 %v6786_v37  ;;  %1940 = vmatprep.subr.bf16.mxu1 %v6788_v38  ;;  %v6843_v37 = vcombine.low %v240_v26, %v244_v27  ;;  %v6850_v38 = vcombine.high %v247_v32, %v251_v33  ;;  %v6852_v39 = vcombine.high %v248_v34, %v252_v35  ;;  %v2015_v26 = vld [vmem:[%s10547_s3 + $0x60] sm:$0xff]  ;;  %v2012_v27 = vld [vmem:[%s10547_s3 + $0x48] sm:$0xff] }
  0xce   :  { %1855 = vmatpush1.bf16.msra.mxu0 %v6785_v42  ;;  %1941 = vmatpush1.bf16.msra.mxu1 %v6787_v56  ;;  %v260_v42 = vld [vmem:[%s10545_s1 + $0x6f8] sm:$0xff]  ;;  %v6849_v56 = vcombine.low %v247_v32, %v251_v33  ;;  %v2019_v33 = vld [vmem:[%s10547_s3 + $0x80] sm:$0xff] }
  0xcf   :  { %1856 = vmatprep.subr.bf16.mxu0 %v6794_v43  ;;  %1942 = vmatprep.subr.bf16.mxu1 %v6796_v44  ;;  %v6851_v43 = vcombine.low %v248_v34, %v252_v35  ;;  %v6858_v44 = vcombine.high %v255_v40, %v259_v10  ;;  %v6860_v45 = vcombine.high %v256_v41, %v260_v42  ;;  %v2023_v34 = vld [vmem:[%s10547_s3 + $0xa0] sm:$0xff]  ;;  %v2020_v35 = vld [vmem:[%s10547_s3 + $0x88] sm:$0xff] }
  0xd2   :  { %1857 = vmatpush1.bf16.msra.mxu0 %v6793_v48  ;;  %1943 = vmatpush1.bf16.msra.mxu1 %v6795_v49  ;;  %v268_v48 = vld [vmem:[%s10545_s1 + $0x738] sm:$0xff]  ;;  %v6857_v49 = vcombine.low %v255_v40, %v259_v10  ;;  %v2027_v10 = vld [vmem:[%s10547_s3 + $0xc0] sm:$0xff] }
  0xd3   :  { %1858 = vmatprep.subr.bf16.mxu0 %v6802_v50  ;;  %1944 = vmatprep.subr.bf16.mxu1 %v6804_v51  ;;  %v6859_v50 = vcombine.low %v256_v41, %v260_v42  ;;  %v6866_v51 = vcombine.high %v263_v46, %v267_v19  ;;  %v6868_v52 = vcombine.high %v264_v47, %v268_v48  ;;  %v2031_v41 = vld [vmem:[%s10547_s3 + $0xe0] sm:$0xff]  ;;  %v2032_v42 = vld [vmem:[%s10547_s3 + $0xe8] sm:$0xff] }
  0xd6   :  { %1859 = vmatpush1.bf16.msra.mxu0 %v6801_v57  ;;  %1945 = vmatpush1.bf16.msra.mxu1 %v6803_v58  ;;  %v276_v57 = vld [vmem:[%s10545_s1 + $0x778] sm:$0xff]  ;;  %v6865_v58 = vcombine.low %v263_v46, %v267_v19  ;;  %v2035_v46 = vld [vmem:[%s10547_s3 + $0x100] sm:$0xff] }
  0xd7   :  { %1860 = vmatprep.subr.bf16.mxu0 %v6810_v59  ;;  %1946 = vmatprep.subr.bf16.mxu1 %v6812_v60  ;;  %v6867_v59 = vcombine.low %v264_v47, %v268_v48  ;;  %v6874_v60 = vcombine.high %v271_v53, %v275_v54  ;;  %v6876_v61 = vcombine.high %v272_v55, %v276_v57  ;;  %v2039_v19 = vld [vmem:[%s10547_s3 + $0x120] sm:$0xff]  ;;  %v2036_v47 = vld [vmem:[%s10547_s3 + $0x108] sm:$0xff] }
  0xd8   :  { %v2040_v48 = vld [vmem:[%s10547_s3 + $0x128] sm:$0xff] }
  0xda   :  { %1861 = vmatpush1.bf16.msra.mxu0 %v6809_v1  ;;  %1947 = vmatpush1.bf16.msra.mxu1 %v6811_v2  ;;  %v284_v1 = vld [vmem:[%s10545_s1 + $0x7b8] sm:$0xff]  ;;  %v6873_v2 = vcombine.low %v271_v53, %v275_v54  ;;  %v2043_v53 = vld [vmem:[%s10547_s3 + $0x140] sm:$0xff] }
  0xdb   :  { %1862 = vmatprep.subr.bf16.mxu0 %v6818_v3  ;;  %1948 = vmatprep.subr.bf16.mxu1 %v6820_v4  ;;  %v6875_v3 = vcombine.low %v272_v55, %v276_v57  ;;  %v6882_v4 = vcombine.high %v279_v62, %v283_v63  ;;  %v6884_v5 = vcombine.high %v280_v0, %v284_v1  ;;  %v2047_v54 = vld [vmem:[%s10547_s3 + $0x160] sm:$0xff]  ;;  %v2044_v55 = vld [vmem:[%s10547_s3 + $0x148] sm:$0xff] }
  0xdc   :  { %v2048_v57 = vld [vmem:[%s10547_s3 + $0x168] sm:$0xff] }
  0xde   :  { %1863 = vmatpush1.bf16.msra.mxu0 %v6817_v9  ;;  %1949 = vmatpush1.bf16.msra.mxu1 %v6819_v11  ;;  %v292_v9 = vld [vmem:[%s10545_s1 + $0x7f8] sm:$0xff]  ;;  %v6881_v11 = vcombine.low %v279_v62, %v283_v63  ;;  %v2051_v62 = vld [vmem:[%s10547_s3 + $0x180] sm:$0xff] }
  0xdf   :  { %1864 = vmatprep.subr.bf16.mxu0 %v6826_v12  ;;  %1950 = vmatprep.subr.bf16.mxu1 %v6828_v13  ;;  %v6883_v12 = vcombine.low %v280_v0, %v284_v1  ;;  %v6890_v13 = vcombine.high %v287_v6, %v291_v7  ;;  %v6892_v14 = vcombine.high %v288_v8, %v292_v9  ;;  %v2055_v63 = vld [vmem:[%s10547_s3 + $0x1a0] sm:$0xff]  ;;  %v2052_v0 = vld [vmem:[%s10547_s3 + $0x188] sm:$0xff] }
  0xe0   :  { %v2056_v1 = vld [vmem:[%s10547_s3 + $0x1a8] sm:$0xff] }
  0xe2   :  { %1865 = vmatpush1.bf16.msra.mxu0 %v6825_v20  ;;  %1951 = vmatpush1.bf16.msra.mxu1 %v6827_v21  ;;  %v2008_v20 = vld [vmem:[%s10547_s3 + $0x28] sm:$0xff]  ;;  %v6889_v21 = vcombine.low %v287_v6, %v291_v7  ;;  %v2059_v6 = vld [vmem:[%s10547_s3 + $0x1c0] sm:$0xff] }
  0xe3   :  { %1866 = vmatprep.subr.bf16.mxu0 %v6834_v22  ;;  %1952 = vmatprep.subr.bf16.mxu1 %v6836_v23  ;;  %v6891_v22 = vcombine.low %v288_v8, %v292_v9  ;;  %v6894_v23 = vcombine.high %v2003_v15, %v2007_v16  ;;  %v6896_v24 = vcombine.high %v2004_v18, %v2008_v20  ;;  %v2063_v7 = vld [vmem:[%s10547_s3 + $0x1e0] sm:$0xff]  ;;  %v2060_v8 = vld [vmem:[%s10547_s3 + $0x1c8] sm:$0xff] }
  0xe4   :  { %v2064_v9 = vld [vmem:[%s10547_s3 + $0x1e8] sm:$0xff] }
  0xe6   :  { %1867 = vmatpush1.bf16.msra.mxu0 %v6833_v28  ;;  %1953 = vmatpush1.bf16.msra.mxu1 %v6835_v29  ;;  %v2016_v28 = vld [vmem:[%s10547_s3 + $0x68] sm:$0xff]  ;;  %v6893_v29 = vcombine.low %v2003_v15, %v2007_v16  ;;  %v2067_v15 = vld [vmem:[%s10547_s3 + $0x200] sm:$0xff] }
  0xe7   :  { %1868 = vmatprep.subr.bf16.mxu0 %v6842_v30  ;;  %1954 = vmatprep.subr.bf16.mxu1 %v6844_v31  ;;  %v6895_v30 = vcombine.low %v2004_v18, %v2008_v20  ;;  %v6902_v31 = vcombine.high %v2011_v25, %v2015_v26  ;;  %v6904_v32 = vcombine.high %v2012_v27, %v2016_v28  ;;  %v2071_v16 = vld [vmem:[%s10547_s3 + $0x220] sm:$0xff]  ;;  %v2068_v18 = vld [vmem:[%s10547_s3 + $0x208] sm:$0xff] }
  0xe8   :  { %v2072_v20 = vld [vmem:[%s10547_s3 + $0x228] sm:$0xff] }
  0xea   :  { %1869 = vmatpush1.bf16.msra.mxu0 %v6841_v36  ;;  %1955 = vmatpush1.bf16.msra.mxu1 %v6843_v37  ;;  %v2024_v36 = vld [vmem:[%s10547_s3 + $0xa8] sm:$0xff]  ;;  %v6901_v37 = vcombine.low %v2011_v25, %v2015_v26  ;;  %v2075_v25 = vld [vmem:[%s10547_s3 + $0x240] sm:$0xff] }
  0xeb   :  { %1870 = vmatprep.subr.bf16.mxu0 %v6850_v38  ;;  %1956 = vmatprep.subr.bf16.mxu1 %v6852_v39  ;;  %v6903_v38 = vcombine.low %v2012_v27, %v2016_v28  ;;  %v6910_v39 = vcombine.high %v2019_v33, %v2023_v34  ;;  %v6912_v40 = vcombine.high %v2020_v35, %v2024_v36  ;;  %v2079_v26 = vld [vmem:[%s10547_s3 + $0x260] sm:$0xff]  ;;  %v2076_v27 = vld [vmem:[%s10547_s3 + $0x248] sm:$0xff] }
  0xec   :  { %v2080_v28 = vld [vmem:[%s10547_s3 + $0x268] sm:$0xff] }
  0xee   :  { %1871 = vmatpush1.bf16.msra.mxu0 %v6849_v56  ;;  %1957 = vmatpush1.bf16.msra.mxu1 %v6851_v43  ;;  %v6909_v56 = vcombine.low %v2019_v33, %v2023_v34  ;;  %v6911_v43 = vcombine.low %v2020_v35, %v2024_v36  ;;  %v2083_v33 = vld [vmem:[%s10547_s3 + $0x280] sm:$0xff]  ;;  %v2084_v35 = vld [vmem:[%s10547_s3 + $0x288] sm:$0xff] }
  0xef   :  { %1872 = vmatprep.subr.bf16.mxu0 %v6858_v44  ;;  %1958 = vmatprep.subr.bf16.mxu1 %v6860_v45  ;;  %v6918_v44 = vcombine.high %v2027_v10, %v2031_v41  ;;  %v2087_v34 = vld [vmem:[%s10547_s3 + $0x2a0] sm:$0xff]  ;;  %v2088_v36 = vld [vmem:[%s10547_s3 + $0x2a8] sm:$0xff] }
  0xf2   :  { %1873 = vmatpush1.bf16.msra.mxu0 %v6857_v49  ;;  %1959 = vmatpush1.bf16.msra.mxu1 %v6859_v50  ;;  %v6917_v49 = vcombine.low %v2027_v10, %v2031_v41  ;;  %v2091_v10 = vld [vmem:[%s10547_s3 + $0x2c0] sm:$0xff] }
  0xf3   :  { %1874 = vmatprep.subr.bf16.mxu0 %v6866_v51  ;;  %1960 = vmatprep.subr.bf16.mxu1 %v6868_v52  ;;  %v6926_v51 = vcombine.high %v2035_v46, %v2039_v19  ;;  %v6928_v52 = vcombine.high %v2036_v47, %v2040_v48  ;;  %v2095_v41 = vld [vmem:[%s10547_s3 + $0x2e0] sm:$0xff] }
  0xf6   :  { %1875 = vmatpush1.bf16.msra.mxu0 %v6865_v58  ;;  %1961 = vmatpush1.bf16.msra.mxu1 %v6867_v59  ;;  %v6925_v58 = vcombine.low %v2035_v46, %v2039_v19  ;;  %v6927_v59 = vcombine.low %v2036_v47, %v2040_v48  ;;  %v2099_v46 = vld [vmem:[%s10547_s3 + $0x300] sm:$0xff]  ;;  %v2100_v47 = vld [vmem:[%s10547_s3 + $0x308] sm:$0xff] }
  0xf7   :  { %1876 = vmatprep.subr.bf16.mxu0 %v6874_v60  ;;  %1962 = vmatprep.subr.bf16.mxu1 %v6876_v61  ;;  %v6934_v60 = vcombine.high %v2043_v53, %v2047_v54  ;;  %v6936_v61 = vcombine.high %v2044_v55, %v2048_v57  ;;  %v2103_v19 = vld [vmem:[%s10547_s3 + $0x320] sm:$0xff]  ;;  %v2104_v48 = vld [vmem:[%s10547_s3 + $0x328] sm:$0xff] }
  0xfa   :  { %1877 = vmatpush1.bf16.msra.mxu0 %v6873_v2  ;;  %1963 = vmatpush1.bf16.msra.mxu1 %v6875_v3  ;;  %v6933_v2 = vcombine.low %v2043_v53, %v2047_v54  ;;  %v6935_v3 = vcombine.low %v2044_v55, %v2048_v57  ;;  %v2107_v53 = vld [vmem:[%s10547_s3 + $0x340] sm:$0xff]  ;;  %v2108_v55 = vld [vmem:[%s10547_s3 + $0x348] sm:$0xff] }
  0xfb   :  { %1878 = vmatprep.subr.bf16.mxu0 %v6882_v4  ;;  %1964 = vmatprep.subr.bf16.mxu1 %v6884_v5  ;;  %v6942_v4 = vcombine.high %v2051_v62, %v2055_v63  ;;  %v6944_v5 = vcombine.high %v2052_v0, %v2056_v1  ;;  %v2111_v54 = vld [vmem:[%s10547_s3 + $0x360] sm:$0xff]  ;;  %v2112_v57 = vld [vmem:[%s10547_s3 + $0x368] sm:$0xff] }
  0xfe   :  { %1879 = vmatpush1.bf16.msra.mxu0 %v6881_v11  ;;  %1965 = vmatpush1.bf16.msra.mxu1 %v6883_v12  ;;  %v6941_v11 = vcombine.low %v2051_v62, %v2055_v63  ;;  %v6943_v12 = vcombine.low %v2052_v0, %v2056_v1  ;;  %v2115_v62 = vld [vmem:[%s10547_s3 + $0x380] sm:$0xff]  ;;  %v2116_v0 = vld [vmem:[%s10547_s3 + $0x388] sm:$0xff] }
  0xff   :  { %1880 = vmatprep.subr.bf16.mxu0 %v6890_v13  ;;  %1966 = vmatprep.subr.bf16.mxu1 %v6892_v14  ;;  %v6950_v13 = vcombine.high %v2059_v6, %v2063_v7  ;;  %v6952_v14 = vcombine.high %v2060_v8, %v2064_v9  ;;  %v2119_v63 = vld [vmem:[%s10547_s3 + $0x3a0] sm:$0xff]  ;;  %v2120_v1 = vld [vmem:[%s10547_s3 + $0x3a8] sm:$0xff] }
 0x102   :  { %1881 = vmatpush1.bf16.msra.mxu0 %v6889_v21  ;;  %1967 = vmatpush1.bf16.msra.mxu1 %v6891_v22  ;;  %v6949_v21 = vcombine.low %v2059_v6, %v2063_v7  ;;  %v6951_v22 = vcombine.low %v2060_v8, %v2064_v9  ;;  %v2123_v6 = vld [vmem:[%s10547_s3 + $0x3c0] sm:$0xff]  ;;  %v2124_v8 = vld [vmem:[%s10547_s3 + $0x3c8] sm:$0xff] }
 0x103   :  { %5117 = vmatprep.subr.bf16.mxu0 %v6894_v23  ;;  %5289 = vmatprep.subr.bf16.mxu1 %v6896_v24  ;;  %v6958_v23 = vcombine.high %v2067_v15, %v2071_v16  ;;  %v6960_v24 = vcombine.high %v2068_v18, %v2072_v20  ;;  %v2127_v7 = vld [vmem:[%s10547_s3 + $0x3e0] sm:$0xff]  ;;  %v2128_v9 = vld [vmem:[%s10547_s3 + $0x3e8] sm:$0xff] }
 0x105   :  { %1883 = vmatmul.mubr.bf16.vlgmr.msra.gmra.mrb[4].mxu0 %v8250_v17  ;;  %1969 = vmatmul.mubr.bf16.vlgmr.msra.gmra.mrb[4].mxu1 %v8250_v17  ;;  %v2028_v17 = vld [vmem:[%s10547_s3 + $0xc8] sm:$0xff] }
 0x106   :  { %5118 = vmatpush1.bf16.msra.mxu0 %v6893_v29  ;;  %5290 = vmatpush1.bf16.msra.mxu1 %v6895_v30  ;;  %v6920_v45 = vcombine.high %v2028_v17, %v2032_v42  ;;  %v6919_v50 = vcombine.low %v2028_v17, %v2032_v42  ;;  %v6957_v29 = vcombine.low %v2067_v15, %v2071_v16  ;;  %v2092_v17 = vld [vmem:[%s10547_s3 + $0x2c8] sm:$0xff]  ;;  %v8823_v15 = vld [vmem:[%s10547_s3 + $0x400] sm:$0xff] }
 0x107   :  { %5119 = vmatprep.subr.bf16.mxu0 %v6902_v31  ;;  %5291 = vmatprep.subr.bf16.mxu1 %v6904_v32  ;;  %v6959_v30 = vcombine.low %v2068_v18, %v2072_v20  ;;  %v6966_v31 = vcombine.high %v2075_v25, %v2079_v26  ;;  %v6968_v32 = vcombine.high %v2076_v27, %v2080_v28  ;;  %v2096_v42 = vld [vmem:[%s10547_s3 + $0x2e8] sm:$0xff]  ;;  %v8828_v16 = vld [vmem:[%s10547_s3 + $0x420] sm:$0xff] }
 0x108   :  { %v8833_v18 = vld [vmem:[%s10547_s3 + $0x408] sm:$0xff] }
 0x109   :  { %v8838_v20 = vld [vmem:[%s10547_s3 + $0x428] sm:$0xff] }
 0x10a   :  { %5120 = vmatpush1.bf16.msra.mxu0 %v6901_v37  ;;  %5292 = vmatpush1.bf16.msra.mxu1 %v6903_v38  ;;  %v6965_v37 = vcombine.low %v2075_v25, %v2079_v26  ;;  %v6967_v38 = vcombine.low %v2076_v27, %v2080_v28  ;;  %v295_v25 = vlaneseq  ;;  %v8850_v28 = vld [vmem:[%s10548_s2] sm:$0xff] }
 0x10b   :  { %5121 = vmatprep.subr.bf16.mxu0 %v6910_v39  ;;  %5293 = vmatprep.subr.bf16.mxu1 %v6912_v40  ;;  %v6974_v39 = vcombine.high %v2083_v33, %v2087_v34  ;;  %v6976_v40 = vcombine.high %v2084_v35, %v2088_v36 }
 0x10c   :  { %v8844_v26 = vshrl.u32 %v295_v25, 7  ;;  %v2167_v25 = vld [vmem:[%s10547_s3 + $0x520] sm:$0xff] }
 0x10e   :  { %5122 = vmatpush1.bf16.msra.mxu0 %v6909_v56  ;;  %5294 = vmatpush1.bf16.msra.mxu1 %v6911_v43  ;;  %v6973_v56 = vcombine.low %v2083_v33, %v2087_v34  ;;  %v6975_v43 = vcombine.low %v2084_v35, %v2088_v36  ;;  %v297_v27 = vsub.s32 0, %v8844_v26 }
 0x10f   :  { %5123 = vmatprep.subr.bf16.mxu0 %v6918_v44  ;;  %5295 = vmatprep.subr.bf16.mxu1 %v6920_v45  ;;  %v6982_v44 = vcombine.high %v2091_v10, %v2095_v41  ;;  %v6984_v45 = vcombine.high %v2092_v17, %v2096_v42 }
 0x112   :  { %5124 = vmatpush1.bf16.msra.mxu0 %v6917_v49  ;;  %5296 = vmatpush1.bf16.msra.mxu1 %v6919_v50  ;;  %v6981_v49 = vcombine.low %v2091_v10, %v2095_v41  ;;  %v6983_v50 = vcombine.low %v2092_v17, %v2096_v42 }
 0x113   :  { %5125 = vmatprep.subr.bf16.mxu0 %v6926_v51  ;;  %5297 = vmatprep.subr.bf16.mxu1 %v6928_v52  ;;  %v6990_v51 = vcombine.high %v2099_v46, %v2103_v19  ;;  %v6992_v52 = vcombine.high %v2100_v47, %v2104_v48 }
 0x116   :  { %5126 = vmatpush1.bf16.msra.mxu0 %v6925_v58  ;;  %5298 = vmatpush1.bf16.msra.mxu1 %v6927_v59  ;;  %v6989_v58 = vcombine.low %v2099_v46, %v2103_v19  ;;  %v6991_v59 = vcombine.low %v2100_v47, %v2104_v48 }
 0x117   :  { %5127 = vmatprep.subr.bf16.mxu0 %v6934_v60  ;;  %5299 = vmatprep.subr.bf16.mxu1 %v6936_v61  ;;  %v6998_v60 = vcombine.high %v2107_v53, %v2111_v54  ;;  %v7000_v61 = vcombine.high %v2108_v55, %v2112_v57 }
 0x11a   :  { %5128 = vmatpush1.bf16.msra.mxu0 %v6933_v2  ;;  %5300 = vmatpush1.bf16.msra.mxu1 %v6935_v3  ;;  %v6997_v2 = vcombine.low %v2107_v53, %v2111_v54  ;;  %v6999_v3 = vcombine.low %v2108_v55, %v2112_v57  ;;  %v2139_v54 = vld [vmem:[%s10547_s3 + $0x440] sm:$0xff] }
 0x11b   :  { %5129 = vmatprep.subr.bf16.mxu0 %v6942_v4  ;;  %5301 = vmatprep.subr.bf16.mxu1 %v6944_v5  ;;  %v7006_v4 = vcombine.high %v2115_v62, %v2119_v63  ;;  %v7008_v5 = vcombine.high %v2116_v0, %v2120_v1 }
 0x11e   :  { %5130 = vmatpush1.bf16.msra.mxu0 %v6941_v11  ;;  %5302 = vmatpush1.bf16.msra.mxu1 %v6943_v12  ;;  %v7005_v11 = vcombine.low %v2115_v62, %v2119_v63  ;;  %v7007_v12 = vcombine.low %v2116_v0, %v2120_v1  ;;  %v7021_v0 = vcombine.low %v8823_v15, %v8828_v16 }
 0x11f   :  { %5131 = vmatprep.subr.bf16.mxu0 %v6950_v13  ;;  %5303 = vmatprep.subr.bf16.mxu1 %v6952_v14  ;;  %v7014_v13 = vcombine.high %v2123_v6, %v2127_v7  ;;  %v7016_v14 = vcombine.high %v2124_v8, %v2128_v9  ;;  %v7023_v1 = vcombine.low %v8833_v18, %v8838_v20 }
 0x122   :  { %5132 = vmatpush1.bf16.msra.mxu0 %v6949_v21  ;;  %5304 = vmatpush1.bf16.msra.mxu1 %v6951_v22  ;;  %v7013_v21 = vcombine.low %v2123_v6, %v2127_v7  ;;  %v7015_v22 = vcombine.low %v2124_v8, %v2128_v9  ;;  %v2151_v6 = vld [vmem:[%s10547_s3 + $0x4a0] sm:$0xff]  ;;  %v2148_v7 = vld [vmem:[%s10547_s3 + $0x488] sm:$0xff] }
 0x123   :  { %5133 = vmatprep.subr.bf16.mxu0 %v6958_v23  ;;  %5305 = vmatprep.subr.bf16.mxu1 %v6960_v24  ;;  %v7022_v23 = vcombine.high %v8823_v15, %v8828_v16  ;;  %v7024_v24 = vcombine.high %v8833_v18, %v8838_v20  ;;  %v2152_v8 = vld [vmem:[%s10547_s3 + $0x4a8] sm:$0xff]  ;;  %v2159_v15 = vld [vmem:[%s10547_s3 + $0x4e0] sm:$0xff] }
 0x124   :  { %v2156_v16 = vld [vmem:[%s10547_s3 + $0x4c8] sm:$0xff] }
 0x125   :  { %v2160_v18 = vld [vmem:[%s10547_s3 + $0x4e8] sm:$0xff] }
 0x126   :  { %5134 = vmatpush1.bf16.msra.mxu0 %v6957_v29  ;;  %5306 = vmatpush1.bf16.msra.mxu1 %v6959_v30  ;;  %v305_v29 = vsub.s32 2, %v8844_v26  ;;  %v301_v30 = vsub.s32 1, %v8844_v26 }
 0x127   :  { %5135 = vmatprep.subr.bf16.mxu0 %v6966_v31  ;;  %5307 = vmatprep.subr.bf16.mxu1 %v6968_v32  ;;  %v309_v31 = vsub.s32 3, %v8844_v26  ;;  %v298_v32 = vrot.slane %v8850_v28, %v297_v27 }
 0x128   :  { %v306_v33 = vrot.slane %v8850_v28, %v305_v29  ;;  %v302_v34 = vrot.slane %v8850_v28, %v301_v30 }
 0x129   :  { %v310_v35 = vrot.slane %v8850_v28, %v309_v31 }
 0x12a   :  { %5136 = vmatpush1.bf16.msra.mxu0 %v6965_v37  ;;  %5308 = vmatpush1.bf16.msra.mxu1 %v6967_v38 }
 0x12b   :  { %5137 = vmatprep.subr.bf16.mxu0 %v6974_v39  ;;  %5309 = vmatprep.subr.bf16.mxu1 %v6976_v40 }
 0x12e   :  { %5138 = vmatpush1.bf16.msra.mxu0 %v6973_v56  ;;  %5310 = vmatpush1.bf16.msra.mxu1 %v6975_v43 }
 0x12f   :  { %5139 = vmatprep.subr.bf16.mxu0 %v6982_v44  ;;  %5311 = vmatprep.subr.bf16.mxu1 %v6984_v45 }
 0x132   :  { %5140 = vmatpush1.bf16.msra.mxu0 %v6981_v49  ;;  %5312 = vmatpush1.bf16.msra.mxu1 %v6983_v50 }
 0x133   :  { %5141 = vmatprep.subr.bf16.mxu0 %v6990_v51  ;;  %5313 = vmatprep.subr.bf16.mxu1 %v6992_v52 }
 0x136   :  { %5142 = vmatpush1.bf16.msra.mxu0 %v6989_v58  ;;  %5314 = vmatpush1.bf16.msra.mxu1 %v6991_v59  ;;  %v2143_v59 = vld [vmem:[%s10547_s3 + $0x460] sm:$0xff] }
 0x137   :  { %5143 = vmatprep.subr.bf16.mxu0 %v6998_v60  ;;  %5315 = vmatprep.subr.bf16.mxu1 %v7000_v61  ;;  %v2140_v60 = vld [vmem:[%s10547_s3 + $0x448] sm:$0xff]  ;;  %v7029_v9 = vcombine.low %v2139_v54, %v2143_v59 }
 0x138   :  { %v2144_v61 = vld [vmem:[%s10547_s3 + $0x468] sm:$0xff] }
 0x13a   :  { %5144 = vmatpush1.bf16.msra.mxu0 %v6997_v2  ;;  %5316 = vmatpush1.bf16.msra.mxu1 %v6999_v3  ;;  %v2147_v3 = vld [vmem:[%s10547_s3 + $0x480] sm:$0xff] }
 0x13b   :  { %5145 = vmatprep.subr.bf16.mxu0 %v7006_v4  ;;  %5317 = vmatprep.subr.bf16.mxu1 %v7008_v5  ;;  %v7030_v4 = vcombine.high %v2139_v54, %v2143_v59  ;;  %v7032_v5 = vcombine.high %v2140_v60, %v2144_v61  ;;  %v7037_v20 = vcombine.low %v2147_v3, %v2151_v6 }
 0x13e   :  { %5146 = vmatpush1.bf16.msra.mxu0 %v7005_v11  ;;  %5318 = vmatpush1.bf16.msra.mxu1 %v7007_v12  ;;  %v7031_v11 = vcombine.low %v2140_v60, %v2144_v61  ;;  %v7038_v12 = vcombine.high %v2147_v3, %v2151_v6  ;;  %v2195_v60 = vld [vmem:[%s10547_s3 + $0x600] sm:$0xff] }
 0x13f   :  { %5147 = vmatprep.subr.bf16.mxu0 %v7014_v13  ;;  %5319 = vmatprep.subr.bf16.mxu1 %v7016_v14  ;;  %v7040_v13 = vcombine.high %v2148_v7, %v2152_v8  ;;  %v2155_v14 = vld [vmem:[%s10547_s3 + $0x4c0] sm:$0xff] }
 0x140   :  { %v2199_v61 = vld [vmem:[%s10547_s3 + $0x620] sm:$0xff] }
 0x142   :  { %5148 = vmatpush1.bf16.msra.mxu0 %v7013_v21  ;;  %5320 = vmatpush1.bf16.msra.mxu1 %v7015_v22  ;;  %v7039_v21 = vcombine.low %v2148_v7, %v2152_v8  ;;  %v7046_v22 = vcombine.high %v2155_v14, %v2159_v15  ;;  %v2203_v7 = vld [vmem:[%s10547_s3 + $0x640] sm:$0xff] }
 0x143   :  { %5160 = vmatprep.subr.bf16.mxu0 %v7022_v23  ;;  %5332 = vmatprep.subr.bf16.mxu1 %v7024_v24  ;;  %v7048_v23 = vcombine.high %v2156_v16, %v2160_v18  ;;  %v2163_v24 = vld [vmem:[%s10547_s3 + $0x500] sm:$0xff] }
 0x144   :  { %v2207_v8 = vld [vmem:[%s10547_s3 + $0x660] sm:$0xff] }
 0x158   :  { %v1712_v36 = vpop.f32.mrb[0].mxu0  ;;  %v1798_v38 = vpop.f32.mrb[0].mxu1 }
 0x159   :  { %v7596_v37 = vadd.f32 %v1712_v36, %v298_v32  ;;  %v1714_v39 = vpop.f32.mrb[1].mxu0  ;;  %v7600_v40 = vadd.f32 %v1798_v38, %v306_v33  ;;  %v1800_v41 = vpop.f32.mrb[1].mxu1  ;;  %v7054_v36 = vcombine.high %v2163_v24, %v2167_v25  ;;  %v2171_v38 = vld [vmem:[%s10547_s3 + $0x540] sm:$0xff] }
 0x15a   :  { %v7597_v10 = vadd.f32 %v1714_v39, %v302_v34  ;;  %v1716_v17 = vpop.f32.mrb[2].mxu0  ;;  %v7601_v42 = vadd.f32 %v1800_v41, %v310_v35  ;;  %v1802_v43 = vpop.f32.mrb[2].mxu1  ;;  %v2175_v39 = vld [vmem:[%s10547_s3 + $0x560] sm:$0xff]  ;;  %v7053_v41 = vcombine.low %v2163_v24, %v2167_v25 }
 0x15b   :  { %v7598_v56 = vadd.f32 %v1716_v17, %v298_v32  ;;  %v1718_v44 = vpop.f32.mrb[3].mxu0  ;;  %v7602_v45 = vadd.f32 %v1802_v43, %v306_v33  ;;  %v1804_v19 = vpop.f32.mrb[3].mxu1  ;;  %v1979_v47 = vmax.f32 %v7596_v37, 0.0  ;;  %v1981_v50 = vmax.f32 %v7600_v40, 0.0  ;;  %v2164_v32 = vld [vmem:[%s10547_s3 + $0x508] sm:$0xff]  ;;  %v2179_v43 = vld [vmem:[%s10547_s3 + $0x580] sm:$0xff] }
 0x15c   :  { %v7599_v46 = vadd.f32 %v1718_v44, %v302_v34  ;;  %v7603_v49 = vadd.f32 %v1804_v19, %v310_v35  ;;  %v1980_v51 = vmax.f32 %v7597_v10, 0.0  ;;  %v1982_v55 = vmax.f32 %v7601_v42, 0.0  ;;  %v2168_v33 = vld [vmem:[%s10547_s3 + $0x528] sm:$0xff]  ;;  %v2183_v44 = vld [vmem:[%s10547_s3 + $0x5a0] sm:$0xff] }
 0x15d   :  { %v1987_v48 = vmax.f32 %v7598_v56, 0.0  ;;  %v1989_v52 = vmax.f32 %v7602_v45, 0.0  ;;  %v7045_v34 = vcombine.low %v2155_v14, %v2159_v15  ;;  %v7047_v35 = vcombine.low %v2156_v16, %v2160_v18  ;;  %v2172_v40 = vld [vmem:[%s10547_s3 + $0x548] sm:$0xff]  ;;  %v2211_v16 = vld [vmem:[%s10547_s3 + $0x680] sm:$0xff] }
 0x15e   :  { %v1988_v53 = vmax.f32 %v7599_v46, 0.0  ;;  %v1990_v58 = vmax.f32 %v7603_v49, 0.0  ;;  %v7056_v37 = vcombine.high %v2164_v32, %v2168_v33  ;;  %v2176_v10 = vld [vmem:[%s10547_s3 + $0x568] sm:$0xff]  ;;  %v7055_v17 = vcombine.low %v2164_v32, %v2168_v33  ;;  %v2215_v18 = vld [vmem:[%s10547_s3 + $0x6a0] sm:$0xff] }
 0x15f   :  { %v8870_v57 = vpack.c.bf16 %v1987_v48, %v1979_v47  ;;  %v8881_v62 = vpack.c.bf16 %v1989_v52, %v1981_v50  ;;  %v7062_v42 = vcombine.high %v2171_v38, %v2175_v39  ;;  %v7064_v56 = vcombine.high %v2172_v40, %v2176_v10  ;;  %v2180_v45 = vld [vmem:[%s10547_s3 + $0x588] sm:$0xff]  ;;  %v2187_v50 = vld [vmem:[%s10547_s3 + $0x5c0] sm:$0xff] }
 0x160   :  { %v8883_v63 = vpack.c.bf16 %v1988_v53, %v1980_v51  ;;  %v8889_v2 = vpack.c.bf16 %v1990_v58, %v1982_v55  ;;  %v2184_v46 = vld [vmem:[%s10547_s3 + $0x5a8] sm:$0xff]  ;;  %v7061_v19 = vcombine.low %v2171_v38, %v2175_v39  ;;  %v7063_v47 = vcombine.low %v2172_v40, %v2176_v10  ;;  %v2191_v51 = vld [vmem:[%s10547_s3 + $0x5e0] sm:$0xff] }
 0x161   :  { %v7070_v48 = vcombine.high %v2179_v43, %v2183_v44  ;;  %v7072_v49 = vcombine.high %v2180_v45, %v2184_v46  ;;  %v2188_v52 = vld [vmem:[%s10547_s3 + $0x5c8] sm:$0xff]  ;;  %v7069_v54 = vcombine.low %v2179_v43, %v2183_v44  ;;  %v7071_v55 = vcombine.low %v2180_v45, %v2184_v46  ;;  %v2219_v32 = vld [vmem:[%s10547_s3 + $0x6c0] sm:$0xff] }
 0x162   :  { %5149 = vmatprep.mubr.bf16.mxu0 %v8883_v63  ;;  %5321 = vmatprep.mubr.bf16.mxu1 %v8883_v63  ;;  %v2192_v53 = vld [vmem:[%s10547_s3 + $0x5e8] sm:$0xff]  ;;  %v7078_v58 = vcombine.high %v2187_v50, %v2191_v51  ;;  %v7077_v3 = vcombine.low %v2187_v50, %v2191_v51  ;;  %v7094_v14 = vcombine.high %v2203_v7, %v2207_v8  ;;  %v2223_v33 = vld [vmem:[%s10547_s3 + $0x6e0] sm:$0xff] }
 0x163   :  { %5150 = vmatmul.mubr.bf16.vlgmr.msra.gmra.mrb[8].mxu0 %v8870_v57  ;;  %5322 = vmatmul.mubr.bf16.vlgmr.msra.gmra.mrb[8].mxu1 %v8870_v57  ;;  %v7080_v59 = vcombine.high %v2188_v52, %v2192_v53  ;;  %v7102_v24 = vcombine.high %v2211_v16, %v2215_v18  ;;  %v7110_v38 = vcombine.high %v2219_v32, %v2223_v33  ;;  %v2227_v40 = vld [vmem:[%s10547_s3 + $0x700] sm:$0xff] }
 0x164   :  { %5161 = vmatpush1.bf16.msra.mxu0 %v7021_v0  ;;  %5333 = vmatpush1.bf16.msra.mxu1 %v7023_v1  ;;  %v2196_v0 = vld [vmem:[%s10547_s3 + $0x608] sm:$0xff]  ;;  %v2231_v10 = vld [vmem:[%s10547_s3 + $0x720] sm:$0xff] }
 0x165   :  { %5192 = vmatprep.mubr.bf16.mxu0 %v8889_v2  ;;  %5364 = vmatprep.mubr.bf16.mxu1 %v8889_v2  ;;  %v2200_v1 = vld [vmem:[%s10547_s3 + $0x628] sm:$0xff]  ;;  %v7118_v43 = vcombine.high %v2227_v40, %v2231_v10  ;;  %v2235_v45 = vld [vmem:[%s10547_s3 + $0x740] sm:$0xff] }
 0x166   :  { %5162 = vmatprep.subr.bf16.mxu0 %v7030_v4  ;;  %5334 = vmatprep.subr.bf16.mxu1 %v7032_v5  ;;  %v7079_v4 = vcombine.low %v2188_v52, %v2192_v53  ;;  %v7086_v5 = vcombine.high %v2195_v60, %v2199_v61  ;;  %v7088_v6 = vcombine.high %v2196_v0, %v2200_v1  ;;  %v2239_v46 = vld [vmem:[%s10547_s3 + $0x760] sm:$0xff] }
 0x167   :  { %v7126_v50 = vcombine.high %v2235_v45, %v2239_v46  ;;  %v2243_v52 = vld [vmem:[%s10547_s3 + $0x780] sm:$0xff] }
 0x168   :  { %5163 = vmatpush1.bf16.msra.mxu0 %v7029_v9  ;;  %5335 = vmatpush1.bf16.msra.mxu1 %v7031_v11  ;;  %v2204_v9 = vld [vmem:[%s10547_s3 + $0x648] sm:$0xff]  ;;  %v2247_v53 = vld [vmem:[%s10547_s3 + $0x7a0] sm:$0xff] }
 0x169   :  { %5164 = vmatprep.subr.bf16.mxu0 %v7038_v12  ;;  %5336 = vmatprep.subr.bf16.mxu1 %v7040_v13  ;;  %v2208_v11 = vld [vmem:[%s10547_s3 + $0x668] sm:$0xff]  ;;  %v7085_v12 = vcombine.low %v2195_v60, %v2199_v61  ;;  %v7087_v13 = vcombine.low %v2196_v0, %v2200_v1  ;;  %v7134_v60 = vcombine.high %v2243_v52, %v2247_v53  ;;  %v2251_v0 = vld [vmem:[%s10547_s3 + $0x7c0] sm:$0xff] }
 0x16a   :  { %v7096_v15 = vcombine.high %v2204_v9, %v2208_v11  ;;  %v2255_v1 = vld [vmem:[%s10547_s3 + $0x7e0] sm:$0xff] }
 0x16c   :  { %5165 = vmatpush1.bf16.msra.mxu0 %v7037_v20  ;;  %5337 = vmatpush1.bf16.msra.mxu1 %v7039_v21  ;;  %v2212_v20 = vld [vmem:[%s10547_s3 + $0x688] sm:$0xff] }
 0x16d   :  { %5166 = vmatprep.subr.bf16.mxu0 %v7046_v22  ;;  %5338 = vmatprep.subr.bf16.mxu1 %v7048_v23  ;;  %v2216_v21 = vld [vmem:[%s10547_s3 + $0x6a8] sm:$0xff]  ;;  %v7093_v22 = vcombine.low %v2203_v7, %v2207_v8  ;;  %v7095_v23 = vcombine.low %v2204_v9, %v2208_v11  ;;  %v7142_v7 = vcombine.high %v2251_v0, %v2255_v1  ;;  %v2259_v9 = vld [vmem:[%s10547_s3 + $0x800] sm:$0xff] }
 0x16e   :  { %v7104_v25 = vcombine.high %v2212_v20, %v2216_v21  ;;  %v2263_v11 = vld [vmem:[%s10547_s3 + $0x820] sm:$0xff] }
 0x170   :  { %5167 = vmatpush1.bf16.msra.mxu0 %v7045_v34  ;;  %5339 = vmatpush1.bf16.msra.mxu1 %v7047_v35  ;;  %v2220_v34 = vld [vmem:[%s10547_s3 + $0x6c8] sm:$0xff] }
 0x171   :  { %5168 = vmatprep.subr.bf16.mxu0 %v7054_v36  ;;  %5340 = vmatprep.subr.bf16.mxu1 %v7056_v37  ;;  %v2224_v35 = vld [vmem:[%s10547_s3 + $0x6e8] sm:$0xff]  ;;  %v7101_v36 = vcombine.low %v2211_v16, %v2215_v18  ;;  %v7103_v37 = vcombine.low %v2212_v20, %v2216_v21  ;;  %v7150_v16 = vcombine.high %v2259_v9, %v2263_v11  ;;  %v2267_v20 = vld [vmem:[%s10547_s3 + $0x840] sm:$0xff] }
 0x172   :  { %v7112_v39 = vcombine.high %v2220_v34, %v2224_v35  ;;  %v2271_v21 = vld [vmem:[%s10547_s3 + $0x860] sm:$0xff] }
 0x174   :  { %5169 = vmatpush1.bf16.msra.mxu0 %v7053_v41  ;;  %5341 = vmatpush1.bf16.msra.mxu1 %v7055_v17  ;;  %v2228_v41 = vld [vmem:[%s10547_s3 + $0x708] sm:$0xff] }
 0x175   :  { %5170 = vmatprep.subr.bf16.mxu0 %v7062_v42  ;;  %5342 = vmatprep.subr.bf16.mxu1 %v7064_v56  ;;  %v2232_v17 = vld [vmem:[%s10547_s3 + $0x728] sm:$0xff]  ;;  %v7109_v42 = vcombine.low %v2219_v32, %v2223_v33  ;;  %v7111_v56 = vcombine.low %v2220_v34, %v2224_v35  ;;  %v7158_v32 = vcombine.high %v2267_v20, %v2271_v21  ;;  %v2275_v34 = vld [vmem:[%s10547_s3 + $0x880] sm:$0xff] }
 0x176   :  { %v7120_v44 = vcombine.high %v2228_v41, %v2232_v17  ;;  %v2279_v35 = vld [vmem:[%s10547_s3 + $0x8a0] sm:$0xff] }
 0x178   :  { %5171 = vmatpush1.bf16.msra.mxu0 %v7061_v19  ;;  %5343 = vmatpush1.bf16.msra.mxu1 %v7063_v47  ;;  %v2236_v19 = vld [vmem:[%s10547_s3 + $0x748] sm:$0xff] }
 0x179   :  { %5172 = vmatprep.subr.bf16.mxu0 %v7070_v48  ;;  %5344 = vmatprep.subr.bf16.mxu1 %v7072_v49  ;;  %v2240_v47 = vld [vmem:[%s10547_s3 + $0x768] sm:$0xff]  ;;  %v7117_v48 = vcombine.low %v2227_v40, %v2231_v10  ;;  %v7119_v49 = vcombine.low %v2228_v41, %v2232_v17  ;;  %v7166_v40 = vcombine.high %v2275_v34, %v2279_v35  ;;  %v2283_v41 = vld [vmem:[%s10547_s3 + $0x8c0] sm:$0xff] }
 0x17a   :  { %v7128_v51 = vcombine.high %v2236_v19, %v2240_v47  ;;  %v2287_v17 = vld [vmem:[%s10547_s3 + $0x8e0] sm:$0xff] }
 0x17c   :  { %5173 = vmatpush1.bf16.msra.mxu0 %v7069_v54  ;;  %5345 = vmatpush1.bf16.msra.mxu1 %v7071_v55  ;;  %v2244_v54 = vld [vmem:[%s10547_s3 + $0x788] sm:$0xff] }
 0x17d   :  { %5174 = vmatprep.subr.bf16.mxu0 %v7078_v58  ;;  %5346 = vmatprep.subr.bf16.mxu1 %v7080_v59  ;;  %v2248_v55 = vld [vmem:[%s10547_s3 + $0x7a8] sm:$0xff]  ;;  %v7125_v58 = vcombine.low %v2235_v45, %v2239_v46  ;;  %v7127_v59 = vcombine.low %v2236_v19, %v2240_v47  ;;  %v7174_v45 = vcombine.high %v2283_v41, %v2287_v17  ;;  %v2291_v19 = vld [vmem:[%s10547_s3 + $0x900] sm:$0xff] }
 0x17e   :  { %v7136_v61 = vcombine.high %v2244_v54, %v2248_v55  ;;  %v2295_v47 = vld [vmem:[%s10547_s3 + $0x920] sm:$0xff] }
 0x180   :  { %5175 = vmatpush1.bf16.msra.mxu0 %v7077_v3  ;;  %5347 = vmatpush1.bf16.msra.mxu1 %v7079_v4  ;;  %v2252_v3 = vld [vmem:[%s10547_s3 + $0x7c8] sm:$0xff] }
 0x181   :  { %5176 = vmatprep.subr.bf16.mxu0 %v7086_v5  ;;  %5348 = vmatprep.subr.bf16.mxu1 %v7088_v6  ;;  %v2256_v4 = vld [vmem:[%s10547_s3 + $0x7e8] sm:$0xff]  ;;  %v7133_v5 = vcombine.low %v2243_v52, %v2247_v53  ;;  %v7135_v6 = vcombine.low %v2244_v54, %v2248_v55  ;;  %v7182_v52 = vcombine.high %v2291_v19, %v2295_v47  ;;  %v2299_v54 = vld [vmem:[%s10547_s3 + $0x940] sm:$0xff] }
 0x182   :  { %v7144_v8 = vcombine.high %v2252_v3, %v2256_v4  ;;  %v2303_v55 = vld [vmem:[%s10547_s3 + $0x960] sm:$0xff] }
 0x184   :  { %5177 = vmatpush1.bf16.msra.mxu0 %v7085_v12  ;;  %5349 = vmatpush1.bf16.msra.mxu1 %v7087_v13  ;;  %v2260_v12 = vld [vmem:[%s10547_s3 + $0x808] sm:$0xff] }
 0x185   :  { %5178 = vmatprep.subr.bf16.mxu0 %v7094_v14  ;;  %5350 = vmatprep.subr.bf16.mxu1 %v7096_v15  ;;  %v2264_v13 = vld [vmem:[%s10547_s3 + $0x828] sm:$0xff]  ;;  %v7141_v14 = vcombine.low %v2251_v0, %v2255_v1  ;;  %v7143_v15 = vcombine.low %v2252_v3, %v2256_v4  ;;  %v7190_v0 = vcombine.high %v2299_v54, %v2303_v55  ;;  %v2307_v3 = vld [vmem:[%s10547_s3 + $0x980] sm:$0xff] }
 0x186   :  { %v7152_v18 = vcombine.high %v2260_v12, %v2264_v13  ;;  %v2311_v4 = vld [vmem:[%s10547_s3 + $0x9a0] sm:$0xff] }
 0x188   :  { %5179 = vmatpush1.bf16.msra.mxu0 %v7093_v22  ;;  %5351 = vmatpush1.bf16.msra.mxu1 %v7095_v23  ;;  %v2268_v22 = vld [vmem:[%s10547_s3 + $0x848] sm:$0xff] }
 0x189   :  { %5180 = vmatprep.subr.bf16.mxu0 %v7102_v24  ;;  %5352 = vmatprep.subr.bf16.mxu1 %v7104_v25  ;;  %v2272_v23 = vld [vmem:[%s10547_s3 + $0x868] sm:$0xff]  ;;  %v7149_v24 = vcombine.low %v2259_v9, %v2263_v11  ;;  %v7151_v25 = vcombine.low %v2260_v12, %v2264_v13  ;;  %v7198_v9 = vcombine.high %v2307_v3, %v2311_v4  ;;  %v2315_v12 = vld [vmem:[%s10547_s3 + $0x9c0] sm:$0xff] }
 0x18a   :  { %v7160_v33 = vcombine.high %v2268_v22, %v2272_v23  ;;  %v2319_v13 = vld [vmem:[%s10547_s3 + $0x9e0] sm:$0xff] }
 0x18c   :  { %5181 = vmatpush1.bf16.msra.mxu0 %v7101_v36  ;;  %5353 = vmatpush1.bf16.msra.mxu1 %v7103_v37  ;;  %v2276_v36 = vld [vmem:[%s10547_s3 + $0x888] sm:$0xff] }
 0x18d   :  { %5182 = vmatprep.subr.bf16.mxu0 %v7110_v38  ;;  %5354 = vmatprep.subr.bf16.mxu1 %v7112_v39  ;;  %v2280_v37 = vld [vmem:[%s10547_s3 + $0x8a8] sm:$0xff]  ;;  %v7157_v38 = vcombine.low %v2267_v20, %v2271_v21  ;;  %v7159_v39 = vcombine.low %v2268_v22, %v2272_v23  ;;  %v7206_v20 = vcombine.high %v2315_v12, %v2319_v13  ;;  %v2323_v22 = vld [vmem:[%s10547_s3 + $0xa00] sm:$0xff] }
 0x18e   :  { %v7168_v10 = vcombine.high %v2276_v36, %v2280_v37  ;;  %v2327_v23 = vld [vmem:[%s10547_s3 + $0xa20] sm:$0xff] }
 0x190   :  { %5183 = vmatpush1.bf16.msra.mxu0 %v7109_v42  ;;  %5355 = vmatpush1.bf16.msra.mxu1 %v7111_v56  ;;  %v2284_v42 = vld [vmem:[%s10547_s3 + $0x8c8] sm:$0xff] }
 0x191   :  { %5184 = vmatprep.subr.bf16.mxu0 %v7118_v43  ;;  %5356 = vmatprep.subr.bf16.mxu1 %v7120_v44  ;;  %v2288_v56 = vld [vmem:[%s10547_s3 + $0x8e8] sm:$0xff]  ;;  %v7165_v43 = vcombine.low %v2275_v34, %v2279_v35  ;;  %v7167_v44 = vcombine.low %v2276_v36, %v2280_v37  ;;  %v7214_v34 = vcombine.high %v2323_v22, %v2327_v23  ;;  %v2331_v36 = vld [vmem:[%s10547_s3 + $0xa40] sm:$0xff] }
 0x192   :  { %v7176_v46 = vcombine.high %v2284_v42, %v2288_v56  ;;  %v2335_v37 = vld [vmem:[%s10547_s3 + $0xa60] sm:$0xff] }
 0x194   :  { %5185 = vmatpush1.bf16.msra.mxu0 %v7117_v48  ;;  %5357 = vmatpush1.bf16.msra.mxu1 %v7119_v49  ;;  %v2292_v48 = vld [vmem:[%s10547_s3 + $0x908] sm:$0xff] }
 0x195   :  { %5186 = vmatprep.subr.bf16.mxu0 %v7126_v50  ;;  %5358 = vmatprep.subr.bf16.mxu1 %v7128_v51  ;;  %v2296_v49 = vld [vmem:[%s10547_s3 + $0x928] sm:$0xff]  ;;  %v7173_v50 = vcombine.low %v2283_v41, %v2287_v17  ;;  %v7175_v51 = vcombine.low %v2284_v42, %v2288_v56  ;;  %v7222_v41 = vcombine.high %v2331_v36, %v2335_v37  ;;  %v2339_v42 = vld [vmem:[%s10547_s3 + $0xa80] sm:$0xff] }
 0x196   :  { %v7184_v53 = vcombine.high %v2292_v48, %v2296_v49  ;;  %v2343_v56 = vld [vmem:[%s10547_s3 + $0xaa0] sm:$0xff] }
 0x198   :  { %5187 = vmatpush1.bf16.msra.mxu0 %v7125_v58  ;;  %5359 = vmatpush1.bf16.msra.mxu1 %v7127_v59  ;;  %v2300_v58 = vld [vmem:[%s10547_s3 + $0x948] sm:$0xff] }
 0x199   :  { %5188 = vmatprep.subr.bf16.mxu0 %v7134_v60  ;;  %5360 = vmatprep.subr.bf16.mxu1 %v7136_v61  ;;  %v2304_v59 = vld [vmem:[%s10547_s3 + $0x968] sm:$0xff]  ;;  %v7181_v60 = vcombine.low %v2291_v19, %v2295_v47  ;;  %v7183_v61 = vcombine.low %v2292_v48, %v2296_v49  ;;  %v7230_v19 = vcombine.high %v2339_v42, %v2343_v56  ;;  %v2347_v48 = vld [vmem:[%s10547_s3 + $0xac0] sm:$0xff] }
 0x19a   :  { %v7192_v1 = vcombine.high %v2300_v58, %v2304_v59  ;;  %v2351_v49 = vld [vmem:[%s10547_s3 + $0xae0] sm:$0xff] }
 0x19c   :  { %5189 = vmatpush1.bf16.msra.mxu0 %v7133_v5  ;;  %5361 = vmatpush1.bf16.msra.mxu1 %v7135_v6  ;;  %v2308_v5 = vld [vmem:[%s10547_s3 + $0x988] sm:$0xff] }
 0x19d   :  { %5190 = vmatprep.subr.bf16.mxu0 %v7142_v7  ;;  %5362 = vmatprep.subr.bf16.mxu1 %v7144_v8  ;;  %v2312_v6 = vld [vmem:[%s10547_s3 + $0x9a8] sm:$0xff]  ;;  %v7189_v7 = vcombine.low %v2299_v54, %v2303_v55  ;;  %v7191_v8 = vcombine.low %v2300_v58, %v2304_v59  ;;  %v7238_v54 = vcombine.high %v2347_v48, %v2351_v49  ;;  %v2355_v58 = vld [vmem:[%s10547_s3 + $0xb00] sm:$0xff] }
 0x19e   :  { %v7200_v11 = vcombine.high %v2308_v5, %v2312_v6  ;;  %v2359_v59 = vld [vmem:[%s10547_s3 + $0xb20] sm:$0xff] }
 0x1a0   :  { %5191 = vmatpush1.bf16.msra.mxu0 %v7141_v14  ;;  %5363 = vmatpush1.bf16.msra.mxu1 %v7143_v15  ;;  %v2316_v14 = vld [vmem:[%s10547_s3 + $0x9c8] sm:$0xff] }
 0x1a1   :  { %5203 = vmatprep.subr.bf16.mxu0 %v7150_v16  ;;  %5375 = vmatprep.subr.bf16.mxu1 %v7152_v18  ;;  %v2320_v15 = vld [vmem:[%s10547_s3 + $0x9e8] sm:$0xff]  ;;  %v7197_v16 = vcombine.low %v2307_v3, %v2311_v4  ;;  %v7199_v18 = vcombine.low %v2308_v5, %v2312_v6  ;;  %v7246_v3 = vcombine.high %v2355_v58, %v2359_v59  ;;  %v2363_v5 = vld [vmem:[%s10547_s3 + $0xb40] sm:$0xff] }
 0x1a2   :  { %v7208_v21 = vcombine.high %v2316_v14, %v2320_v15  ;;  %v2367_v6 = vld [vmem:[%s10547_s3 + $0xb60] sm:$0xff] }
 0x1a3   :  { %5193 = vmatmul.mubr.bf16.vlgmr.msra.gmra.mrb[8].mxu0 %v8881_v62  ;;  %5365 = vmatmul.mubr.bf16.vlgmr.msra.gmra.mrb[8].mxu1 %v8881_v62 }
 0x1a4   :  { %5204 = vmatpush1.bf16.msra.mxu0 %v7149_v24  ;;  %5376 = vmatpush1.bf16.msra.mxu1 %v7151_v25  ;;  %v2324_v24 = vld [vmem:[%s10547_s3 + $0xa08] sm:$0xff] }
 0x1a5   :  { %5205 = vmatprep.subr.bf16.mxu0 %v7158_v32  ;;  %5377 = vmatprep.subr.bf16.mxu1 %v7160_v33  ;;  %v2328_v25 = vld [vmem:[%s10547_s3 + $0xa28] sm:$0xff]  ;;  %v7205_v32 = vcombine.low %v2315_v12, %v2319_v13  ;;  %v7207_v33 = vcombine.low %v2316_v14, %v2320_v15  ;;  %v7254_v12 = vcombine.high %v2363_v5, %v2367_v6  ;;  %v313_v14 = vsub.s32 4, %v8844_v26  ;;  %v2371_v15 = vld [vmem:[%s10547_s3 + $0xb80] sm:$0xff] }
 0x1a6   :  { %v7216_v35 = vcombine.high %v2324_v24, %v2328_v25 }
 0x1a8   :  { %5206 = vmatpush1.bf16.msra.mxu0 %v7157_v38  ;;  %5378 = vmatpush1.bf16.msra.mxu1 %v7159_v39  ;;  %v2332_v38 = vld [vmem:[%s10547_s3 + $0xa48] sm:$0xff] }
 0x1a9   :  { %5207 = vmatprep.subr.bf16.mxu0 %v7166_v40  ;;  %5379 = vmatprep.subr.bf16.mxu1 %v7168_v10  ;;  %v2336_v39 = vld [vmem:[%s10547_s3 + $0xa68] sm:$0xff]  ;;  %v7213_v40 = vcombine.low %v2323_v22, %v2327_v23  ;;  %v7215_v10 = vcombine.low %v2324_v24, %v2328_v25  ;;  %v325_v23 = vsub.s32 7, %v8844_v26  ;;  %v7253_v24 = vcombine.low %v2363_v5, %v2367_v6 }
 0x1aa   :  { %v7224_v17 = vcombine.high %v2332_v38, %v2336_v39  ;;  %v2376_v22 = vld [vmem:[%s10547_s3 + $0xba8] sm:$0xff] }
 0x1ac   :  { %5208 = vmatpush1.bf16.msra.mxu0 %v7165_v43  ;;  %5380 = vmatpush1.bf16.msra.mxu1 %v7167_v44  ;;  %v2340_v43 = vld [vmem:[%s10547_s3 + $0xa88] sm:$0xff] }
 0x1ad   :  { %5209 = vmatprep.subr.bf16.mxu0 %v7174_v45  ;;  %5381 = vmatprep.subr.bf16.mxu1 %v7176_v46  ;;  %v2344_v44 = vld [vmem:[%s10547_s3 + $0xaa8] sm:$0xff]  ;;  %v7221_v45 = vcombine.low %v2331_v36, %v2335_v37  ;;  %v7223_v46 = vcombine.low %v2332_v38, %v2336_v39  ;;  %v2383_v38 = vld [vmem:[%s10547_s3 + $0xbe0] sm:$0xff] }
 0x1ae   :  { %v7232_v47 = vcombine.high %v2340_v43, %v2344_v44  ;;  %v2380_v39 = vld [vmem:[%s10547_s3 + $0xbc8] sm:$0xff] }
 0x1b0   :  { %5210 = vmatpush1.bf16.msra.mxu0 %v7173_v50  ;;  %5382 = vmatpush1.bf16.msra.mxu1 %v7175_v51  ;;  %v2348_v50 = vld [vmem:[%s10547_s3 + $0xac8] sm:$0xff] }
 0x1b1   :  { %5211 = vmatprep.subr.bf16.mxu0 %v7182_v52  ;;  %5383 = vmatprep.subr.bf16.mxu1 %v7184_v53  ;;  %v2352_v51 = vld [vmem:[%s10547_s3 + $0xae8] sm:$0xff]  ;;  %v7229_v52 = vcombine.low %v2339_v42, %v2343_v56  ;;  %v7231_v53 = vcombine.low %v2340_v43, %v2344_v44 }
 0x1b2   :  { %v7240_v55 = vcombine.high %v2348_v50, %v2352_v51 }
 0x1b4   :  { %5212 = vmatpush1.bf16.msra.mxu0 %v7181_v60  ;;  %5384 = vmatpush1.bf16.msra.mxu1 %v7183_v61  ;;  %v2356_v60 = vld [vmem:[%s10547_s3 + $0xb08] sm:$0xff] }
 0x1b5   :  { %5213 = vmatprep.subr.bf16.mxu0 %v7190_v0  ;;  %5385 = vmatprep.subr.bf16.mxu1 %v7192_v1  ;;  %v2360_v61 = vld [vmem:[%s10547_s3 + $0xb28] sm:$0xff]  ;;  %v7237_v0 = vcombine.low %v2347_v48, %v2351_v49  ;;  %v7239_v1 = vcombine.low %v2348_v50, %v2352_v51 }
 0x1b6   :  { %v7248_v4 = vcombine.high %v2356_v60, %v2360_v61  ;;  %v2388_v51 = vld [vmem:[%s10547_s3 + $0xc08] sm:$0xff] }
 0x1b8   :  { %5214 = vmatpush1.bf16.msra.mxu0 %v7189_v7  ;;  %5386 = vmatpush1.bf16.msra.mxu1 %v7191_v8  ;;  %v2364_v7 = vld [vmem:[%s10547_s3 + $0xb48] sm:$0xff] }
 0x1b9   :  { %5215 = vmatprep.subr.bf16.mxu0 %v7198_v9  ;;  %5387 = vmatprep.subr.bf16.mxu1 %v7200_v11  ;;  %v2368_v8 = vld [vmem:[%s10547_s3 + $0xb68] sm:$0xff]  ;;  %v7245_v9 = vcombine.low %v2355_v58, %v2359_v59  ;;  %v7247_v11 = vcombine.low %v2356_v60, %v2360_v61 }
 0x1ba   :  { %v7256_v13 = vcombine.high %v2364_v7, %v2368_v8  ;;  %v7255_v25 = vcombine.low %v2364_v7, %v2368_v8 }
 0x1bc   :  { %5216 = vmatpush1.bf16.msra.mxu0 %v7197_v16  ;;  %5388 = vmatpush1.bf16.msra.mxu1 %v7199_v18  ;;  %v321_v16 = vsub.s32 6, %v8844_v26  ;;  %v317_v18 = vsub.s32 5, %v8844_v26 }
 0x1bd   :  { %5217 = vmatprep.subr.bf16.mxu0 %v7206_v20  ;;  %5389 = vmatprep.subr.bf16.mxu1 %v7208_v21  ;;  %v2375_v20 = vld [vmem:[%s10547_s3 + $0xba0] sm:$0xff]  ;;  %v2372_v21 = vld [vmem:[%s10547_s3 + $0xb88] sm:$0xff] }
 0x1be   :  { %v322_v36 = vrot.slane %v8850_v28, %v321_v16  ;;  %v318_v37 = vrot.slane %v8850_v28, %v317_v18  ;;  %v7263_v42 = vcombine.low %v2372_v21, %v2376_v22 }
 0x1c0   :  { %5218 = vmatpush1.bf16.msra.mxu0 %v7205_v32  ;;  %5390 = vmatpush1.bf16.msra.mxu1 %v7207_v33  ;;  %v314_v32 = vrot.slane %v8850_v28, %v313_v14  ;;  %v7262_v33 = vcombine.high %v2371_v15, %v2375_v20 }
 0x1c1   :  { %5219 = vmatprep.subr.bf16.mxu0 %v7214_v34  ;;  %5391 = vmatprep.subr.bf16.mxu1 %v7216_v35  ;;  %v7264_v34 = vcombine.high %v2372_v21, %v2376_v22  ;;  %v2379_v35 = vld [vmem:[%s10547_s3 + $0xbc0] sm:$0xff] }
 0x1c2   :  { %v7269_v59 = vcombine.low %v2379_v35, %v2383_v38 }
 0x1c4   :  { %5220 = vmatpush1.bf16.msra.mxu0 %v7213_v40  ;;  %5392 = vmatpush1.bf16.msra.mxu1 %v7215_v10  ;;  %v2384_v40 = vld [vmem:[%s10547_s3 + $0xbe8] sm:$0xff]  ;;  %v326_v10 = vrot.slane %v8850_v28, %v325_v23  ;;  %v2391_v28 = vld [vmem:[%s10547_s3 + $0xc20] sm:$0xff] }
 0x1c5   :  { %5221 = vmatprep.subr.bf16.mxu0 %v7222_v41  ;;  %5393 = vmatprep.subr.bf16.mxu1 %v7224_v17  ;;  %v7261_v17 = vcombine.low %v2371_v15, %v2375_v20  ;;  %v7271_v60 = vcombine.low %v2380_v39, %v2384_v40 }
 0x1c8   :  { %5222 = vmatpush1.bf16.msra.mxu0 %v7221_v45  ;;  %5394 = vmatpush1.bf16.msra.mxu1 %v7223_v46  ;;  %v7270_v45 = vcombine.high %v2379_v35, %v2383_v38  ;;  %v7272_v46 = vcombine.high %v2380_v39, %v2384_v40  ;;  %v2407_v40 = vld [vmem:[%s10547_s3 + $0xca0] sm:$0xff] }
 0x1c9   :  { %5223 = vmatprep.subr.bf16.mxu0 %v7230_v19  ;;  %5395 = vmatprep.subr.bf16.mxu1 %v7232_v47  ;;  %v2387_v19 = vld [vmem:[%s10547_s3 + $0xc00] sm:$0xff] }
 0x1ca   :  { %v7277_v22 = vcombine.low %v2387_v19, %v2391_v28 }
 0x1cc   :  { %5224 = vmatpush1.bf16.msra.mxu0 %v7229_v52  ;;  %5396 = vmatpush1.bf16.msra.mxu1 %v7231_v53  ;;  %v2392_v52 = vld [vmem:[%s10547_s3 + $0xc28] sm:$0xff] }
 0x1cd   :  { %5225 = vmatprep.subr.bf16.mxu0 %v7238_v54  ;;  %5397 = vmatprep.subr.bf16.mxu1 %v7240_v55  ;;  %v7280_v7 = vcombine.high %v2388_v51, %v2392_v52  ;;  %v7279_v35 = vcombine.low %v2388_v51, %v2392_v52  ;;  %v2423_v51 = vld [vmem:[%s10547_s3 + $0xd20] sm:$0xff]  ;;  %v2420_v52 = vld [vmem:[%s10547_s3 + $0xd08] sm:$0xff] }
 0x1d0   :  { %5226 = vmatpush1.bf16.msra.mxu0 %v7237_v0  ;;  %5398 = vmatpush1.bf16.msra.mxu1 %v7239_v1 }
 0x1d1   :  { %5227 = vmatprep.subr.bf16.mxu0 %v7246_v3  ;;  %5399 = vmatprep.subr.bf16.mxu1 %v7248_v4  ;;  %v7278_v3 = vcombine.high %v2387_v19, %v2391_v28  ;;  %v2416_v19 = vld [vmem:[%s10547_s3 + $0xce8] sm:$0xff] }
 0x1d4   :  { %5228 = vmatpush1.bf16.msra.mxu0 %v7245_v9  ;;  %5400 = vmatpush1.bf16.msra.mxu1 %v7247_v11 }
 0x1d5   :  { %5229 = vmatprep.subr.bf16.mxu0 %v7254_v12  ;;  %5401 = vmatprep.subr.bf16.mxu1 %v7256_v13  ;;  %v2395_v13 = vld [vmem:[%s10547_s3 + $0xc40] sm:$0xff] }
 0x1d8   :  { %5230 = vmatpush1.bf16.msra.mxu0 %v7253_v24  ;;  %5402 = vmatpush1.bf16.msra.mxu1 %v7255_v25  ;;  %v1884_v41 = vpop.f32.mrb[4].mxu0  ;;  %v1970_v43 = vpop.f32.mrb[4].mxu1  ;;  %v2399_v24 = vld [vmem:[%s10547_s3 + $0xc60] sm:$0xff]  ;;  %v2396_v25 = vld [vmem:[%s10547_s3 + $0xc48] sm:$0xff] }
 0x1d9   :  { %v7604_v56 = vadd.f32 %v1884_v41, %v314_v32  ;;  %v1886_v44 = vpop.f32.mrb[5].mxu0  ;;  %5231 = vmatprep.subr.bf16.mxu0 %v7262_v33  ;;  %5403 = vmatprep.subr.bf16.mxu1 %v7264_v34  ;;  %v7608_v47 = vadd.f32 %v1970_v43, %v322_v36  ;;  %v1972_v49 = vpop.f32.mrb[5].mxu1  ;;  %v7286_v38 = vcombine.high %v2395_v13, %v2399_v24  ;;  %v2408_v41 = vld [vmem:[%s10547_s3 + $0xca8] sm:$0xff] }
 0x1da   :  { %v7605_v48 = vadd.f32 %v1886_v44, %v318_v37  ;;  %v1888_v50 = vpop.f32.mrb[6].mxu0  ;;  %v7609_v53 = vadd.f32 %v1972_v49, %v326_v10  ;;  %v1974_v55 = vpop.f32.mrb[6].mxu1  ;;  %v2411_v44 = vld [vmem:[%s10547_s3 + $0xcc0] sm:$0xff] }
 0x1db   :  { %v7606_v54 = vadd.f32 %v1888_v50, %v314_v32  ;;  %v1890_v58 = vpop.f32.mrb[7].mxu0  ;;  %v7610_v61 = vadd.f32 %v1974_v55, %v322_v36  ;;  %v1976_v1 = vpop.f32.mrb[7].mxu1  ;;  %v1983_v4 = vmax.f32 %v7604_v56, 0.0  ;;  %v1985_v8 = vmax.f32 %v7608_v47, 0.0  ;;  %v2400_v32 = vld [vmem:[%s10547_s3 + $0xc68] sm:$0xff]  ;;  %v2419_v50 = vld [vmem:[%s10547_s3 + $0xd00] sm:$0xff] }
 0x1dc   :  { %v7607_v0 = vadd.f32 %v1890_v58, %v318_v37  ;;  %5232 = vmatpush1.bf16.msra.mxu0 %v7261_v17  ;;  %5404 = vmatpush1.bf16.msra.mxu1 %v7263_v42  ;;  %v7611_v6 = vadd.f32 %v1976_v1, %v326_v10  ;;  %v1984_v9 = vmax.f32 %v7605_v48, 0.0  ;;  %v1986_v15 = vmax.f32 %v7609_v53, 0.0  ;;  %v2403_v37 = vld [vmem:[%s10547_s3 + $0xc80] sm:$0xff]  ;;  %v2404_v10 = vld [vmem:[%s10547_s3 + $0xc88] sm:$0xff] }
 0x1dd   :  { %v1991_v5 = vmax.f32 %v7606_v54, 0.0  ;;  %5233 = vmatprep.subr.bf16.mxu0 %v7270_v45  ;;  %5405 = vmatprep.subr.bf16.mxu1 %v7272_v46  ;;  %v1993_v11 = vmax.f32 %v7610_v61, 0.0  ;;  %v7288_v39 = vcombine.high %v2396_v25, %v2400_v32  ;;  %v7285_v17 = vcombine.low %v2395_v13, %v2399_v24  ;;  %v2415_v45 = vld [vmem:[%s10547_s3 + $0xce0] sm:$0xff]  ;;  %v2412_v46 = vld [vmem:[%s10547_s3 + $0xcc8] sm:$0xff] }
 0x1de   :  { %v1992_v12 = vmax.f32 %v7607_v0, 0.0  ;;  %v1994_v21 = vmax.f32 %v7611_v6, 0.0  ;;  %v7287_v42 = vcombine.low %v2396_v25, %v2400_v32  ;;  %v7294_v56 = vcombine.high %v2403_v37, %v2407_v40  ;;  %v2424_v53 = vld [vmem:[%s10547_s3 + $0xd28] sm:$0xff]  ;;  %v2431_v61 = vld [vmem:[%s10547_s3 + $0xd60] sm:$0xff] }
 0x1df   :  { %v9290_v20 = vpack.c.bf16 %v1991_v5, %v1983_v4  ;;  %v9301_v33 = vpack.c.bf16 %v1993_v11, %v1985_v8  ;;  %v7296_v43 = vcombine.high %v2404_v10, %v2408_v41  ;;  %v7293_v28 = vcombine.low %v2403_v37, %v2407_v40  ;;  %v2428_v0 = vld [vmem:[%s10547_s3 + $0xd48] sm:$0xff]  ;;  %v2439_v8 = vld [vmem:[%s10547_s3 + $0xda0] sm:$0xff] }
 0x1e0   :  { %v9303_v34 = vpack.c.bf16 %v1992_v12, %v1984_v9  ;;  %5234 = vmatpush1.bf16.msra.mxu0 %v7269_v59  ;;  %5406 = vmatpush1.bf16.msra.mxu1 %v7271_v60  ;;  %v9305_v36 = vpack.c.bf16 %v1994_v21, %v1986_v15  ;;  %v7295_v47 = vcombine.low %v2404_v10, %v2408_v41  ;;  %v2427_v60 = vld [vmem:[%s10547_s3 + $0xd40] sm:$0xff]  ;;  %v2432_v1 = vld [vmem:[%s10547_s3 + $0xd68] sm:$0xff] }
 0x1e1   :  { %5246 = vmatprep.subr.bf16.mxu0 %v7278_v3  ;;  %5418 = vmatprep.subr.bf16.mxu1 %v7280_v7  ;;  %v7302_v48 = vcombine.high %v2411_v44, %v2415_v45  ;;  %v7304_v49 = vcombine.high %v2412_v46, %v2416_v19  ;;  %v7301_v54 = vcombine.low %v2411_v44, %v2415_v45  ;;  %v2435_v7 = vld [vmem:[%s10547_s3 + $0xd80] sm:$0xff]  ;;  %v2436_v9 = vld [vmem:[%s10547_s3 + $0xd88] sm:$0xff] }
 0x1e2   :  { %5235 = vmatprep.mubr.bf16.mxu0 %v9303_v34  ;;  %5407 = vmatprep.mubr.bf16.mxu1 %v9303_v34  ;;  %v7303_v55 = vcombine.low %v2412_v46, %v2416_v19  ;;  %v7310_v58 = vcombine.high %v2419_v50, %v2423_v51  ;;  %v7312_v59 = vcombine.high %v2420_v52, %v2424_v53  ;;  %v2440_v11 = vld [vmem:[%s10547_s3 + $0xda8] sm:$0xff]  ;;  %v2447_v24 = vld [vmem:[%s10547_s3 + $0xde0] sm:$0xff] }
 0x1e3   :  { %5236 = vmatmul.mubr.bf16.vlgmr.msra.gmra.mrb[8].mxu0 %v9290_v20  ;;  %5408 = vmatmul.mubr.bf16.vlgmr.msra.gmra.mrb[8].mxu1 %v9290_v20  ;;  %v7309_v3 = vcombine.low %v2419_v50, %v2423_v51  ;;  %v7311_v4 = vcombine.low %v2420_v52, %v2424_v53  ;;  %v7318_v5 = vcombine.high %v2427_v60, %v2431_v61  ;;  %v2444_v25 = vld [vmem:[%s10547_s3 + $0xdc8] sm:$0xff]  ;;  %v2451_v40 = vld [vmem:[%s10547_s3 + $0xe00] sm:$0xff] }
 0x1e4   :  { %5247 = vmatpush1.bf16.msra.mxu0 %v7277_v22  ;;  %5419 = vmatpush1.bf16.msra.mxu1 %v7279_v35  ;;  %v7320_v6 = vcombine.high %v2428_v0, %v2432_v1  ;;  %v7317_v12 = vcombine.low %v2427_v60, %v2431_v61  ;;  %v7319_v13 = vcombine.low %v2428_v0, %v2432_v1  ;;  %v2443_v22 = vld [vmem:[%s10547_s3 + $0xdc0] sm:$0xff]  ;;  %v2448_v32 = vld [vmem:[%s10547_s3 + $0xde8] sm:$0xff] }
 0x1e5   :  { %5278 = vmatprep.mubr.bf16.mxu0 %v9305_v36  ;;  %5450 = vmatprep.mubr.bf16.mxu1 %v9305_v36  ;;  %v7326_v15 = vcombine.high %v2435_v7, %v2439_v8  ;;  %v7328_v21 = vcombine.high %v2436_v9, %v2440_v11  ;;  %v7325_v35 = vcombine.low %v2435_v7, %v2439_v8  ;;  %v2455_v10 = vld [vmem:[%s10547_s3 + $0xe20] sm:$0xff]  ;;  %v2452_v41 = vld [vmem:[%s10547_s3 + $0xe08] sm:$0xff] }
 0x1e6   :  { %5248 = vmatprep.subr.bf16.mxu0 %v7286_v38  ;;  %5420 = vmatprep.subr.bf16.mxu1 %v7288_v39  ;;  %v7327_v37 = vcombine.low %v2436_v9, %v2440_v11  ;;  %v7334_v38 = vcombine.high %v2443_v22, %v2447_v24  ;;  %v7336_v39 = vcombine.high %v2444_v25, %v2448_v32  ;;  %v2459_v45 = vld [vmem:[%s10547_s3 + $0xe40] sm:$0xff]  ;;  %v2460_v19 = vld [vmem:[%s10547_s3 + $0xe48] sm:$0xff] }
 0x1e7   :  { %v2463_v46 = vld [vmem:[%s10547_s3 + $0xe60] sm:$0xff]  ;;  %v2468_v53 = vld [vmem:[%s10547_s3 + $0xe88] sm:$0xff] }
 0x1e8   :  { %5249 = vmatpush1.bf16.msra.mxu0 %v7285_v17  ;;  %5421 = vmatpush1.bf16.msra.mxu1 %v7287_v42  ;;  %v2456_v17 = vld [vmem:[%s10547_s3 + $0xe28] sm:$0xff]  ;;  %v7333_v42 = vcombine.low %v2443_v22, %v2447_v24  ;;  %v2467_v51 = vld [vmem:[%s10547_s3 + $0xe80] sm:$0xff] }
 0x1e9   :  { %5250 = vmatprep.subr.bf16.mxu0 %v7294_v56  ;;  %5422 = vmatprep.subr.bf16.mxu1 %v7296_v43  ;;  %v7335_v56 = vcombine.low %v2444_v25, %v2448_v32  ;;  %v7342_v43 = vcombine.high %v2451_v40, %v2455_v10  ;;  %v7344_v44 = vcombine.high %v2452_v41, %v2456_v17  ;;  %v2471_v52 = vld [vmem:[%s10547_s3 + $0xea0] sm:$0xff]  ;;  %v2476_v1 = vld [vmem:[%s10547_s3 + $0xec8] sm:$0xff] }
 0x1ea   :  { %v2475_v61 = vld [vmem:[%s10547_s3 + $0xec0] sm:$0xff]  ;;  %v2484_v11 = vld [vmem:[%s10547_s3 + $0xf08] sm:$0xff] }
 0x1eb   :  { %v2479_v0 = vld [vmem:[%s10547_s3 + $0xee0] sm:$0xff]  ;;  %v2492_v32 = vld [vmem:[%s10547_s3 + $0xf48] sm:$0xff] }
 0x1ec   :  { %5251 = vmatpush1.bf16.msra.mxu0 %v7293_v28  ;;  %5423 = vmatpush1.bf16.msra.mxu1 %v7295_v47  ;;  %v2464_v28 = vld [vmem:[%s10547_s3 + $0xe68] sm:$0xff]  ;;  %v7341_v47 = vcombine.low %v2451_v40, %v2455_v10  ;;  %v2483_v8 = vld [vmem:[%s10547_s3 + $0xf00] sm:$0xff] }
 0x1ed   :  { %5252 = vmatprep.subr.bf16.mxu0 %v7302_v48  ;;  %5424 = vmatprep.subr.bf16.mxu1 %v7304_v49  ;;  %v7343_v48 = vcombine.low %v2452_v41, %v2456_v17  ;;  %v7350_v49 = vcombine.high %v2459_v45, %v2463_v46  ;;  %v7352_v50 = vcombine.high %v2460_v19, %v2464_v28  ;;  %v2487_v9 = vld [vmem:[%s10547_s3 + $0xf20] sm:$0xff]  ;;  %v2500_v17 = vld [vmem:[%s10547_s3 + $0xf88] sm:$0xff] }
 0x1ee   :  { %v2491_v24 = vld [vmem:[%s10547_s3 + $0xf40] sm:$0xff] }
 0x1ef   :  { %v2495_v25 = vld [vmem:[%s10547_s3 + $0xf60] sm:$0xff] }
 0x1f0   :  { %5253 = vmatpush1.bf16.msra.mxu0 %v7301_v54  ;;  %5425 = vmatpush1.bf16.msra.mxu1 %v7303_v55  ;;  %v2472_v54 = vld [vmem:[%s10547_s3 + $0xea8] sm:$0xff]  ;;  %v7349_v55 = vcombine.low %v2459_v45, %v2463_v46  ;;  %v2499_v10 = vld [vmem:[%s10547_s3 + $0xf80] sm:$0xff] }
 0x1f1   :  { %5254 = vmatprep.subr.bf16.mxu0 %v7310_v58  ;;  %5426 = vmatprep.subr.bf16.mxu1 %v7312_v59  ;;  %v7351_v58 = vcombine.low %v2460_v19, %v2464_v28  ;;  %v7358_v59 = vcombine.high %v2467_v51, %v2471_v52  ;;  %v7360_v60 = vcombine.high %v2468_v53, %v2472_v54  ;;  %v2503_v41 = vld [vmem:[%s10547_s3 + $0xfa0] sm:$0xff]  ;;  %v2508_v28 = vld [vmem:[%s10547_s3 + $0xfc8] sm:$0xff] }
 0x1f2   :  { %v2507_v46 = vld [vmem:[%s10547_s3 + $0xfc0] sm:$0xff] }
 0x1f3   :  { %v2511_v19 = vld [vmem:[%s10547_s3 + $0xfe0] sm:$0xff] }
 0x1f4   :  { %5255 = vmatpush1.bf16.msra.mxu0 %v7309_v3  ;;  %5427 = vmatpush1.bf16.msra.mxu1 %v7311_v4  ;;  %v2480_v3 = vld [vmem:[%s10547_s3 + $0xee8] sm:$0xff]  ;;  %v7357_v4 = vcombine.low %v2467_v51, %v2471_v52  ;;  %v2005_v52 = vld [vmem:[%s10547_s3 + $0x10] sm:$0xff] }
 0x1f5   :  { %5256 = vmatprep.subr.bf16.mxu0 %v7318_v5  ;;  %5428 = vmatprep.subr.bf16.mxu1 %v7320_v6  ;;  %v7359_v5 = vcombine.low %v2468_v53, %v2472_v54  ;;  %v7366_v6 = vcombine.high %v2475_v61, %v2479_v0  ;;  %v7368_v7 = vcombine.high %v2476_v1, %v2480_v3  ;;  %v2009_v53 = vld [vmem:[%s10547_s3 + $0x30] sm:$0xff]  ;;  %v2006_v54 = vld [vmem:[%s10547_s3 + $0x18] sm:$0xff] }
 0x1f8   :  { %5257 = vmatpush1.bf16.msra.mxu0 %v7317_v12  ;;  %5429 = vmatpush1.bf16.msra.mxu1 %v7319_v13  ;;  %v2488_v12 = vld [vmem:[%s10547_s3 + $0xf28] sm:$0xff]  ;;  %v7365_v13 = vcombine.low %v2475_v61, %v2479_v0  ;;  %v2013_v0 = vld [vmem:[%s10547_s3 + $0x50] sm:$0xff] }
 0x1f9   :  { %5258 = vmatprep.subr.bf16.mxu0 %v7326_v15  ;;  %5430 = vmatprep.subr.bf16.mxu1 %v7328_v21  ;;  %v7367_v15 = vcombine.low %v2476_v1, %v2480_v3  ;;  %v7374_v21 = vcombine.high %v2483_v8, %v2487_v9  ;;  %v7376_v22 = vcombine.high %v2484_v11, %v2488_v12  ;;  %v2017_v1 = vld [vmem:[%s10547_s3 + $0x70] sm:$0xff]  ;;  %v2014_v3 = vld [vmem:[%s10547_s3 + $0x58] sm:$0xff] }
 0x1fc   :  { %5259 = vmatpush1.bf16.msra.mxu0 %v7325_v35  ;;  %5431 = vmatpush1.bf16.msra.mxu1 %v7327_v37  ;;  %v2496_v35 = vld [vmem:[%s10547_s3 + $0xf68] sm:$0xff]  ;;  %v7373_v37 = vcombine.low %v2483_v8, %v2487_v9  ;;  %v2021_v9 = vld [vmem:[%s10547_s3 + $0x90] sm:$0xff] }
 0x1fd   :  { %5260 = vmatprep.subr.bf16.mxu0 %v7334_v38  ;;  %5432 = vmatprep.subr.bf16.mxu1 %v7336_v39  ;;  %v7375_v38 = vcombine.low %v2484_v11, %v2488_v12  ;;  %v7382_v39 = vcombine.high %v2491_v24, %v2495_v25  ;;  %v7384_v40 = vcombine.high %v2492_v32, %v2496_v35  ;;  %v2025_v11 = vld [vmem:[%s10547_s3 + $0xb0] sm:$0xff]  ;;  %v2022_v12 = vld [vmem:[%s10547_s3 + $0x98] sm:$0xff] }
 0x200   :  { %5261 = vmatpush1.bf16.msra.mxu0 %v7333_v42  ;;  %5433 = vmatpush1.bf16.msra.mxu1 %v7335_v56  ;;  %v2504_v42 = vld [vmem:[%s10547_s3 + $0xfa8] sm:$0xff]  ;;  %v7381_v56 = vcombine.low %v2491_v24, %v2495_v25  ;;  %v2029_v25 = vld [vmem:[%s10547_s3 + $0xd0] sm:$0xff] }
 0x201   :  { %5262 = vmatprep.subr.bf16.mxu0 %v7342_v43  ;;  %5434 = vmatprep.subr.bf16.mxu1 %v7344_v44  ;;  %v7383_v43 = vcombine.low %v2492_v32, %v2496_v35  ;;  %v7390_v44 = vcombine.high %v2499_v10, %v2503_v41  ;;  %v7392_v45 = vcombine.high %v2500_v17, %v2504_v42  ;;  %v2033_v32 = vld [vmem:[%s10547_s3 + $0xf0] sm:$0xff]  ;;  %v2030_v35 = vld [vmem:[%s10547_s3 + $0xd8] sm:$0xff] }
 0x204   :  { %5263 = vmatpush1.bf16.msra.mxu0 %v7341_v47  ;;  %5435 = vmatpush1.bf16.msra.mxu1 %v7343_v48  ;;  %v2512_v47 = vld [vmem:[%s10547_s3 + $0xfe8] sm:$0xff]  ;;  %v7389_v48 = vcombine.low %v2499_v10, %v2503_v41  ;;  %v2037_v10 = vld [vmem:[%s10547_s3 + $0x110] sm:$0xff] }
 0x205   :  { %5264 = vmatprep.subr.bf16.mxu0 %v7350_v49  ;;  %5436 = vmatprep.subr.bf16.mxu1 %v7352_v50  ;;  %v7391_v49 = vcombine.low %v2500_v17, %v2504_v42  ;;  %v7398_v50 = vcombine.high %v2507_v46, %v2511_v19  ;;  %v7400_v51 = vcombine.high %v2508_v28, %v2512_v47  ;;  %v2041_v41 = vld [vmem:[%s10547_s3 + $0x130] sm:$0xff]  ;;  %v2038_v17 = vld [vmem:[%s10547_s3 + $0x118] sm:$0xff] }
 0x206   :  { %v2042_v42 = vld [vmem:[%s10547_s3 + $0x138] sm:$0xff] }
 0x208   :  { %5265 = vmatpush1.bf16.msra.mxu0 %v7349_v55  ;;  %5437 = vmatpush1.bf16.msra.mxu1 %v7351_v58  ;;  %v2010_v55 = vld [vmem:[%s10547_s3 + $0x38] sm:$0xff]  ;;  %v7397_v58 = vcombine.low %v2507_v46, %v2511_v19  ;;  %v2045_v46 = vld [vmem:[%s10547_s3 + $0x150] sm:$0xff] }
 0x209   :  { %5266 = vmatprep.subr.bf16.mxu0 %v7358_v59  ;;  %5438 = vmatprep.subr.bf16.mxu1 %v7360_v60  ;;  %v7399_v59 = vcombine.low %v2508_v28, %v2512_v47  ;;  %v6898_v60 = vcombine.high %v2005_v52, %v2009_v53  ;;  %v6900_v61 = vcombine.high %v2006_v54, %v2010_v55  ;;  %v2049_v19 = vld [vmem:[%s10547_s3 + $0x170] sm:$0xff]  ;;  %v2046_v28 = vld [vmem:[%s10547_s3 + $0x158] sm:$0xff] }
 0x20a   :  { %v2050_v47 = vld [vmem:[%s10547_s3 + $0x178] sm:$0xff] }
 0x20c   :  { %5267 = vmatpush1.bf16.msra.mxu0 %v7357_v4  ;;  %5439 = vmatpush1.bf16.msra.mxu1 %v7359_v5  ;;  %v2018_v4 = vld [vmem:[%s10547_s3 + $0x78] sm:$0xff]  ;;  %v6897_v5 = vcombine.low %v2005_v52, %v2009_v53  ;;  %v2053_v52 = vld [vmem:[%s10547_s3 + $0x190] sm:$0xff] }
 0x20d   :  { %5268 = vmatprep.subr.bf16.mxu0 %v7366_v6  ;;  %5440 = vmatprep.subr.bf16.mxu1 %v7368_v7  ;;  %v6899_v6 = vcombine.low %v2006_v54, %v2010_v55  ;;  %v6906_v7 = vcombine.high %v2013_v0, %v2017_v1  ;;  %v6908_v8 = vcombine.high %v2014_v3, %v2018_v4  ;;  %v2057_v53 = vld [vmem:[%s10547_s3 + $0x1b0] sm:$0xff]  ;;  %v2054_v54 = vld [vmem:[%s10547_s3 + $0x198] sm:$0xff] }
 0x20e   :  { %v2058_v55 = vld [vmem:[%s10547_s3 + $0x1b8] sm:$0xff] }
 0x210   :  { %5269 = vmatpush1.bf16.msra.mxu0 %v7365_v13  ;;  %5441 = vmatpush1.bf16.msra.mxu1 %v7367_v15  ;;  %v2026_v13 = vld [vmem:[%s10547_s3 + $0xb8] sm:$0xff]  ;;  %v6905_v15 = vcombine.low %v2013_v0, %v2017_v1  ;;  %v2061_v0 = vld [vmem:[%s10547_s3 + $0x1d0] sm:$0xff] }
 0x211   :  { %5270 = vmatprep.subr.bf16.mxu0 %v7374_v21  ;;  %5442 = vmatprep.subr.bf16.mxu1 %v7376_v22  ;;  %v6907_v21 = vcombine.low %v2014_v3, %v2018_v4  ;;  %v6914_v22 = vcombine.high %v2021_v9, %v2025_v11  ;;  %v6916_v24 = vcombine.high %v2022_v12, %v2026_v13  ;;  %v2065_v1 = vld [vmem:[%s10547_s3 + $0x1f0] sm:$0xff]  ;;  %v2062_v3 = vld [vmem:[%s10547_s3 + $0x1d8] sm:$0xff] }
 0x212   :  { %v2066_v4 = vld [vmem:[%s10547_s3 + $0x1f8] sm:$0xff] }
 0x214   :  { %5271 = vmatpush1.bf16.msra.mxu0 %v7373_v37  ;;  %5443 = vmatpush1.bf16.msra.mxu1 %v7375_v38  ;;  %v6913_v37 = vcombine.low %v2021_v9, %v2025_v11  ;;  %v6915_v38 = vcombine.low %v2022_v12, %v2026_v13  ;;  %v2069_v9 = vld [vmem:[%s10547_s3 + $0x210] sm:$0xff]  ;;  %v2070_v12 = vld [vmem:[%s10547_s3 + $0x218] sm:$0xff] }
 0x215   :  { %5272 = vmatprep.subr.bf16.mxu0 %v7382_v39  ;;  %5444 = vmatprep.subr.bf16.mxu1 %v7384_v40  ;;  %v6922_v39 = vcombine.high %v2029_v25, %v2033_v32  ;;  %v2073_v11 = vld [vmem:[%s10547_s3 + $0x230] sm:$0xff]  ;;  %v2074_v13 = vld [vmem:[%s10547_s3 + $0x238] sm:$0xff] }
 0x218   :  { %5273 = vmatpush1.bf16.msra.mxu0 %v7381_v56  ;;  %5445 = vmatpush1.bf16.msra.mxu1 %v7383_v43  ;;  %v6921_v56 = vcombine.low %v2029_v25, %v2033_v32  ;;  %v2077_v25 = vld [vmem:[%s10547_s3 + $0x250] sm:$0xff] }
 0x219   :  { %5274 = vmatprep.subr.bf16.mxu0 %v7390_v44  ;;  %5446 = vmatprep.subr.bf16.mxu1 %v7392_v45  ;;  %v6930_v44 = vcombine.high %v2037_v10, %v2041_v41  ;;  %v6932_v45 = vcombine.high %v2038_v17, %v2042_v42  ;;  %v2081_v32 = vld [vmem:[%s10547_s3 + $0x270] sm:$0xff] }
 0x21c   :  { %5275 = vmatpush1.bf16.msra.mxu0 %v7389_v48  ;;  %5447 = vmatpush1.bf16.msra.mxu1 %v7391_v49  ;;  %v6929_v48 = vcombine.low %v2037_v10, %v2041_v41  ;;  %v6931_v49 = vcombine.low %v2038_v17, %v2042_v42  ;;  %v2085_v10 = vld [vmem:[%s10547_s3 + $0x290] sm:$0xff]  ;;  %v2086_v17 = vld [vmem:[%s10547_s3 + $0x298] sm:$0xff] }
 0x21d   :  { %5276 = vmatprep.subr.bf16.mxu0 %v7398_v50  ;;  %5448 = vmatprep.subr.bf16.mxu1 %v7400_v51  ;;  %v6938_v50 = vcombine.high %v2045_v46, %v2049_v19  ;;  %v6940_v51 = vcombine.high %v2046_v28, %v2050_v47  ;;  %v2089_v41 = vld [vmem:[%s10547_s3 + $0x2b0] sm:$0xff]  ;;  %v2090_v42 = vld [vmem:[%s10547_s3 + $0x2b8] sm:$0xff] }
 0x220   :  { %5277 = vmatpush1.bf16.msra.mxu0 %v7397_v58  ;;  %5449 = vmatpush1.bf16.msra.mxu1 %v7399_v59  ;;  %v6937_v58 = vcombine.low %v2045_v46, %v2049_v19  ;;  %v6939_v59 = vcombine.low %v2046_v28, %v2050_v47  ;;  %v2093_v46 = vld [vmem:[%s10547_s3 + $0x2d0] sm:$0xff]  ;;  %v2094_v28 = vld [vmem:[%s10547_s3 + $0x2d8] sm:$0xff] }
 0x221   :  { %5461 = vmatprep.subr.bf16.mxu0 %v6898_v60  ;;  %5633 = vmatprep.subr.bf16.mxu1 %v6900_v61  ;;  %v6946_v60 = vcombine.high %v2053_v52, %v2057_v53  ;;  %v6948_v61 = vcombine.high %v2054_v54, %v2058_v55  ;;  %v2097_v19 = vld [vmem:[%s10547_s3 + $0x2f0] sm:$0xff]  ;;  %v2098_v47 = vld [vmem:[%s10547_s3 + $0x2f8] sm:$0xff] }
 0x223   :  { %5279 = vmatmul.mubr.bf16.vlgmr.msra.gmra.mrb[8].mxu0 %v9301_v33  ;;  %5451 = vmatmul.mubr.bf16.vlgmr.msra.gmra.mrb[8].mxu1 %v9301_v33 }
 0x224   :  { %5462 = vmatpush1.bf16.msra.mxu0 %v6897_v5  ;;  %5493 = vmatprep.mubr.bf16.mxu0 %v8883_v63  ;;  %v6945_v5 = vcombine.low %v2053_v52, %v2057_v53  ;;  %v2101_v52 = vld [vmem:[%s10547_s3 + $0x310] sm:$0xff] }
 0x225   :  { %5634 = vmatpush1.bf16.msra.mxu1 %v6899_v6  ;;  %5665 = vmatprep.mubr.bf16.mxu1 %v8883_v63  ;;  %v2034_v63 = vld [vmem:[%s10547_s3 + $0xf8] sm:$0xff]  ;;  %v6947_v6 = vcombine.low %v2054_v54, %v2058_v55  ;;  %v2105_v53 = vld [vmem:[%s10547_s3 + $0x330] sm:$0xff] }
 0x226   :  { %5463 = vmatprep.subr.bf16.mxu0 %v6906_v7  ;;  %5635 = vmatprep.subr.bf16.mxu1 %v6908_v8  ;;  %v6924_v40 = vcombine.high %v2030_v35, %v2034_v63  ;;  %v6923_v43 = vcombine.low %v2030_v35, %v2034_v63  ;;  %v6954_v7 = vcombine.high %v2061_v0, %v2065_v1  ;;  %v2078_v35 = vld [vmem:[%s10547_s3 + $0x258] sm:$0xff] }
 0x227   :  { %v6956_v8 = vcombine.high %v2062_v3, %v2066_v4  ;;  %v2082_v63 = vld [vmem:[%s10547_s3 + $0x278] sm:$0xff] }
 0x228   :  { %5464 = vmatpush1.bf16.msra.mxu0 %v6905_v15  ;;  %v6953_v15 = vcombine.low %v2061_v0, %v2065_v1  ;;  %v2102_v54 = vld [vmem:[%s10547_s3 + $0x318] sm:$0xff]  ;;  %v2109_v0 = vld [vmem:[%s10547_s3 + $0x350] sm:$0xff] }
 0x229   :  { %5636 = vmatpush1.bf16.msra.mxu1 %v6907_v21  ;;  %5465 = vmatprep.subr.bf16.mxu0 %v6914_v22  ;;  %v6955_v21 = vcombine.low %v2062_v3, %v2066_v4  ;;  %v6962_v22 = vcombine.high %v2069_v9, %v2073_v11  ;;  %v2106_v55 = vld [vmem:[%s10547_s3 + $0x338] sm:$0xff]  ;;  %v2113_v1 = vld [vmem:[%s10547_s3 + $0x370] sm:$0xff] }
 0x22a   :  { %5637 = vmatprep.subr.bf16.mxu1 %v6916_v24  ;;  %v6964_v24 = vcombine.high %v2070_v12, %v2074_v13  ;;  %v2110_v3 = vld [vmem:[%s10547_s3 + $0x358] sm:$0xff] }
 0x22b   :  { %v2114_v4 = vld [vmem:[%s10547_s3 + $0x378] sm:$0xff] }
 0x22c   :  { %5466 = vmatpush1.bf16.msra.mxu0 %v6913_v37  ;;  %v6961_v37 = vcombine.low %v2069_v9, %v2073_v11  ;;  %v2117_v9 = vld [vmem:[%s10547_s3 + $0x390] sm:$0xff] }
 0x22d   :  { %5638 = vmatpush1.bf16.msra.mxu1 %v6915_v38  ;;  %5467 = vmatprep.subr.bf16.mxu0 %v6922_v39  ;;  %v6963_v38 = vcombine.low %v2070_v12, %v2074_v13  ;;  %v6970_v39 = vcombine.high %v2077_v25, %v2081_v32  ;;  %v2121_v11 = vld [vmem:[%s10547_s3 + $0x3b0] sm:$0xff]  ;;  %v2118_v12 = vld [vmem:[%s10547_s3 + $0x398] sm:$0xff] }
 0x22e   :  { %5639 = vmatprep.subr.bf16.mxu1 %v6924_v40  ;;  %v6972_v40 = vcombine.high %v2078_v35, %v2082_v63  ;;  %v2122_v13 = vld [vmem:[%s10547_s3 + $0x3b8] sm:$0xff] }
 0x230   :  { %5468 = vmatpush1.bf16.msra.mxu0 %v6921_v56  ;;  %v6969_v56 = vcombine.low %v2077_v25, %v2081_v32  ;;  %v2125_v25 = vld [vmem:[%s10547_s3 + $0x3d0] sm:$0xff] }
 0x231   :  { %5640 = vmatpush1.bf16.msra.mxu1 %v6923_v43  ;;  %5469 = vmatprep.subr.bf16.mxu0 %v6930_v44  ;;  %v6971_v43 = vcombine.low %v2078_v35, %v2082_v63  ;;  %v6978_v44 = vcombine.high %v2085_v10, %v2089_v41  ;;  %v2129_v32 = vld [vmem:[%s10547_s3 + $0x3f0] sm:$0xff]  ;;  %v2126_v35 = vld [vmem:[%s10547_s3 + $0x3d8] sm:$0xff] }
 0x232   :  { %5641 = vmatprep.subr.bf16.mxu1 %v6932_v45  ;;  %v6980_v45 = vcombine.high %v2086_v17, %v2090_v42  ;;  %v2130_v63 = vld [vmem:[%s10547_s3 + $0x3f8] sm:$0xff] }
 0x234   :  { %5470 = vmatpush1.bf16.msra.mxu0 %v6929_v48  ;;  %v6977_v48 = vcombine.low %v2085_v10, %v2089_v41  ;;  %v2133_v10 = vld [vmem:[%s10547_s3 + $0x410] sm:$0xff] }
 0x235   :  { %5642 = vmatpush1.bf16.msra.mxu1 %v6931_v49  ;;  %5471 = vmatprep.subr.bf16.mxu0 %v6938_v50  ;;  %v6979_v49 = vcombine.low %v2086_v17, %v2090_v42  ;;  %v6986_v50 = vcombine.high %v2093_v46, %v2097_v19  ;;  %v2137_v41 = vld [vmem:[%s10547_s3 + $0x430] sm:$0xff]  ;;  %v2134_v17 = vld [vmem:[%s10547_s3 + $0x418] sm:$0xff] }
 0x236   :  { %5643 = vmatprep.subr.bf16.mxu1 %v6940_v51  ;;  %v6988_v51 = vcombine.high %v2094_v28, %v2098_v47  ;;  %v2138_v42 = vld [vmem:[%s10547_s3 + $0x438] sm:$0xff] }
 0x238   :  { %5472 = vmatpush1.bf16.msra.mxu0 %v6937_v58  ;;  %v6985_v58 = vcombine.low %v2093_v46, %v2097_v19  ;;  %v2141_v46 = vld [vmem:[%s10547_s3 + $0x450] sm:$0xff] }
 0x239   :  { %5644 = vmatpush1.bf16.msra.mxu1 %v6939_v59  ;;  %5473 = vmatprep.subr.bf16.mxu0 %v6946_v60  ;;  %v6987_v59 = vcombine.low %v2094_v28, %v2098_v47  ;;  %v6994_v60 = vcombine.high %v2101_v52, %v2105_v53  ;;  %v2145_v19 = vld [vmem:[%s10547_s3 + $0x470] sm:$0xff]  ;;  %v7025_v28 = vcombine.low %v2133_v10, %v2137_v41  ;;  %v2142_v47 = vld [vmem:[%s10547_s3 + $0x458] sm:$0xff] }
 0x23a   :  { %5645 = vmatprep.subr.bf16.mxu1 %v6948_v61  ;;  %v6996_v61 = vcombine.high %v2102_v54, %v2106_v55 }
 0x23c   :  { %5474 = vmatpush1.bf16.msra.mxu0 %v6945_v5  ;;  %v6993_v5 = vcombine.low %v2101_v52, %v2105_v53  ;;  %v2153_v52 = vld [vmem:[%s10547_s3 + $0x4b0] sm:$0xff] }
 0x23d   :  { %5646 = vmatpush1.bf16.msra.mxu1 %v6947_v6  ;;  %5475 = vmatprep.subr.bf16.mxu0 %v6954_v7  ;;  %v6995_v6 = vcombine.low %v2102_v54, %v2106_v55  ;;  %v7002_v7 = vcombine.high %v2109_v0, %v2113_v1  ;;  %v2150_v54 = vld [vmem:[%s10547_s3 + $0x498] sm:$0xff] }
 0x23e   :  { %5647 = vmatprep.subr.bf16.mxu1 %v6956_v8  ;;  %v7004_v8 = vcombine.high %v2110_v3, %v2114_v4  ;;  %v2154_v55 = vld [vmem:[%s10547_s3 + $0x4b8] sm:$0xff] }
 0x240   :  { %5476 = vmatpush1.bf16.msra.mxu0 %v6953_v15  ;;  %v7001_v15 = vcombine.low %v2109_v0, %v2113_v1  ;;  %v2157_v0 = vld [vmem:[%s10547_s3 + $0x4d0] sm:$0xff] }
 0x241   :  { %5648 = vmatpush1.bf16.msra.mxu1 %v6955_v21  ;;  %5477 = vmatprep.subr.bf16.mxu0 %v6962_v22  ;;  %v7003_v21 = vcombine.low %v2110_v3, %v2114_v4  ;;  %v7010_v22 = vcombine.high %v2117_v9, %v2121_v11  ;;  %v2161_v1 = vld [vmem:[%s10547_s3 + $0x4f0] sm:$0xff]  ;;  %v2162_v3 = vld [vmem:[%s10547_s3 + $0x4f8] sm:$0xff]  ;;  %v7043_v4 = vcombine.low %v2150_v54, %v2154_v55 }
 0x242   :  { %5649 = vmatprep.subr.bf16.mxu1 %v6964_v24  ;;  %v7012_v24 = vcombine.high %v2118_v12, %v2122_v13 }
 0x244   :  { %5478 = vmatpush1.bf16.msra.mxu0 %v6961_v37  ;;  %v7009_v37 = vcombine.low %v2117_v9, %v2121_v11  ;;  %v2166_v9 = vld [vmem:[%s10547_s3 + $0x518] sm:$0xff] }
 0x245   :  { %5650 = vmatpush1.bf16.msra.mxu1 %v6963_v38  ;;  %5479 = vmatprep.subr.bf16.mxu0 %v6970_v39  ;;  %v7011_v38 = vcombine.low %v2118_v12, %v2122_v13  ;;  %v7018_v39 = vcombine.high %v2125_v25, %v2129_v32  ;;  %v2170_v11 = vld [vmem:[%s10547_s3 + $0x538] sm:$0xff]  ;;  %v7049_v12 = vcombine.low %v2157_v0, %v2161_v1 }
 0x246   :  { %5651 = vmatprep.subr.bf16.mxu1 %v6972_v40  ;;  %v7020_v40 = vcombine.high %v2126_v35, %v2130_v63 }
 0x248   :  { %5480 = vmatpush1.bf16.msra.mxu0 %v6969_v56  ;;  %v7017_v56 = vcombine.low %v2125_v25, %v2129_v32  ;;  %v2174_v25 = vld [vmem:[%s10547_s3 + $0x558] sm:$0xff] }
 0x249   :  { %5652 = vmatpush1.bf16.msra.mxu1 %v6971_v43  ;;  %5481 = vmatprep.subr.bf16.mxu0 %v6978_v44  ;;  %v7019_v43 = vcombine.low %v2126_v35, %v2130_v63  ;;  %v7026_v44 = vcombine.high %v2133_v10, %v2137_v41  ;;  %v2178_v32 = vld [vmem:[%s10547_s3 + $0x578] sm:$0xff]  ;;  %v7059_v63 = vcombine.low %v2166_v9, %v2170_v11 }
 0x24a   :  { %5653 = vmatprep.subr.bf16.mxu1 %v6980_v45  ;;  %v7028_v45 = vcombine.high %v2134_v17, %v2138_v42  ;;  %v2182_v10 = vld [vmem:[%s10547_s3 + $0x598] sm:$0xff] }
 0x24b   :  { %v2186_v41 = vld [vmem:[%s10547_s3 + $0x5b8] sm:$0xff] }
 0x24c   :  { %5482 = vmatpush1.bf16.msra.mxu0 %v6977_v48  ;;  %v2146_v48 = vld [vmem:[%s10547_s3 + $0x478] sm:$0xff] }
 0x24d   :  { %5654 = vmatpush1.bf16.msra.mxu1 %v6979_v49  ;;  %5483 = vmatprep.subr.bf16.mxu0 %v6986_v50  ;;  %v7027_v49 = vcombine.low %v2134_v17, %v2138_v42  ;;  %v7034_v50 = vcombine.high %v2141_v46, %v2145_v19  ;;  %v7036_v53 = vcombine.high %v2142_v47, %v2146_v48 }
 0x24e   :  { %5655 = vmatprep.subr.bf16.mxu1 %v6988_v51  ;;  %v2149_v51 = vld [vmem:[%s10547_s3 + $0x490] sm:$0xff]  ;;  %v7067_v42 = vcombine.low %v2174_v25, %v2178_v32 }
 0x250   :  { %5484 = vmatpush1.bf16.msra.mxu0 %v6985_v58  ;;  %v7033_v58 = vcombine.low %v2141_v46, %v2145_v19  ;;  %v2190_v46 = vld [vmem:[%s10547_s3 + $0x5d8] sm:$0xff] }
 0x251   :  { %5656 = vmatpush1.bf16.msra.mxu1 %v6987_v59  ;;  %5485 = vmatprep.subr.bf16.mxu0 %v6994_v60  ;;  %v7035_v59 = vcombine.low %v2142_v47, %v2146_v48  ;;  %v7042_v60 = vcombine.high %v2149_v51, %v2153_v52  ;;  %v2194_v19 = vld [vmem:[%s10547_s3 + $0x5f8] sm:$0xff]  ;;  %v7075_v47 = vcombine.low %v2182_v10, %v2186_v41 }
 0x252   :  { %5657 = vmatprep.subr.bf16.mxu1 %v6996_v61  ;;  %v7044_v61 = vcombine.high %v2150_v54, %v2154_v55  ;;  %v7083_v55 = vcombine.low %v2190_v46, %v2194_v19 }
 0x254   :  { %5486 = vmatpush1.bf16.msra.mxu0 %v6993_v5  ;;  %v7050_v5 = vcombine.high %v2157_v0, %v2161_v1  ;;  %v2206_v0 = vld [vmem:[%s10547_s3 + $0x658] sm:$0xff] }
 0x255   :  { %5658 = vmatpush1.bf16.msra.mxu1 %v6995_v6  ;;  %5487 = vmatprep.subr.bf16.mxu0 %v7002_v7  ;;  %v2165_v7 = vld [vmem:[%s10547_s3 + $0x510] sm:$0xff]  ;;  %v2210_v1 = vld [vmem:[%s10547_s3 + $0x678] sm:$0xff] }
 0x256   :  { %5659 = vmatprep.subr.bf16.mxu1 %v7004_v8  ;;  %v2169_v8 = vld [vmem:[%s10547_s3 + $0x530] sm:$0xff] }
 0x257   :  { %v7057_v35 = vcombine.low %v2165_v7, %v2169_v8 }
 0x258   :  { %5488 = vmatpush1.bf16.msra.mxu0 %v7001_v15  ;;  %v7058_v15 = vcombine.high %v2165_v7, %v2169_v8  ;;  %v2214_v7 = vld [vmem:[%s10547_s3 + $0x698] sm:$0xff] }
 0x259   :  { %5660 = vmatpush1.bf16.msra.mxu1 %v7003_v21  ;;  %5489 = vmatprep.subr.bf16.mxu0 %v7010_v22  ;;  %v7060_v21 = vcombine.high %v2166_v9, %v2170_v11  ;;  %v2173_v22 = vld [vmem:[%s10547_s3 + $0x550] sm:$0xff]  ;;  %v2218_v8 = vld [vmem:[%s10547_s3 + $0x6b8] sm:$0xff]  ;;  %v7099_v11 = vcombine.low %v2206_v0, %v2210_v1 }
 0x25a   :  { %5661 = vmatprep.subr.bf16.mxu1 %v7012_v24  ;;  %v2177_v24 = vld [vmem:[%s10547_s3 + $0x570] sm:$0xff] }
 0x25b   :  { %v7065_v17 = vcombine.low %v2173_v22, %v2177_v24 }
 0x25c   :  { %5490 = vmatpush1.bf16.msra.mxu0 %v7009_v37  ;;  %v7066_v37 = vcombine.high %v2173_v22, %v2177_v24  ;;  %v2222_v22 = vld [vmem:[%s10547_s3 + $0x6d8] sm:$0xff] }
 0x25d   :  { %5662 = vmatpush1.bf16.msra.mxu1 %v7011_v38  ;;  %5491 = vmatprep.subr.bf16.mxu0 %v7018_v39  ;;  %v7068_v38 = vcombine.high %v2174_v25, %v2178_v32  ;;  %v2181_v39 = vld [vmem:[%s10547_s3 + $0x590] sm:$0xff]  ;;  %v2226_v24 = vld [vmem:[%s10547_s3 + $0x6f8] sm:$0xff]  ;;  %v7107_v32 = vcombine.low %v2214_v7, %v2218_v8 }
 0x25e   :  { %5663 = vmatprep.subr.bf16.mxu1 %v7020_v40  ;;  %v2185_v40 = vld [vmem:[%s10547_s3 + $0x5b0] sm:$0xff] }
 0x260   :  { %5492 = vmatpush1.bf16.msra.mxu0 %v7017_v56  ;;  %v7074_v56 = vcombine.high %v2181_v39, %v2185_v40 }
 0x261   :  { %5664 = vmatpush1.bf16.msra.mxu1 %v7019_v43  ;;  %5504 = vmatprep.subr.bf16.mxu0 %v7026_v44  ;;  %v7076_v43 = vcombine.high %v2182_v10, %v2186_v41  ;;  %v2189_v44 = vld [vmem:[%s10547_s3 + $0x5d0] sm:$0xff]  ;;  %v7115_v41 = vcombine.low %v2222_v22, %v2226_v24 }
 0x262   :  { %5676 = vmatprep.subr.bf16.mxu1 %v7028_v45  ;;  %v2193_v45 = vld [vmem:[%s10547_s3 + $0x5f0] sm:$0xff] }
 0x263   :  { %5494 = vmatmul.mubr.bf16.vlgmr.msra.gmra.mrb[12].mxu0 %v8870_v57  ;;  %v7082_v48 = vcombine.high %v2189_v44, %v2193_v45  ;;  %v7081_v54 = vcombine.low %v2189_v44, %v2193_v45  ;;  %v2238_v44 = vld [vmem:[%s10547_s3 + $0x758] sm:$0xff] }
 0x264   :  { %5666 = vmatmul.mubr.bf16.vlgmr.msra.gmra.mrb[12].mxu1 %v8870_v57  ;;  %5505 = vmatpush1.bf16.msra.mxu0 %v7025_v28  ;;  %v2158_v57 = vld [vmem:[%s10547_s3 + $0x4d8] sm:$0xff]  ;;  %v7073_v28 = vcombine.low %v2181_v39, %v2185_v40 }
 0x265   :  { %5536 = vmatprep.mubr.bf16.mxu0 %v8889_v2  ;;  %5677 = vmatpush1.bf16.msra.mxu1 %v7027_v49  ;;  %v7052_v6 = vcombine.high %v2158_v57, %v2162_v3  ;;  %v7051_v13 = vcombine.low %v2158_v57, %v2162_v3  ;;  %v7084_v49 = vcombine.high %v2190_v46, %v2194_v19  ;;  %v2230_v39 = vld [vmem:[%s10547_s3 + $0x718] sm:$0xff] }
 0x266   :  { %5708 = vmatprep.mubr.bf16.mxu1 %v8889_v2  ;;  %5506 = vmatprep.subr.bf16.mxu0 %v7034_v50  ;;  %v7041_v2 = vcombine.low %v2149_v51, %v2153_v52  ;;  %v2197_v50 = vld [vmem:[%s10547_s3 + $0x610] sm:$0xff]  ;;  %v2198_v52 = vld [vmem:[%s10547_s3 + $0x618] sm:$0xff] }
 0x267   :  { %5678 = vmatprep.subr.bf16.mxu1 %v7036_v53  ;;  %v2201_v51 = vld [vmem:[%s10547_s3 + $0x630] sm:$0xff]  ;;  %v2202_v53 = vld [vmem:[%s10547_s3 + $0x638] sm:$0xff] }
 0x268   :  { %5507 = vmatpush1.bf16.msra.mxu0 %v7033_v58  ;;  %v7090_v58 = vcombine.high %v2197_v50, %v2201_v51  ;;  %v7089_v57 = vcombine.low %v2197_v50, %v2201_v51  ;;  %v7091_v3 = vcombine.low %v2198_v52, %v2202_v53  ;;  %v2234_v40 = vld [vmem:[%s10547_s3 + $0x738] sm:$0xff] }
 0x269   :  { %5679 = vmatpush1.bf16.msra.mxu1 %v7035_v59  ;;  %5508 = vmatprep.subr.bf16.mxu0 %v7042_v60  ;;  %v7092_v59 = vcombine.high %v2198_v52, %v2202_v53  ;;  %v2205_v60 = vld [vmem:[%s10547_s3 + $0x650] sm:$0xff]  ;;  %v2242_v45 = vld [vmem:[%s10547_s3 + $0x778] sm:$0xff]  ;;  %v7123_v19 = vcombine.low %v2230_v39, %v2234_v40 }
 0x26a   :  { %5680 = vmatprep.subr.bf16.mxu1 %v7044_v61  ;;  %v2209_v61 = vld [vmem:[%s10547_s3 + $0x670] sm:$0xff]  ;;  %v2246_v50 = vld [vmem:[%s10547_s3 + $0x798] sm:$0xff]  ;;  %v7131_v53 = vcombine.low %v2238_v44, %v2242_v45 }
 0x26b   :  { %v7097_v9 = vcombine.low %v2205_v60, %v2209_v61  ;;  %v2250_v51 = vld [vmem:[%s10547_s3 + $0x7b8] sm:$0xff] }
 0x26c   :  { %5509 = vmatpush1.bf16.msra.mxu0 %v7041_v2  ;;  %v7098_v2 = vcombine.high %v2205_v60, %v2209_v61  ;;  %v2254_v60 = vld [vmem:[%s10547_s3 + $0x7d8] sm:$0xff] }
 0x26d   :  { %5681 = vmatpush1.bf16.msra.mxu1 %v7043_v4  ;;  %5510 = vmatprep.subr.bf16.mxu0 %v7050_v5  ;;  %v7100_v4 = vcombine.high %v2206_v0, %v2210_v1  ;;  %v2213_v5 = vld [vmem:[%s10547_s3 + $0x690] sm:$0xff]  ;;  %v2258_v61 = vld [vmem:[%s10547_s3 + $0x7f8] sm:$0xff]  ;;  %v7139_v1 = vcombine.low %v2246_v50, %v2250_v51 }
 0x26e   :  { %5682 = vmatprep.subr.bf16.mxu1 %v7052_v6  ;;  %v2217_v6 = vld [vmem:[%s10547_s3 + $0x6b0] sm:$0xff] }
 0x26f   :  { %v7105_v25 = vcombine.low %v2213_v5, %v2217_v6 }
 0x270   :  { %5511 = vmatpush1.bf16.msra.mxu0 %v7049_v12  ;;  %v7106_v12 = vcombine.high %v2213_v5, %v2217_v6  ;;  %v2262_v5 = vld [vmem:[%s10547_s3 + $0x818] sm:$0xff] }
 0x271   :  { %5683 = vmatpush1.bf16.msra.mxu1 %v7051_v13  ;;  %5512 = vmatprep.subr.bf16.mxu0 %v7058_v15  ;;  %v7108_v13 = vcombine.high %v2214_v7, %v2218_v8  ;;  %v2221_v15 = vld [vmem:[%s10547_s3 + $0x6d0] sm:$0xff]  ;;  %v2266_v6 = vld [vmem:[%s10547_s3 + $0x838] sm:$0xff]  ;;  %v7147_v8 = vcombine.low %v2254_v60, %v2258_v61 }
 0x272   :  { %5684 = vmatprep.subr.bf16.mxu1 %v7060_v21  ;;  %v2225_v21 = vld [vmem:[%s10547_s3 + $0x6f0] sm:$0xff] }
 0x273   :  { %v7113_v10 = vcombine.low %v2221_v15, %v2225_v21 }
 0x274   :  { %5513 = vmatpush1.bf16.msra.mxu0 %v7057_v35  ;;  %v7114_v35 = vcombine.high %v2221_v15, %v2225_v21  ;;  %v2270_v21 = vld [vmem:[%s10547_s3 + $0x858] sm:$0xff] }
 0x275   :  { %5685 = vmatpush1.bf16.msra.mxu1 %v7059_v63  ;;  %5514 = vmatprep.subr.bf16.mxu0 %v7066_v37  ;;  %v7116_v63 = vcombine.high %v2222_v22, %v2226_v24  ;;  %v2229_v37 = vld [vmem:[%s10547_s3 + $0x710] sm:$0xff]  ;;  %v2274_v22 = vld [vmem:[%s10547_s3 + $0x878] sm:$0xff]  ;;  %v7155_v24 = vcombine.low %v2262_v5, %v2266_v6 }
 0x276   :  { %5686 = vmatprep.subr.bf16.mxu1 %v7068_v38  ;;  %v2233_v38 = vld [vmem:[%s10547_s3 + $0x730] sm:$0xff] }
 0x277   :  { %v7121_v46 = vcombine.low %v2229_v37, %v2233_v38 }
 0x278   :  { %5515 = vmatpush1.bf16.msra.mxu0 %v7065_v17  ;;  %v7122_v17 = vcombine.high %v2229_v37, %v2233_v38  ;;  %v7164_v37 = vcombine.high %v2270_v21, %v2274_v22  ;;  %v2282_v38 = vld [vmem:[%s10547_s3 + $0x8b8] sm:$0xff] }
 0x279   :  { %5687 = vmatpush1.bf16.msra.mxu1 %v7067_v42  ;;  %5516 = vmatprep.subr.bf16.mxu0 %v7074_v56  ;;  %v7124_v42 = vcombine.high %v2230_v39, %v2234_v40  ;;  %v2237_v56 = vld [vmem:[%s10547_s3 + $0x750] sm:$0xff] }
 0x27a   :  { %5688 = vmatprep.subr.bf16.mxu1 %v7076_v43  ;;  %v2241_v43 = vld [vmem:[%s10547_s3 + $0x770] sm:$0xff] }
 0x27b   :  { %v7129_v52 = vcombine.low %v2237_v56, %v2241_v43  ;;  %v2285_v40 = vld [vmem:[%s10547_s3 + $0x8d0] sm:$0xff] }
 0x27c   :  { %5517 = vmatpush1.bf16.msra.mxu0 %v7073_v28  ;;  %v7130_v28 = vcombine.high %v2237_v56, %v2241_v43  ;;  %v2290_v56 = vld [vmem:[%s10547_s3 + $0x8f8] sm:$0xff] }
 0x27d   :  { %5689 = vmatpush1.bf16.msra.mxu1 %v7075_v47  ;;  %5518 = vmatprep.subr.bf16.mxu0 %v7082_v48  ;;  %v7132_v47 = vcombine.high %v2238_v44, %v2242_v45  ;;  %v2245_v48 = vld [vmem:[%s10547_s3 + $0x790] sm:$0xff] }
 0x27e   :  { %5690 = vmatprep.subr.bf16.mxu1 %v7084_v49  ;;  %v2249_v49 = vld [vmem:[%s10547_s3 + $0x7b0] sm:$0xff] }
 0x27f   :  { %v7137_v0 = vcombine.low %v2245_v48, %v2249_v49  ;;  %v2293_v44 = vld [vmem:[%s10547_s3 + $0x910] sm:$0xff] }
 0x280   :  { %5519 = vmatpush1.bf16.msra.mxu0 %v7081_v54  ;;  %v7138_v54 = vcombine.high %v2245_v48, %v2249_v49  ;;  %v2301_v49 = vld [vmem:[%s10547_s3 + $0x950] sm:$0xff] }
 0x281   :  { %5691 = vmatpush1.bf16.msra.mxu1 %v7083_v55  ;;  %5520 = vmatprep.subr.bf16.mxu0 %v7090_v58  ;;  %v7140_v55 = vcombine.high %v2246_v50, %v2250_v51  ;;  %v2253_v58 = vld [vmem:[%s10547_s3 + $0x7d0] sm:$0xff] }
 0x282   :  { %5692 = vmatprep.subr.bf16.mxu1 %v7092_v59  ;;  %v2257_v59 = vld [vmem:[%s10547_s3 + $0x7f0] sm:$0xff] }
 0x283   :  { %v7145_v7 = vcombine.low %v2253_v58, %v2257_v59 }
 0x284   :  { %5521 = vmatpush1.bf16.msra.mxu0 %v7089_v57  ;;  %v7146_v57 = vcombine.high %v2253_v58, %v2257_v59  ;;  %v2309_v59 = vld [vmem:[%s10547_s3 + $0x990] sm:$0xff] }
 0x285   :  { %5693 = vmatpush1.bf16.msra.mxu1 %v7091_v3  ;;  %5522 = vmatprep.subr.bf16.mxu0 %v7098_v2  ;;  %v7148_v3 = vcombine.high %v2254_v60, %v2258_v61  ;;  %v2261_v2 = vld [vmem:[%s10547_s3 + $0x810] sm:$0xff] }
 0x286   :  { %5694 = vmatprep.subr.bf16.mxu1 %v7100_v4  ;;  %v2265_v4 = vld [vmem:[%s10547_s3 + $0x830] sm:$0xff] }
 0x287   :  { %v7153_v15 = vcombine.low %v2261_v2, %v2265_v4 }
 0x288   :  { %5523 = vmatpush1.bf16.msra.mxu0 %v7097_v9  ;;  %v7154_v9 = vcombine.high %v2261_v2, %v2265_v4  ;;  %v2317_v4 = vld [vmem:[%s10547_s3 + $0x9d0] sm:$0xff] }
 0x289   :  { %5695 = vmatpush1.bf16.msra.mxu1 %v7099_v11  ;;  %5524 = vmatprep.subr.bf16.mxu0 %v7106_v12  ;;  %v7156_v11 = vcombine.high %v2262_v5, %v2266_v6  ;;  %v2269_v12 = vld [vmem:[%s10547_s3 + $0x850] sm:$0xff] }
 0x28a   :  { %5696 = vmatprep.subr.bf16.mxu1 %v7108_v13  ;;  %v2273_v13 = vld [vmem:[%s10547_s3 + $0x870] sm:$0xff] }
 0x28b   :  { %v7161_v39 = vcombine.low %v2269_v12, %v2273_v13 }
 0x28c   :  { %5525 = vmatpush1.bf16.msra.mxu0 %v7105_v25  ;;  %v7162_v25 = vcombine.high %v2269_v12, %v2273_v13  ;;  %v2325_v13 = vld [vmem:[%s10547_s3 + $0xa10] sm:$0xff] }
 0x28d   :  { %5697 = vmatpush1.bf16.msra.mxu1 %v7107_v32  ;;  %5526 = vmatprep.subr.bf16.mxu0 %v7114_v35  ;;  %v2277_v32 = vld [vmem:[%s10547_s3 + $0x890] sm:$0xff] }
 0x28e   :  { %5698 = vmatprep.subr.bf16.mxu1 %v7116_v63  ;;  %v2281_v35 = vld [vmem:[%s10547_s3 + $0x8b0] sm:$0xff]  ;;  %v2278_v63 = vld [vmem:[%s10547_s3 + $0x898] sm:$0xff] }
 0x28f   :  { %v7169_v43 = vcombine.low %v2277_v32, %v2281_v35 }
 0x290   :  { %5527 = vmatpush1.bf16.msra.mxu0 %v7113_v10  ;;  %v7163_v10 = vcombine.low %v2270_v21, %v2274_v22  ;;  %v2329_v22 = vld [vmem:[%s10547_s3 + $0xa30] sm:$0xff] }
 0x291   :  { %5699 = vmatpush1.bf16.msra.mxu1 %v7115_v41  ;;  %5528 = vmatprep.subr.bf16.mxu0 %v7122_v17  ;;  %v7170_v41 = vcombine.high %v2277_v32, %v2281_v35  ;;  %v2289_v17 = vld [vmem:[%s10547_s3 + $0x8f0] sm:$0xff]  ;;  %v2330_v32 = vld [vmem:[%s10547_s3 + $0xa38] sm:$0xff] }
 0x292   :  { %5700 = vmatprep.subr.bf16.mxu1 %v7124_v42  ;;  %v7172_v42 = vcombine.high %v2278_v63, %v2282_v38  ;;  %v7178_v45 = vcombine.high %v2285_v40, %v2289_v17  ;;  %v7177_v48 = vcombine.low %v2285_v40, %v2289_v17  ;;  %v7217_v17 = vcombine.low %v2325_v13, %v2329_v22 }
 0x294   :  { %5529 = vmatpush1.bf16.msra.mxu0 %v7121_v46  ;;  %v2297_v46 = vld [vmem:[%s10547_s3 + $0x930] sm:$0xff] }
 0x295   :  { %5701 = vmatpush1.bf16.msra.mxu1 %v7123_v19  ;;  %5530 = vmatprep.subr.bf16.mxu0 %v7130_v28  ;;  %v2294_v28 = vld [vmem:[%s10547_s3 + $0x918] sm:$0xff]  ;;  %v7186_v51 = vcombine.high %v2293_v44, %v2297_v46  ;;  %v7185_v58 = vcombine.low %v2293_v44, %v2297_v46 }
 0x296   :  { %5702 = vmatprep.subr.bf16.mxu1 %v7132_v47  ;;  %v2298_v47 = vld [vmem:[%s10547_s3 + $0x938] sm:$0xff] }
 0x297   :  { %v7187_v60 = vcombine.low %v2294_v28, %v2298_v47  ;;  %v2342_v44 = vld [vmem:[%s10547_s3 + $0xa98] sm:$0xff] }
 0x298   :  { %5531 = vmatpush1.bf16.msra.mxu0 %v7129_v52  ;;  %v2305_v52 = vld [vmem:[%s10547_s3 + $0x970] sm:$0xff] }
 0x299   :  { %5703 = vmatpush1.bf16.msra.mxu1 %v7131_v53  ;;  %5532 = vmatprep.subr.bf16.mxu0 %v7138_v54  ;;  %v7188_v53 = vcombine.high %v2294_v28, %v2298_v47  ;;  %v2302_v54 = vld [vmem:[%s10547_s3 + $0x958] sm:$0xff]  ;;  %v7194_v61 = vcombine.high %v2301_v49, %v2305_v52  ;;  %v7193_v2 = vcombine.low %v2301_v49, %v2305_v52 }
 0x29a   :  { %5704 = vmatprep.subr.bf16.mxu1 %v7140_v55  ;;  %v2306_v55 = vld [vmem:[%s10547_s3 + $0x978] sm:$0xff] }
 0x29b   :  { %v7195_v5 = vcombine.low %v2302_v54, %v2306_v55 }
 0x29c   :  { %5533 = vmatpush1.bf16.msra.mxu0 %v7137_v0  ;;  %v2313_v0 = vld [vmem:[%s10547_s3 + $0x9b0] sm:$0xff] }
 0x29d   :  { %5705 = vmatpush1.bf16.msra.mxu1 %v7139_v1  ;;  %5534 = vmatprep.subr.bf16.mxu0 %v7146_v57  ;;  %v7196_v1 = vcombine.high %v2302_v54, %v2306_v55  ;;  %v2310_v57 = vld [vmem:[%s10547_s3 + $0x998] sm:$0xff]  ;;  %v7202_v6 = vcombine.high %v2309_v59, %v2313_v0  ;;  %v7201_v12 = vcombine.low %v2309_v59, %v2313_v0 }
 0x29e   :  { %5706 = vmatprep.subr.bf16.mxu1 %v7148_v3  ;;  %v2314_v3 = vld [vmem:[%s10547_s3 + $0x9b8] sm:$0xff] }
 0x2a0   :  { %5535 = vmatpush1.bf16.msra.mxu0 %v7145_v7  ;;  %v2321_v7 = vld [vmem:[%s10547_s3 + $0x9f0] sm:$0xff] }
 0x2a1   :  { %5707 = vmatpush1.bf16.msra.mxu1 %v7147_v8  ;;  %5547 = vmatprep.subr.bf16.mxu0 %v7154_v9  ;;  %v7204_v8 = vcombine.high %v2310_v57, %v2314_v3  ;;  %v2318_v9 = vld [vmem:[%s10547_s3 + $0x9d8] sm:$0xff]  ;;  %v7210_v21 = vcombine.high %v2317_v4, %v2321_v7  ;;  %v7209_v35 = vcombine.low %v2317_v4, %v2321_v7 }
 0x2a2   :  { %5719 = vmatprep.subr.bf16.mxu1 %v7156_v11  ;;  %v2322_v11 = vld [vmem:[%s10547_s3 + $0x9f8] sm:$0xff] }
 0x2a3   :  { %5537 = vmatmul.mubr.bf16.vlgmr.msra.gmra.mrb[12].mxu0 %v8881_v62 }
 0x2a4   :  { %5709 = vmatmul.mubr.bf16.vlgmr.msra.gmra.mrb[12].mxu1 %v8881_v62  ;;  %5548 = vmatpush1.bf16.msra.mxu0 %v7153_v15  ;;  %v2286_v62 = vld [vmem:[%s10547_s3 + $0x8d8] sm:$0xff]  ;;  %v7203_v15 = vcombine.low %v2310_v57, %v2314_v3 }
 0x2a5   :  { %5579 = vmatprep.mubr.bf16.mxu0 %v9303_v34  ;;  %5720 = vmatpush1.bf16.msra.mxu1 %v7155_v24  ;;  %v7180_v19 = vcombine.high %v2286_v62, %v2290_v56  ;;  %v7179_v50 = vcombine.low %v2286_v62, %v2290_v56  ;;  %v7212_v24 = vcombine.high %v2318_v9, %v2322_v11  ;;  %v2345_v62 = vld [vmem:[%s10547_s3 + $0xab0] sm:$0xff] }
 0x2a6   :  { %5751 = vmatprep.mubr.bf16.mxu1 %v9303_v34  ;;  %5549 = vmatprep.subr.bf16.mxu0 %v7162_v25  ;;  %v7171_v34 = vcombine.low %v2278_v63, %v2282_v38  ;;  %v2326_v25 = vld [vmem:[%s10547_s3 + $0xa18] sm:$0xff]  ;;  %v2333_v63 = vld [vmem:[%s10547_s3 + $0xa50] sm:$0xff]  ;;  %v7218_v38 = vcombine.high %v2325_v13, %v2329_v22 }
 0x2a7   :  { %5721 = vmatprep.subr.bf16.mxu1 %v7164_v37  ;;  %v7211_v37 = vcombine.low %v2318_v9, %v2322_v11  ;;  %v7220_v40 = vcombine.high %v2326_v25, %v2330_v32  ;;  %v7219_v56 = vcombine.low %v2326_v25, %v2330_v32 }
 0x2a8   :  { %5550 = vmatpush1.bf16.msra.mxu0 %v7161_v39  ;;  %v2337_v39 = vld [vmem:[%s10547_s3 + $0xa70] sm:$0xff] }
 0x2a9   :  { %5722 = vmatpush1.bf16.msra.mxu1 %v7163_v10  ;;  %5551 = vmatprep.subr.bf16.mxu0 %v7170_v41  ;;  %v2334_v10 = vld [vmem:[%s10547_s3 + $0xa58] sm:$0xff]  ;;  %v7225_v46 = vcombine.low %v2333_v63, %v2337_v39 }
 0x2aa   :  { %5723 = vmatprep.subr.bf16.mxu1 %v7172_v42  ;;  %v2338_v41 = vld [vmem:[%s10547_s3 + $0xa78] sm:$0xff]  ;;  %v2341_v42 = vld [vmem:[%s10547_s3 + $0xa90] sm:$0xff] }
 0x2ab   :  { %v7227_v28 = vcombine.low %v2334_v10, %v2338_v41  ;;  %v7234_v47 = vcombine.high %v2341_v42, %v2345_v62  ;;  %v7233_v52 = vcombine.low %v2341_v42, %v2345_v62  ;;  %v2390_v42 = vld [vmem:[%s10547_s3 + $0xc18] sm:$0xff] }
 0x2ac   :  { %5552 = vmatpush1.bf16.msra.mxu0 %v7169_v43  ;;  %v7226_v43 = vcombine.high %v2333_v63, %v2337_v39  ;;  %v2394_v62 = vld [vmem:[%s10547_s3 + $0xc38] sm:$0xff] }
 0x2ad   :  { %5724 = vmatpush1.bf16.msra.mxu1 %v7171_v34  ;;  %5553 = vmatprep.subr.bf16.mxu0 %v7178_v45  ;;  %v7228_v34 = vcombine.high %v2334_v10, %v2338_v41  ;;  %v2346_v45 = vld [vmem:[%s10547_s3 + $0xab8] sm:$0xff]  ;;  %v2393_v10 = vld [vmem:[%s10547_s3 + $0xc30] sm:$0xff] }
 0x2ae   :  { %5725 = vmatprep.subr.bf16.mxu1 %v7180_v19  ;;  %v2349_v19 = vld [vmem:[%s10547_s3 + $0xad0] sm:$0xff]  ;;  %v7236_v49 = vcombine.high %v2342_v44, %v2346_v45  ;;  %v7235_v54 = vcombine.low %v2342_v44, %v2346_v45 }
 0x2af   :  { %v2397_v45 = vld [vmem:[%s10547_s3 + $0xc50] sm:$0xff] }
 0x2b0   :  { %5554 = vmatpush1.bf16.msra.mxu0 %v7177_v48  ;;  %v2353_v48 = vld [vmem:[%s10547_s3 + $0xaf0] sm:$0xff] }
 0x2b1   :  { %5726 = vmatpush1.bf16.msra.mxu1 %v7179_v50  ;;  %5555 = vmatprep.subr.bf16.mxu0 %v7186_v51  ;;  %v2350_v50 = vld [vmem:[%s10547_s3 + $0xad8] sm:$0xff]  ;;  %v7242_v55 = vcombine.high %v2349_v19, %v2353_v48  ;;  %v7241_v0 = vcombine.low %v2349_v19, %v2353_v48  ;;  %v2401_v19 = vld [vmem:[%s10547_s3 + $0xc70] sm:$0xff] }
 0x2b2   :  { %5727 = vmatprep.subr.bf16.mxu1 %v7188_v53  ;;  %v2354_v51 = vld [vmem:[%s10547_s3 + $0xaf8] sm:$0xff]  ;;  %v2357_v53 = vld [vmem:[%s10547_s3 + $0xb10] sm:$0xff] }
 0x2b3   :  { %v7244_v59 = vcombine.high %v2350_v50, %v2354_v51  ;;  %v7243_v57 = vcombine.low %v2350_v50, %v2354_v51  ;;  %v2402_v48 = vld [vmem:[%s10547_s3 + $0xc78] sm:$0xff]  ;;  %v7290_v50 = vcombine.high %v2397_v45, %v2401_v19  ;;  %v2405_v51 = vld [vmem:[%s10547_s3 + $0xc90] sm:$0xff] }
 0x2b4   :  { %5556 = vmatpush1.bf16.msra.mxu0 %v7185_v58  ;;  %v2361_v58 = vld [vmem:[%s10547_s3 + $0xb30] sm:$0xff] }
 0x2b5   :  { %5728 = vmatpush1.bf16.msra.mxu1 %v7187_v60  ;;  %5557 = vmatprep.subr.bf16.mxu0 %v7194_v61  ;;  %v2358_v60 = vld [vmem:[%s10547_s3 + $0xb18] sm:$0xff]  ;;  %v7250_v3 = vcombine.high %v2357_v53, %v2361_v58  ;;  %v7249_v7 = vcombine.low %v2357_v53, %v2361_v58  ;;  %v7289_v58 = vcombine.low %v2397_v45, %v2401_v19 }
 0x2b6   :  { %5729 = vmatprep.subr.bf16.mxu1 %v7196_v1  ;;  %v2362_v61 = vld [vmem:[%s10547_s3 + $0xb38] sm:$0xff]  ;;  %v2365_v1 = vld [vmem:[%s10547_s3 + $0xb50] sm:$0xff] }
 0x2b7   :  { %v7252_v4 = vcombine.high %v2358_v60, %v2362_v61  ;;  %v7251_v9 = vcombine.low %v2358_v60, %v2362_v61 }
 0x2b8   :  { %5558 = vmatpush1.bf16.msra.mxu0 %v7193_v2  ;;  %v2369_v2 = vld [vmem:[%s10547_s3 + $0xb70] sm:$0xff] }
 0x2b9   :  { %5730 = vmatpush1.bf16.msra.mxu1 %v7195_v5  ;;  %5559 = vmatprep.subr.bf16.mxu0 %v7202_v6  ;;  %v2366_v5 = vld [vmem:[%s10547_s3 + $0xb58] sm:$0xff]  ;;  %v7258_v11 = vcombine.high %v2365_v1, %v2369_v2  ;;  %v7257_v22 = vcombine.low %v2365_v1, %v2369_v2  ;;  %v2417_v1 = vld [vmem:[%s10547_s3 + $0xcf0] sm:$0xff] }
 0x2ba   :  { %5731 = vmatprep.subr.bf16.mxu1 %v7204_v8  ;;  %v2370_v6 = vld [vmem:[%s10547_s3 + $0xb78] sm:$0xff]  ;;  %v2373_v8 = vld [vmem:[%s10547_s3 + $0xb90] sm:$0xff] }
 0x2bb   :  { %v7260_v13 = vcombine.high %v2366_v5, %v2370_v6  ;;  %v7259_v25 = vcombine.low %v2366_v5, %v2370_v6  ;;  %v2421_v5 = vld [vmem:[%s10547_s3 + $0xd10] sm:$0xff] }
 0x2bc   :  { %5560 = vmatpush1.bf16.msra.mxu0 %v7201_v12  ;;  %v2377_v12 = vld [vmem:[%s10547_s3 + $0xbb0] sm:$0xff] }
 0x2bd   :  { %5732 = vmatpush1.bf16.msra.mxu1 %v7203_v15  ;;  %5561 = vmatprep.subr.bf16.mxu0 %v7210_v21  ;;  %v2374_v15 = vld [vmem:[%s10547_s3 + $0xb98] sm:$0xff]  ;;  %v7266_v32 = vcombine.high %v2373_v8, %v2377_v12  ;;  %v7265_v39 = vcombine.low %v2373_v8, %v2377_v12  ;;  %v2425_v6 = vld [vmem:[%s10547_s3 + $0xd30] sm:$0xff] }
 0x2be   :  { %5733 = vmatprep.subr.bf16.mxu1 %v7212_v24  ;;  %v2378_v21 = vld [vmem:[%s10547_s3 + $0xbb8] sm:$0xff]  ;;  %v2381_v24 = vld [vmem:[%s10547_s3 + $0xbd0] sm:$0xff]  ;;  %v7314_v12 = vcombine.high %v2421_v5, %v2425_v6 }
 0x2bf   :  { %v7268_v63 = vcombine.high %v2374_v15, %v2378_v21  ;;  %v7267_v41 = vcombine.low %v2374_v15, %v2378_v21  ;;  %v2426_v8 = vld [vmem:[%s10547_s3 + $0xd38] sm:$0xff]  ;;  %v2429_v15 = vld [vmem:[%s10547_s3 + $0xd50] sm:$0xff] }
 0x2c0   :  { %5562 = vmatpush1.bf16.msra.mxu0 %v7209_v35  ;;  %v2385_v35 = vld [vmem:[%s10547_s3 + $0xbf0] sm:$0xff] }
 0x2c1   :  { %5734 = vmatpush1.bf16.msra.mxu1 %v7211_v37  ;;  %5563 = vmatprep.subr.bf16.mxu0 %v7218_v38  ;;  %v2382_v37 = vld [vmem:[%s10547_s3 + $0xbd8] sm:$0xff]  ;;  %v2433_v21 = vld [vmem:[%s10547_s3 + $0xd70] sm:$0xff] }
 0x2c2   :  { %5735 = vmatprep.subr.bf16.mxu1 %v7220_v40  ;;  %v2386_v38 = vld [vmem:[%s10547_s3 + $0xbf8] sm:$0xff]  ;;  %v2389_v40 = vld [vmem:[%s10547_s3 + $0xc10] sm:$0xff] }
 0x2c3   :  { %v7275_v44 = vcombine.low %v2382_v37, %v2386_v38 }
 0x2c4   :  { %5564 = vmatpush1.bf16.msra.mxu0 %v7217_v17  ;;  %v7274_v17 = vcombine.high %v2381_v24, %v2385_v35 }
 0x2c5   :  { %5736 = vmatpush1.bf16.msra.mxu1 %v7219_v56  ;;  %5565 = vmatprep.subr.bf16.mxu0 %v7226_v43  ;;  %v7276_v56 = vcombine.high %v2382_v37, %v2386_v38  ;;  %v7273_v43 = vcombine.low %v2381_v24, %v2385_v35  ;;  %v2434_v24 = vld [vmem:[%s10547_s3 + $0xd78] sm:$0xff]  ;;  %v2437_v38 = vld [vmem:[%s10547_s3 + $0xd90] sm:$0xff] }
 0x2c6   :  { %5737 = vmatprep.subr.bf16.mxu1 %v7228_v34  ;;  %v7282_v34 = vcombine.high %v2389_v40, %v2393_v10 }
 0x2c8   :  { %5566 = vmatpush1.bf16.msra.mxu0 %v7225_v46  ;;  %v7284_v46 = vcombine.high %v2390_v42, %v2394_v62 }
 0x2c9   :  { %5738 = vmatpush1.bf16.msra.mxu1 %v7227_v28  ;;  %5567 = vmatprep.subr.bf16.mxu0 %v7234_v47  ;;  %v7281_v28 = vcombine.low %v2389_v40, %v2393_v10  ;;  %v2398_v47 = vld [vmem:[%s10547_s3 + $0xc58] sm:$0xff] }
 0x2ca   :  { %5739 = vmatprep.subr.bf16.mxu1 %v7236_v49  ;;  %v7283_v49 = vcombine.low %v2390_v42, %v2394_v62  ;;  %v7292_v53 = vcombine.high %v2398_v47, %v2402_v48  ;;  %v7321_v62 = vcombine.low %v2429_v15, %v2433_v21 }
 0x2cc   :  { %5568 = vmatpush1.bf16.msra.mxu0 %v7233_v52  ;;  %v2409_v52 = vld [vmem:[%s10547_s3 + $0xcb0] sm:$0xff] }
 0x2cd   :  { %5740 = vmatpush1.bf16.msra.mxu1 %v7235_v54  ;;  %5569 = vmatprep.subr.bf16.mxu0 %v7242_v55  ;;  %v2406_v54 = vld [vmem:[%s10547_s3 + $0xc98] sm:$0xff]  ;;  %v7298_v60 = vcombine.high %v2405_v51, %v2409_v52 }
 0x2ce   :  { %5741 = vmatprep.subr.bf16.mxu1 %v7244_v59  ;;  %v2410_v55 = vld [vmem:[%s10547_s3 + $0xcb8] sm:$0xff]  ;;  %v7291_v59 = vcombine.low %v2398_v47, %v2402_v48 }
 0x2cf   :  { %v7300_v61 = vcombine.high %v2406_v54, %v2410_v55  ;;  %v2446_v48 = vld [vmem:[%s10547_s3 + $0xdd8] sm:$0xff] }
 0x2d0   :  { %5570 = vmatpush1.bf16.msra.mxu0 %v7241_v0  ;;  %v2413_v0 = vld [vmem:[%s10547_s3 + $0xcd0] sm:$0xff] }
 0x2d1   :  { %5742 = vmatpush1.bf16.msra.mxu1 %v7243_v57  ;;  %5571 = vmatprep.subr.bf16.mxu0 %v7250_v3  ;;  %v2418_v57 = vld [vmem:[%s10547_s3 + $0xcf8] sm:$0xff]  ;;  %v7299_v3 = vcombine.low %v2406_v54, %v2410_v55  ;;  %v7306_v2 = vcombine.high %v2413_v0, %v2417_v1 }
 0x2d2   :  { %5743 = vmatprep.subr.bf16.mxu1 %v7252_v4 }
 0x2d4   :  { %5572 = vmatpush1.bf16.msra.mxu0 %v7249_v7  ;;  %v2422_v7 = vld [vmem:[%s10547_s3 + $0xd18] sm:$0xff] }
 0x2d5   :  { %5744 = vmatpush1.bf16.msra.mxu1 %v7251_v9  ;;  %5573 = vmatprep.subr.bf16.mxu0 %v7258_v11  ;;  %v7305_v9 = vcombine.low %v2413_v0, %v2417_v1  ;;  %v7315_v35 = vcombine.low %v2422_v7, %v2426_v8 }
 0x2d6   :  { %5745 = vmatprep.subr.bf16.mxu1 %v7260_v13  ;;  %v7316_v13 = vcombine.high %v2422_v7, %v2426_v8  ;;  %v2454_v8 = vld [vmem:[%s10547_s3 + $0xe18] sm:$0xff] }
 0x2d8   :  { %5574 = vmatpush1.bf16.msra.mxu0 %v7257_v22  ;;  %v2430_v22 = vld [vmem:[%s10547_s3 + $0xd58] sm:$0xff] }
 0x2d9   :  { %5746 = vmatpush1.bf16.msra.mxu1 %v7259_v25  ;;  %5575 = vmatprep.subr.bf16.mxu0 %v7266_v32  ;;  %v7313_v25 = vcombine.low %v2421_v5, %v2425_v6  ;;  %v10148_v32 = vld [vmem:[%s10550_s4] sm:$0xff]  ;;  %v7324_v37 = vcombine.high %v2430_v22, %v2434_v24 }
 0x2da   :  { %5747 = vmatprep.subr.bf16.mxu1 %v7268_v63  ;;  %v7322_v63 = vcombine.high %v2429_v15, %v2433_v21  ;;  %v2520_v40 = vrot.slane %v10148_v32, %v297_v27  ;;  %v2528_v10 = vrot.slane %v10148_v32, %v305_v29  ;;  %v2524_v42 = vrot.slane %v10148_v32, %v301_v30 }
 0x2db   :  { %v2532_v27 = vrot.slane %v10148_v32, %v309_v31  ;;  %v7323_v29 = vcombine.low %v2430_v22, %v2434_v24 }
 0x2dc   :  { %5576 = vmatpush1.bf16.msra.mxu0 %v7265_v39  ;;  %v2441_v39 = vld [vmem:[%s10547_s3 + $0xdb0] sm:$0xff] }
 0x2dd   :  { %5748 = vmatpush1.bf16.msra.mxu1 %v7267_v41  ;;  %5577 = vmatprep.subr.bf16.mxu0 %v7274_v17  ;;  %v2438_v41 = vld [vmem:[%s10547_s3 + $0xd98] sm:$0xff]  ;;  %v7329_v47 = vcombine.low %v2437_v38, %v2441_v39 }
 0x2de   :  { %5749 = vmatprep.subr.bf16.mxu1 %v7276_v56  ;;  %v2442_v17 = vld [vmem:[%s10547_s3 + $0xdb8] sm:$0xff]  ;;  %v7330_v56 = vcombine.high %v2437_v38, %v2441_v39  ;;  %v2465_v38 = vld [vmem:[%s10547_s3 + $0xe70] sm:$0xff] }
 0x2df   :  { %v7332_v30 = vcombine.high %v2438_v41, %v2442_v17  ;;  %v7331_v54 = vcombine.low %v2438_v41, %v2442_v17  ;;  %v2462_v39 = vld [vmem:[%s10547_s3 + $0xe58] sm:$0xff] }
 0x2e0   :  { %5578 = vmatpush1.bf16.msra.mxu0 %v7273_v43  ;;  %v2445_v43 = vld [vmem:[%s10547_s3 + $0xdd0] sm:$0xff] }
 0x2e1   :  { %5750 = vmatpush1.bf16.msra.mxu1 %v7275_v44  ;;  %5590 = vmatprep.subr.bf16.mxu0 %v7282_v34  ;;  %v2449_v44 = vld [vmem:[%s10547_s3 + $0xdf0] sm:$0xff] }
 0x2e2   :  { %5762 = vmatprep.subr.bf16.mxu1 %v7284_v46  ;;  %v7337_v55 = vcombine.low %v2445_v43, %v2449_v44  ;;  %v7338_v0 = vcombine.high %v2445_v43, %v2449_v44 }
 0x2e3   :  { %5580 = vmatmul.mubr.bf16.vlgmr.msra.gmra.mrb[12].mxu0 %v9290_v20 }
 0x2e4   :  { %5752 = vmatmul.mubr.bf16.vlgmr.msra.gmra.mrb[12].mxu1 %v9290_v20  ;;  %5591 = vmatpush1.bf16.msra.mxu0 %v7281_v28  ;;  %v2414_v20 = vld [vmem:[%s10547_s3 + $0xcd8] sm:$0xff] }
 0x2e5   :  { %5622 = vmatprep.mubr.bf16.mxu0 %v9305_v36  ;;  %5763 = vmatpush1.bf16.msra.mxu1 %v7283_v49  ;;  %v7308_v4 = vcombine.high %v2414_v20, %v2418_v57  ;;  %v7307_v11 = vcombine.low %v2414_v20, %v2418_v57  ;;  %v2450_v49 = vld [vmem:[%s10547_s3 + $0xdf8] sm:$0xff] }
 0x2e6   :  { %5794 = vmatprep.mubr.bf16.mxu1 %v9305_v36  ;;  %5592 = vmatprep.subr.bf16.mxu0 %v7290_v50  ;;  %v7297_v36 = vcombine.low %v2405_v51, %v2409_v52  ;;  %v7339_v57 = vcombine.low %v2446_v48, %v2450_v49 }
 0x2e7   :  { %5764 = vmatprep.subr.bf16.mxu1 %v7292_v53 }
 0x2e8   :  { %5593 = vmatpush1.bf16.msra.mxu0 %v7289_v58 }
 0x2e9   :  { %5765 = vmatpush1.bf16.msra.mxu1 %v7291_v59  ;;  %5594 = vmatprep.subr.bf16.mxu0 %v7298_v60 }
 0x2ea   :  { %5766 = vmatprep.subr.bf16.mxu1 %v7300_v61 }
 0x2ec   :  { %5595 = vmatpush1.bf16.msra.mxu0 %v7297_v36  ;;  %v7340_v36 = vcombine.high %v2446_v48, %v2450_v49 }
 0x2ed   :  { %5767 = vmatpush1.bf16.msra.mxu1 %v7299_v3  ;;  %5596 = vmatprep.subr.bf16.mxu0 %v7306_v2  ;;  %v2453_v3 = vld [vmem:[%s10547_s3 + $0xe10] sm:$0xff] }
 0x2ee   :  { %5768 = vmatprep.subr.bf16.mxu1 %v7308_v4  ;;  %v2457_v2 = vld [vmem:[%s10547_s3 + $0xe30] sm:$0xff] }
 0x2ef   :  { %v7346_v24 = vcombine.high %v2453_v3, %v2457_v2 }
 0x2f0   :  { %5597 = vmatpush1.bf16.msra.mxu0 %v7305_v9  ;;  %v2458_v9 = vld [vmem:[%s10547_s3 + $0xe38] sm:$0xff] }
 0x2f1   :  { %5769 = vmatpush1.bf16.msra.mxu1 %v7307_v11  ;;  %5598 = vmatprep.subr.bf16.mxu0 %v7314_v12  ;;  %v7347_v41 = vcombine.low %v2454_v8, %v2458_v9 }
 0x2f2   :  { %5770 = vmatprep.subr.bf16.mxu1 %v7316_v13 }
 0x2f4   :  { %5599 = vmatpush1.bf16.msra.mxu0 %v7313_v25 }
 0x2f5   :  { %5771 = vmatpush1.bf16.msra.mxu1 %v7315_v35  ;;  %5600 = vmatprep.subr.bf16.mxu0 %v7322_v63  ;;  %v7348_v63 = vcombine.high %v2454_v8, %v2458_v9 }
 0x2f6   :  { %v5280_v34 = vpop.f32.mrb[8].mxu0  ;;  %v5452_v45 = vpop.f32.mrb[8].mxu1  ;;  %5772 = vmatprep.subr.bf16.mxu1 %v7324_v37  ;;  %v2461_v37 = vld [vmem:[%s10547_s3 + $0xe50] sm:$0xff] }
 0x2f7   :  { %v7612_v46 = vadd.f32 %v5280_v34, %v2520_v40  ;;  %v7616_v19 = vadd.f32 %v5452_v45, %v2528_v10  ;;  %v5282_v31 = vpop.f32.mrb[9].mxu0  ;;  %v5454_v28 = vpop.f32.mrb[9].mxu1  ;;  %v7354_v17 = vcombine.high %v2461_v37, %v2465_v38  ;;  %v7353_v43 = vcombine.low %v2461_v37, %v2465_v38 }
 0x2f8   :  { %v7613_v50 = vadd.f32 %v5282_v31, %v2524_v42  ;;  %v7617_v51 = vadd.f32 %v5454_v28, %v2532_v27  ;;  %v5284_v52 = vpop.f32.mrb[10].mxu0  ;;  %v5456_v53 = vpop.f32.mrb[10].mxu1  ;;  %5601 = vmatpush1.bf16.msra.mxu0 %v7321_v62  ;;  %v2473_v62 = vld [vmem:[%s10547_s3 + $0xeb0] sm:$0xff]  ;;  %v2482_v31 = vld [vmem:[%s10547_s3 + $0xef8] sm:$0xff] }
 0x2f9   :  { %v7614_v58 = vadd.f32 %v5284_v52, %v2520_v40  ;;  %v7618_v59 = vadd.f32 %v5456_v53, %v2528_v10  ;;  %5773 = vmatpush1.bf16.msra.mxu1 %v7323_v29  ;;  %v5286_v60 = vpop.f32.mrb[11].mxu0  ;;  %v5458_v61 = vpop.f32.mrb[11].mxu1  ;;  %5602 = vmatprep.subr.bf16.mxu0 %v7330_v56  ;;  %v5805_v4 = vmax.f32 %v7612_v46, 0.0  ;;  %v5807_v5 = vmax.f32 %v7616_v19, 0.0  ;;  %v2466_v40 = vld [vmem:[%s10547_s3 + $0xe78] sm:$0xff]  ;;  %v2481_v46 = vld [vmem:[%s10547_s3 + $0xef0] sm:$0xff] }
 0x2fa   :  { %v7615_v1 = vadd.f32 %v5286_v60, %v2524_v42  ;;  %v7619_v20 = vadd.f32 %v5458_v61, %v2532_v27  ;;  %5774 = vmatprep.subr.bf16.mxu1 %v7332_v30  ;;  %v5806_v11 = vmax.f32 %v7613_v50, 0.0  ;;  %v5808_v12 = vmax.f32 %v7617_v51, 0.0  ;;  %v2469_v27 = vld [vmem:[%s10547_s3 + $0xe90] sm:$0xff]  ;;  %v2470_v29 = vld [vmem:[%s10547_s3 + $0xe98] sm:$0xff] }
 0x2fb   :  { %v5813_v6 = vmax.f32 %v7614_v58, 0.0  ;;  %v5815_v7 = vmax.f32 %v7618_v59, 0.0  ;;  %v7345_v10 = vcombine.low %v2453_v3, %v2457_v2  ;;  %v7356_v42 = vcombine.high %v2462_v39, %v2466_v40  ;;  %v2474_v56 = vld [vmem:[%s10547_s3 + $0xeb8] sm:$0xff]  ;;  %v2477_v30 = vld [vmem:[%s10547_s3 + $0xed0] sm:$0xff] }
 0x2fc   :  { %v5814_v13 = vmax.f32 %v7615_v1, 0.0  ;;  %v5816_v15 = vmax.f32 %v7619_v20, 0.0  ;;  %5603 = vmatpush1.bf16.msra.mxu0 %v7329_v47  ;;  %v7355_v44 = vcombine.low %v2462_v39, %v2466_v40  ;;  %v7362_v34 = vcombine.high %v2469_v27, %v2473_v62  ;;  %v2478_v19 = vld [vmem:[%s10547_s3 + $0xed8] sm:$0xff]  ;;  %v2485_v50 = vld [vmem:[%s10547_s3 + $0xf10] sm:$0xff] }
 0x2fd   :  { %v10198_v21 = vpack.c.bf16 %v5813_v6, %v5805_v4  ;;  %v10200_v22 = vpack.c.bf16 %v5815_v7, %v5807_v5  ;;  %5775 = vmatpush1.bf16.msra.mxu1 %v7331_v54  ;;  %5604 = vmatprep.subr.bf16.mxu0 %v7338_v0  ;;  %v7364_v45 = vcombine.high %v2470_v29, %v2474_v56  ;;  %v2489_v51 = vld [vmem:[%s10547_s3 + $0xf30] sm:$0xff]  ;;  %v2486_v52 = vld [vmem:[%s10547_s3 + $0xf18] sm:$0xff] }
 0x2fe   :  { %v10202_v25 = vpack.c.bf16 %v5814_v13, %v5806_v11  ;;  %v10204_v35 = vpack.c.bf16 %v5816_v15, %v5808_v12  ;;  %5776 = vmatprep.subr.bf16.mxu1 %v7340_v36  ;;  %v7361_v28 = vcombine.low %v2469_v27, %v2473_v62  ;;  %v7363_v47 = vcombine.low %v2470_v29, %v2474_v56  ;;  %v2490_v53 = vld [vmem:[%s10547_s3 + $0xf38] sm:$0xff]  ;;  %v2493_v60 = vld [vmem:[%s10547_s3 + $0xf50] sm:$0xff]  ;;  %v7703_v27 = vld [vmem:[%s10549_s5 + $0x80] sm:$0xff]  }
 0x2ff   :  { %v7370_v48 = vcombine.high %v2477_v30, %v2481_v46  ;;  %v7372_v49 = vcombine.high %v2478_v19, %v2482_v31  ;;  %v7369_v54 = vcombine.low %v2477_v30, %v2481_v46  ;;  %v7378_v58 = vcombine.high %v2485_v50, %v2489_v51  ;;  %v2497_v61 = vld [vmem:[%s10547_s3 + $0xf70] sm:$0xff]  ;;  %v2494_v0 = vld [vmem:[%s10547_s3 + $0xf58] sm:$0xff]  ;;  %v7704_v62 = vld [vmem:[%s10549_s5 + $0x48] sm:$0xff]  }
 0x300   :  { %5605 = vmatpush1.bf16.msra.mxu0 %v7337_v55  ;;  %v7371_v55 = vcombine.low %v2478_v19, %v2482_v31  ;;  %v7380_v59 = vcombine.high %v2486_v52, %v2490_v53  ;;  %v2498_v1 = vld [vmem:[%s10547_s3 + $0xf78] sm:$0xff]  ;;  %v7377_v20 = vcombine.low %v2485_v50, %v2489_v51  ;;  %v7386_v36 = vcombine.high %v2493_v60, %v2497_v61  ;;  %v2501_v2 = vld [vmem:[%s10547_s3 + $0xf90] sm:$0xff]  ;;  %v7705_v29 = vld [vmem:[%s10549_s5 + $0xc8] sm:$0xff]  }
 0x301   :  { %5777 = vmatpush1.bf16.msra.mxu1 %v7339_v57  ;;  %5606 = vmatprep.subr.bf16.mxu0 %v7346_v24  ;;  %v7379_v57 = vcombine.low %v2486_v52, %v2490_v53  ;;  %v7388_v3 = vcombine.high %v2494_v0, %v2498_v1  ;;  %v2505_v4 = vld [vmem:[%s10547_s3 + $0xfb0] sm:$0xff]  ;;  %v2502_v5 = vld [vmem:[%s10547_s3 + $0xf98] sm:$0xff]  ;;  %v7385_v7 = vcombine.low %v2493_v60, %v2497_v61  ;;  %v7706_v56 = vld [vmem:[%s10549_s5 + $0x8] sm:$0xff]  }
 0x302   :  { %5778 = vmatprep.subr.bf16.mxu1 %v7348_v63  ;;  %v2506_v6 = vld [vmem:[%s10547_s3 + $0xfb8] sm:$0xff]  ;;  %v7387_v8 = vcombine.low %v2494_v0, %v2498_v1  ;;  %v7394_v9 = vcombine.high %v2501_v2, %v2505_v4  ;;  %v2509_v12 = vld [vmem:[%s10547_s3 + $0xfd0] sm:$0xff]  ;;  %v7393_v63 = vcombine.low %v2501_v2, %v2505_v4  ;;  %v7716_v19 = vld [vmem:[%s10549_s5 + $0x60] sm:$0xff]  }
 0x303   :  { %v7396_v11 = vcombine.high %v2502_v5, %v2506_v6  ;;  %v2513_v13 = vld [vmem:[%s10547_s3 + $0xff0] sm:$0xff]  ;;  %v2510_v15 = vld [vmem:[%s10547_s3 + $0xfd8] sm:$0xff]  ;;  %v7395_v37 = vcombine.low %v2502_v5, %v2506_v6  ;;  %v7717_v31 = vld [vmem:[%s10549_s5 + $0xe0] sm:$0xff]  }
 0x304   :  { %5607 = vmatpush1.bf16.msra.mxu0 %v7345_v10  ;;  %v2514_v24 = vld [vmem:[%s10547_s3 + $0xff8] sm:$0xff]  ;;  %v7402_v38 = vcombine.high %v2509_v12, %v2513_v13  ;;  %v7401_v40 = vcombine.low %v2509_v12, %v2513_v13  ;;  %v7722_v50 = vld [vmem:[%s10549_s5 + $0x28] sm:$0xff]   ;;  %v7724_v52 = vld [vmem:[%s10549_s5 + $0x70] sm:$0xff]  }
 0x305   :  { %5779 = vmatpush1.bf16.msra.mxu1 %v7347_v41  ;;  %5608 = vmatprep.subr.bf16.mxu0 %v7354_v17  ;;  %v7404_v39 = vcombine.high %v2510_v15, %v2514_v24  ;;  %v7403_v10 = vcombine.low %v2510_v15, %v2514_v24  ;;  %v7700_v41 = vld [vmem:[%s10549_s5 + $0x40] sm:$0xff]   ;;  %v7714_v30 = vld [vmem:[%s10549_s5 + $0x18] sm:$0xff]   ;;  %v7723_v51 = vld [vmem:[%s10549_s5 + $0xa8] sm:$0xff]  }
 0x306   :  { %5780 = vmatprep.subr.bf16.mxu1 %v7356_v42  ;;  %v7701_v17 = vld [vmem:[%s10549_s5 + $0xc0] sm:$0xff]   ;;  %v7715_v46 = vld [vmem:[%s10549_s5 + $0x98] sm:$0xff]   ;;  %v7725_v53 = vld [vmem:[%s10549_s5 + $0xf0] sm:$0xff]  }
 0x307   :  { %v7702_v42 = vld [vmem:[%s10549_s5] sm:$0xff]   ;;  %v7730_v60 = vld [vmem:[%s10549_s5 + $0x38] sm:$0xff]   ;;  %v7738_v2 = vld [vmem:[%s10549_s5 + $0x108] sm:$0xff]  }
 0x308   :  { %5609 = vmatpush1.bf16.msra.mxu0 %v7353_v43  ;;  %v7707_v43 = vld [vmem:[%s10549_s5 + $0x88] sm:$0xff]   ;;  %v7731_v61 = vld [vmem:[%s10549_s5 + $0xb8] sm:$0xff]   ;;  %v7732_v0 = vld [vmem:[%s10549_s5 + $0x140] sm:$0xff]  }
 0x309   :  { %5781 = vmatpush1.bf16.msra.mxu1 %v7355_v44  ;;  %5610 = vmatprep.subr.bf16.mxu0 %v7362_v34  ;;  %v7708_v44 = vld [vmem:[%s10549_s5 + $0x50] sm:$0xff]   ;;  %v7733_v1 = vld [vmem:[%s10549_s5 + $0x1c0] sm:$0xff]   ;;  %v7739_v4 = vld [vmem:[%s10549_s5 + $0x188] sm:$0xff]  }
 0x30a   :  { %5782 = vmatprep.subr.bf16.mxu1 %v7364_v45  ;;  %v7711_v34 = vld [vmem:[%s10549_s5 + $0x90] sm:$0xff]   ;;  %v7713_v45 = vld [vmem:[%s10549_s5 + $0xd8] sm:$0xff]   ;;  %v7748_v12 = vld [vmem:[%s10549_s5 + $0x160] sm:$0xff]  }
 0x30b   :  { %v7740_v5 = vld [vmem:[%s10549_s5 + $0x150] sm:$0xff]   ;;  %v7749_v13 = vld [vmem:[%s10549_s5 + $0x1e0] sm:$0xff]  }
 0x30c   :  { %5611 = vmatpush1.bf16.msra.mxu0 %v7361_v28  ;;  %v7718_v28 = vld [vmem:[%s10549_s5 + $0x20] sm:$0xff]   ;;  %v7743_v6 = vld [vmem:[%s10549_s5 + $0x190] sm:$0xff]  }
 0x30d   :  { %5783 = vmatpush1.bf16.msra.mxu1 %v7363_v47  ;;  %5612 = vmatprep.subr.bf16.mxu0 %v7370_v48  ;;  %v7719_v47 = vld [vmem:[%s10549_s5 + $0xa0] sm:$0xff]   ;;  %v7720_v48 = vld [vmem:[%s10549_s5 + $0x68] sm:$0xff]  }
 0x30e   :  { %5784 = vmatprep.subr.bf16.mxu1 %v7372_v49  ;;  %v7721_v49 = vld [vmem:[%s10549_s5 + $0xe8] sm:$0xff]   ;;  %v7750_v15 = vld [vmem:[%s10549_s5 + $0x120] sm:$0xff]  }
 0x30f   :  { %v7751_v24 = vld [vmem:[%s10549_s5 + $0x1a0] sm:$0xff]  }
 0x310   :  { %5613 = vmatpush1.bf16.msra.mxu0 %v7369_v54  ;;  %v7726_v54 = vld [vmem:[%s10549_s5 + $0x30] sm:$0xff]  }
 0x311   :  { %5785 = vmatpush1.bf16.msra.mxu1 %v7371_v55  ;;  %5614 = vmatprep.subr.bf16.mxu0 %v7378_v58  ;;  %v7727_v55 = vld [vmem:[%s10549_s5 + $0xb0] sm:$0xff]   ;;  %v7728_v58 = vld [vmem:[%s10549_s5 + $0x78] sm:$0xff]  }
 0x312   :  { %5786 = vmatprep.subr.bf16.mxu1 %v7380_v59  ;;  %v7729_v59 = vld [vmem:[%s10549_s5 + $0xf8] sm:$0xff]  }
 0x314   :  { %5615 = vmatpush1.bf16.msra.mxu0 %v7377_v20  ;;  %v7734_v20 = vld [vmem:[%s10549_s5 + $0x100] sm:$0xff]  }
 0x315   :  { %5787 = vmatpush1.bf16.msra.mxu1 %v7379_v57  ;;  %5616 = vmatprep.subr.bf16.mxu0 %v7386_v36  ;;  %v7735_v57 = vld [vmem:[%s10549_s5 + $0x180] sm:$0xff]   ;;  %v7736_v36 = vld [vmem:[%s10549_s5 + $0x148] sm:$0xff]  }
 0x316   :  { %5788 = vmatprep.subr.bf16.mxu1 %v7388_v3  ;;  %v7737_v3 = vld [vmem:[%s10549_s5 + $0x1c8] sm:$0xff]  }
 0x318   :  { %5617 = vmatpush1.bf16.msra.mxu0 %v7385_v7  ;;  %v7744_v7 = vld [vmem:[%s10549_s5 + $0x158] sm:$0xff]  }
 0x319   :  { %5789 = vmatpush1.bf16.msra.mxu1 %v7387_v8  ;;  %5618 = vmatprep.subr.bf16.mxu0 %v7394_v9  ;;  %v7745_v8 = vld [vmem:[%s10549_s5 + $0x1d8] sm:$0xff]  }
 0x31a   :  { %5790 = vmatprep.subr.bf16.mxu1 %v7396_v11  ;;  %v7746_v9 = vld [vmem:[%s10549_s5 + $0x118] sm:$0xff]  }
 0x31b   :  { %v7747_v11 = vld [vmem:[%s10549_s5 + $0x198] sm:$0xff]  }
 0x31c   :  { %5619 = vmatpush1.bf16.msra.mxu0 %v7393_v63  ;;  %v7752_v63 = vld [vmem:[%s10549_s5 + $0x168] sm:$0xff]  }
 0x31d   :  { %5791 = vmatpush1.bf16.msra.mxu1 %v7395_v37  ;;  %5620 = vmatprep.subr.bf16.mxu0 %v7402_v38  ;;  %v7753_v37 = vld [vmem:[%s10549_s5 + $0x1e8] sm:$0xff]  }
 0x31e   :  { %5792 = vmatprep.subr.bf16.mxu1 %v7404_v39  ;;  %v7754_v38 = vld [vmem:[%s10549_s5 + $0x128] sm:$0xff]  }
 0x31f   :  { %v7755_v39 = vld [vmem:[%s10549_s5 + $0x1a8] sm:$0xff]  }
 0x320   :  { %5621 = vmatpush1.bf16.msra.mxu0 %v7401_v40  ;;  %v7756_v40 = vld [vmem:[%s10549_s5 + $0x170] sm:$0xff]  }
 0x321   :  { %5793 = vmatpush1.bf16.msra.mxu1 %v7403_v10  ;;  %7479 = vmatprep.subr.bf16.mxu0 %v7700_v41  ;;  %v7757_v10 = vld [vmem:[%s10549_s5 + $0x1f0] sm:$0xff]  }
 0x322   :  { %7501 = vmatprep.subr.bf16.mxu1 %v7701_v17  ;;  %v7758_v41 = vld [vmem:[%s10549_s5 + $0x130] sm:$0xff]  }
 0x323   :  { %5623 = vmatmul.mubr.bf16.vlgmr.msra.gmra.mrb[12].mxu0 %v9301_v33  ;;  %v7759_v17 = vld [vmem:[%s10549_s5 + $0x1b0] sm:$0xff]  }
 0x324   :  { %5795 = vmatmul.mubr.bf16.vlgmr.msra.gmra.mrb[12].mxu1 %v9301_v33  ;;  %7480 = vmatpush3.bf16.msra.mxu0 %v7702_v42  ;;  %v7709_v33 = vld [vmem:[%s10549_s5 + $0xd0] sm:$0xff]   ;;  %v7760_v42 = vld [vmem:[%s10549_s5 + $0x178] sm:$0xff]  }
 0x325   :  { %6380 = vmatprep.mubr.bf16.mxu0 %v10202_v25  ;;  %7502 = vmatpush3.bf16.msra.mxu1 %v7703_v27  ;;  %v7710_v25 = vld [vmem:[%s10549_s5 + $0x10] sm:$0xff]   ;;  %v7761_v27 = vld [vmem:[%s10549_s5 + $0x1f8] sm:$0xff]  }
 0x326   :  { %6421 = vmatprep.mubr.bf16.mxu1 %v10204_v35  ;;  %7481 = vmatprep.subr.bf16.mxu0 %v7704_v62  ;;  %v7712_v35 = vld [vmem:[%s10549_s5 + $0x58] sm:$0xff]  }
 0x327   :  { %7503 = vmatprep.subr.bf16.mxu1 %v7705_v29  ;;  %v7762_v62 = vld [vmem:[%s10549_s5 + $0x138] sm:$0xff]  }
 0x328   :  { %7482 = vmatpush3.bf16.msra.mxu0 %v7706_v56  ;;  %v7763_v29 = vld [vmem:[%s10549_s5 + $0x1b8] sm:$0xff]   ;;  %v7772_v56 = vmov 0.0  }
 0x329   :  { %7504 = vmatpush3.bf16.msra.mxu1 %v7707_v43  ;;  %7483 = vmatprep.subr.bf16.mxu0 %v7708_v44  ;;  %v2536_v43 = vrot.slane %v10148_v32, %v313_v14  ;;  %v2544_v44 = vrot.slane %v10148_v32, %v321_v16 }
 0x32a   :  { %7505 = vmatprep.subr.bf16.mxu1 %v7709_v33  ;;  %v2540_v33 = vrot.slane %v10148_v32, %v317_v18 }
 0x32c   :  { %7484 = vmatpush3.bf16.msra.mxu0 %v7710_v25  ;;  %v2548_v25 = vrot.slane %v10148_v32, %v325_v23 }
 0x32d   :  { %7506 = vmatpush3.bf16.msra.mxu1 %v7711_v34  ;;  %7485 = vmatprep.subr.bf16.mxu0 %v7712_v35 }
 0x32e   :  { %7507 = vmatprep.subr.bf16.mxu1 %v7713_v45 }
 0x330   :  { %7486 = vmatpush3.bf16.msra.mxu0 %v7714_v30 }
 0x331   :  { %7508 = vmatpush3.bf16.msra.mxu1 %v7715_v46  ;;  %7487 = vmatprep.subr.bf16.mxu0 %v7716_v19 }
 0x332   :  { %7509 = vmatprep.subr.bf16.mxu1 %v7717_v31 }
 0x334   :  { %7488 = vmatpush3.bf16.msra.mxu0 %v7718_v28 }
 0x335   :  { %7510 = vmatpush3.bf16.msra.mxu1 %v7719_v47  ;;  %7489 = vmatprep.subr.bf16.mxu0 %v7720_v48 }
 0x336   :  { %7511 = vmatprep.subr.bf16.mxu1 %v7721_v49 }
 0x338   :  { %7490 = vmatpush3.bf16.msra.mxu0 %v7722_v50 }
 0x339   :  { %7512 = vmatpush3.bf16.msra.mxu1 %v7723_v51  ;;  %7491 = vmatprep.subr.bf16.mxu0 %v7724_v52 }
 0x33a   :  { %7513 = vmatprep.subr.bf16.mxu1 %v7725_v53 }
 0x33c   :  { %7492 = vmatpush3.bf16.msra.mxu0 %v7726_v54 }
 0x33d   :  { %7514 = vmatpush3.bf16.msra.mxu1 %v7727_v55  ;;  %7493 = vmatprep.subr.bf16.mxu0 %v7728_v58 }
 0x33e   :  { %7515 = vmatprep.subr.bf16.mxu1 %v7729_v59 }
 0x340   :  { %7494 = vmatpush3.bf16.msra.mxu0 %v7730_v60 }
 0x341   :  { %7516 = vmatpush3.bf16.msra.mxu1 %v7731_v61  ;;  %7523 = vmatprep.subr.bf16.mxu0 %v7732_v0  ;;  %v7764_v0 = vld [vmem:[%s10551_s7] sm:$0xff]  }
 0x342   :  { %7545 = vmatprep.subr.bf16.mxu1 %v7733_v1 }
 0x343   :  { %6381 = vmatmul.mubr.bf16.vlgmr.msra.gmra.mrb[16].mxu0 %v10198_v21  ;;  %v7741_v21 = vld [vmem:[%s10549_s5 + $0x1d0] sm:$0xff]  }
 0x344   :  { %6422 = vmatmul.mubr.bf16.vlgmr.msra.gmra.mrb[16].mxu1 %v10200_v22  ;;  %7524 = vmatpush3.bf16.msra.mxu0 %v7734_v20  ;;  %v7742_v22 = vld [vmem:[%s10549_s5 + $0x110] sm:$0xff]   ;;  %v7765_v20 = vld [vmem:[%s10551_s7 + $0x8] sm:$0xff]  }
 0x345   :  { %7546 = vmatpush3.bf16.msra.mxu1 %v7735_v57  ;;  %7525 = vmatprep.subr.bf16.mxu0 %v7736_v36  ;;  %v7766_v57 = vld [vmem:[%s10551_s7 + $0x10] sm:$0xff]   ;;  %v7767_v36 = vld [vmem:[%s10551_s7 + $0x18] sm:$0xff]  }
 0x346   :  { %7547 = vmatprep.subr.bf16.mxu1 %v7737_v3  ;;  %v7768_v3 = vld [vmem:[%s10551_s7 + $0x20] sm:$0xff]  }
 0x348   :  { %7526 = vmatpush3.bf16.msra.mxu0 %v7738_v2 }
 0x349   :  { %7548 = vmatpush3.bf16.msra.mxu1 %v7739_v4  ;;  %7527 = vmatprep.subr.bf16.mxu0 %v7740_v5  ;;  %v7405_v5 = vld [vmem:[%s10552_s6] ss:$0 sm:$0xff] }
 0x34a   :  { %7549 = vmatprep.subr.bf16.mxu1 %v7741_v21 }
 0x34c   :  { %7528 = vmatpush3.bf16.msra.mxu0 %v7742_v22 }
 0x34d   :  { %7550 = vmatpush3.bf16.msra.mxu1 %v7743_v6  ;;  %7529 = vmatprep.subr.bf16.mxu0 %v7744_v7 }
 0x34e   :  { %7551 = vmatprep.subr.bf16.mxu1 %v7745_v8 }
 0x350   :  { %7530 = vmatpush3.bf16.msra.mxu0 %v7746_v9 }
 0x351   :  { %7552 = vmatpush3.bf16.msra.mxu1 %v7747_v11  ;;  %7531 = vmatprep.subr.bf16.mxu0 %v7748_v12 }
 0x352   :  { %7553 = vmatprep.subr.bf16.mxu1 %v7749_v13 }
 0x354   :  { %7532 = vmatpush3.bf16.msra.mxu0 %v7750_v15 }
 0x355   :  { %7554 = vmatpush3.bf16.msra.mxu1 %v7751_v24  ;;  %7533 = vmatprep.subr.bf16.mxu0 %v7752_v63 }
 0x356   :  { %7555 = vmatprep.subr.bf16.mxu1 %v7753_v37 }
 0x358   :  { %7534 = vmatpush3.bf16.msra.mxu0 %v7754_v38 }
 0x359   :  { %7556 = vmatpush3.bf16.msra.mxu1 %v7755_v39  ;;  %7535 = vmatprep.subr.bf16.mxu0 %v7756_v40  ;;  %v7769_v39 = vld [vmem:[%s10551_s7 + $0x28] sm:$0xff]   ;;  %v7770_v40 = vld [vmem:[%s10551_s7 + $0x30] sm:$0xff]  }
 0x35a   :  { %7557 = vmatprep.subr.bf16.mxu1 %v7757_v10  ;;  %v7771_v10 = vld [vmem:[%s10551_s7 + $0x38] sm:$0xff]  }
 0x35c   :  { %7536 = vmatpush3.bf16.msra.mxu0 %v7758_v41 }
 0x35d   :  { %7558 = vmatpush3.bf16.msra.mxu1 %v7759_v17  ;;  %7537 = vmatprep.subr.bf16.mxu0 %v7760_v42 }
 0x35e   :  { %7559 = vmatprep.subr.bf16.mxu1 %v7761_v27 }
 0x360   :  { %7538 = vmatpush3.bf16.msra.mxu0 %v7762_v62 }
 0x361   :  { %7560 = vmatpush3.bf16.msra.mxu1 %v7763_v29  ;;  %7576 = vmatprep.subr.bf16.mxu0 %v7772_v56 }
 0x3f6   :  { %v5624_v34 = vpop.f32.mrb[12].mxu0 }
 0x3f7   :  { %v7620_v35 = vadd.f32 %v5624_v34, %v2536_v43  ;;  %v5796_v45 = vpop.f32.mrb[12].mxu1  ;;  %v5626_v30 = vpop.f32.mrb[13].mxu0 }
 0x3f8   :  { %v7624_v46 = vadd.f32 %v5796_v45, %v2544_v44  ;;  %v7621_v19 = vadd.f32 %v5626_v30, %v2540_v33  ;;  %v5798_v31 = vpop.f32.mrb[13].mxu1  ;;  %v5628_v14 = vpop.f32.mrb[14].mxu0 }
 0x3f9   :  { %v7625_v28 = vadd.f32 %v5798_v31, %v2548_v25  ;;  %v7622_v47 = vadd.f32 %v5628_v14, %v2536_v43  ;;  %v5800_v48 = vpop.f32.mrb[14].mxu1  ;;  %v5630_v16 = vpop.f32.mrb[15].mxu0  ;;  %v5809_v18 = vmax.f32 %v7620_v35, 0.0 }
 0x3fa   :  { %v7626_v49 = vadd.f32 %v5800_v48, %v2544_v44  ;;  %v7623_v50 = vadd.f32 %v5630_v16, %v2540_v33  ;;  %v5802_v51 = vpop.f32.mrb[15].mxu1  ;;  %v5811_v53 = vmax.f32 %v7624_v46, 0.0  ;;  %v5810_v23 = vmax.f32 %v7621_v19, 0.0 }
 0x3fb   :  { %v5817_v52 = vmax.f32 %v7622_v47, 0.0  ;;  %v7627_v26 = vadd.f32 %v5802_v51, %v2548_v25  ;;  %v5812_v55 = vmax.f32 %v7625_v28, 0.0 }
 0x3fc   :  { %v5819_v32 = vmax.f32 %v7626_v49, 0.0  ;;  %v5818_v54 = vmax.f32 %v7623_v50, 0.0 }
 0x3fd   :  { %v5825_v58 = vpack.c.bf16 %v5817_v52, %v5809_v18  ;;  %v5820_v59 = vmax.f32 %v7627_v26, 0.0 }
 0x3fe   :  { %v5827_v60 = vpack.c.bf16 %v5819_v32, %v5811_v53  ;;  %v5826_v61 = vpack.c.bf16 %v5818_v54, %v5810_v23 }
 0x3ff   :  { %v5828_v1 = vpack.c.bf16 %v5820_v59, %v5812_v55 }
 0x400   :  { %6462 = vmatprep.mubr.bf16.mxu0 %v5826_v61 }
 0x401   :  { %6503 = vmatprep.mubr.bf16.mxu1 %v5828_v1  ;;  %6463 = vmatmul.mubr.bf16.vlgmr.msra.gmra.mrb[20].mxu0 %v5825_v58 }
 0x402   :  { %6504 = vmatmul.mubr.bf16.vlgmr.msra.gmra.mrb[20].mxu1 %v5827_v60  ;;  %7577 = vmatpush3.bf16.msra.mxu0 %v7764_v0 }
 0x403   :  { %7578 = vmatprep.subr.bf16.mxu0 %v7772_v56  ;;  %7592 = vmatprep.mubr.msk.bf16.mxu0 %vm7773_vm0, %v7772_v56 }
 0x406   :  { %7579 = vmatpush3.bf16.msra.mxu0 %v7765_v20 }
 0x407   :  { %7580 = vmatprep.subr.bf16.mxu0 %v7772_v56 }
 0x40a   :  { %7581 = vmatpush3.bf16.msra.mxu0 %v7766_v57 }
 0x40b   :  { %7582 = vmatprep.subr.bf16.mxu0 %v7772_v56 }
 0x40e   :  { %7583 = vmatpush3.bf16.msra.mxu0 %v7767_v36 }
 0x40f   :  { %7584 = vmatprep.subr.bf16.mxu0 %v7772_v56 }
 0x412   :  { %7585 = vmatpush3.bf16.msra.mxu0 %v7768_v3 }
 0x413   :  { %7586 = vmatprep.subr.bf16.mxu0 %v7772_v56 }
 0x416   :  { %v7495_v2 = vpop.f32.mrb[16].mxu0  ;;  %7587 = vmatpush3.bf16.msra.mxu0 %v7769_v39 }
 0x417   :  { %v7517_v4 = vpop.f32.mrb[16].mxu1  ;;  %v7496_v21 = vpop.f32.mrb[17].mxu0  ;;  %7588 = vmatprep.subr.bf16.mxu0 %v7772_v56 }
 0x418   :  { %v7497_v22 = vadd.f32 %v7496_v21, %v7495_v2  ;;  %v7518_v6 = vpop.f32.mrb[17].mxu1  ;;  %v7498_v7 = vpop.f32.mrb[18].mxu0 }
 0x419   :  { %v7519_v8 = vadd.f32 %v7518_v6, %v7517_v4  ;;  %v7520_v9 = vpop.f32.mrb[18].mxu1  ;;  %v7499_v11 = vpop.f32.mrb[19].mxu0 }
 0x41a   :  { %v6383_v12 = vadd.f32 %v7497_v22, %v7405_v5  ;;  %v7500_v13 = vadd.f32 %v7499_v11, %v7498_v7  ;;  %v7521_v15 = vpop.f32.mrb[19].mxu1  ;;  %7589 = vmatpush3.bf16.msra.mxu0 %v7770_v40 }
 0x41b   :  { %v7522_v24 = vadd.f32 %v7521_v15, %v7520_v9  ;;  %7590 = vmatprep.subr.bf16.mxu0 %v7772_v56  ;;  %v7470_v56 = vld [vmem:[%s10553_s8] ss:$0 sm:$0xff] }
 0x41c   :  { %v6424_v63 = vadd.f32 %v7519_v8, %v6383_v12  ;;  %v6386_v37 = vadd.f32 %v7500_v13, %v7405_v5 }
 0x41e   :  { %v6427_v38 = vadd.f32 %v7522_v24, %v6386_v37  ;;  %7591 = vmatpush3.bf16.msra.mxu0 %v7771_v10 }
 0x4d4   :  { %v7539_v41 = vpop.f32.mrb[20].mxu0 }
 0x4d5   :  { %v7561_v17 = vpop.f32.mrb[20].mxu1  ;;  %v7540_v42 = vpop.f32.mrb[21].mxu0 }
 0x4d6   :  { %v7541_v27 = vadd.f32 %v7540_v42, %v7539_v41  ;;  %v7562_v62 = vpop.f32.mrb[21].mxu1  ;;  %v7542_v29 = vpop.f32.mrb[22].mxu0 }
 0x4d7   :  { %v7563_v43 = vadd.f32 %v7562_v62, %v7561_v17  ;;  %v7564_v44 = vpop.f32.mrb[22].mxu1  ;;  %v7543_v33 = vpop.f32.mrb[23].mxu0 }
 0x4d8   :  { %v6465_v25 = vadd.f32 %v7541_v27, %v6424_v63  ;;  %v7544_v34 = vadd.f32 %v7543_v33, %v7542_v29  ;;  %v7565_v35 = vpop.f32.mrb[23].mxu1 }
 0x4d9   :  { %v7566_v45 = vadd.f32 %v7565_v35, %v7564_v44 }
 0x4da   :  { %v6506_v30 = vadd.f32 %v7563_v43, %v6465_v25  ;;  %v6468_v46 = vadd.f32 %v7544_v34, %v6427_v38 }
 0x4dc   :  { %v6509_v19 = vadd.f32 %v7566_v45, %v6468_v46  ;;  %v6512_v31 = vmax.f32 %v6506_v30, 0.0 }
 0x4de   :  { %v6513_v14 = vmax.f32 %v6509_v19, 0.0 }
 0x4e0   :  { %v6514_v28 = vpack.c.bf16 %v6513_v14, %v6512_v31 }
 0x4e2   :  { %7593 = vmatmul.mubr.bf16.vlgmr.msra.gmra.mrb[24].mxu0 %v6514_v28 }
 0x5b5   :  { %v6620_v47 = vpop.f32.mrb[24].mxu0 }
 0x5b6   :  { %v6621_v48 = vadd.f32 %v7470_v56, %v6620_v47  ;;  %v7594_v16 = vpop.f32.mrb[25].mxu0 }
 0x5b7   :  { %v6623_v49 = vpop.f32.mrb[26].mxu0 }
 0x5b8   :  { %6627 = vst [vmem:[%s10554_s9] sm:$0xff] %v6621_v48  ;;  %v6624_v50 = vadd.f32 %v7470_v56, %v6623_v49  ;;  %v7595_v51 = vpop.f32.mrb[27].mxu0 }
 0x5ba   :  { %6628 = vst [vmem:[%s10554_s9 + $0x8] sm:$0xff] %v6624_v50 }

</bundles_post_ra>
